<compile_context>
chip_gen: v5e
topology: v5e:2x2
jax: 0.10.0
libtpu: 0.0.40
codegen_flags: <defaults>
</compile_context>

<pallas_src>
from functools import lru_cache

import jax
import jax.numpy as jnp
from jax.experimental import pallas as pl
from jax.experimental.pallas import tpu as pltpu

KPOOL = 31
PAD = 15

# Parameter from __init__ (only used by boundary_forward, which is not the
# forward pass being implemented).
LAPLACIAN = jnp.array([[[[-1, -1, -1], [-1, 8, -1], [-1, -1, -1]]]], dtype=jnp.float16)
# TODO(synk): boundary_forward / dice_coefficient are auxiliary methods, not
# part of forward(); they are intentionally not lowered to Pallas here.


def _loss_kernel(pred_ref, mask_ref, ah_ref, aw_ref, wbce_ref, wiou_ref):
    pred = pred_ref[...].astype(jnp.float32)   # (TB, H, W) logits
    mask = mask_ref[...].astype(jnp.float32)   # (TB, H, W) targets in [0, 1]
    tb, h, w = pred.shape

    # ---- avg_pool2d(mask, 31, stride=1, pad=15, count_include_pad=True) ----
    # Width pass: one lane-dense 2-D MXU matmul with M = TB*H.
    # bf16 operands are exact for binary {0,1} masks (integer sums <= 31).
    mask_b16 = mask.astype(jnp.bfloat16)
    tmp = jnp.dot(mask_b16.reshape(tb * h, w), aw_ref[...],
                  preferred_element_type=jnp.float32)              # (TB*H, W)
    # Height pass via transpose-sandwich: fold batch*W into M so one 2-D MXU
    # matmul contracts the original H axis (A_h symmetric => right-multiply is
    # equivalent).  f32 (0,2,1) transposes run on the idle XLU; no (TB,H,H)
    # broadcast is ever materialized.
    tmp_t = jnp.swapaxes(tmp.reshape(tb, h, w), 1, 2)              # (TB, W, H)
    pooled_t = jnp.dot(tmp_t.reshape(tb * w, h).astype(jnp.bfloat16), ah_ref[...],
                       preferred_element_type=jnp.float32)         # (TB*W, H)
    pooled = jnp.swapaxes(pooled_t.reshape(tb, w, h), 1, 2)        # (TB, H, W)
    pooled = pooled * (1.0 / (KPOOL * KPOOL))

    # ---- weighted BCE-with-logits + weighted IoU, fused elementwise sweep ---
    weit = 1.0 + 5.0 * jnp.abs(pooled - mask)

    # Share a single exp(-|x|) between the stable BCE and the sigmoid (EUP).
    e = jnp.exp(-jnp.abs(pred))
    # log1p(e) would be marginally more accurate; jnp.log(1+e) is the
    # guaranteed-lowering choice and its abs error here is ~1e-7.
    bce = jnp.maximum(pred, 0.0) - pred * mask + jnp.log(1.0 + e)
    # approx reciprocal lives in the EUP slot (essentially free on the VPU-
    # bound elementwise phase); ~1e-4 relative error, well inside tolerance.
    inv_1pe = pl.reciprocal(1.0 + e, approx=True)
    sig = jnp.where(pred >= 0.0, inv_1pe, e * inv_1pe)

    def ssum(x):  # spatial sum over (H, W) -> (TB, 1)
        return jnp.sum(jnp.sum(x, axis=2), axis=1, keepdims=True)

    weit_sum = ssum(weit)
    wbce_sum = ssum(weit * bce)
    sw = weit * sig
    inter = ssum(sw * mask)
    union = ssum(weit * (sig + mask))   # = sum(weit*sig) + sum(weit*mask), no mw temp

    wbce_ref[...] = wbce_sum / weit_sum
    wiou_ref[...] = 1.0 - (inter + 1.0) / (union - inter + 1.0)


def _tpu_budget():
    """(vmem_capacity_bytes, tensorcores_per_chip) with safe defaults."""
    vmem_cap = 128 << 20
    n_tc = 1
    try:
        info = pltpu.get_tpu_info()
        vmem_cap = int(getattr(info, "vmem_capacity_bytes", vmem_cap))
        n_tc = int(getattr(info, "num_cores",
                           getattr(info, "tensorcores_per_chip", 1)))
    except Exception:
        pass
    # v7x-class parts report 64 MiB VMEM per TensorCore and have 2 TCs/chip.
    if vmem_cap <= (64 << 20):
        n_tc = max(n_tc, 2)
    return vmem_cap, n_tc


def _per_row_bytes(h, w, itemsize):
    """Estimated VMEM working set per batch row at the chosen tile."""
    return (2 * 2 * h * w * itemsize   # pred + mask, double-buffered DMA
            + 14 * h * w * 4)          # live f32 temporaries in the body


def _fixed_bytes(h, w):
    return (2 * (h * h + w * w) * 2 * 2   # band matrices (bf16), 2 buffers each
            + (4 << 20))                  # Mosaic internal scratch headroom


def _choose_batch_tile(b_pad, h, w, itemsize, vmem_cap, n_tc):
    """Largest multiple-of-8 batch tile dividing b_pad whose working set fits
    ~72% of this generation's VMEM, while keeping >= 2 (ideally an even number
    of) grid steps when two TensorCores are available."""
    budget = int(vmem_cap * 0.72) - _fixed_bytes(h, w)   # ~46 MiB v7x, ~92 MiB v5e/v6e
    cap = max(8, budget // _per_row_bytes(h, w, itemsize))
    if n_tc >= 2 and b_pad >= 16:
        cap = min(cap, b_pad // 2)        # guarantee >= 2 grid steps for dual-TC
    best, best_even = 8, None
    for tb in range(8, min(b_pad, cap) + 1, 8):
        if b_pad % tb:
            continue
        best = tb
        if (b_pad // tb) % 2 == 0:
            best_even = tb
    if n_tc >= 2 and best_even is not None and (b_pad // best) % 2:
        best = best_even                  # prefer an even split across the 2 TCs
    return best


@lru_cache(maxsize=8)
def _band_matrices(h, w):
    """Band matrices implementing the 31x31 zero-padded box sum (exact 0/1
    entries, so bf16 is lossless and halves their DMA bytes).  Cached per
    (H, W) so repeated calls do no redundant device work."""
    ih = jnp.arange(h)
    ah = (jnp.abs(ih[:, None] - ih[None, :]) <= PAD).astype(jnp.bfloat16)
    iw = jnp.arange(w)
    aw = (jnp.abs(iw[:, None] - iw[None, :]) <= PAD).astype(jnp.bfloat16)
    return ah, aw


def lossncriterion_forward(inputs, target, *, batch_tile=None):
    """inputs, target: NCHW arrays of identical shape. Returns scalar loss."""
    n, c, h, w = inputs.shape
    assert target.shape == inputs.shape
    b = n * c
    # Keep the native dtype (no wrapper-side up-cast -> no extra HBM traffic);
    # the kernel casts after the DMA.  bf16 logits/targets are accepted as-is.
    pred = inputs.reshape(b, h, w)
    mask = target.reshape(b, h, w)
    itemsize = jnp.dtype(pred.dtype).itemsize

    # Pad the fused batch axis up to a multiple of 8 so a sublane-aligned tile
    # always exists (no huge-tile fallback); padded rows are masked out of the
    # final means below.
    b_pad = -(-b // 8) * 8
    if b_pad != b:
        padn = b_pad - b
        pred = jnp.concatenate([pred, jnp.zeros((padn, h, w), pred.dtype)], axis=0)
        mask = jnp.concatenate([mask, jnp.zeros((padn, h, w), mask.dtype)], axis=0)

    ah, aw = _band_matrices(h, w)

    vmem_cap, n_tc = _tpu_budget()
    tb = (batch_tile if batch_tile is not None
          else _choose_batch_tile(b_pad, h, w, itemsize, vmem_cap, n_tc))
    assert b_pad % tb == 0 and tb % 8 == 0, (b_pad, tb)
    grid = (b_pad // tb,)

    # Scoped-VMEM limit sized from the tile, always leaving >= 8 MiB physical
    # headroom (never the full 64 MiB on v7x).
    vmem_est = (tb * _per_row_bytes(h, w, itemsize) + _fixed_bytes(h, w))
    vmem_limit = int(min(max(vmem_est, 32 << 20),
                         max(vmem_cap - (8 << 20), 32 << 20)))

    # NOTE: the ah/aw blocks never change index; default double-buffering of
    # these small constants is accepted for lowering robustness
    # (pipeline_mode=pl.Buffered(1) would save a few KiB of VMEM).
    wbce, wiou = pl.pallas_call(
        _loss_kernel,
        out_shape=(jax.ShapeDtypeStruct((b_pad, 1), jnp.float32),
                   jax.ShapeDtypeStruct((b_pad, 1), jnp.float32)),
        grid=grid,
        in_specs=[
            pl.BlockSpec((tb, h, w), lambda i: (i, 0, 0)),
            pl.BlockSpec((tb, h, w), lambda i: (i, 0, 0)),
            pl.BlockSpec((h, h), lambda i: (0, 0)),
            pl.BlockSpec((w, w), lambda i: (0, 0)),
        ],
        out_specs=(
            pl.BlockSpec((tb, 1), lambda i: (i, 0)),
            pl.BlockSpec((tb, 1), lambda i: (i, 0)),
        ),
        compiler_params=pltpu.CompilerParams(
            dimension_semantics=("parallel",),
            vmem_limit_bytes=vmem_limit),
    )(pred, mask, ah, aw)

    # Exclude padded rows from the per-(N,C) means.
    return jnp.mean(wbce[:b]) + jnp.mean(wiou[:b])


def _reference(inputs, target):
    """Pure-JAX reference (independent avg-pool via reduce_window)."""
    x = inputs.astype(jnp.float32)
    m = target.astype(jnp.float32)
    pooled = jax.lax.reduce_window(
        m, 0.0, jax.lax.add,
        (1, 1, KPOOL, KPOOL), (1, 1, 1, 1),
        [(0, 0), (0, 0), (PAD, PAD), (PAD, PAD)]) / (KPOOL * KPOOL)
    weit = 1.0 + 5.0 * jnp.abs(pooled - m)
    bce = jnp.maximum(x, 0.0) - x * m + jnp.log1p(jnp.exp(-jnp.abs(x)))
    wbce = (weit * bce).sum(axis=(2, 3)) / weit.sum(axis=(2, 3))
    s = jax.nn.sigmoid(x)
    inter = (s * m * weit).sum(axis=(2, 3))
    union = (s * weit).sum(axis=(2, 3)) + (m * weit).sum(axis=(2, 3))
    wiou = 1.0 - (inter + 1.0) / (union - inter + 1.0)
    return wbce.mean() + wiou.mean()


if __name__ == "__main__":
    key = jax.random.PRNGKey(0)
    k1, k2, k3, k4 = jax.random.split(key, 4)

    # --- main shape: B = N*C = 16 (multiple of 8), 32x32 spatial ---
    N, C, H, W = 4, 4, 32, 32
    inputs = jax.random.normal(k1, (N, C, H, W), dtype=jnp.float32)            # logits
    target = (jax.random.uniform(k2, (N, C, H, W)) > 0.5).astype(jnp.float32)  # binary mask
    ref = _reference(inputs, target)

    # Default tile (generation-aware chooser).
    loss = lossncriterion_forward(inputs, target)
    jax.block_until_ready(loss)
    assert jnp.allclose(loss, ref, rtol=1e-3, atol=1e-3), (loss, ref)

    # Explicit multi-step, batch-tiled (pipelined / 2-TC parallel) path.
    loss_tiled = lossncriterion_forward(inputs, target, batch_tile=8)
    jax.block_until_ready(loss_tiled)
    assert jnp.allclose(loss_tiled, ref, rtol=1e-3, atol=1e-3), (loss_tiled, ref)

    # Batch not a multiple of 8 -> exercises the padding + masked-mean path.
    N2, C2 = 3, 3
    inputs2 = jax.random.normal(k3, (N2, C2, H, W), dtype=jnp.float32)
    target2 = (jax.random.uniform(k4, (N2, C2, H, W)) > 0.5).astype(jnp.float32)
    ref2 = _reference(inputs2, target2)
    loss2 = lossncriterion_forward(inputs2, target2)
    jax.block_until_ready(loss2)
    assert jnp.allclose(loss2, ref2, rtol=1e-3, atol=1e-3), (loss2, ref2)

    print("KERNEL_OK")
</pallas_src>

<mosaic_0001>
module attributes {stable_mosaic.version = 11 : i64} {
  func.func @_loss_kernel(%arg0: i32, %arg1: memref<16x32x32xf32, #tpu.memory_space<vmem>>, %arg2: memref<16x32x32xf32, #tpu.memory_space<vmem>>, %arg3: memref<32x32xbf16, #tpu.memory_space<vmem>>, %arg4: memref<32x32xbf16, #tpu.memory_space<vmem>>, %arg5: memref<16x1xf32, #tpu.memory_space<vmem>>, %arg6: memref<16x1xf32, #tpu.memory_space<vmem>>) attributes {dimension_semantics = [#tpu.dimension_semantics<parallel>], iteration_bounds = array<i64: 1>, scalar_prefetch = 0 : i64, scratch_operands = 0 : i64, tpu.core_type = #tpu.core_type<tc>, window_params = [{transform_indices = @transform_0, window_bounds = array<i64: 16, 32, 32>}, {transform_indices = @transform_1, window_bounds = array<i64: 16, 32, 32>}, {pipeline_mode = #tpu.pipeline_mode<synchronous>, transform_indices = @transform_2, window_bounds = array<i64: 32, 32>}, {pipeline_mode = #tpu.pipeline_mode<synchronous>, transform_indices = @transform_3, window_bounds = array<i64: 32, 32>}, {transform_indices = @transform_4, window_bounds = array<i64: 16, 1>}, {transform_indices = @transform_5, window_bounds = array<i64: 16, 1>}]} {
    %c0 = arith.constant 0 : index
    %c0_0 = arith.constant 0 : index
    %c0_1 = arith.constant 0 : index
    %0 = vector.load %arg1[%c0, %c0_0, %c0_1] : memref<16x32x32xf32, #tpu.memory_space<vmem>>, vector<16x32x32xf32>
    %c0_2 = arith.constant 0 : index
    %c0_3 = arith.constant 0 : index
    %c0_4 = arith.constant 0 : index
    %1 = vector.load %arg2[%c0_2, %c0_3, %c0_4] : memref<16x32x32xf32, #tpu.memory_space<vmem>>, vector<16x32x32xf32>
    %2 = arith.truncf %1 : vector<16x32x32xf32> to vector<16x32x32xbf16>
    %3 = vector.shape_cast %2 : vector<16x32x32xbf16> to vector<512x32xbf16>
    %c0_5 = arith.constant 0 : index
    %c0_6 = arith.constant 0 : index
    %4 = vector.load %arg4[%c0_5, %c0_6] : memref<32x32xbf16, #tpu.memory_space<vmem>>, vector<32x32xbf16>
    %cst = arith.constant dense<0.000000e+00> : vector<512x32xf32>
    %5 = tpu.matmul %3, %4, %cst {dimension_numbers = #tpu.dot_dimension_numbers<[1], [0], [0], [1], [0, 0, 1, 1], [], []>} : vector<512x32xbf16>, vector<32x32xbf16>, vector<512x32xf32> -> vector<512x32xf32>
    %6 = vector.shape_cast %5 : vector<512x32xf32> to vector<16x32x32xf32>
    %7 = tpu.transpose %6, [0, 2, 1] : vector<16x32x32xf32> -> vector<16x32x32xf32>
    %8 = vector.shape_cast %7 : vector<16x32x32xf32> to vector<512x32xf32>
    %9 = arith.truncf %8 : vector<512x32xf32> to vector<512x32xbf16>
    %c0_7 = arith.constant 0 : index
    %c0_8 = arith.constant 0 : index
    %10 = vector.load %arg3[%c0_7, %c0_8] : memref<32x32xbf16, #tpu.memory_space<vmem>>, vector<32x32xbf16>
    %cst_9 = arith.constant dense<0.000000e+00> : vector<512x32xf32>
    %11 = tpu.matmul %9, %10, %cst_9 {dimension_numbers = #tpu.dot_dimension_numbers<[1], [0], [0], [1], [0, 0, 1, 1], [], []>} : vector<512x32xbf16>, vector<32x32xbf16>, vector<512x32xf32> -> vector<512x32xf32>
    %12 = vector.shape_cast %11 : vector<512x32xf32> to vector<16x32x32xf32>
    %13 = tpu.transpose %12, [0, 2, 1] : vector<16x32x32xf32> -> vector<16x32x32xf32>
    %cst_10 = arith.constant 0.00104058278 : f32
    %14 = vector.broadcast %cst_10 : f32 to vector<16x32x32xf32>
    %15 = arith.mulf %13, %14 : vector<16x32x32xf32>
    %16 = arith.subf %15, %1 : vector<16x32x32xf32>
    %17 = math.absf %16 : vector<16x32x32xf32>
    %cst_11 = arith.constant 5.000000e+00 : f32
    %18 = vector.broadcast %cst_11 : f32 to vector<16x32x32xf32>
    %19 = arith.mulf %18, %17 : vector<16x32x32xf32>
    %cst_12 = arith.constant 1.000000e+00 : f32
    %20 = vector.broadcast %cst_12 : f32 to vector<16x32x32xf32>
    %21 = arith.addf %20, %19 : vector<16x32x32xf32>
    %22 = math.absf %0 : vector<16x32x32xf32>
    %cst_13 = arith.constant 0.000000e+00 : f32
    %23 = vector.broadcast %cst_13 : f32 to vector<16x32x32xf32>
    %24 = arith.subf %23, %22 : vector<16x32x32xf32>
    %25 = math.exp %24 : vector<16x32x32xf32>
    %cst_14 = arith.constant 0.000000e+00 : f32
    %26 = vector.broadcast %cst_14 : f32 to vector<16x32x32xf32>
    %27 = arith.maximumf %0, %26 : vector<16x32x32xf32>
    %28 = arith.mulf %0, %1 : vector<16x32x32xf32>
    %29 = arith.subf %27, %28 : vector<16x32x32xf32>
    %cst_15 = arith.constant 1.000000e+00 : f32
    %30 = vector.broadcast %cst_15 : f32 to vector<16x32x32xf32>
    %31 = arith.addf %30, %25 : vector<16x32x32xf32>
    %32 = math.log %31 : vector<16x32x32xf32>
    %33 = arith.addf %29, %32 : vector<16x32x32xf32>
    %cst_16 = arith.constant 1.000000e+00 : f32
    %34 = vector.broadcast %cst_16 : f32 to vector<16x32x32xf32>
    %35 = arith.addf %34, %25 : vector<16x32x32xf32>
    %36 = tpu.reciprocal %35 {approx = true} : vector<16x32x32xf32> -> vector<16x32x32xf32>
    %cst_17 = arith.constant 0.000000e+00 : f32
    %37 = vector.broadcast %cst_17 : f32 to vector<16x32x32xf32>
    %38 = arith.cmpf oge, %0, %37 : vector<16x32x32xf32>
    %39 = arith.mulf %25, %36 : vector<16x32x32xf32>
    %40 = arith.select %38, %36, %39 : vector<16x32x32xi1>, vector<16x32x32xf32>
    %cst_18 = arith.constant dense<0.000000e+00> : vector<16x32xf32>
    %41 = vector.multi_reduction <add>, %21, %cst_18 [2] : vector<16x32x32xf32> to vector<16x32xf32>
    %cst_19 = arith.constant dense<0.000000e+00> : vector<16xf32>
    %42 = vector.multi_reduction <add>, %41, %cst_19 [1] : vector<16x32xf32> to vector<16xf32>
    %43 = vector.shape_cast %42 : vector<16xf32> to vector<16x1xf32>
    %44 = arith.mulf %21, %33 : vector<16x32x32xf32>
    %cst_20 = arith.constant dense<0.000000e+00> : vector<16x32xf32>
    %45 = vector.multi_reduction <add>, %44, %cst_20 [2] : vector<16x32x32xf32> to vector<16x32xf32>
    %cst_21 = arith.constant dense<0.000000e+00> : vector<16xf32>
    %46 = vector.multi_reduction <add>, %45, %cst_21 [1] : vector<16x32xf32> to vector<16xf32>
    %47 = vector.shape_cast %46 : vector<16xf32> to vector<16x1xf32>
    %48 = arith.mulf %21, %40 : vector<16x32x32xf32>
    %49 = arith.mulf %48, %1 : vector<16x32x32xf32>
    %cst_22 = arith.constant dense<0.000000e+00> : vector<16x32xf32>
    %50 = vector.multi_reduction <add>, %49, %cst_22 [2] : vector<16x32x32xf32> to vector<16x32xf32>
    %cst_23 = arith.constant dense<0.000000e+00> : vector<16xf32>
    %51 = vector.multi_reduction <add>, %50, %cst_23 [1] : vector<16x32xf32> to vector<16xf32>
    %52 = vector.shape_cast %51 : vector<16xf32> to vector<16x1xf32>
    %53 = arith.addf %40, %1 : vector<16x32x32xf32>
    %54 = arith.mulf %21, %53 : vector<16x32x32xf32>
    %cst_24 = arith.constant dense<0.000000e+00> : vector<16x32xf32>
    %55 = vector.multi_reduction <add>, %54, %cst_24 [2] : vector<16x32x32xf32> to vector<16x32xf32>
    %cst_25 = arith.constant dense<0.000000e+00> : vector<16xf32>
    %56 = vector.multi_reduction <add>, %55, %cst_25 [1] : vector<16x32xf32> to vector<16xf32>
    %57 = vector.shape_cast %56 : vector<16xf32> to vector<16x1xf32>
    %58 = arith.divf %47, %43 : vector<16x1xf32>
    %c0_26 = arith.constant 0 : index
    %c0_27 = arith.constant 0 : index
    %59 = vector.load %arg5[%c0_26, %c0_27] : memref<16x1xf32, #tpu.memory_space<vmem>>, vector<16x1xf32>
    tpu.vector_store %arg5[%c0_26, %c0_27], %58 {strides = array<i32>} : memref<16x1xf32, #tpu.memory_space<vmem>>, vector<16x1xf32>,
    %cst_28 = arith.constant 1.000000e+00 : f32
    %60 = vector.broadcast %cst_28 : f32 to vector<16x1xf32>
    %61 = arith.addf %52, %60 : vector<16x1xf32>
    %62 = arith.subf %57, %52 : vector<16x1xf32>
    %cst_29 = arith.constant 1.000000e+00 : f32
    %63 = vector.broadcast %cst_29 : f32 to vector<16x1xf32>
    %64 = arith.addf %62, %63 : vector<16x1xf32>
    %65 = arith.divf %61, %64 : vector<16x1xf32>
    %cst_30 = arith.constant 1.000000e+00 : f32
    %66 = vector.broadcast %cst_30 : f32 to vector<16x1xf32>
    %67 = arith.subf %66, %65 : vector<16x1xf32>
    %c0_31 = arith.constant 0 : index
    %c0_32 = arith.constant 0 : index
    %68 = vector.load %arg6[%c0_31, %c0_32] : memref<16x1xf32, #tpu.memory_space<vmem>>, vector<16x1xf32>
    tpu.vector_store %arg6[%c0_31, %c0_32], %67 {strides = array<i32>} : memref<16x1xf32, #tpu.memory_space<vmem>>, vector<16x1xf32>,
    return
  }
  func.func @transform_0(%arg0: i32) -> (i32, i32, i32) {
    %c0_i32 = arith.constant 0 : i32
    %c0_i32_0 = arith.constant 0 : i32
    %c0_i32_1 = arith.constant 0 : i32
    return %arg0, %c0_i32, %c0_i32_0 : i32, i32, i32
  }
  func.func @transform_1(%arg0: i32) -> (i32, i32, i32) {
    %c0_i32 = arith.constant 0 : i32
    %c0_i32_0 = arith.constant 0 : i32
    %c0_i32_1 = arith.constant 0 : i32
    return %arg0, %c0_i32, %c0_i32_0 : i32, i32, i32
  }
  func.func @transform_2(%arg0: i32) -> (i32, i32) {
    %c0_i32 = arith.constant 0 : i32
    %c0_i32_0 = arith.constant 0 : i32
    %c0_i32_1 = arith.constant 0 : i32
    return %c0_i32, %c0_i32_0 : i32, i32
  }
  func.func @transform_3(%arg0: i32) -> (i32, i32) {
    %c0_i32 = arith.constant 0 : i32
    %c0_i32_0 = arith.constant 0 : i32
    %c0_i32_1 = arith.constant 0 : i32
    return %c0_i32, %c0_i32_0 : i32, i32
  }
  func.func @transform_4(%arg0: i32) -> (i32, i32) {
    %c0_i32 = arith.constant 0 : i32
    %c0_i32_0 = arith.constant 0 : i32
    return %arg0, %c0_i32 : i32, i32
  }
  func.func @transform_5(%arg0: i32) -> (i32, i32) {
    %c0_i32 = arith.constant 0 : i32
    %c0_i32_0 = arith.constant 0 : i32
    return %arg0, %c0_i32 : i32, i32
  }
}

</mosaic_0001>

<bundles_post_ra>
// kernel: tpu_custom_call.1
= control target key start
LH: loop header
LB: loop body
LE: loop exit
PB: predicated region body
PF: predicated region fallthrough
CT: control target
= control target key end

     0   :  { %11 = vsyncpa [#allocation3], 0  ;;  %s9557_s0 = inlined_call_operand.hbm [shape: f32[16,32,32], index: 0, kind: input, shape index: {}]   ;;  %s9558_s1 = inlined_call_operand.hbm [shape: f32[16,32,32], index: 1, kind: input, shape index: {}]   ;;  %s9559_s2 = inlined_call_operand.hbm [shape: bf16[32,32], index: 2, kind: input, shape index: {}]   ;;  %s9560_s3 = inlined_call_operand.hbm [shape: bf16[32,32], index: 3, kind: input, shape index: {}]   ;;  %s9561_s4 = inlined_call_operand.vmem [shape: f32[16,1], index: 4, kind: output, shape index: {0}]   ;;  %s9562_s5 = inlined_call_operand.vmem [shape: f32[16,1], index: 5, kind: output, shape index: {1}]  }
   0x1   :  { %12 = vsyncpa [#allocation5], 0 }
   0x2   :  { %13 = vsyncpa [#allocation8], 0  ;;  %s31_s20 = sshll.u32 %s9558_s1, 4  ;;  %s6268_s21 = smov [#allocation4]   ;;  %s32_s20 = int_to_ptr.hbm [resolvable:$true] %s31_s20 }
   0x3   :  { %s33_s22 = sshll.u32 %s6268_s21, 4  ;;  %s18_s25 = sshll.u32 %s9557_s0, 4  ;;  %s34_s22 = int_to_ptr.vmem [resolvable:$true] %s33_s22  ;;  %s19_s25 = int_to_ptr.hbm [resolvable:$true] %s18_s25 }
   0x4   :  { %s6269_s26 = smov 128   ;;  %s6270_s27 = smov 8  }
   0x5   :  { %39 = dma.hbm_to_vmem [thread:$0]  %s32_s20, 8192, %s34_s22, [#allocation5], %s6269_s26, %s6269_s26, %s6270_s27  }
   0x6   :  { %s6271_s28 = smov [#allocation2]   ;;  %s44_s7 = sshll.u32 %s9559_s2, 4  ;;  %s45_s7 = int_to_ptr.hbm [resolvable:$true] %s44_s7 }
   0x7   :  { %s20_s29 = sshll.u32 %s6271_s28, 4  ;;  %s6272_s1 = smov [#allocation6]   ;;  %s21_s29 = int_to_ptr.vmem [resolvable:$true] %s20_s29 }
   0x8   :  { %26 = dma.hbm_to_vmem [thread:$0]  %s19_s25, 8192, %s21_s29, [#allocation3], %s6269_s26, %s6269_s26, %s6270_s27  }
   0x9   :  { %s46_s8 = sshll.u32 %s6272_s1, 4  ;;  %s57_s0 = sshll.u32 %s9560_s3, 4  ;;  %s47_s8 = int_to_ptr.vmem [resolvable:$true] %s46_s8  ;;  %s58_s0 = int_to_ptr.hbm [resolvable:$true] %s57_s0 }
   0xa   :  { %s6273_s11 = smov 64   ;;  %s6274_s12 = smov 4  }
   0xb   :  { %52 = dma.hbm_to_vmem [thread:$0]  %s45_s7, 256, %s47_s8, [#allocation5], %s6273_s11, %s6273_s11, %s6274_s12  }
   0xc   :  { %s6275_s13 = smov [#allocation7]  }
   0xd   :  { %s59_s14 = sshll.u32 %s6275_s13, 4  ;;  %s60_s14 = int_to_ptr.vmem [resolvable:$true] %s59_s14 }
   0xe   :  { %65 = dma.hbm_to_vmem [thread:$0]  %s58_s0, 256, %s60_s14, [#allocation8], %s6273_s11, %s6273_s11, %s6274_s12  }
   0xf   :  { %6262 = dma.done.wait [#allocation3], 8192  }
  0x10   :  { %6263 = vsyncadd [#allocation3], 4294959104 }
  0x11   :  { %6264 = dma.done.wait [#allocation5], 8448  }
  0x12   :  { %6265 = vsyncadd [#allocation5], 4294958848 }
  0x13   :  { %6266 = dma.done.wait [#allocation8], 256  }
  0x14   :  { %6267 = vsyncadd [#allocation8], 4294967040  ;;  %v5394_v0 = vld [vmem:[#allocation7 + $0x8] sm:$0xff]  ;;  %v147_v1 = vld [vmem:[#allocation4] sm:$0xff]  ;;  %vm451_vm0 = vcmask 261120  }
  0x15   :  { %v148_v2 = vld [vmem:[#allocation4 + $0x8] sm:$0xff]  ;;  %v211_v3 = vpack.c.bf16 %v147_v1, %v147_v1  ;;  %v179_v4 = vld [vmem:[#allocation4 + $0x100] sm:$0xff]  ;;  %554 = vmatpush.bf16.msra.mxu0 %v5394_v0  ;;  %5397 = vmatpush.bf16.msra.mxu2 %v5394_v0  ;;  %v5393_v6 = vld [vmem:[#allocation7] sm:$0xff] }
  0x16   :  { %v180_v5 = vld [vmem:[#allocation4 + $0x108] sm:$0xff]  ;;  %v212_v7 = vpack.c.bf16 %v148_v2, %v148_v2  ;;  %v243_v8 = vpack.c.bf16 %v179_v4, %v179_v4  ;;  %v149_v16 = vld [vmem:[#allocation4 + $0x10] sm:$0xff]  ;;  %v150_v17 = vld [vmem:[#allocation4 + $0x18] sm:$0xff] }
  0x17   :  { %v244_v9 = vpack.c.bf16 %v180_v5, %v180_v5  ;;  %v343_v10 = vunpack.c.l.b16 %v211_v3  ;;  %v181_v18 = vld [vmem:[#allocation4 + $0x110] sm:$0xff]  ;;  %v182_v19 = vld [vmem:[#allocation4 + $0x118] sm:$0xff]  ;;  %v213_v20 = vpack.c.bf16 %v149_v16, %v149_v16  ;;  %v214_v21 = vpack.c.bf16 %v150_v17, %v150_v17  ;;  %v151_v30 = vld [vmem:[#allocation4 + $0x20] sm:$0xff] }
  0x18   :  { %v344_v11 = vunpack.c.l.b16 %v212_v7  ;;  %v375_v12 = vunpack.c.l.b16 %v243_v8  ;;  %v245_v22 = vpack.c.bf16 %v181_v18, %v181_v18  ;;  %v246_v23 = vpack.c.bf16 %v182_v19, %v182_v19  ;;  %v152_v31 = vld [vmem:[#allocation4 + $0x28] sm:$0xff]  ;;  %v183_v32 = vld [vmem:[#allocation4 + $0x120] sm:$0xff]  ;;  %v153_v44 = vld [vmem:[#allocation4 + $0x30] sm:$0xff] }
  0x19   :  { %v376_v13 = vunpack.c.l.b16 %v244_v9  ;;  %555 = vmatpush.bf16.msra.mxu0 %v5393_v6  ;;  %5398 = vmatpush.bf16.msra.mxu2 %v5393_v6  ;;  %v345_v24 = vunpack.c.l.b16 %v213_v20  ;;  %v346_v25 = vunpack.c.l.b16 %v214_v21  ;;  %v184_v33 = vld [vmem:[#allocation4 + $0x128] sm:$0xff]  ;;  %v215_v34 = vpack.c.bf16 %v151_v30, %v151_v30  ;;  %v154_v45 = vld [vmem:[#allocation4 + $0x38] sm:$0xff]  ;;  %v185_v46 = vld [vmem:[#allocation4 + $0x130] sm:$0xff] }
  0x1a   :  { %v407_v14 = vpack.c.b16 %v344_v11, %v343_v10  ;;  %v377_v26 = vunpack.c.l.b16 %v245_v22  ;;  %v378_v27 = vunpack.c.l.b16 %v246_v23  ;;  %v216_v35 = vpack.c.bf16 %v152_v31, %v152_v31  ;;  %v186_v47 = vld [vmem:[#allocation4 + $0x138] sm:$0xff]  ;;  %v155_v58 = vld [vmem:[#allocation4 + $0x40] sm:$0xff]  ;;  %v156_v59 = vld [vmem:[#allocation4 + $0x48] sm:$0xff] }
  0x1b   :  { %v423_v15 = vpack.c.b16 %v376_v13, %v375_v12  ;;  %v408_v28 = vpack.c.b16 %v346_v25, %v345_v24  ;;  %v247_v36 = vpack.c.bf16 %v183_v32, %v183_v32  ;;  %v248_v37 = vpack.c.bf16 %v184_v33, %v184_v33  ;;  %v157_v1 = vld [vmem:[#allocation4 + $0x50] sm:$0xff]  ;;  %v158_v2 = vld [vmem:[#allocation4 + $0x58] sm:$0xff]  ;;  %v159_v8 = vld [vmem:[#allocation4 + $0x60] sm:$0xff] }
  0x1c   :  { %5321 = vmatmul.msk.bf16.vlgmr.msra.gmra.mxu0 %vm451_vm0, %v407_v14  ;;  %v424_v29 = vpack.c.b16 %v378_v27, %v377_v26  ;;  %v347_v38 = vunpack.c.l.b16 %v215_v34  ;;  %v348_v39 = vunpack.c.l.b16 %v216_v35  ;;  %v217_v48 = vpack.c.bf16 %v153_v44, %v153_v44  ;;  %v160_v9 = vld [vmem:[#allocation4 + $0x68] sm:$0xff]  ;;  %v162_v16 = vld [vmem:[#allocation4 + $0x78] sm:$0xff]  ;;  %v187_v22 = vld [vmem:[#allocation4 + $0x140] sm:$0xff] }
  0x1d   :  { %5337 = vmatmul.msk.bf16.vlgmr.msra.gmra.mxu2 %vm451_vm0, %v423_v15  ;;  %v379_v40 = vunpack.c.l.b16 %v247_v36  ;;  %v380_v41 = vunpack.c.l.b16 %v248_v37  ;;  %v218_v49 = vpack.c.bf16 %v154_v45, %v154_v45  ;;  %v249_v50 = vpack.c.bf16 %v185_v46, %v185_v46  ;;  %v161_v15 = vld [vmem:[#allocation4 + $0x70] sm:$0xff]  ;;  %v188_v23 = vld [vmem:[#allocation4 + $0x148] sm:$0xff]  ;;  %v190_v34 = vld [vmem:[#allocation4 + $0x158] sm:$0xff] }
  0x1e   :  { %v409_v42 = vpack.c.b16 %v348_v39, %v347_v38  ;;  %v250_v51 = vpack.c.bf16 %v186_v47, %v186_v47  ;;  %v349_v52 = vunpack.c.l.b16 %v217_v48  ;;  %v219_v60 = vpack.c.bf16 %v155_v58, %v155_v58  ;;  %v189_v33 = vld [vmem:[#allocation4 + $0x150] sm:$0xff]  ;;  %v191_v44 = vld [vmem:[#allocation4 + $0x160] sm:$0xff]  ;;  %v192_v45 = vld [vmem:[#allocation4 + $0x168] sm:$0xff] }
  0x1f   :  { %v425_v43 = vpack.c.b16 %v380_v41, %v379_v40  ;;  %v350_v53 = vunpack.c.l.b16 %v218_v49  ;;  %v381_v54 = vunpack.c.l.b16 %v249_v50  ;;  %v220_v61 = vpack.c.bf16 %v156_v59, %v156_v59  ;;  %v163_v50 = vld [vmem:[#allocation4 + $0x80] sm:$0xff] }
  0x20   :  { %v382_v55 = vunpack.c.l.b16 %v250_v51  ;;  %v351_v62 = vunpack.c.l.b16 %v219_v60  ;;  %v221_v3 = vpack.c.bf16 %v157_v1, %v157_v1  ;;  %v222_v4 = vpack.c.bf16 %v158_v2, %v158_v2  ;;  %v164_v51 = vld [vmem:[#allocation4 + $0x88] sm:$0xff] }
  0x21   :  { %v410_v56 = vpack.c.b16 %v350_v53, %v349_v52  ;;  %v352_v63 = vunpack.c.l.b16 %v220_v61  ;;  %v223_v10 = vpack.c.bf16 %v159_v8, %v159_v8  ;;  %v224_v11 = vpack.c.bf16 %v160_v9, %v160_v9  ;;  %v165_v9 = vld [vmem:[#allocation4 + $0x90] sm:$0xff] }
  0x22   :  { %v426_v57 = vpack.c.b16 %v382_v55, %v381_v54  ;;  %v353_v5 = vunpack.c.l.b16 %v221_v3  ;;  %v354_v6 = vunpack.c.l.b16 %v222_v4  ;;  %v225_v17 = vpack.c.bf16 %v161_v15, %v161_v15 }
  0x23   :  { %v411_v0 = vpack.c.b16 %v352_v63, %v351_v62  ;;  %v355_v12 = vunpack.c.l.b16 %v223_v10  ;;  %v356_v13 = vunpack.c.l.b16 %v224_v11  ;;  %v226_v18 = vpack.c.bf16 %v162_v16, %v162_v16  ;;  %v193_v63 = vld [vmem:[#allocation4 + $0x170] sm:$0xff]  ;;  %v166_v10 = vld [vmem:[#allocation4 + $0x98] sm:$0xff] }
  0x24   :  { %v412_v7 = vpack.c.b16 %v354_v6, %v353_v5  ;;  %v357_v19 = vunpack.c.l.b16 %v225_v17  ;;  %v251_v25 = vpack.c.bf16 %v187_v22, %v187_v22  ;;  %v252_v26 = vpack.c.bf16 %v188_v23, %v188_v23  ;;  %v196_v22 = vld [vmem:[#allocation4 + $0x188] sm:$0xff] }
  0x25   :  { %v413_v14 = vpack.c.b16 %v356_v13, %v355_v12  ;;  %v358_v20 = vunpack.c.l.b16 %v226_v18  ;;  %v253_v36 = vpack.c.bf16 %v189_v33, %v189_v33  ;;  %v254_v37 = vpack.c.bf16 %v190_v34, %v190_v34 }
  0x26   :  { %v383_v27 = vunpack.c.l.b16 %v251_v25  ;;  %v255_v47 = vpack.c.bf16 %v191_v44, %v191_v44  ;;  %v256_v48 = vpack.c.bf16 %v192_v45, %v192_v45  ;;  %v227_v54 = vpack.c.bf16 %v163_v50, %v163_v50 }
  0x27   :  { %v414_v21 = vpack.c.b16 %v358_v20, %v357_v19  ;;  %v385_v38 = vunpack.c.l.b16 %v253_v36  ;;  %v386_v39 = vunpack.c.l.b16 %v254_v37  ;;  %v228_v55 = vpack.c.bf16 %v164_v51, %v164_v51 }
  0x28   :  { %v387_v52 = vunpack.c.l.b16 %v255_v47  ;;  %v388_v53 = vunpack.c.l.b16 %v256_v48  ;;  %v257_v2 = vpack.c.bf16 %v193_v63, %v193_v63  ;;  %v229_v12 = vpack.c.bf16 %v165_v9, %v165_v9  ;;  %v169_v47 = vld [vmem:[#allocation4 + $0xb0] sm:$0xff]  ;;  %v170_v48 = vld [vmem:[#allocation4 + $0xb8] sm:$0xff] }
  0x29   :  { %v428_v40 = vpack.c.b16 %v386_v39, %v385_v38  ;;  %v360_v58 = vunpack.c.l.b16 %v228_v55  ;;  %v230_v13 = vpack.c.bf16 %v166_v10, %v166_v10  ;;  %v260_v25 = vpack.c.bf16 %v196_v22, %v196_v22  ;;  %v202_v9 = vld [vmem:[#allocation4 + $0x1b8] sm:$0xff] }
  0x2a   :  { %v389_v5 = vunpack.c.l.b16 %v257_v2  ;;  %v361_v15 = vunpack.c.l.b16 %v229_v12  ;;  %v233_v50 = vpack.c.bf16 %v169_v47, %v169_v47  ;;  %v234_v51 = vpack.c.bf16 %v170_v48, %v170_v48  ;;  %v173_v12 = vld [vmem:[#allocation4 + $0xd0] sm:$0xff]  ;;  %v5396_v47 = vld [vmem:[#allocation6 + $0x8] sm:$0xff] }
  0x2b   :  { %v362_v16 = vunpack.c.l.b16 %v230_v13  ;;  %v174_v13 = vld [vmem:[#allocation4 + $0xd8] sm:$0xff]  ;;  %1379 = vmatpush.bf16.msra.mxu1 %v5396_v47  ;;  %5399 = vmatpush.bf16.msra.mxu3 %v5396_v47 }
  0x2c   :  { %5322 = vmatmul.msk.bf16.gmra.mxu0 %vm451_vm0, %v408_v28  ;;  %v384_v28 = vunpack.c.l.b16 %v252_v26 }
  0x2d   :  { %5338 = vmatmul.msk.bf16.gmra.mxu2 %vm451_vm0, %v424_v29  ;;  %v416_v17 = vpack.c.b16 %v362_v16, %v361_v15  ;;  %v266_v15 = vpack.c.bf16 %v202_v9, %v202_v9  ;;  %v237_v16 = vpack.c.bf16 %v173_v12, %v173_v12 }
  0x2e   :  { %v427_v29 = vpack.c.b16 %v384_v28, %v383_v27  ;;  %v392_v28 = vunpack.c.l.b16 %v260_v25 }
  0x3c   :  { %5323 = vmatmul.msk.bf16.gmra.mxu0 %vm451_vm0, %v409_v42 }
  0x3d   :  { %5339 = vmatmul.msk.bf16.gmra.mxu2 %vm451_vm0, %v425_v43 }
  0x4c   :  { %5324 = vmatmul.msk.bf16.gmra.mxu0 %vm451_vm0, %v410_v56  ;;  %v429_v56 = vpack.c.b16 %v388_v53, %v387_v52  ;;  %v365_v52 = vunpack.c.l.b16 %v233_v50  ;;  %v366_v53 = vunpack.c.l.b16 %v234_v51  ;;  %v5395_v50 = vld [vmem:[#allocation6] sm:$0xff] }
  0x4d   :  { %5340 = vmatmul.msk.bf16.gmra.mxu2 %vm451_vm0, %v426_v57  ;;  %v359_v57 = vunpack.c.l.b16 %v227_v54  ;;  %1380 = vmatpush.bf16.msra.mxu1 %v5395_v50 }
  0x4e   :  { %v418_v54 = vpack.c.b16 %v366_v53, %v365_v52  ;;  %5400 = vmatpush.bf16.msra.mxu3 %v5395_v50  ;;  %v203_v53 = vld [vmem:[#allocation4 + $0x1c0] sm:$0xff] }
  0x4f   :  { %v415_v60 = vpack.c.b16 %v360_v58, %v359_v57  ;;  %v200_v57 = vld [vmem:[#allocation4 + $0x1a8] sm:$0xff] }
  0x5c   :  { %5325 = vmatmul.msk.bf16.gmra.mxu0 %vm451_vm0, %v411_v0  ;;  %v194_v0 = vld [vmem:[#allocation4 + $0x178] sm:$0xff] }
  0x5d   :  { %5341 = vmatmul.msk.bf16.gmra.mxu2 %vm451_vm0, %v427_v29  ;;  %v258_v3 = vpack.c.bf16 %v194_v0, %v194_v0 }
  0x5f   :  { %v390_v6 = vunpack.c.l.b16 %v258_v3 }
  0x6c   :  { %5326 = vmatmul.msk.bf16.gmra.mxu0 %vm451_vm0, %v412_v7 }
  0x6d   :  { %5342 = vmatmul.msk.bf16.gmra.mxu2 %vm451_vm0, %v428_v40  ;;  %v197_v40 = vld [vmem:[#allocation4 + $0x190] sm:$0xff] }
  0x7c   :  { %5327 = vmatmul.msk.bf16.gmra.mxu0 %vm451_vm0, %v413_v14  ;;  %v430_v14 = vpack.c.b16 %v390_v6, %v389_v5 }
  0x7d   :  { %5343 = vmatmul.msk.bf16.gmra.mxu2 %vm451_vm0, %v429_v56  ;;  %v199_v56 = vld [vmem:[#allocation4 + $0x1a0] sm:$0xff] }
  0x7e   :  { %v263_v58 = vpack.c.bf16 %v199_v56, %v199_v56 }
  0x80   :  { %v395_v0 = vunpack.c.l.b16 %v263_v58 }
  0x8c   :  { %5328 = vmatmul.msk.bf16.gmra.mxu0 %vm451_vm0, %v414_v21  ;;  %v195_v21 = vld [vmem:[#allocation4 + $0x180] sm:$0xff] }
  0x8d   :  { %5344 = vmatmul.msk.bf16.gmra.mxu2 %vm451_vm0, %v430_v14 }
  0x99   :  { %v557_v24 = vpop.f32.mrf.mxu0 }
  0x9c   :  { %5329 = vmatmul.msk.bf16.gmra.mxu0 %vm451_vm0, %v415_v60  ;;  %v171_v60 = vld [vmem:[#allocation4 + $0xc0] sm:$0xff] }
  0xa0   :  { %v637_v30 = vpop.f32.mrf.mxu2 }
  0xa1   :  { %v559_v31 = vpop.f32.mrf.mxu0 }
  0xa8   :  { %v639_v32 = vpop.f32.mrf.mxu2 }
  0xa9   :  { %v562_v35 = vpop.f32.mrf.mxu0 }
  0xac   :  { %5330 = vmatmul.msk.bf16.gmra.mxu0 %vm451_vm0, %v416_v17  ;;  %v238_v17 = vpack.c.bf16 %v174_v13, %v174_v13 }
  0xae   :  { %v370_v22 = vunpack.c.l.b16 %v238_v17 }
  0xb0   :  { %v642_v41 = vpop.f32.mrf.mxu2 }
  0xb1   :  { %v564_v42 = vpop.f32.mrf.mxu0 }
  0xb8   :  { %v6332_v43 = vpop.f32.mrf.mxu2 }
  0xb9   :  { %v567_v46 = vpop.f32.mrf.mxu0 }
  0xba   :  { %v5410_v49 = vpack.i.bf16 %v567_v46, %v557_v24  ;;  %v259_v24 = vpack.c.bf16 %v195_v21, %v195_v21  ;;  %v369_v21 = vunpack.c.l.b16 %v237_v16 }
  0xbc   :  { %5411 = vxpose.xlu0.b32.start [1/4] (short) (narrow) %v5410_v49, 32  ;;  %v391_v27 = vunpack.c.l.b16 %v259_v24  ;;  %v420_v25 = vpack.c.b16 %v370_v22, %v369_v21  ;;  %v208_v21 = vld [vmem:[#allocation4 + $0x1e8] sm:$0xff] }
  0xbe   :  { %v431_v33 = vpack.c.b16 %v392_v28, %v391_v27  ;;  %v175_v28 = vld [vmem:[#allocation4 + $0xe0] sm:$0xff] }
  0xc0   :  { %v647_v59 = vpop.f32.mrf.mxu2  ;;  %5345 = vmatmul.msk.bf16.gmra.mxu2 %vm451_vm0, %v431_v33 }
  0xc1   :  { %v5438_v61 = vpack.i.bf16 %v647_v59, %v637_v30  ;;  %v569_v62 = vpop.f32.mrf.mxu0  ;;  %v264_v59 = vpack.c.bf16 %v200_v57, %v200_v57 }
  0xc2   :  { %v5412_v1 = vpack.i.bf16 %v569_v62, %v559_v31  ;;  %v167_v31 = vld [vmem:[#allocation4 + $0xa0] sm:$0xff]  ;;  %v235_v62 = vpack.c.bf16 %v171_v60, %v171_v60 }
  0xc3   :  { %5439 = vxpose.xlu1.b32.start [1/4] (short) (narrow) %v5438_v61, 32  ;;  %v231_v34 = vpack.c.bf16 %v167_v31, %v167_v31  ;;  %v172_v61 = vld [vmem:[#allocation4 + $0xc8] sm:$0xff] }
  0xc4   :  { %5413 = vxpose.xlu0.b32.cont [2/4] (short) (narrow) %v5412_v1, 32  ;;  %v236_v63 = vpack.c.bf16 %v172_v61, %v172_v61  ;;  %v396_v1 = vunpack.c.l.b16 %v264_v59  ;;  %v367_v3 = vunpack.c.l.b16 %v235_v62 }
  0xc5   :  { %v363_v36 = vunpack.c.l.b16 %v231_v34 }
  0xc6   :  { %v433_v6 = vpack.c.b16 %v396_v1, %v395_v0 }
  0xc8   :  { %v649_v4 = vpop.f32.mrf.mxu2 }
  0xc9   :  { %v5440_v7 = vpack.i.bf16 %v649_v4, %v639_v32  ;;  %v572_v8 = vpop.f32.mrf.mxu0  ;;  %v168_v32 = vld [vmem:[#allocation4 + $0xa8] sm:$0xff]  ;;  %v368_v4 = vunpack.c.l.b16 %v236_v63 }
  0xca   :  { %v5414_v11 = vpack.i.bf16 %v572_v8, %v562_v35  ;;  %v232_v35 = vpack.c.bf16 %v168_v32, %v168_v32  ;;  %v201_v8 = vld [vmem:[#allocation4 + $0x1b0] sm:$0xff] }
  0xcb   :  { %5441 = vxpose.xlu1.b32.cont [2/4] (short) (narrow) %v5440_v7, 32  ;;  %v419_v7 = vpack.c.b16 %v368_v4, %v367_v3  ;;  %v265_v14 = vpack.c.bf16 %v201_v8, %v201_v8  ;;  %v206_v3 = vld [vmem:[#allocation4 + $0x1d8] sm:$0xff] }
  0xcc   :  { %5415 = vxpose.xlu0.b32.cont [3/4] (short) (narrow) %v5414_v11, 32  ;;  %v364_v37 = vunpack.c.l.b16 %v232_v35 }
  0xce   :  { %v417_v38 = vpack.c.b16 %v364_v37, %v363_v36  ;;  %v177_v36 = vld [vmem:[#allocation4 + $0xf0] sm:$0xff]  ;;  %v178_v37 = vld [vmem:[#allocation4 + $0xf8] sm:$0xff] }
  0xd0   :  { %v652_v18 = vpop.f32.mrf.mxu2  ;;  %5331 = vmatmul.msk.bf16.gmra.mxu0 %vm451_vm0, %v417_v38  ;;  %v241_v38 = vpack.c.bf16 %v177_v36, %v177_v36 }
  0xd1   :  { %v5442_v19 = vpack.i.bf16 %v652_v18, %v642_v41  ;;  %v574_v20 = vpop.f32.mrf.mxu0  ;;  %v198_v41 = vld [vmem:[#allocation4 + $0x198] sm:$0xff]  ;;  %v397_v18 = vunpack.c.l.b16 %v265_v14 }
  0xd2   :  { %v5416_v23 = vpack.i.bf16 %v574_v20, %v564_v42  ;;  %v261_v42 = vpack.c.bf16 %v197_v40, %v197_v40  ;;  %v262_v44 = vpack.c.bf16 %v198_v41, %v198_v41  ;;  %v373_v40 = vunpack.c.l.b16 %v241_v38 }
  0xd3   :  { %5443 = vxpose.xlu1.b32.cont [3/4] (short) (narrow) %v5442_v19, 32  ;;  %v398_v19 = vunpack.c.l.b16 %v266_v15 }
  0xd4   :  { %5417 = vxpose.xlu0.b32.end [4/4] (short) (narrow) %v5416_v23, 32  ;;  %v394_v45 = vunpack.c.l.b16 %v262_v44 }
  0xd5   :  { %v434_v24 = vpack.c.b16 %v398_v19, %v397_v18 }
  0xd8   :  { %v654_v26 = vpop.f32.mrf.mxu2 }
  0xd9   :  { %v5444_v29 = vpack.i.bf16 %v654_v26, %v6332_v43  ;;  %v577_v30 = vpop.f32.mrf.mxu0  ;;  %v393_v43 = vunpack.c.l.b16 %v261_v42 }
  0xdb   :  { %5445 = vxpose.xlu1.b32.end [4/4] (short) (narrow) %v5444_v29, 32  ;;  %v432_v49 = vpack.c.b16 %v394_v45, %v393_v43  ;;  %v176_v29 = vld [vmem:[#allocation4 + $0xe8] sm:$0xff] }
  0xdc   :  { %v240_v31 = vpack.c.bf16 %v176_v29, %v176_v29 }
  0xdd   :  { %5346 = vmatmul.msk.bf16.gmra.mxu2 %vm451_vm0, %v432_v49 }
  0xde   :  { %v372_v33 = vunpack.c.l.b16 %v240_v31 }
  0xe0   :  { %5332 = vmatmul.msk.bf16.gmra.mxu0 %vm451_vm0, %v418_v54  ;;  %v657_v35 = vpop.f32.mrf.mxu2  ;;  %v204_v54 = vld [vmem:[#allocation4 + $0x1c8] sm:$0xff] }
  0xe1   :  { %v579_v39 = vpop.f32.mrf.mxu0  ;;  %v268_v56 = vpack.c.bf16 %v204_v54, %v204_v54 }
  0xe3   :  { %v400_v59 = vunpack.c.l.b16 %v268_v56 }
  0xe8   :  { %v659_v42 = vpop.f32.mrf.mxu2 }
  0xe9   :  { %v582_v46 = vpop.f32.mrf.mxu0 }
  0xed   :  { %5347 = vmatmul.msk.bf16.gmra.mxu2 %vm451_vm0, %v433_v6 }
  0xf0   :  { %5333 = vmatmul.msk.bf16.gmra.mxu0 %vm451_vm0, %v419_v7  ;;  %v662_v43 = vpop.f32.mrf.mxu2 }
  0xf1   :  { %v584_v55 = vpop.f32.mrf.mxu0 }
  0xf8   :  { %v664_v45 = vpop.f32.mrf.mxu2 }
  0xf9   :  { %v587_v2 = vpop.f32.mrf.mxu0 }
  0xfa   :  { %v5466_v5 = vpack.i.bf16 %v587_v2, %v577_v30  ;;  %v239_v30 = vpack.c.bf16 %v175_v28, %v175_v28  ;;  %v205_v2 = vld [vmem:[#allocation4 + $0x1d0] sm:$0xff] }
  0xfb   :  { %v269_v4 = vpack.c.bf16 %v205_v2, %v205_v2 }
  0xfc   :  { %5467 = vxpose.xlu1.b32.start [1/4] (short) (narrow) %v5466_v5, 32  ;;  %v371_v32 = vunpack.c.l.b16 %v239_v30  ;;  %v270_v5 = vpack.c.bf16 %v206_v3, %v206_v3 }
  0xfd   :  { %5348 = vmatmul.msk.bf16.gmra.mxu2 %vm451_vm0, %v434_v24  ;;  %v401_v7 = vunpack.c.l.b16 %v269_v4  ;;  %v272_v24 = vpack.c.bf16 %v208_v21, %v208_v21 }
  0xfe   :  { %v421_v34 = vpack.c.b16 %v372_v33, %v371_v32  ;;  %v402_v8 = vunpack.c.l.b16 %v270_v5 }
 0x100   :  { %5334 = vmatmul.msk.bf16.gmra.mxu0 %vm451_vm0, %v420_v25  ;;  %v667_v48 = vpop.f32.mrf.mxu2  ;;  %v436_v9 = vpack.c.b16 %v402_v8, %v401_v7 }
 0x101   :  { %v589_v10 = vpop.f32.mrf.mxu0  ;;  %v5494_v49 = vpack.i.bf16 %v667_v48, %v657_v35 }
 0x102   :  { %v5468_v11 = vpack.i.bf16 %v589_v10, %v579_v39  ;;  %v242_v39 = vpack.c.bf16 %v178_v37, %v178_v37 }
 0x103   :  { %5495 = vxpose.xlu2.b32.start [1/4] (short) (narrow) %v5494_v49, 32 }
 0x104   :  { %5469 = vxpose.xlu1.b32.cont [2/4] (short) (narrow) %v5468_v11, 32  ;;  %v374_v41 = vunpack.c.l.b16 %v242_v39 }
 0x106   :  { %v422_v44 = vpack.c.b16 %v374_v41, %v373_v40 }
 0x108   :  { %v669_v52 = vpop.f32.mrf.mxu2 }
 0x109   :  { %v592_v20 = vpop.f32.mrf.mxu0  ;;  %v5496_v57 = vpack.i.bf16 %v669_v52, %v659_v42 }
 0x10a   :  { %v5470_v23 = vpack.i.bf16 %v592_v20, %v582_v46  ;;  %v207_v20 = vld [vmem:[#allocation4 + $0x1e0] sm:$0xff] }
 0x10b   :  { %5497 = vxpose.xlu2.b32.cont [2/4] (short) (narrow) %v5496_v57, 32 }
 0x10c   :  { %5471 = vxpose.xlu1.b32.cont [3/4] (short) (narrow) %v5470_v23, 32  ;;  %v271_v23 = vpack.c.bf16 %v207_v20, %v207_v20 }
 0x110   :  { %5335 = vmatmul.msk.bf16.gmra.mxu0 %vm451_vm0, %v421_v34  ;;  %v672_v62 = vpop.f32.mrf.mxu2 }
 0x111   :  { %v594_v26 = vpop.f32.mrf.mxu0  ;;  %v5498_v63 = vpack.i.bf16 %v672_v62, %v662_v43  ;;  %v209_v43 = vld [vmem:[#allocation4 + $0x1f0] sm:$0xff] }
 0x112   :  { %v5472_v27 = vpack.i.bf16 %v594_v26, %v584_v55  ;;  %v267_v55 = vpack.c.bf16 %v203_v53, %v203_v53  ;;  %v403_v26 = vunpack.c.l.b16 %v271_v23  ;;  %v273_v47 = vpack.c.bf16 %v209_v43, %v209_v43 }
 0x113   :  { %5499 = vxpose.xlu2.b32.cont [3/4] (short) (narrow) %v5498_v63, 32 }
 0x114   :  { %5473 = vxpose.xlu1.b32.end [4/4] (short) (narrow) %v5472_v27, 32  ;;  %v399_v58 = vunpack.c.l.b16 %v267_v55  ;;  %v404_v27 = vunpack.c.l.b16 %v272_v24  ;;  %v405_v50 = vunpack.c.l.b16 %v273_v47 }
 0x116   :  { %v435_v60 = vpack.c.b16 %v400_v59, %v399_v58  ;;  %v437_v31 = vpack.c.b16 %v404_v27, %v403_v26 }
 0x118   :  { %5349 = vmatmul.msk.bf16.gmra.mxu2 %vm451_vm0, %v435_v60  ;;  %v674_v1 = vpop.f32.mrf.mxu2 }
 0x119   :  { %v597_v46 = vpop.f32.mrf.mxu0  ;;  %v5500_v6 = vpack.i.bf16 %v674_v1, %v664_v45  ;;  %v210_v45 = vld [vmem:[#allocation4 + $0x1f8] sm:$0xff] }
 0x11a   :  { %v274_v48 = vpack.c.bf16 %v210_v45, %v210_v45 }
 0x11b   :  { %5501 = vxpose.xlu2.b32.end [4/4] (short) (narrow) %v5500_v6, 32 }
 0x120   :  { %5336 = vmatmul.msk.bf16.gmra.mxu0 %vm451_vm0, %v422_v44 }
 0x121   :  { %v599_v51 = vpop.f32.mrf.mxu0 }
 0x128   :  { %5350 = vmatmul.msk.bf16.gmra.mxu2 %vm451_vm0, %v436_v9 }
 0x129   :  { %v602_v61 = vpop.f32.mrf.mxu0 }
 0x131   :  { %v6350_v0 = vpop.f32.mrf.mxu0 }
 0x138   :  { %5351 = vmatmul.msk.bf16.gmra.mxu2 %vm451_vm0, %v437_v31 }
 0x143   :  { %v677_v12 = vpop.f32.mrf.mxu2 }
 0x14b   :  { %v679_v19 = vpop.f32.mrf.mxu2 }
 0x14d   :  { %v607_v11 = vpop.f32.mrf.mxu0 }
 0x14e   :  { %v5522_v13 = vpack.i.bf16 %v607_v11, %v597_v46 }
 0x150   :  { %5523 = vxpose.xlu2.b32.start [1/4] (short) (narrow) %v5522_v13, 32 }
 0x155   :  { %v609_v18 = vpop.f32.mrf.mxu0 }
 0x156   :  { %v5524_v25 = vpack.i.bf16 %v609_v18, %v599_v51  ;;  %v406_v51 = vunpack.c.l.b16 %v274_v48 }
 0x158   :  { %5525 = vxpose.xlu2.b32.cont [2/4] (short) (narrow) %v5524_v25, 32  ;;  %v438_v54 = vpack.c.b16 %v406_v51, %v405_v50 }
 0x15a   :  { %5352 = vmatmul.msk.bf16.gmra.mxu2 %vm451_vm0, %v438_v54 }
 0x15d   :  { %v612_v34 = vpop.f32.mrf.mxu0 }
 0x15e   :  { %v5526_v36 = vpack.i.bf16 %v612_v34, %v602_v61 }
 0x160   :  { %v6352_v10 = vpop.trf.xlu0  ;;  %v682_v35 = vpop.f32.mrf.mxu2  ;;  %5527 = vxpose.xlu2.b32.cont [3/4] (short) (narrow) %v5526_v36, 32 }
 0x161   :  { %v5419_v17 = vunpack.i.l.bf16 %v6352_v10  ;;  %v5422_v60 = vunpack.i.h.bf16 %v6352_v10 }
 0x165   :  { %v614_v41 = vpop.f32.mrf.mxu0 }
 0x166   :  { %v5528_v46 = vpack.i.bf16 %v614_v41, %v6350_v0 }
 0x167   :  { %v6355_v14 = vpop.trf.xlu1 }
 0x168   :  { %v5423_v15 = vpop.trf.xlu0  ;;  %v5447_v29 = vunpack.i.l.bf16 %v6355_v14  ;;  %v684_v42 = vpop.f32.mrf.mxu2  ;;  %5529 = vxpose.xlu2.b32.end [4/4] (short) (narrow) %v5528_v46, 32  ;;  %v5450_v2 = vunpack.i.h.bf16 %v6355_v14 }
 0x169   :  { %v5424_v16 = vunpack.i.l.bf16 %v5423_v15  ;;  %v5427_v59 = vunpack.i.h.bf16 %v5423_v15 }
 0x16b   :  { %v1229_v22 = vpack.c.bf16 %v5424_v16, %v5419_v17  ;;  %v1231_v63 = vpack.c.bf16 %v5427_v59, %v5422_v60 }
 0x16d   :  { %5361 = vmatmul.msk.bf16.vlgmr.msra.gmra.mxu1 %vm451_vm0, %v1229_v22  ;;  %v617_v56 = vpop.f32.mrf.mxu0 }
 0x16f   :  { %v5451_v28 = vpop.trf.xlu1 }
 0x170   :  { %v5452_v30 = vunpack.i.l.bf16 %v5451_v28  ;;  %v5428_v32 = vpop.trf.xlu0  ;;  %v687_v57 = vpop.f32.mrf.mxu2  ;;  %v5455_v1 = vunpack.i.h.bf16 %v5451_v28 }
 0x171   :  { %v5429_v40 = vunpack.i.l.bf16 %v5428_v32  ;;  %v5550_v58 = vpack.i.bf16 %v687_v57, %v677_v12  ;;  %v5432_v8 = vunpack.i.h.bf16 %v5428_v32 }
 0x172   :  { %v1245_v33 = vpack.c.bf16 %v5452_v30, %v5447_v29  ;;  %v1247_v3 = vpack.c.bf16 %v5455_v1, %v5450_v2 }
 0x173   :  { %5551 = vxpose.xlu0.b32.start [1/4] (short) (narrow) %v5550_v58, 32 }
 0x174   :  { %5377 = vmatmul.msk.bf16.vlgmr.msra.gmra.mxu3 %vm451_vm0, %v1245_v33 }
 0x175   :  { %v619_v61 = vpop.f32.mrf.mxu0 }
 0x177   :  { %v5456_v37 = vpop.trf.xlu1 }
 0x178   :  { %v5433_v38 = vpop.trf.xlu0  ;;  %v5457_v53 = vunpack.i.l.bf16 %v5456_v37  ;;  %v689_v62 = vpop.f32.mrf.mxu2  ;;  %v5460_v15 = vunpack.i.h.bf16 %v5456_v37 }
 0x179   :  { %v5434_v39 = vunpack.i.l.bf16 %v5433_v38  ;;  %v5552_v0 = vpack.i.bf16 %v689_v62, %v679_v19  ;;  %v5437_v7 = vunpack.i.h.bf16 %v5433_v38 }
 0x17b   :  { %v1230_v44 = vpack.c.bf16 %v5434_v39, %v5429_v40  ;;  %5553 = vxpose.xlu0.b32.cont [2/4] (short) (narrow) %v5552_v0, 32  ;;  %v1232_v11 = vpack.c.bf16 %v5437_v7, %v5432_v8 }
 0x17d   :  { %5362 = vmatmul.msk.bf16.gmra.mxu1 %vm451_vm0, %v1230_v44  ;;  %v622_v4 = vpop.f32.mrf.mxu0 }
 0x17f   :  { %v5461_v49 = vpop.trf.xlu1 }
 0x180   :  { %v5462_v52 = vunpack.i.l.bf16 %v5461_v49  ;;  %v692_v5 = vpop.f32.mrf.mxu2  ;;  %v5465_v13 = vunpack.i.h.bf16 %v5461_v49 }
 0x181   :  { %v5554_v6 = vpack.i.bf16 %v692_v5, %v682_v35 }
 0x182   :  { %v1246_v55 = vpack.c.bf16 %v5462_v52, %v5457_v53  ;;  %v1248_v14 = vpack.c.bf16 %v5465_v13, %v5460_v15 }
 0x183   :  { %5555 = vxpose.xlu0.b32.cont [3/4] (short) (narrow) %v5554_v6, 32 }
 0x184   :  { %5378 = vmatmul.msk.bf16.gmra.mxu3 %vm451_vm0, %v1246_v55 }
 0x185   :  { %v624_v9 = vpop.f32.mrf.mxu0 }
 0x188   :  { %v694_v10 = vpop.f32.mrf.mxu2 }
 0x189   :  { %v5556_v12 = vpack.i.bf16 %v694_v10, %v684_v42 }
 0x18b   :  { %5557 = vxpose.xlu0.b32.end [4/4] (short) (narrow) %v5556_v12, 32 }
 0x18d   :  { %5363 = vmatmul.msk.bf16.gmra.mxu1 %vm451_vm0, %v1231_v63  ;;  %v627_v17 = vpop.f32.mrf.mxu0 }
 0x18e   :  { %v5578_v18 = vpack.i.bf16 %v627_v17, %v617_v56 }
 0x193   :  { %5579 = vxpose.xlu0.b32.start [1/4] (short) (narrow) %v5578_v18, 32 }
 0x194   :  { %5379 = vmatmul.msk.bf16.gmra.mxu3 %vm451_vm0, %v1247_v3 }
 0x195   :  { %v629_v22 = vpop.f32.mrf.mxu0 }
 0x196   :  { %v5580_v23 = vpack.i.bf16 %v629_v22, %v619_v61 }
 0x19b   :  { %5581 = vxpose.xlu0.b32.cont [2/4] (short) (narrow) %v5580_v23, 32  ;;  %v697_v34 = vpop.f32.mrf.mxu2 }
 0x19c   :  { %v5502_v35 = vpop.trf.xlu2 }
 0x19d   :  { %5364 = vmatmul.msk.bf16.gmra.mxu1 %vm451_vm0, %v1232_v11  ;;  %v632_v26 = vpop.f32.mrf.mxu0  ;;  %v5503_v44 = vunpack.i.l.bf16 %v5502_v35  ;;  %v5506_v5 = vunpack.i.h.bf16 %v5502_v35 }
 0x19e   :  { %v5582_v27 = vpack.i.bf16 %v632_v26, %v622_v4 }
 0x1a0   :  { %v5474_v16 = vpop.trf.xlu1 }
 0x1a1   :  { %v5475_v19 = vunpack.i.l.bf16 %v5474_v16  ;;  %v5478_v41 = vunpack.i.h.bf16 %v5474_v16 }
 0x1a3   :  { %5583 = vxpose.xlu0.b32.cont [3/4] (short) (narrow) %v5582_v27, 32  ;;  %v699_v37 = vpop.f32.mrf.mxu2 }
 0x1a4   :  { %5380 = vmatmul.msk.bf16.gmra.mxu3 %vm451_vm0, %v1248_v14  ;;  %v5507_v38 = vpop.trf.xlu2 }
 0x1a5   :  { %v634_v31 = vpop.f32.mrf.mxu0  ;;  %v5508_v42 = vunpack.i.l.bf16 %v5507_v38  ;;  %v5511_v3 = vunpack.i.h.bf16 %v5507_v38 }
 0x1a6   :  { %v5584_v32 = vpack.i.bf16 %v634_v31, %v624_v9 }
 0x1a7   :  { %v1249_v45 = vpack.c.bf16 %v5508_v42, %v5503_v44  ;;  %v1251_v10 = vpack.c.bf16 %v5511_v3, %v5506_v5 }
 0x1a8   :  { %v5479_v20 = vpop.trf.xlu1 }
 0x1a9   :  { %v5480_v21 = vunpack.i.l.bf16 %v5479_v20  ;;  %v5483_v39 = vunpack.i.h.bf16 %v5479_v20 }
 0x1ab   :  { %v1233_v24 = vpack.c.bf16 %v5480_v21, %v5475_v19  ;;  %5585 = vxpose.xlu0.b32.end [4/4] (short) (narrow) %v5584_v32, 32  ;;  %v1235_v43 = vpack.c.bf16 %v5483_v39, %v5478_v41  ;;  %v6374_v47 = vpop.f32.mrf.mxu2 }
 0x1ac   :  { %v5512_v48 = vpop.trf.xlu2 }
 0x1ad   :  { %5365 = vmatmul.msk.bf16.gmra.mxu1 %vm451_vm0, %v1233_v24  ;;  %v5513_v58 = vunpack.i.l.bf16 %v5512_v48  ;;  %v5516_v21 = vunpack.i.h.bf16 %v5512_v48 }
 0x1b0   :  { %v5484_v25 = vpop.trf.xlu1 }
 0x1b1   :  { %v5485_v28 = vunpack.i.l.bf16 %v5484_v25  ;;  %v5488_v51 = vunpack.i.h.bf16 %v5484_v25 }
 0x1b3   :  { %v704_v54 = vpop.f32.mrf.mxu2 }
 0x1b4   :  { %5381 = vmatmul.msk.bf16.gmra.mxu3 %vm451_vm0, %v1249_v45  ;;  %v5517_v53 = vpop.trf.xlu2 }
 0x1b5   :  { %v5518_v57 = vunpack.i.l.bf16 %v5517_v53  ;;  %v5521_v19 = vunpack.i.h.bf16 %v5517_v53 }
 0x1b7   :  { %v1250_v59 = vpack.c.bf16 %v5518_v57, %v5513_v58  ;;  %v1252_v25 = vpack.c.bf16 %v5521_v19, %v5516_v21  ;;  %v6410_v19 = vld [vmem:[#allocation2 + $0x108] sm:$0xff] }
 0x1b8   :  { %v5489_v29 = vpop.trf.xlu1  ;;  %vm3175_vm5 = vcmp.ge.f32.partialorder %v6410_v19, 0.0 }
 0x1b9   :  { %v5490_v30 = vunpack.i.l.bf16 %v5489_v29  ;;  %v5493_v52 = vunpack.i.h.bf16 %v5489_v29 }
 0x1bb   :  { %v1234_v33 = vpack.c.bf16 %v5490_v30, %v5485_v28  ;;  %v1236_v56 = vpack.c.bf16 %v5493_v52, %v5488_v51  ;;  %v707_v63 = vpop.f32.mrf.mxu2 }
 0x1bc   :  { %v5606_v7 = vpack.i.bf16 %v707_v63, %v697_v34 }
 0x1bd   :  { %5366 = vmatmul.msk.bf16.gmra.mxu1 %vm451_vm0, %v1234_v33 }
 0x1c3   :  { %v709_v8 = vpop.f32.mrf.mxu2 }
 0x1c4   :  { %5382 = vmatmul.msk.bf16.gmra.mxu3 %vm451_vm0, %v1250_v59  ;;  %v5608_v15 = vpack.i.bf16 %v709_v8, %v699_v37  ;;  %v6393_v59 = vld [vmem:[#allocation2] sm:$0xff] }
 0x1c5   :  { %vm3142_vm1 = vcmp.ge.f32.partialorder %v6393_v59, 0.0 }
 0x1cd   :  { %5367 = vmatmul.msk.bf16.gmra.mxu1 %vm451_vm0, %v1235_v43 }
 0x1d4   :  { %5383 = vmatmul.msk.bf16.gmra.mxu3 %vm451_vm0, %v1251_v10 }
 0x1dd   :  { %5368 = vmatmul.msk.bf16.gmra.mxu1 %vm451_vm0, %v1236_v56  ;;  %v712_v14 = vpop.f32.mrf.mxu2 }
 0x1de   :  { %v5610_v23 = vpack.i.bf16 %v712_v14, %v6374_v47 }
 0x1e4   :  { %5384 = vmatmul.msk.bf16.gmra.mxu3 %vm451_vm0, %v1252_v25 }
 0x1e5   :  { %v714_v27 = vpop.f32.mrf.mxu2 }
 0x1e6   :  { %v5612_v29 = vpack.i.bf16 %v714_v27, %v704_v54 }
 0x1e9   :  { %v5530_v61 = vpop.trf.xlu2 }
 0x1ea   :  { %v1382_v36 = vpop.f32.mrf.mxu1  ;;  %v5531_v2 = vunpack.i.l.bf16 %v5530_v61  ;;  %v5534_v33 = vunpack.i.h.bf16 %v5530_v61 }
 0x1eb   :  { %1542 = vxpose.xlu2.b32.start [1/4] (short) (narrow) %v1382_v36, 32 }
 0x1f1   :  { %v5535_v1 = vpop.trf.xlu2 }
 0x1f2   :  { %v1384_v40 = vpop.f32.mrf.mxu1  ;;  %v5536_v4 = vunpack.i.l.bf16 %v5535_v1  ;;  %v5539_v32 = vunpack.i.h.bf16 %v5535_v1 }
 0x1f3   :  { %1543 = vxpose.xlu2.b32.cont [2/4] (short) (narrow) %v1384_v40, 32 }
 0x1f4   :  { %v1237_v9 = vpack.c.bf16 %v5536_v4, %v5531_v2  ;;  %v1239_v37 = vpack.c.bf16 %v5539_v32, %v5534_v33  ;;  %v6400_v4 = vld [vmem:[#allocation2 + $0x8] sm:$0xff] }
 0x1f5   :  { %vm3143_vm2 = vcmp.ge.f32.partialorder %v6400_v4, 0.0 }
 0x1f6   :  { %5369 = vmatmul.msk.bf16.gmra.mxu1 %vm451_vm0, %v1237_v9 }
 0x1f7   :  { %v1462_v46 = vpop.f32.mrf.mxu3 }
 0x1f8   :  { %1798 = vxpose.xlu1.b32.start [1/4] (short) (narrow) %v1462_v46, 32 }
 0x1f9   :  { %v5540_v12 = vpop.trf.xlu2 }
 0x1fa   :  { %v1387_v49 = vpop.f32.mrf.mxu1  ;;  %v5541_v18 = vunpack.i.l.bf16 %v5540_v12  ;;  %v5544_v44 = vunpack.i.h.bf16 %v5540_v12 }
 0x1fb   :  { %1544 = vxpose.xlu2.b32.cont [3/4] (short) (narrow) %v1387_v49, 32 }
 0x1ff   :  { %v1464_v50 = vpop.f32.mrf.mxu3 }
 0x200   :  { %1799 = vxpose.xlu1.b32.cont [2/4] (short) (narrow) %v1464_v50, 32 }
 0x201   :  { %v5545_v17 = vpop.trf.xlu2 }
 0x202   :  { %v1389_v55 = vpop.f32.mrf.mxu1  ;;  %v5546_v20 = vunpack.i.l.bf16 %v5545_v17  ;;  %v5549_v42 = vunpack.i.h.bf16 %v5545_v17 }
 0x203   :  { %1545 = vxpose.xlu2.b32.end [4/4] (short) (narrow) %v1389_v55, 32 }
 0x204   :  { %v1238_v24 = vpack.c.bf16 %v5546_v20, %v5541_v18  ;;  %v1240_v47 = vpack.c.bf16 %v5549_v42, %v5544_v44  ;;  %v6408_v18 = vld [vmem:[#allocation2 + $0x10] sm:$0xff] }
 0x205   :  { %v2376_v21 = vand.u32 2147483647, %v6408_v18  ;;  %vm3144_vm4 = vcmp.ge.f32.partialorder %v6408_v18, 0.0 }
 0x206   :  { %5370 = vmatmul.msk.bf16.gmra.mxu1 %vm451_vm0, %v1238_v24 }
 0x207   :  { %v1467_v60 = vpop.f32.mrf.mxu3  ;;  %v2440_v25 = vsub.f32 0.0, %v2376_v21 }
 0x208   :  { %1800 = vxpose.xlu1.b32.cont [3/4] (short) (narrow) %v1467_v60, 32  ;;  %v2374_v60 = vand.u32 2147483647, %v6393_v59 }
 0x20a   :  { %v1392_v62 = vpop.f32.mrf.mxu1 }
 0x20b   :  { %1574 = vxpose.xlu0.b32.start [1/4] (short) (narrow) %v1392_v62, 32 }
 0x20f   :  { %v1469_v0 = vpop.f32.mrf.mxu3 }
 0x210   :  { %1801 = vxpose.xlu1.b32.end [4/4] (short) (narrow) %v1469_v0, 32  ;;  %v2438_v0 = vsub.f32 0.0, %v2374_v60 }
 0x212   :  { %v1394_v6 = vpop.f32.mrf.mxu1  ;;  %v2502_v3 = vmul.f32 1.442695, %v2438_v0 }
 0x213   :  { %1575 = vxpose.xlu0.b32.cont [2/4] (short) (narrow) %v1394_v6, 32 }
 0x214   :  { %5634 = vpow2.f32 %v2502_v3 }
 0x216   :  { %5371 = vmatmul.msk.bf16.gmra.mxu1 %vm451_vm0, %v1239_v37 }
 0x217   :  { %v1472_v11 = vpop.f32.mrf.mxu3  ;;  %v5558_v28 = vpop.trf.xlu0 }
 0x218   :  { %5607 = vxpose.xlu1.b32.start [1/4] (short) (narrow) %v5606_v7, 32  ;;  %1830 = vxpose.xlu2.b32.start [1/4] (short) (narrow) %v1472_v11, 32  ;;  %v5559_v34 = vunpack.i.l.bf16 %v5558_v28  ;;  %v5562_v53 = vunpack.i.h.bf16 %v5558_v28  ;;  %v2375_v7 = vand.u32 2147483647, %v6400_v4  ;;  %v6405_v11 = vld [vmem:[#allocation2 + $0x100] sm:$0xff] }
 0x219   :  { %vm3174_vm3 = vcmp.ge.f32.partialorder %v6405_v11, 0.0 }
 0x21a   :  { %v1397_v13 = vpop.f32.mrf.mxu1  ;;  %v2439_v8 = vsub.f32 0.0, %v2375_v7  ;;  %v5635_v10 = vpop.eup %5634 }
 0x21b   :  { %1576 = vxpose.xlu0.b32.cont [3/4] (short) (narrow) %v1397_v13, 32  ;;  %v2822_v12 = vadd.f32 1.0, %v5635_v10  ;;  %v2406_v13 = vand.u32 2147483647, %v6405_v11 }
 0x21c   :  { %v2504_v9 = vmul.f32 1.442695, %v2439_v8 }
 0x21e   :  { %5636 = vpow2.f32 %v2504_v9 }
 0x21f   :  { %v1474_v16 = vpop.f32.mrf.mxu3  ;;  %v5563_v35 = vpop.trf.xlu0  ;;  %5638 = vrcp.f32 %v2822_v12 }
 0x220   :  { %5609 = vxpose.xlu1.b32.cont [2/4] (short) (narrow) %v5608_v15, 32  ;;  %1831 = vxpose.xlu2.b32.cont [2/4] (short) (narrow) %v1474_v16, 32  ;;  %v5564_v36 = vunpack.i.l.bf16 %v5563_v35  ;;  %v5567_v52 = vunpack.i.h.bf16 %v5563_v35  ;;  %v2470_v15 = vsub.f32 0.0, %v2406_v13  ;;  %v6027_v13 = vld [vmem:[#allocation4 + $0x8] sm:$0xff] }
 0x222   :  { %v1399_v22 = vpop.f32.mrf.mxu1  ;;  %v1253_v38 = vpack.c.bf16 %v5564_v36, %v5559_v34  ;;  %v1255_v57 = vpack.c.bf16 %v5567_v52, %v5562_v53  ;;  %v2566_v16 = vmul.f32 1.442695, %v2470_v15  ;;  %v6421_v34 = vld [vmem:[#allocation2 + $0x110] sm:$0xff]  ;;  %v2695_v15 = vmul.f32 %v6027_v13, %v6400_v4 }
 0x223   :  { %1577 = vxpose.xlu0.b32.end [4/4] (short) (narrow) %v1399_v22, 32  ;;  %v2407_v22 = vand.u32 2147483647, %v6410_v19  ;;  %v2408_v35 = vand.u32 2147483647, %v6421_v34  ;;  %vm3176_vm6 = vcmp.ge.f32.partialorder %v6421_v34, 0.0 }
 0x224   :  { %5385 = vmatmul.msk.bf16.gmra.mxu3 %vm451_vm0, %v1253_v38  ;;  %5640 = vpow2.f32 %v2566_v16  ;;  %v5637_v20 = vpop.eup %5636 }
 0x225   :  { %v2823_v28 = vadd.f32 1.0, %v5637_v20  ;;  %v2472_v36 = vsub.f32 0.0, %v2408_v35 }
 0x226   :  { %5372 = vmatmul.msk.bf16.gmra.mxu1 %vm451_vm0, %v1240_v47 }
 0x227   :  { %v1477_v26 = vpop.f32.mrf.mxu3  ;;  %v5568_v40 = vpop.trf.xlu0  ;;  %5642 = vrcp.f32 %v2823_v28 }
 0x228   :  { %5611 = vxpose.xlu1.b32.cont [3/4] (short) (narrow) %v5610_v23, 32  ;;  %1832 = vxpose.xlu2.b32.cont [3/4] (short) (narrow) %v1477_v26, 32  ;;  %v5569_v41 = vunpack.i.l.bf16 %v5568_v40  ;;  %v5572_v61 = vunpack.i.h.bf16 %v5568_v40  ;;  %v5639_v23 = vpop.eup %5638  ;;  %v2471_v26 = vsub.f32 0.0, %v2407_v22  ;;  %v2570_v40 = vmul.f32 1.442695, %v2472_v36 }
 0x229   :  { %v3206_v27 = vmul.f32 %v5639_v23, %v5635_v10 }
 0x22a   :  { %v1402_v31 = vpop.f32.mrf.mxu1  ;;  %v2568_v32 = vmul.f32 1.442695, %v2471_v26 }
 0x22b   :  { %v6418_v33 = vsel %vm3142_vm1, %v5639_v23, %v3206_v27 }
 0x22f   :  { %v1479_v30 = vpop.f32.mrf.mxu3  ;;  %v5573_v43 = vpop.trf.xlu0 }
 0x230   :  { %5613 = vxpose.xlu1.b32.end [4/4] (short) (narrow) %v5612_v29, 32  ;;  %1833 = vxpose.xlu2.b32.end [4/4] (short) (narrow) %v1479_v30, 32  ;;  %v5574_v46 = vunpack.i.l.bf16 %v5573_v43  ;;  %v5577_v62 = vunpack.i.h.bf16 %v5573_v43  ;;  %v5641_v29 = vpop.eup %5640  ;;  %v2506_v30 = vmul.f32 1.442695, %v2440_v25 }
 0x231   :  { %v5643_v37 = vpop.eup %5642 }
 0x232   :  { %v1404_v39 = vpop.f32.mrf.mxu1  ;;  %v1254_v48 = vpack.c.bf16 %v5574_v46, %v5569_v41  ;;  %v1256_v6 = vpack.c.bf16 %v5577_v62, %v5572_v61  ;;  %5644 = vpow2.f32 %v2506_v30  ;;  %v3207_v41 = vmul.f32 %v5643_v37, %v5637_v20 }
 0x234   :  { %5386 = vmatmul.msk.bf16.gmra.mxu3 %vm451_vm0, %v1254_v48 }
 0x237   :  { %v5586_v49 = vpop.trf.xlu0 }
 0x238   :  { %1606 = vxpose.xlu1.b32.start [1/4] (short) (narrow) %v1402_v31, 32  ;;  %v5587_v51 = vunpack.i.l.bf16 %v5586_v49  ;;  %v5590_v14 = vunpack.i.h.bf16 %v5586_v49  ;;  %v6416_v31 = vadd.f32 1.0, %v5641_v29  ;;  %v5645_v38 = vpop.eup %5644 }
 0x239   :  { %v6426_v43 = vadd.f32 1.0, %v5645_v38 }
 0x23a   :  { %v1407_v45 = vpop.f32.mrf.mxu1  ;;  %5646 = vrcp.f32 %v6416_v31 }
 0x23b   :  { %5648 = vpow2.f32 %v2568_v32 }
 0x23c   :  { %5650 = vlog2.f32 %v2822_v12  ;;  %v2631_v12 = vmax.f32 %v6400_v4, 0.0 }
 0x23d   :  { %5652 = vpow2.f32 %v2570_v40 }
 0x23e   :  { %5654 = vrcp.f32 %v6426_v43 }
 0x23f   :  { %v5591_v54 = vpop.trf.xlu0 }
 0x240   :  { %1607 = vxpose.xlu1.b32.cont [2/4] (short) (narrow) %v1404_v39, 32  ;;  %v5592_v55 = vunpack.i.l.bf16 %v5591_v54  ;;  %v5595_v17 = vunpack.i.h.bf16 %v5591_v54  ;;  %v5647_v42 = vpop.eup %5646  ;;  %v6026_v54 = vld [vmem:[#allocation4] sm:$0xff] }
 0x241   :  { %v3238_v46 = vmul.f32 %v5647_v42, %v5641_v29  ;;  %v5649_v47 = vpop.eup %5648  ;;  %v4711_v7 = vadd.f32 %v6026_v54, %v6418_v33 }
 0x242   :  { %v1409_v50 = vpop.f32.mrf.mxu1  ;;  %v1241_v56 = vpack.c.bf16 %v5592_v55, %v5587_v51  ;;  %v1243_v24 = vpack.c.bf16 %v5595_v17, %v5590_v14  ;;  %v6433_v49 = vadd.f32 1.0, %v5649_v47  ;;  %v5651_v53 = vpop.eup %5650 }
 0x244   :  { %5373 = vmatmul.msk.bf16.gmra.mxu1 %vm451_vm0, %v1241_v56  ;;  %5387 = vmatmul.msk.bf16.gmra.mxu3 %vm451_vm0, %v1255_v57  ;;  %v2630_v56 = vmax.f32 %v6393_v59, 0.0  ;;  %v2694_v57 = vmul.f32 %v6026_v54, %v6393_v59  ;;  %5656 = vrcp.f32 %v6433_v49 }
 0x245   :  { %5658 = vlog2.f32 %v2823_v28  ;;  %v2759_v28 = vsub.f32 %v2631_v12, %v2695_v15 }
 0x246   :  { %v2758_v3 = vsub.f32 %v2630_v56, %v2694_v57 }
 0x247   :  { %v6391_v58 = vpop.trf.xlu0 }
 0x248   :  { %1608 = vxpose.xlu1.b32.cont [3/4] (short) (narrow) %v1407_v45, 32  ;;  %v5597_v63 = vunpack.i.l.bf16 %v6391_v58  ;;  %v5600_v39 = vunpack.i.h.bf16 %v6391_v58  ;;  %v6429_v45 = vsel %vm3143_vm2, %v5643_v37, %v3207_v41  ;;  %v5653_v58 = vpop.eup %5652 }
 0x249   :  { %v5655_v60 = vpop.eup %5654  ;;  %v6441_v62 = vadd.f32 1.0, %v5653_v58 }
 0x24a   :  { %v5657_v8 = vpop.eup %5656 }
 0x24b   :  { %5660 = vrcp.f32 %v6441_v62  ;;  %v5659_v16 = vpop.eup %5658  ;;  %v3239_v20 = vmul.f32 %v5657_v8, %v5649_v47 }
 0x24c   :  { %v2889_v29 = vmul.f32 0.6931472, %v5659_v16 }
 0x24f   :  { %v6397_v1 = vpop.trf.xlu0 }
 0x250   :  { %1609 = vxpose.xlu1.b32.end [4/4] (short) (narrow) %v1409_v50, 32  ;;  %v5602_v2 = vunpack.i.l.bf16 %v6397_v1  ;;  %v5605_v44 = vunpack.i.h.bf16 %v6397_v1  ;;  %v6435_v50 = vsel %vm3174_vm3, %v5647_v42, %v3238_v46  ;;  %v3208_v1 = vmul.f32 %v5655_v60, %v5645_v38  ;;  %v6464_v42 = vld [vmem:[#allocation4 + $0x10] sm:$0xff] }
 0x251   :  { %v5661_v26 = vpop.eup %5660 }
 0x252   :  { %v1242_v5 = vpack.c.bf16 %v5602_v2, %v5597_v63  ;;  %v1244_v52 = vpack.c.bf16 %v5605_v44, %v5600_v39  ;;  %v6443_v63 = vld [vmem:[#allocation2 + $0x20] sm:$0xff]  ;;  %v3272_v17 = vsel %vm3144_vm4, %v5655_v60, %v3208_v1  ;;  %v3240_v30 = vmul.f32 %v5661_v26, %v5653_v58 }
 0x253   :  { %v2378_v0 = vand.u32 2147483647, %v6443_v63  ;;  %v3015_v39 = vadd.f32 %v2889_v29, %v2759_v28  ;;  %v6029_v60 = vld [vmem:[#allocation4 + $0x100] sm:$0xff]  ;;  %vm3146_vm7 = vcmp.ge.f32.partialorder %v6443_v63, 0.0  ;;  %v2664_v28 = vmax.f32 %v6421_v34, 0.0  ;;  %v6031_v29 = vld [vmem:[#allocation4 + $0x110] sm:$0xff] }
 0x254   :  { %5374 = vmatmul.msk.bf16.gmra.mxu1 %vm451_vm0, %v1242_v5  ;;  %5388 = vmatmul.msk.bf16.gmra.mxu3 %vm451_vm0, %v1256_v6  ;;  %v2887_v5 = vmul.f32 0.6931472, %v5651_v53  ;;  %v6461_v36 = vsel %vm3176_vm6, %v5661_v26, %v3240_v30  ;;  %v2728_v30 = vmul.f32 %v6031_v29, %v6421_v34 }
 0x255   :  { %v2442_v6 = vsub.f32 0.0, %v2378_v0 }
 0x256   :  { %v3014_v22 = vadd.f32 %v2887_v5, %v2758_v3 }
 0x257   :  { %v2510_v14 = vmul.f32 1.442695, %v2442_v6 }
 0x259   :  { %5662 = vpow2.f32 %v2510_v14 }
 0x25f   :  { %v5663_v41 = vpop.eup %5662 }
 0x260   :  { %v2826_v46 = vadd.f32 1.0, %v5663_v41 }
 0x262   :  { %5664 = vrcp.f32 %v2826_v46 }
 0x263   :  { %5666 = vlog2.f32 %v6416_v31  ;;  %v2662_v31 = vmax.f32 %v6405_v11, 0.0 }
 0x264   :  { %5375 = vmatmul.msk.bf16.gmra.mxu1 %vm451_vm0, %v1243_v24  ;;  %v6455_v24 = vsel %vm3175_vm5, %v5657_v8, %v3239_v20  ;;  %5668 = vlog2.f32 %v6441_v62 }
 0x265   :  { %5670 = vlog2.f32 %v2826_v46 }
 0x266   :  { %5672 = vlog2.f32 %v6426_v43  ;;  %v2696_v43 = vmul.f32 %v6464_v42, %v6408_v18 }
 0x268   :  { %v5665_v0 = vpop.eup %5664 }
 0x269   :  { %v3210_v3 = vmul.f32 %v5665_v0, %v5663_v41 }
 0x274   :  { %5376 = vmatmul.msk.bf16.gmra.mxu1 %vm451_vm0, %v1244_v52 }
 0x284   :  { %v1558_v48 = vpop.trf.xlu2 }
 0x285   :  { %v2054_v51 = vmul.f32 0.0010405828, %v1558_v48 }
 0x287   :  { %v2118_v55 = vsub.f32 %v2054_v51, %v6026_v54 }
 0x289   :  { %v2182_v61 = vand.u32 2147483647, %v2118_v55 }
 0x28b   :  { %v2246_v2 = vmul.f32 5.0, %v2182_v61 }
 0x28c   :  { %v1559_v59 = vpop.trf.xlu2 }
 0x28d   :  { %v2310_v9 = vadd.f32 1.0, %v2246_v2  ;;  %v2055_v10 = vmul.f32 0.0010405828, %v1559_v59  ;;  %v6481_v59 = vsel %vm3146_vm7, %v5665_v0, %v3210_v3 }
 0x28f   :  { %v2119_v21 = vsub.f32 %v2055_v10, %v6027_v13  ;;  %v6453_v23 = vmul.f32 %v6418_v33, %v2310_v9  ;;  %v6457_v25 = vmul.f32 %v4711_v7, %v2310_v9  ;;  %v3334_v4 = vsel %vm451_vm0, %v2310_v9, 0.0 }
 0x290   :  { %v4712_v33 = vadd.f32 %v6027_v13, %v6429_v45  ;;  %v3739_v38 = vmul.f32 %v3014_v22, %v2310_v9  ;;  %v4743_v7 = vadd.f32 %v6029_v60, %v6435_v50  ;;  %v6491_v13 = vld [vmem:[#allocation4 + $0x108] sm:$0xff] }
 0x291   :  { %9621 = vst [vmem:[#allocation12_spill] sm:$0xff] %v6453_v23  ;;  %v2183_v27 = vand.u32 2147483647, %v2119_v21  ;;  %v4744_v22 = vadd.f32 %v6491_v13, %v6455_v24 }
 0x292   :  { %9622 = vst [vmem:[#allocation13_spill] sm:$0xff] %v6457_v25  ;;  %v3803_v51 = vsel %vm451_vm0, %v3739_v38, 0.0 }
 0x293   :  { %v2247_v32 = vmul.f32 5.0, %v2183_v27 }
 0x294   :  { %3335 = vadd.xlane.f32.xlu0 %v3334_v4  ;;  %v1560_v35 = vpop.trf.xlu2  ;;  %v5667_v4 = vpop.eup %5666 }
 0x295   :  { %v2311_v37 = vadd.f32 1.0, %v2247_v32  ;;  %v2056_v40 = vmul.f32 0.0010405828, %v1560_v35  ;;  %v5669_v32 = vpop.eup %5668 }
 0x296   :  { %v2955_v34 = vmul.f32 0.6931472, %v5669_v32 }
 0x297   :  { %v2120_v44 = vsub.f32 %v2056_v40, %v6464_v42  ;;  %v6468_v47 = vmul.f32 %v6429_v45, %v2311_v37  ;;  %v6470_v48 = vmul.f32 %v4712_v33, %v2311_v37  ;;  %v3740_v52 = vmul.f32 %v3015_v39, %v2311_v37 }
 0x298   :  { %v4713_v45 = vadd.f32 %v6464_v42, %v3272_v17  ;;  %v3337_v35 = vsel %vm451_vm0, %v2311_v37, 0.0  ;;  %v6032_v37 = vld [vmem:[#allocation4 + $0x20] sm:$0xff] }
 0x299   :  { %9623 = vst [vmem:[#allocation14_spill] sm:$0xff] %v6468_v47  ;;  %v2184_v53 = vand.u32 2147483647, %v2120_v44  ;;  %v3806_v57 = vsel %vm451_vm0, %v3740_v52, 0.0  ;;  %v2951_v44 = vmul.f32 0.6931472, %v5667_v4 }
 0x29a   :  { %9624 = vst [vmem:[#allocation15_spill] sm:$0xff] %v6470_v48 }
 0x29b   :  { %v2248_v55 = vmul.f32 5.0, %v2184_v53 }
 0x29c   :  { %v1814_v54 = vpop.trf.xlu1  ;;  %3804 = vadd.xlane.f32.xlu0 %v3803_v51  ;;  %v2792_v51 = vsub.f32 %v2664_v28, %v2728_v30 }
 0x29d   :  { %v2086_v56 = vmul.f32 0.0010405828, %v1814_v54  ;;  %v6474_v58 = vadd.f32 1.0, %v2248_v55  ;;  %v6520_v54 = vld [vmem:[#allocation2 + $0x118] sm:$0xff] }
 0x29e   :  { %v3048_v0 = vadd.f32 %v2955_v34, %v2792_v51  ;;  %v88_v51 = vld [vmem:[#allocation2 + $0x28] sm:$0xff] }
 0x29f   :  { %v2150_v61 = vsub.f32 %v2086_v56, %v6029_v60  ;;  %v6478_v2 = vmul.f32 %v3272_v17, %v6474_v58  ;;  %v6485_v8 = vmul.f32 %v4713_v45, %v6474_v58  ;;  %v3340_v12 = vsel %vm451_vm0, %v6474_v58, 0.0  ;;  %v1561_v45 = vpop.trf.xlu2 }
 0x2a0   :  { %v2634_v56 = vmax.f32 %v6443_v63, 0.0  ;;  %v2057_v42 = vmul.f32 0.0010405828, %v1561_v45 }
 0x2a1   :  { %v2214_v1 = vand.u32 2147483647, %v2150_v61  ;;  %3807 = vadd.xlane.f32.xlu2 %v3806_v57  ;;  %9625 = vst [vmem:[#allocation16_spill] sm:$0xff] %v6485_v8  ;;  %v2698_v57 = vmul.f32 %v6032_v37, %v6443_v63  ;;  %v6704_v8 = vld [vmem:[#allocation2 + $0x140] sm:$0xff] }
 0x2a2   :  { %vm3182_vm1 = vcmp.ge.f32.partialorder %v6704_v8, 0.0 }
 0x2a3   :  { %v2278_v5 = vmul.f32 5.0, %v2214_v1  ;;  %v2632_v1 = vmax.f32 %v6408_v18, 0.0 }
 0x2a4   :  { %v1815_v6 = vpop.trf.xlu1 }
 0x2a5   :  { %v6487_v9 = vadd.f32 1.0, %v2278_v5  ;;  %v2087_v10 = vmul.f32 0.0010405828, %v1815_v6 }
 0x2a7   :  { %v2151_v15 = vsub.f32 %v2087_v10, %v6491_v13  ;;  %v6497_v16 = vmul.f32 %v6435_v50, %v6487_v9  ;;  %v6500_v14 = vmul.f32 %v4743_v7, %v6487_v9  ;;  %v2726_v50 = vmul.f32 %v6029_v60, %v6405_v11  ;;  %v5671_v60 = vpop.eup %5670 }
 0x2a8   :  { %v3430_v3 = vsel %vm451_vm0, %v6487_v9, 0.0  ;;  %v2409_v7 = vand.u32 2147483647, %v6520_v54  ;;  %v5673_v10 = vpop.eup %5672 }
 0x2a9   :  { %9626 = vst [vmem:[#allocation17_spill] sm:$0xff] %v6497_v16  ;;  %v2215_v17 = vand.u32 2147483647, %v2151_v15  ;;  %3341 = vadd.xlane.f32.xlu2 %v3340_v12  ;;  %v2790_v41 = vsub.f32 %v2662_v31, %v2726_v50  ;;  %v4715_v15 = vadd.f32 %v6032_v37, %v6481_v59  ;;  %v2891_v50 = vmul.f32 0.6931472, %v5673_v10 }
 0x2aa   :  { %9627 = vst [vmem:[#allocation18_spill] sm:$0xff] %v6500_v14  ;;  %v2473_v4 = vsub.f32 0.0, %v2409_v7  ;;  %v2665_v7 = vmax.f32 %v6520_v54, 0.0 }
 0x2ab   :  { %v2279_v20 = vmul.f32 5.0, %v2215_v17  ;;  %v3046_v61 = vadd.f32 %v2951_v44, %v2790_v41 }
 0x2ac   :  { %v1816_v21 = vpop.trf.xlu1 }
 0x2ad   :  { %v6505_v26 = vadd.f32 1.0, %v2279_v20  ;;  %v2088_v27 = vmul.f32 0.0010405828, %v1816_v21  ;;  %v2762_v20 = vsub.f32 %v2634_v56, %v2698_v57  ;;  %v2895_v21 = vmul.f32 0.6931472, %v5671_v60 }
 0x2af   :  { %v2152_v62 = vsub.f32 %v2088_v27, %v6031_v29  ;;  %v6514_v33 = vmul.f32 %v6455_v24, %v6505_v26  ;;  %v1590_v38 = vpop.trf.xlu0  ;;  %v6517_v39 = vmul.f32 %v4744_v22, %v6505_v26  ;;  %v4745_v24 = vadd.f32 %v6031_v29, %v6461_v36 }
 0x2b0   :  { %3338 = vadd.xlane.f32.xlu1 %v3337_v35  ;;  %v2058_v40 = vmul.f32 0.0010405828, %v1590_v38  ;;  %v2760_v22 = vsub.f32 %v2632_v1, %v2696_v43  ;;  %v3771_v27 = vmul.f32 %v3046_v61, %v6487_v9  ;;  %v3018_v32 = vadd.f32 %v2895_v21, %v2762_v20 }
 0x2b1   :  { %9628 = vst [vmem:[#allocation19_spill] sm:$0xff] %v6514_v33  ;;  %v2216_v11 = vand.u32 2147483647, %v2152_v62  ;;  %v1482_v62 = vpop.f32.mrf.mxu3  ;;  %v2572_v9 = vmul.f32 1.442695, %v2473_v4 }
 0x2b2   :  { %9629 = vst [vmem:[#allocation20_spill] sm:$0xff] %v6517_v39  ;;  %v2122_v53 = vsub.f32 %v2058_v40, %v6032_v37  ;;  %v3899_v35 = vsel %vm451_vm0, %v3771_v27, 0.0 }
 0x2b3   :  { %v2280_v52 = vmul.f32 5.0, %v2216_v11  ;;  %v3016_v11 = vadd.f32 %v2891_v50, %v2760_v22  ;;  %5674 = vpow2.f32 %v2572_v9 }
 0x2b4   :  { %v2186_v46 = vand.u32 2147483647, %v2122_v53  ;;  %v1817_v63 = vpop.trf.xlu1  ;;  %v2379_v53 = vand.u32 2147483647, %v88_v51 }
 0x2b5   :  { %v2344_v55 = vadd.f32 1.0, %v2280_v52  ;;  %v3741_v44 = vmul.f32 %v3016_v11, %v6474_v58  ;;  %v2089_v57 = vmul.f32 0.0010405828, %v1817_v63 }
 0x2b6   :  { %v2250_v6 = vmul.f32 5.0, %v2186_v46  ;;  %v2443_v58 = vsub.f32 0.0, %v2379_v53  ;;  %v1412_v53 = vpop.f32.mrf.mxu1 }
 0x2b7   :  { %v3436_v5 = vsel %vm451_vm0, %v2344_v55, 0.0  ;;  %v6533_v12 = vmul.f32 %v6461_v36, %v2344_v55  ;;  %v6536_v17 = vmul.f32 %v4745_v24, %v2344_v55  ;;  %v3773_v31 = vmul.f32 %v3048_v0, %v2344_v55  ;;  %v6544_v36 = vld [vmem:[#allocation4 + $0x18] sm:$0xff] }
 0x2b8   :  { %3431 = vadd.xlane.f32.xlu1 %v3430_v3  ;;  %3437 = vadd.xlane.f32.xlu2 %v3436_v5  ;;  %v2314_v18 = vadd.f32 1.0, %v2250_v6  ;;  %v2121_v30 = vsub.f32 %v2057_v42, %v6544_v36  ;;  %v3809_v37 = vsel %vm451_vm0, %v3741_v44, 0.0  ;;  %v6034_v0 = vld [vmem:[#allocation4 + $0x118] sm:$0xff]  ;;  %v2512_v1 = vmul.f32 1.442695, %v2443_v58 }
 0x2b9   :  { %9630 = vst [vmem:[#allocation21_spill] sm:$0xff] %v6533_v12  ;;  %v3905_v38 = vsel %vm451_vm0, %v3773_v31, 0.0  ;;  %v6556_v55 = vpop.eup %5674  ;;  %v1484_v46 = vpop.f32.mrf.mxu3  ;;  %v2153_v45 = vsub.f32 %v2089_v57, %v6034_v0  ;;  %v2729_v10 = vmul.f32 %v6034_v0, %v6520_v54 }
 0x2ba   :  { %9631 = vst [vmem:[#allocation22_spill] sm:$0xff] %v6536_v17  ;;  %v6540_v28 = vmul.f32 %v6481_v59, %v2314_v18  ;;  %v6542_v29 = vmul.f32 %v4715_v15, %v2314_v18  ;;  %v2185_v59 = vand.u32 2147483647, %v2121_v30  ;;  %v3743_v41 = vmul.f32 %v3018_v32, %v2314_v18  ;;  %v1591_v15 = vpop.trf.xlu0  ;;  %v6035_v32 = vld [vmem:[#allocation4 + $0x28] sm:$0xff]  ;;  %v6706_v17 = vld [vmem:[#allocation2 + $0x40] sm:$0xff] }
 0x2bb   :  { %9634 = vst [vmem:[#allocation25_spill] sm:$0xff] %v6556_v55  ;;  %v6561_v60 = vadd.f32 1.0, %v6556_v55  ;;  %v2217_v43 = vand.u32 2147483647, %v2153_v45  ;;  %v3346_v42 = vsel %vm451_vm0, %v2314_v18, 0.0  ;;  %v2793_v27 = vsub.f32 %v2665_v7, %v2729_v10 }
 0x2bc   :  { %9632 = vst [vmem:[#allocation23_spill] sm:$0xff] %v6540_v28  ;;  %v6549_v40 = vpop.trf.xlu1  ;;  %v2249_v34 = vmul.f32 5.0, %v2185_v59  ;;  %v3815_v52 = vsel %vm451_vm0, %v3743_v41, 0.0  ;;  %v2059_v22 = vmul.f32 0.0010405828, %v1591_v15  ;;  %v2635_v59 = vmax.f32 %v88_v51, 0.0 }
 0x2bd   :  { %9633 = vst [vmem:[#allocation24_spill] sm:$0xff] %v6542_v29  ;;  %5676 = vlog2.f32 %v6561_v60  ;;  %v2281_v6 = vmul.f32 5.0, %v2217_v43  ;;  %v2699_v41 = vmul.f32 %v6035_v32, %v88_v51  ;;  %v5615_v7 = vunpack.i.l.bf16 %v6549_v40 }
 0x2be   :  { %v6558_v56 = vadd.f32 1.0, %v2249_v34  ;;  %9636 = vst [vmem:[#allocation27_spill] sm:$0xff] %v6561_v60  ;;  %5678 = vpow2.f32 %v2512_v1  ;;  %v6591_v1 = vld [vmem:[#allocation2 + $0x18] sm:$0xff]  ;;  %vm3150_vm15 = vcmp.ge.f32.partialorder %v6706_v17, 0.0 }
 0x2bf   :  { %v6573_v21 = vadd.f32 1.0, %v2281_v6  ;;  %v2377_v43 = vand.u32 2147483647, %v6591_v1  ;;  %vm3145_vm8 = vcmp.ge.f32.partialorder %v6591_v1, 0.0 }
 0x2c0   :  { %3900 = vadd.xlane.f32.xlu1 %v3899_v35  ;;  %3906 = vadd.xlane.f32.xlu2 %v3905_v38  ;;  %9635 = vst [vmem:[#allocation26_spill] sm:$0xff] %v6558_v56  ;;  %v3343_v61 = vsel %vm451_vm0, %v6558_v56, 0.0 }
 0x2c1   :  { %v1487_v5 = vpop.f32.mrf.mxu3  ;;  %9637 = vst [vmem:[#allocation28_spill] sm:$0xff] %v6573_v21  ;;  %v3439_v54 = vsel %vm451_vm0, %v6573_v21, 0.0 }
 0x2c3   :  { %v5677_v63 = vpop.eup %5676 }
 0x2c4   :  { %v6554_v24 = vpop.trf.xlu1  ;;  %v6571_v20 = vpop.eup %5678  ;;  %v2957_v31 = vmul.f32 0.6931472, %v5677_v63 }
 0x2c5   :  { %1862 = vxpose.xlu0.b32.start [1/4] (short) (narrow) %v1482_v62, 32  ;;  %v6578_v4 = vadd.f32 1.0, %v6571_v20  ;;  %v2123_v62 = vsub.f32 %v2059_v22, %v6035_v32  ;;  %v5620_v10 = vunpack.i.l.bf16 %v6554_v24 }
 0x2c6   :  { %v3049_v18 = vadd.f32 %v2957_v31, %v2793_v27  ;;  %v6597_v27 = vld [vmem:[#allocation2 + $0x120] sm:$0xff] }
 0x2c7   :  { %5680 = vlog2.f32 %v6578_v4  ;;  %v2187_v35 = vand.u32 2147483647, %v2123_v62  ;;  %v1257_v63 = vpack.c.bf16 %v5620_v10, %v5615_v7  ;;  %v2410_v31 = vand.u32 2147483647, %v6597_v27 }
 0x2c8   :  { %3810 = vadd.xlane.f32.xlu1 %v3809_v37  ;;  %3816 = vadd.xlane.f32.xlu2 %v3815_v52  ;;  %v3774_v38 = vmul.f32 %v3049_v18, %v6573_v21  ;;  %v2763_v52 = vsub.f32 %v2635_v59, %v2699_v41  ;;  %vm3178_vm9 = vcmp.ge.f32.partialorder %v6597_v27, 0.0 }
 0x2c9   :  { %v1489_v30 = vpop.f32.mrf.mxu3  ;;  %v2251_v11 = vmul.f32 5.0, %v2187_v35  ;;  %5389 = vmatmul.msk.bf16.gmra.mxu3 %vm451_vm0, %v1257_v63  ;;  %v5618_v63 = vunpack.i.h.bf16 %v6549_v40 }
 0x2ca   :  { %v3908_v9 = vsel %vm451_vm0, %v3774_v38, 0.0 }
 0x2cb   :  { %v6585_v34 = vadd.f32 1.0, %v2251_v11 }
 0x2cc   :  { %v6566_v3 = vpop.trf.xlu1 }
 0x2cd   :  { %1863 = vxpose.xlu0.b32.cont [2/4] (short) (narrow) %v1484_v46, 32  ;;  %v5681_v44 = vpop.eup %5680  ;;  %9638 = vst [vmem:[#allocation29_spill] sm:$0xff] %v6585_v34  ;;  %v3349_v46 = vsel %vm451_vm0, %v6585_v34, 0.0 }
 0x2ce   :  { %v2897_v37 = vmul.f32 0.6931472, %v5681_v44 }
 0x2d0   :  { %3344 = vadd.xlane.f32.xlu1 %v3343_v61  ;;  %v3019_v57 = vadd.f32 %v2897_v37, %v2763_v52  ;;  %v1414_v61 = vpop.f32.mrf.mxu1  ;;  %v6606_v52 = vld [vmem:[#allocation4 + $0x120] sm:$0xff] }
 0x2d1   :  { %v1492_v15 = vpop.f32.mrf.mxu3 }
 0x2d2   :  { %v3744_v58 = vmul.f32 %v3019_v57, %v6585_v34  ;;  %v6614_v57 = vld [vmem:[#allocation2 + $0x128] sm:$0xff] }
 0x2d3   :  { %vm3179_vm11 = vcmp.ge.f32.partialorder %v6614_v57, 0.0 }
 0x2d4   :  { %v6575_v50 = vpop.trf.xlu1  ;;  %v3818_v0 = vsel %vm451_vm0, %v3744_v58, 0.0 }
 0x2d5   :  { %1864 = vxpose.xlu0.b32.cont [3/4] (short) (narrow) %v1487_v5, 32  ;;  %v2441_v5 = vsub.f32 0.0, %v2377_v43  ;;  %v5630_v32 = vunpack.i.l.bf16 %v6575_v50 }
 0x2d7   :  { %v2508_v6 = vmul.f32 1.442695, %v2441_v5  ;;  %v2663_v5 = vmax.f32 %v6410_v19, 0.0 }
 0x2d8   :  { %3347 = vadd.xlane.f32.xlu1 %v3346_v42  ;;  %v1417_v51 = vpop.f32.mrf.mxu1 }
 0x2d9   :  { %5682 = vpow2.f32 %v2508_v6  ;;  %v1494_v18 = vpop.f32.mrf.mxu3 }
 0x2dd   :  { %1865 = vxpose.xlu0.b32.end [4/4] (short) (narrow) %v1489_v30, 32  ;;  %v2474_v30 = vsub.f32 0.0, %v2410_v31 }
 0x2df   :  { %v5683_v42 = vpop.eup %5682  ;;  %v2574_v35 = vmul.f32 1.442695, %v2474_v30 }
 0x2e0   :  { %3440 = vadd.xlane.f32.xlu1 %v3439_v54  ;;  %v1419_v45 = vpop.f32.mrf.mxu1  ;;  %v2825_v22 = vadd.f32 1.0, %v5683_v42  ;;  %v5625_v54 = vunpack.i.l.bf16 %v6566_v3 }
 0x2e1   :  { %v1497_v58 = vpop.f32.mrf.mxu3 }
 0x2e2   :  { %5684 = vrcp.f32 %v2825_v22  ;;  %v1258_v11 = vpack.c.bf16 %v5630_v32, %v5625_v54  ;;  %v6624_v32 = vld [vmem:[#allocation2 + $0x38] sm:$0xff] }
 0x2e3   :  { %5686 = vpow2.f32 %v2574_v35  ;;  %v2381_v35 = vand.u32 2147483647, %v6624_v32  ;;  %vm3149_vm12 = vcmp.ge.f32.partialorder %v6624_v32, 0.0 }
 0x2e4   :  { %5390 = vmatmul.msk.bf16.gmra.mxu3 %vm451_vm0, %v1258_v11  ;;  %5688 = vlog2.f32 %v6433_v49  ;;  %v2727_v49 = vmul.f32 %v6491_v13, %v6410_v19 }
 0x2e8   :  { %3909 = vadd.xlane.f32.xlu1 %v3908_v9  ;;  %v5685_v62 = vpop.eup %5684  ;;  %v1846_v9 = vpop.trf.xlu2 }
 0x2e9   :  { %v3209_v38 = vmul.f32 %v5685_v62, %v5683_v42  ;;  %v2090_v41 = vmul.f32 0.0010405828, %v1846_v9  ;;  %v5687_v44 = vpop.eup %5686  ;;  %v1592_v42 = vpop.trf.xlu0 }
 0x2ea   :  { %v5689_v10 = vpop.eup %5688  ;;  %v2060_v19 = vmul.f32 0.0010405828, %v1592_v42  ;;  %v1499_v40 = vpop.f32.mrf.mxu3  ;;  %v3433_v42 = vsel %vm451_vm0, %v6505_v26, 0.0 }
 0x2eb   :  { %v6603_v59 = vsel %vm3145_vm8, %v5685_v62, %v3209_v38  ;;  %v2154_v37 = vsub.f32 %v2090_v41, %v6606_v52  ;;  %v2791_v62 = vsub.f32 %v2663_v5, %v2727_v49  ;;  %v6627_v38 = vld [vmem:[#allocation2 + $0x130] sm:$0xff] }
 0x2ec   :  { %9639 = vst [vmem:[#allocation30_spill] sm:$0xff] %v6603_v59  ;;  %v2412_v11 = vand.u32 2147483647, %v6627_v38  ;;  %vm3180_vm13 = vcmp.ge.f32.partialorder %v6627_v38, 0.0 }
 0x2ed   :  { %v2218_v43 = vand.u32 2147483647, %v2154_v37 }
 0x2ef   :  { %v2282_v54 = vmul.f32 5.0, %v2218_v43 }
 0x2f0   :  { %3350 = vadd.xlane.f32.xlu1 %v3349_v46  ;;  %v6612_v46 = vld [vmem:[#allocation2 + $0x30] sm:$0xff]  ;;  %v1847_v31 = vpop.trf.xlu2 }
 0x2f1   :  { %1638 = vxpose.xlu2.b32.start [1/4] (short) (narrow) %v1412_v53, 32  ;;  %v6610_v53 = vadd.f32 1.0, %v5687_v44  ;;  %v6631_v41 = vadd.f32 1.0, %v2282_v54  ;;  %v6653_v54 = vld [vmem:[#allocation4 + $0x128] sm:$0xff]  ;;  %vm3148_vm10 = vcmp.ge.f32.partialorder %v6612_v46, 0.0 }
 0x2f3   :  { %5690 = vrcp.f32 %v6610_v53 }
 0x2f8   :  { %3819 = vadd.xlane.f32.xlu1 %v3818_v0  ;;  %v2411_v0 = vand.u32 2147483647, %v6614_v57 }
 0x2f9   :  { %1639 = vxpose.xlu2.b32.cont [2/4] (short) (narrow) %v1414_v61, 32  ;;  %v2380_v61 = vand.u32 2147483647, %v6612_v46  ;;  %v5691_v30 = vpop.eup %5690 }
 0x2fa   :  { %v3242_v9 = vmul.f32 %v5691_v30, %v5687_v44 }
 0x301   :  { %1640 = vxpose.xlu2.b32.cont [3/4] (short) (narrow) %v1417_v51, 32  ;;  %v2444_v51 = vsub.f32 0.0, %v2380_v61 }
 0x303   :  { %v2514_v6 = vmul.f32 1.442695, %v2444_v51  ;;  %v6633_v51 = vsel %vm3178_vm9, %v5691_v30, %v3242_v9 }
 0x304   :  { %v6643_v44 = vmul.f32 %v6633_v51, %v6631_v41 }
 0x305   :  { %5692 = vpow2.f32 %v2514_v6  ;;  %v2633_v6 = vmax.f32 %v6591_v1, 0.0 }
 0x306   :  { %9640 = vst [vmem:[#allocation31_spill] sm:$0xff] %v6643_v44 }
 0x309   :  { %1641 = vxpose.xlu2.b32.end [4/4] (short) (narrow) %v1419_v45, 32  ;;  %v2475_v45 = vsub.f32 0.0, %v2411_v0  ;;  %v2476_v0 = vsub.f32 0.0, %v2412_v11 }
 0x30b   :  { %v2576_v7 = vmul.f32 1.442695, %v2475_v45  ;;  %v5693_v37 = vpop.eup %5692  ;;  %v2578_v30 = vmul.f32 1.442695, %v2476_v0 }
 0x30c   :  { %v6639_v5 = vadd.f32 1.0, %v5693_v37 }
 0x30d   :  { %5694 = vpow2.f32 %v2576_v7  ;;  %v2697_v7 = vmul.f32 %v6544_v36, %v6591_v1  ;;  %v6657_v1 = vld [vmem:[#allocation2 + $0x138] sm:$0xff] }
 0x30e   :  { %5696 = vlog2.f32 %v2825_v22  ;;  %v6635_v22 = vld [vmem:[#allocation4 + $0x30] sm:$0xff]  ;;  %vm3181_vm14 = vcmp.ge.f32.partialorder %v6657_v1, 0.0 }
 0x30f   :  { %v2124_v45 = vsub.f32 %v2060_v19, %v6635_v22  ;;  %v2761_v19 = vsub.f32 %v2633_v6, %v2697_v7  ;;  %v5628_v6 = vunpack.i.h.bf16 %v6566_v3 }
 0x313   :  { %v5695_v49 = vpop.eup %5694 }
 0x332   :  { %1894 = vxpose.xlu1.b32.start [1/4] (short) (narrow) %v1492_v15, 32  ;;  %v5623_v15 = vunpack.i.h.bf16 %v6554_v24  ;;  %v2445_v24 = vsub.f32 0.0, %v2381_v35 }
 0x334   :  { %v1259_v13 = vpack.c.bf16 %v5623_v15, %v5618_v63  ;;  %v2516_v61 = vmul.f32 1.442695, %v2445_v24  ;;  %v1593_v63 = vpop.trf.xlu0  ;;  %v1848_v15 = vpop.trf.xlu2 }
 0x335   :  { %v2061_v35 = vmul.f32 0.0010405828, %v1593_v63  ;;  %v2092_v9 = vmul.f32 0.0010405828, %v1848_v15 }
 0x336   :  { %5391 = vmatmul.msk.bf16.gmra.mxu3 %vm451_vm0, %v1259_v13  ;;  %5698 = vpow2.f32 %v2516_v61 }
 0x337   :  { %5700 = vrcp.f32 %v6639_v5 }
 0x33a   :  { %1895 = vxpose.xlu1.b32.cont [2/4] (short) (narrow) %v1494_v18, 32  ;;  %v2953_v18 = vmul.f32 0.6931472, %v5689_v10  ;;  %v5697_v10 = vpop.eup %5696 }
 0x33b   :  { %v2893_v13 = vmul.f32 0.6931472, %v5697_v10 }
 0x33c   :  { %v3047_v43 = vadd.f32 %v2953_v18, %v2791_v62  ;;  %v2188_v18 = vand.u32 2147483647, %v2124_v45  ;;  %v6661_v24 = vpop.eup %5698  ;;  %v6663_v45 = vld [vmem:[#allocation4 + $0x38] sm:$0xff] }
 0x33d   :  { %v3017_v7 = vadd.f32 %v2893_v13, %v2761_v19  ;;  %v6669_v63 = vadd.f32 1.0, %v6661_v24  ;;  %v6679_v13 = vpop.xlane.xlu0 %3335 }
 0x33e   :  { %v3772_v36 = vmul.f32 %v3047_v43, %v6505_v26  ;;  %v2252_v0 = vmul.f32 5.0, %v2188_v18  ;;  %v2125_v26 = vsub.f32 %v2061_v35, %v6663_v45  ;;  %v6674_v18 = vld [vmem:[#allocation4 + $0x130] sm:$0xff]  ;;  %9641 = vst [vmem:[#allocation32_spill] sm:$0xff] %v6679_v13 }
 0x33f   :  { %v2156_v35 = vsub.f32 %v2092_v9, %v6674_v18 }
 0x340   :  { %v3902_v43 = vsel %vm451_vm0, %v3772_v36, 0.0  ;;  %v6677_v36 = vadd.f32 1.0, %v2252_v0  ;;  %v2189_v19 = vand.u32 2147483647, %v2125_v26 }
 0x341   :  { %v2220_v26 = vand.u32 2147483647, %v2156_v35 }
 0x342   :  { %1896 = vxpose.xlu1.b32.cont [3/4] (short) (narrow) %v1497_v58, 32  ;;  %v2091_v58 = vmul.f32 0.0010405828, %v1847_v31  ;;  %v6651_v31 = vadd.f32 1.0, %v5695_v49 }
 0x343   :  { %v2284_v39 = vmul.f32 5.0, %v2220_v26 }
 0x344   :  { %v2155_v62 = vsub.f32 %v2091_v58, %v6653_v54  ;;  %5702 = vrcp.f32 %v6651_v31  ;;  %v5701_v58 = vpop.eup %5700 }
 0x345   :  { %5704 = vpow2.f32 %v2578_v30  ;;  %v3212_v15 = vmul.f32 %v5701_v58, %v5693_v37  ;;  %v6718_v25 = vpop.xlane.xlu0 %3804  ;;  %v6721_v13 = vadd.f32 1.0, %v2284_v39 }
 0x346   :  { %v2219_v11 = vand.u32 2147483647, %v2155_v62  ;;  %5706 = vlog2.f32 %v6610_v53  ;;  %9644 = vst [vmem:[#allocation35_spill] sm:$0xff] %v6718_v25 }
 0x348   :  { %v2283_v62 = vmul.f32 5.0, %v2219_v11 }
 0x34a   :  { %1897 = vxpose.xlu1.b32.end [4/4] (short) (narrow) %v1499_v40, 32  ;;  %v2413_v40 = vand.u32 2147483647, %v6657_v1  ;;  %v5703_v30 = vpop.eup %5702 }
 0x34b   :  { %v5705_v3 = vpop.eup %5704  ;;  %v3243_v0 = vmul.f32 %v5703_v30, %v5695_v49 }
 0x34c   :  { %v2477_v61 = vsub.f32 0.0, %v2413_v40  ;;  %v3276_v40 = vsel %vm3148_vm10, %v5701_v58, %v3212_v15  ;;  %v6683_v37 = vadd.f32 1.0, %v5705_v3  ;;  %v2666_v58 = vmax.f32 %v6597_v27, 0.0 }
 0x34d   :  { %v6686_v9 = vmul.f32 %v3276_v40, %v6677_v36  ;;  %v4717_v39 = vadd.f32 %v6635_v22, %v3276_v40 }
 0x34e   :  { %3434 = vadd.xlane.f32.xlu0 %v3433_v42  ;;  %v2580_v10 = vmul.f32 1.442695, %v2477_v61  ;;  %v5633_v42 = vunpack.i.h.bf16 %v6575_v50  ;;  %v1849_v50 = vpop.trf.xlu2  ;;  %v3742_v61 = vmul.f32 %v3017_v7, %v6558_v56  ;;  %v2730_v7 = vmul.f32 %v6606_v52, %v6597_v27 }
 0x34f   :  { %v2093_v53 = vmul.f32 0.0010405828, %v1849_v50  ;;  %9642 = vst [vmem:[#allocation33_spill] sm:$0xff] %v6686_v9  ;;  %v2253_v50 = vmul.f32 5.0, %v2189_v19  ;;  %v2414_v19 = vand.u32 2147483647, %v6704_v8 }
 0x350   :  { %5708 = vpow2.f32 %v2580_v10  ;;  %v1260_v11 = vpack.c.bf16 %v5633_v42, %v5628_v6  ;;  %v5707_v10 = vpop.eup %5706  ;;  %v6696_v6 = vsel %vm3179_vm11, %v5703_v30, %v3243_v0  ;;  %v6698_v42 = vld [vmem:[#allocation4 + $0x138] sm:$0xff]  ;;  %v2382_v30 = vand.u32 2147483647, %v6706_v17 }
 0x351   :  { %5710 = vrcp.f32 %v6669_v63  ;;  %v2157_v49 = vsub.f32 %v2093_v53, %v6698_v42  ;;  %v2794_v53 = vsub.f32 %v2666_v58, %v2730_v7  ;;  %v6715_v14 = vadd.f32 1.0, %v2253_v50 }
 0x352   :  { %5392 = vmatmul.msk.bf16.gmra.mxu3 %vm451_vm0, %v1260_v11  ;;  %5712 = vrcp.f32 %v6683_v37  ;;  %v1622_v11 = vpop.trf.xlu1  ;;  %v2478_v29 = vsub.f32 0.0, %v2414_v19  ;;  %v2446_v48 = vsub.f32 0.0, %v2382_v30 }
 0x353   :  { %v2062_v26 = vmul.f32 0.0010405828, %v1622_v11 }
 0x354   :  { %v2518_v58 = vmul.f32 1.442695, %v2446_v48 }
 0x356   :  { %3903 = vadd.xlane.f32.xlu0 %v3902_v43  ;;  %v6689_v43 = vadd.f32 1.0, %v2283_v62  ;;  %v5709_v15 = vpop.eup %5708  ;;  %v3812_v62 = vsel %vm451_vm0, %v3742_v61, 0.0  ;;  %v2959_v61 = vmul.f32 0.6931472, %v5707_v10  ;;  %v3442_v10 = vsel %vm451_vm0, %v6631_v41, 0.0 }
 0x357   :  { %v6702_v35 = vadd.f32 1.0, %v5709_v15  ;;  %v5711_v27 = vpop.eup %5710 }
 0x358   :  { %v6712_v0 = vmul.f32 %v6696_v6, %v6689_v43  ;;  %v3213_v44 = vmul.f32 %v5711_v27, %v6661_v24  ;;  %v5713_v21 = vpop.eup %5712  ;;  %v3050_v7 = vadd.f32 %v2959_v61, %v2794_v53  ;;  %v6729_v24 = vld [vmem:[#allocation2 + $0x48] sm:$0xff] }
 0x359   :  { %5714 = vrcp.f32 %v6702_v35  ;;  %v2383_v48 = vand.u32 2147483647, %v6729_v24  ;;  %vm3151_vm2 = vcmp.ge.f32.partialorder %v6729_v24, 0.0 }
 0x35a   :  { %9643 = vst [vmem:[#allocation34_spill] sm:$0xff] %v6712_v0  ;;  %v2582_v0 = vmul.f32 1.442695, %v2478_v29  ;;  %v3277_v50 = vsel %vm3149_vm12, %v5711_v27, %v3213_v44  ;;  %v6735_v44 = vld [vmem:[#allocation4 + $0x40] sm:$0xff]  ;;  %v1623_v53 = vpop.trf.xlu1 }
 0x35b   :  { %v6727_v11 = vmul.f32 %v3277_v50, %v6715_v14  ;;  %v2126_v27 = vsub.f32 %v2062_v26, %v6735_v44  ;;  %v2447_v40 = vsub.f32 0.0, %v2383_v48  ;;  %v4718_v48 = vadd.f32 %v6663_v45, %v3277_v50 }
 0x35c   :  { %5716 = vpow2.f32 %v2582_v0  ;;  %v3775_v0 = vmul.f32 %v3050_v7, %v6631_v41 }
 0x35d   :  { %9645 = vst [vmem:[#allocation36_spill] sm:$0xff] %v6727_v11  ;;  %5718 = vpow2.f32 %v2518_v58 }
 0x35e   :  { %3813 = vadd.xlane.f32.xlu0 %v3812_v62  ;;  %v2221_v62 = vand.u32 2147483647, %v2157_v49  ;;  %v3244_v49 = vmul.f32 %v5713_v21, %v5705_v3  ;;  %5720 = vlog2.f32 %v6639_v5  ;;  %v3911_v25 = vsel %vm451_vm0, %v3775_v0, 0.0  ;;  %v6765_v0 = vld [vmem:[#allocation2 + $0x50] sm:$0xff] }
 0x35f   :  { %v5715_v19 = vpop.eup %5714  ;;  %5722 = vlog2.f32 %v6651_v31  ;;  %v2636_v31 = vmax.f32 %v6612_v46, 0.0  ;;  %vm3152_vm3 = vcmp.ge.f32.partialorder %v6765_v0, 0.0 }
 0x360   :  { %v2285_v30 = vmul.f32 5.0, %v2221_v62  ;;  %v6733_v29 = vsel %vm3180_vm13, %v5713_v21, %v3244_v49  ;;  %v3245_v61 = vmul.f32 %v5715_v19, %v5709_v15  ;;  %v2063_v62 = vmul.f32 0.0010405828, %v1623_v53 }
 0x361   :  { %v6741_v3 = vmul.f32 %v6733_v29, %v6721_v13  ;;  %v2520_v49 = vmul.f32 1.442695, %v2447_v40  ;;  %v2190_v53 = vand.u32 2147483647, %v2126_v27  ;;  %v6769_v40 = vld [vmem:[#allocation4 + $0x48] sm:$0xff] }
 0x362   :  { %v6745_v21 = vadd.f32 1.0, %v2285_v30  ;;  %v5717_v26 = vpop.eup %5716  ;;  %v6755_v30 = vld [vmem:[#allocation4 + $0x140] sm:$0xff] }
 0x363   :  { %9646 = vst [vmem:[#allocation37_spill] sm:$0xff] %v6741_v3  ;;  %v3309_v3 = vsel %vm3181_vm14, %v5715_v19, %v3245_v61  ;;  %v6752_v5 = vadd.f32 1.0, %v5717_v26  ;;  %v5719_v15 = vpop.eup %5718  ;;  %5724 = vpow2.f32 %v2520_v49  ;;  %v2700_v19 = vmul.f32 %v6635_v22, %v6612_v46 }
 0x364   :  { %v6767_v50 = vadd.f32 1.0, %v5719_v15  ;;  %v5721_v27 = vpop.eup %5720  ;;  %v2127_v61 = vsub.f32 %v2063_v62, %v6769_v40  ;;  %v2667_v49 = vmax.f32 %v6614_v57, 0.0  ;;  %v2731_v46 = vmul.f32 %v6653_v54, %v6614_v57 }
 0x365   :  { %5726 = vrcp.f32 %v6752_v5  ;;  %v6777_v22 = vmul.f32 %v4718_v48, %v6715_v14  ;;  %v2254_v33 = vmul.f32 5.0, %v2190_v53  ;;  %v3352_v48 = vsel %vm451_vm0, %v6677_v36, 0.0  ;;  %v1624_v53 = vpop.trf.xlu1 }
 0x366   :  { %3443 = vadd.xlane.f32.xlu0 %v3442_v10  ;;  %v6748_v10 = vmul.f32 %v4717_v39, %v6677_v36  ;;  %v6759_v39 = vmul.f32 %v3309_v3, %v6745_v21  ;;  %5728 = vrcp.f32 %v6767_v50  ;;  %v2191_v11 = vand.u32 2147483647, %v2127_v61 }
 0x367   :  { %9649 = vst [vmem:[#allocation40_spill] sm:$0xff] %v6777_v22  ;;  %v2795_v22 = vsub.f32 %v2667_v49, %v2731_v46 }
 0x368   :  { %9647 = vst [vmem:[#allocation38_spill] sm:$0xff] %v6748_v10  ;;  %v4748_v10 = vadd.f32 %v6653_v54, %v6696_v6  ;;  %v4750_v6 = vadd.f32 %v6698_v42, %v3309_v3  ;;  %v2255_v3 = vmul.f32 5.0, %v2191_v11 }
 0x369   :  { %v1878_v58 = vpop.trf.xlu0  ;;  %9648 = vst [vmem:[#allocation39_spill] sm:$0xff] %v6759_v39  ;;  %v5723_v39 = vpop.eup %5722 }
 0x36a   :  { %v2094_v7 = vmul.f32 0.0010405828, %v1878_v58  ;;  %v6783_v55 = vmul.f32 %v4748_v10, %v6689_v43  ;;  %v5725_v60 = vpop.eup %5724  ;;  %v2961_v54 = vmul.f32 0.6931472, %v5723_v39  ;;  %v4747_v10 = vadd.f32 %v6606_v52, %v6633_v51 }
 0x36b   :  { %v5727_v9 = vpop.eup %5726  ;;  %v3445_v39 = vsel %vm451_vm0, %v6689_v43, 0.0  ;;  %v6804_v49 = vmul.f32 %v4750_v6, %v6745_v21 }
 0x36c   :  { %v2158_v12 = vsub.f32 %v2094_v7, %v6755_v30  ;;  %v2384_v7 = vand.u32 2147483647, %v6765_v0  ;;  %9650 = vst [vmem:[#allocation41_spill] sm:$0xff] %v6783_v55  ;;  %v3051_v51 = vadd.f32 %v2961_v54, %v2795_v22  ;;  %v6807_v46 = vmul.f32 %v4747_v10, %v6631_v41 }
 0x36d   :  { %9651 = vst [vmem:[#allocation42_spill] sm:$0xff] %v6804_v49  ;;  %v2669_v41 = vmax.f32 %v6657_v1, 0.0  ;;  %v6826_v54 = vadd.f32 1.0, %v2255_v3 }
 0x36e   :  { %3912 = vadd.xlane.f32.xlu0 %v3911_v25  ;;  %v2222_v58 = vand.u32 2147483647, %v2158_v12  ;;  %v2448_v16 = vsub.f32 0.0, %v2384_v7  ;;  %v2764_v25 = vsub.f32 %v2636_v31, %v2700_v19  ;;  %v2899_v12 = vmul.f32 0.6931472, %v5721_v27  ;;  %9652 = vst [vmem:[#allocation43_spill] sm:$0xff] %v6807_v46 }
 0x36f   :  { %v6788_v7 = vadd.f32 1.0, %v5725_v60  ;;  %v3246_v31 = vmul.f32 %v5727_v9, %v5717_v26  ;;  %v6792_v19 = vadd.f32 1.0, %v2254_v33  ;;  %v2064_v27 = vmul.f32 0.0010405828, %v1624_v53 }
 0x370   :  { %v2286_v62 = vmul.f32 5.0, %v2222_v58  ;;  %v2522_v57 = vmul.f32 1.442695, %v2448_v16  ;;  %v3020_v16 = vadd.f32 %v2899_v12, %v2764_v25  ;;  %v5729_v58 = vpop.eup %5728  ;;  %v6809_v25 = vld [vmem:[#allocation4 + $0x50] sm:$0xff]  ;;  %v3776_v6 = vmul.f32 %v3051_v51, %v6689_v43 }
 0x371   :  { %v3214_v33 = vmul.f32 %v5729_v58, %v5719_v15  ;;  %v3310_v52 = vsel %vm3182_vm1, %v5727_v9, %v3246_v31  ;;  %v2637_v43 = vmax.f32 %v6624_v32, 0.0 }
 0x372   :  { %5730 = vpow2.f32 %v2522_v57  ;;  %v6794_v61 = vadd.f32 1.0, %v2286_v62  ;;  %v4751_v26 = vadd.f32 %v6755_v30, %v3310_v52  ;;  %v3745_v11 = vmul.f32 %v3020_v16, %v6677_v36 }
 0x373   :  { %5732 = vlog2.f32 %v6702_v35  ;;  %v2128_v35 = vsub.f32 %v2064_v27, %v6809_v25  ;;  %v3278_v12 = vsel %vm3150_vm15, %v5729_v58, %v3214_v33  ;;  %v2733_v57 = vmul.f32 %v6698_v42, %v6657_v1 }
 0x374   :  { %5734 = vrcp.f32 %v6788_v7  ;;  %v6814_v15 = vmul.f32 %v3310_v52, %v6794_v61  ;;  %v6817_v22 = vmul.f32 %v3278_v12, %v6792_v19  ;;  %v6820_v62 = vmul.f32 %v4751_v26, %v6794_v61 }
 0x375   :  { %5736 = vlog2.f32 %v6669_v63  ;;  %v2192_v31 = vand.u32 2147483647, %v2128_v35  ;;  %v3821_v10 = vsel %vm451_vm0, %v3745_v11, 0.0  ;;  %v2797_v16 = vsub.f32 %v2669_v41, %v2733_v57 }
 0x376   :  { %3353 = vadd.xlane.f32.xlu0 %v3352_v48  ;;  %9653 = vst [vmem:[#allocation44_spill] sm:$0xff] %v6814_v15  ;;  %v4719_v1 = vadd.f32 %v6735_v44, %v3278_v12  ;;  %v4749_v63 = vadd.f32 %v6674_v18, %v6733_v29  ;;  %v3914_v42 = vsel %vm451_vm0, %v3776_v6, 0.0  ;;  %v3451_v11 = vsel %vm451_vm0, %v6745_v21, 0.0 }
 0x377   :  { %9654 = vst [vmem:[#allocation45_spill] sm:$0xff] %v6817_v22  ;;  %v2256_v52 = vmul.f32 5.0, %v2192_v31 }
 0x378   :  { %v5731_v9 = vpop.eup %5730  ;;  %9655 = vst [vmem:[#allocation46_spill] sm:$0xff] %v6820_v62  ;;  %v6843_v26 = vmul.f32 %v4719_v1, %v6792_v19  ;;  %v6846_v29 = vmul.f32 %v4749_v63, %v6721_v13  ;;  %v2670_v63 = vmax.f32 %v6704_v8, 0.0 }
 0x379   :  { %v2832_v48 = vadd.f32 1.0, %v5731_v9  ;;  %v5733_v36 = vpop.eup %5732 }
 0x37a   :  { %3446 = vadd.xlane.f32.xlu2 %v3445_v39  ;;  %v5735_v53 = vpop.eup %5734  ;;  %v2965_v58 = vmul.f32 0.6931472, %v5733_v36  ;;  %v2701_v39 = vmul.f32 %v6663_v45, %v6624_v32  ;;  %9657 = vst [vmem:[#allocation48_spill] sm:$0xff] %v6843_v26  ;;  %v2320_v36 = vadd.f32 1.0, %v2256_v52  ;;  %v7000_v26 = vld [vmem:[#allocation2 + $0x60] sm:$0xff] }
 0x37b   :  { %5738 = vrcp.f32 %v2832_v48  ;;  %v3215_v27 = vmul.f32 %v5735_v53, %v5725_v60  ;;  %v5737_v33 = vpop.eup %5736  ;;  %9658 = vst [vmem:[#allocation49_spill] sm:$0xff] %v6846_v29  ;;  %vm3154_vm6 = vcmp.ge.f32.partialorder %v7000_v26, 0.0 }
 0x37c   :  { %v3053_v32 = vadd.f32 %v2965_v58, %v2797_v16  ;;  %v2765_v45 = vsub.f32 %v2637_v43, %v2701_v39  ;;  %v2901_v12 = vmul.f32 0.6931472, %v5737_v33  ;;  %5740 = vlog2.f32 %v6752_v5  ;;  %v6873_v5 = vld [vmem:[#allocation2 + $0x148] sm:$0xff] }
 0x37d   :  { %v3279_v3 = vsel %vm3151_vm2, %v5735_v53, %v3215_v27  ;;  %v3454_v33 = vsel %vm451_vm0, %v6794_v61, 0.0  ;;  %5742 = vlog2.f32 %v6683_v37  ;;  %v2415_v37 = vand.u32 2147483647, %v6873_v5 }
 0x37e   :  { %3822 = vadd.xlane.f32.xlu0 %v3821_v10  ;;  %v6839_v60 = vmul.f32 %v3279_v3, %v6826_v54  ;;  %v4720_v51 = vadd.f32 %v6769_v40, %v3279_v3  ;;  %v3778_v53 = vmul.f32 %v3053_v32, %v6745_v21  ;;  %v3355_v10 = vsel %vm451_vm0, %v6715_v14, 0.0 }
 0x37f   :  { %v3021_v27 = vadd.f32 %v2901_v12, %v2765_v45  ;;  %5744 = vlog2.f32 %v2832_v48  ;;  %v2704_v32 = vmul.f32 %v6809_v25, %v6765_v0 }
 0x380   :  { %9656 = vst [vmem:[#allocation47_spill] sm:$0xff] %v6839_v60  ;;  %v6851_v57 = vmul.f32 %v4720_v51, %v6826_v54  ;;  %v3920_v58 = vsel %vm451_vm0, %v3778_v53, 0.0  ;;  %v2668_v51 = vmax.f32 %v6627_v38, 0.0  ;;  %v3364_v53 = vsel %vm451_vm0, %v2320_v36, 0.0 }
 0x381   :  { %v5739_v35 = vpop.eup %5738  ;;  %v3746_v1 = vmul.f32 %v3021_v27, %v6715_v14  ;;  %5746 = vlog2.f32 %v6767_v50  ;;  %v6888_v27 = vld [vmem:[#allocation2 + $0x58] sm:$0xff] }
 0x382   :  { %3915 = vadd.xlane.f32.xlu2 %v3914_v42  ;;  %v3216_v41 = vmul.f32 %v5739_v35, %v5731_v9  ;;  %9659 = vst [vmem:[#allocation50_spill] sm:$0xff] %v6851_v57  ;;  %v2734_v42 = vmul.f32 %v6755_v30, %v6704_v8  ;;  %v5741_v43 = vpop.eup %5740  ;;  %v2732_v8 = vmul.f32 %v6674_v18, %v6627_v38  ;;  %v3448_v18 = vsel %vm451_vm0, %v6721_v13, 0.0 }
 0x383   :  { %v3824_v21 = vsel %vm451_vm0, %v3746_v1, 0.0  ;;  %v2967_v3 = vmul.f32 0.6931472, %v5741_v43  ;;  %v5743_v30 = vpop.eup %5742  ;;  %v1422_v1 = vpop.f32.mrf.mxu1  ;;  %v2385_v43 = vand.u32 2147483647, %v6888_v27 }
 0x384   :  { %v3280_v6 = vsel %vm3152_vm3, %v5739_v35, %v3216_v41  ;;  %v2798_v39 = vsub.f32 %v2670_v63, %v2734_v42  ;;  %v2963_v45 = vmul.f32 0.6931472, %v5743_v30  ;;  %v2638_v63 = vmax.f32 %v6706_v17, 0.0 }
 0x385   :  { %v4721_v31 = vadd.f32 %v6809_v25, %v3280_v6  ;;  %v6858_v16 = vmul.f32 %v3280_v6, %v2320_v36  ;;  %v5745_v48 = vpop.eup %5744  ;;  %v2479_v6 = vsub.f32 0.0, %v2415_v37  ;;  %v2702_v42 = vmul.f32 %v6735_v44, %v6706_v17 }
 0x386   :  { %3452 = vadd.xlane.f32.xlu0 %v3451_v11  ;;  %v3054_v52 = vadd.f32 %v2967_v3, %v2798_v39  ;;  %v2640_v11 = vmax.f32 %v6765_v0, 0.0  ;;  %v2907_v41 = vmul.f32 0.6931472, %v5745_v48  ;;  %v3358_v17 = vsel %vm451_vm0, %v6792_v19, 0.0 }
 0x387   :  { %9660 = vst [vmem:[#allocation51_spill] sm:$0xff] %v6858_v16  ;;  %v6860_v9 = vmul.f32 %v4721_v31, %v2320_v36  ;;  %v5747_v39 = vpop.eup %5746  ;;  %v2766_v3 = vsub.f32 %v2638_v63, %v2702_v42  ;;  %v2671_v48 = vmax.f32 %v6873_v5, 0.0 }
 0x388   :  { %v3779_v14 = vmul.f32 %v3054_v52, %v6794_v61  ;;  %v2796_v61 = vsub.f32 %v2668_v51, %v2732_v8  ;;  %v2768_v12 = vsub.f32 %v2640_v11, %v2704_v32  ;;  %v2449_v52 = vsub.f32 0.0, %v2385_v43  ;;  %v6046_v51 = vld [vmem:[#allocation4 + $0x148] sm:$0xff] }
 0x389   :  { %9661 = vst [vmem:[#allocation52_spill] sm:$0xff] %v6860_v9  ;;  %v7010_v9 = vld [vmem:[#allocation4 + $0x60] sm:$0xff] }
 0x38a   :  { %3356 = vadd.xlane.f32.xlu2 %v3355_v10  ;;  %v3923_v35 = vsel %vm451_vm0, %v3779_v14, 0.0  ;;  %v3052_v38 = vadd.f32 %v2963_v45, %v2796_v61  ;;  %v3024_v31 = vadd.f32 %v2907_v41, %v2768_v12  ;;  %v2584_v10 = vmul.f32 1.442695, %v2479_v6  ;;  %v1625_v41 = vpop.trf.xlu1 }
 0x38b   :  { %v2524_v30 = vmul.f32 1.442695, %v2449_v52  ;;  %v2735_v61 = vmul.f32 %v6046_v51, %v6873_v5 }
 0x38c   :  { %v3777_v0 = vmul.f32 %v3052_v38, %v6721_v13  ;;  %v3749_v25 = vmul.f32 %v3024_v31, %v2320_v36  ;;  %5748 = vpow2.f32 %v2584_v10  ;;  %v1879_v13 = vpop.trf.xlu0 }
 0x38d   :  { %v2095_v36 = vmul.f32 0.0010405828, %v1879_v13 }
 0x38e   :  { %3921 = vadd.xlane.f32.xlu0 %v3920_v58  ;;  %v3917_v58 = vsel %vm451_vm0, %v3777_v0, 0.0  ;;  %v6047_v0 = vld [vmem:[#allocation4 + $0x58] sm:$0xff] }
 0x38f   :  { %v2159_v8 = vsub.f32 %v2095_v36, %v6046_v51  ;;  %v2705_v13 = vmul.f32 %v6047_v0, %v6888_v27  ;;  %v1502_v51 = vpop.f32.mrf.mxu3 }
 0x391   :  { %v2223_v11 = vand.u32 2147483647, %v2159_v8 }
 0x392   :  { %3825 = vadd.xlane.f32.xlu2 %v3824_v21  ;;  %v3833_v21 = vsel %vm451_vm0, %v3749_v25, 0.0  ;;  %v6896_v50 = vpop.eup %5748 }
 0x393   :  { %9662 = vst [vmem:[#allocation53_spill] sm:$0xff] %v6896_v50  ;;  %v6899_v14 = vadd.f32 1.0, %v6896_v50  ;;  %v2287_v37 = vmul.f32 5.0, %v2223_v11 }
 0x395   :  { %9663 = vst [vmem:[#allocation54_spill] sm:$0xff] %v6899_v14  ;;  %5750 = vlog2.f32 %v6899_v14  ;;  %v6910_v38 = vadd.f32 1.0, %v2287_v37 }
 0x396   :  { %5752 = vpow2.f32 %v2524_v30 }
 0x397   :  { %9665 = vst [vmem:[#allocation56_spill] sm:$0xff] %v6910_v38  ;;  %v3457_v5 = vsel %vm451_vm0, %v6910_v38, 0.0 }
 0x39a   :  { %3455 = vadd.xlane.f32.xlu2 %v3454_v33  ;;  %v2903_v33 = vmul.f32 0.6931472, %v5747_v39  ;;  %v2641_v39 = vmax.f32 %v6888_v27, 0.0 }
 0x39b   :  { %v5751_v45 = vpop.eup %5750 }
 0x39c   :  { %v3022_v44 = vadd.f32 %v2903_v33, %v2766_v3  ;;  %v6908_v6 = vpop.eup %5752  ;;  %v2969_v31 = vmul.f32 0.6931472, %v5751_v45  ;;  %v2769_v33 = vsub.f32 %v2641_v39, %v2705_v13  ;;  %v1880_v45 = vpop.trf.xlu0 }
 0x39d   :  { %9664 = vst [vmem:[#allocation55_spill] sm:$0xff] %v6908_v6  ;;  %v6913_v10 = vadd.f32 1.0, %v6908_v6 }
 0x39e   :  { %v3747_v32 = vmul.f32 %v3022_v44, %v6792_v19  ;;  %v6926_v44 = vpop.xlane.xlu1 %3338 }
 0x39f   :  { %9666 = vst [vmem:[#allocation57_spill] sm:$0xff] %v6913_v10  ;;  %5754 = vlog2.f32 %v6913_v10 }
 0x3a0   :  { %v3827_v12 = vsel %vm451_vm0, %v3747_v32, 0.0  ;;  %9668 = vst [vmem:[#allocation59_spill] sm:$0xff] %v6926_v44 }
 0x3a2   :  { %3924 = vadd.xlane.f32.xlu2 %v3923_v35  ;;  %v1424_v35 = vpop.f32.mrf.mxu1 }
 0x3a5   :  { %v5755_v36 = vpop.eup %5754 }
 0x3a6   :  { %v2909_v52 = vmul.f32 0.6931472, %v5755_v36  ;;  %v6930_v11 = vpop.xlane.xlu1 %3431 }
 0x3a7   :  { %9669 = vst [vmem:[#allocation60_spill] sm:$0xff] %v6930_v11 }
 0x3aa   :  { %3449 = vadd.xlane.f32.xlu1 %v3448_v18  ;;  %3365 = vadd.xlane.f32.xlu2 %v3364_v53  ;;  %v2065_v53 = vmul.f32 0.0010405828, %v1625_v41  ;;  %v2799_v18 = vsub.f32 %v2671_v48, %v2735_v61  ;;  %v1427_v19 = vpop.f32.mrf.mxu1 }
 0x3ac   :  { %v2129_v25 = vsub.f32 %v2065_v53, %v6047_v0 }
 0x3ae   :  { %v6932_v37 = vpop.xlane.xlu1 %3900 }
 0x3af   :  { %9670 = vst [vmem:[#allocation61_spill] sm:$0xff] %v6932_v37 }
 0x3b2   :  { %3918 = vadd.xlane.f32.xlu1 %v3917_v58  ;;  %3834 = vadd.xlane.f32.xlu2 %v3833_v21  ;;  %v3055_v58 = vadd.f32 %v2969_v31, %v2799_v18  ;;  %v1429_v63 = vpop.f32.mrf.mxu1  ;;  %v1881_v18 = vpop.trf.xlu0 }
 0x3b4   :  { %v3780_v21 = vmul.f32 %v3055_v58, %v6910_v38 }
 0x3b6   :  { %v3926_v43 = vsel %vm451_vm0, %v3780_v21, 0.0  ;;  %v6934_v61 = vpop.xlane.xlu1 %3810 }
 0x3b7   :  { %1670 = vxpose.xlu0.b32.start [1/4] (short) (narrow) %v1422_v1, 32  ;;  %v2193_v1 = vand.u32 2147483647, %v2129_v25  ;;  %9671 = vst [vmem:[#allocation62_spill] sm:$0xff] %v6934_v61  ;;  %v2096_v25 = vmul.f32 0.0010405828, %v1880_v45 }
 0x3b9   :  { %v2257_v42 = vmul.f32 5.0, %v2193_v1 }
 0x3ba   :  { %3359 = vadd.xlane.f32.xlu1 %v3358_v17  ;;  %v3025_v17 = vadd.f32 %v2909_v52, %v2769_v33 }
 0x3bb   :  { %v6922_v3 = vadd.f32 1.0, %v2257_v42 }
 0x3bd   :  { %9667 = vst [vmem:[#allocation58_spill] sm:$0xff] %v6922_v3  ;;  %v3367_v8 = vsel %vm451_vm0, %v6922_v3, 0.0  ;;  %v3750_v30 = vmul.f32 %v3025_v17, %v6922_v3 }
 0x3be   :  { %v6938_v41 = vpop.xlane.xlu1 %3344 }
 0x3bf   :  { %1671 = vxpose.xlu0.b32.cont [2/4] (short) (narrow) %v1424_v35, 32  ;;  %v1504_v35 = vpop.f32.mrf.mxu3  ;;  %v3836_v27 = vsel %vm451_vm0, %v3750_v30, 0.0  ;;  %9672 = vst [vmem:[#allocation63_spill] sm:$0xff] %v6938_v41  ;;  %v6958_v30 = vld [vmem:[#allocation4 + $0x158] sm:$0xff] }
 0x3c2   :  { %3828 = vadd.xlane.f32.xlu1 %v3827_v12  ;;  %v6936_v12 = vld [vmem:[#allocation2 + $0x150] sm:$0xff] }
 0x3c3   :  { %v2416_v53 = vand.u32 2147483647, %v6936_v12  ;;  %vm3184_vm4 = vcmp.ge.f32.partialorder %v6936_v12, 0.0 }
 0x3c5   :  { %v2480_v31 = vsub.f32 0.0, %v2416_v53 }
 0x3c6   :  { %v6946_v1 = vpop.xlane.xlu1 %3347 }
 0x3c7   :  { %1672 = vxpose.xlu0.b32.cont [3/4] (short) (narrow) %v1427_v19, 32  ;;  %v1507_v32 = vpop.f32.mrf.mxu3  ;;  %v6941_v19 = vpop.xlane.xlu2 %3807  ;;  %v2586_v0 = vmul.f32 1.442695, %v2480_v31  ;;  %9674 = vst [vmem:[#allocation65_spill] sm:$0xff] %v6946_v1  ;;  %v7029_v1 = vld [vmem:[#allocation2 + $0x168] sm:$0xff] }
 0x3c8   :  { %9673 = vst [vmem:[#allocation64_spill] sm:$0xff] %v6941_v19  ;;  %vm3187_vm9 = vcmp.ge.f32.partialorder %v7029_v1, 0.0 }
 0x3c9   :  { %5756 = vpow2.f32 %v2586_v0 }
 0x3ca   :  { %3458 = vadd.xlane.f32.xlu1 %v3457_v5  ;;  %v6943_v5 = vld [vmem:[#allocation2 + $0x158] sm:$0xff] }
 0x3cb   :  { %v2417_v58 = vand.u32 2147483647, %v6943_v5  ;;  %vm3185_vm5 = vcmp.ge.f32.partialorder %v6943_v5, 0.0 }
 0x3cd   :  { %v2481_v21 = vsub.f32 0.0, %v2417_v58 }
 0x3cf   :  { %1673 = vxpose.xlu0.b32.end [4/4] (short) (narrow) %v1429_v63, 32  ;;  %v1509_v48 = vpop.f32.mrf.mxu3  ;;  %v6948_v63 = vld [vmem:[#allocation4 + $0x150] sm:$0xff]  ;;  %v5757_v39 = vpop.eup %5756  ;;  %v2588_v36 = vmul.f32 1.442695, %v2481_v21 }
 0x3d0   :  { %v2160_v42 = vsub.f32 %v2096_v25, %v6948_v63  ;;  %v6953_v13 = vpop.xlane.xlu2 %3341  ;;  %v6955_v33 = vadd.f32 1.0, %v5757_v39 }
 0x3d1   :  { %9676 = vst [vmem:[#allocation67_spill] sm:$0xff] %v6953_v13  ;;  %5758 = vpow2.f32 %v2588_v36 }
 0x3d2   :  { %3927 = vadd.xlane.f32.xlu1 %v3926_v43  ;;  %v6951_v43 = vpop.xlane.xlu0 %3434  ;;  %v2224_v52 = vand.u32 2147483647, %v2160_v42  ;;  %5760 = vrcp.f32 %v6955_v33 }
 0x3d3   :  { %9675 = vst [vmem:[#allocation66_spill] sm:$0xff] %v6951_v43 }
 0x3d4   :  { %v2288_v17 = vmul.f32 5.0, %v2224_v52 }
 0x3d8   :  { %v6967_v31 = vpop.xlane.xlu2 %3437 }
 0x3d9   :  { %9679 = vst [vmem:[#allocation70_spill] sm:$0xff] %v6967_v31 }
 0x3da   :  { %3368 = vadd.xlane.f32.xlu1 %v3367_v8  ;;  %v1432_v8 = vpop.f32.mrf.mxu1  ;;  %v6963_v45 = vpop.xlane.xlu0 %3903 }
 0x3db   :  { %1926 = vxpose.xlu2.b32.start [1/4] (short) (narrow) %v1502_v51, 32  ;;  %v2097_v51 = vmul.f32 0.0010405828, %v1881_v18  ;;  %9678 = vst [vmem:[#allocation69_spill] sm:$0xff] %v6963_v45  ;;  %v6969_v18 = vadd.f32 1.0, %v2288_v17 }
 0x3e2   :  { %3837 = vadd.xlane.f32.xlu1 %v3836_v27  ;;  %v5759_v27 = vpop.eup %5758  ;;  %v6984_v46 = vpop.xlane.xlu0 %3813 }
 0x3e3   :  { %1927 = vxpose.xlu2.b32.cont [2/4] (short) (narrow) %v1504_v35, 32  ;;  %v2161_v35 = vsub.f32 %v2097_v51, %v6958_v30  ;;  %v6965_v53 = vadd.f32 1.0, %v5759_v27  ;;  %9683 = vst [vmem:[#allocation74_spill] sm:$0xff] %v6984_v46 }
 0x3e5   :  { %v2225_v25 = vand.u32 2147483647, %v2161_v35  ;;  %5762 = vrcp.f32 %v6965_v53 }
 0x3e7   :  { %v2289_v42 = vmul.f32 5.0, %v2225_v25 }
 0x3e9   :  { %v6982_v29 = vadd.f32 1.0, %v2289_v42 }
 0x3ea   :  { %v6998_v42 = vpop.xlane.xlu0 %3443 }
 0x3eb   :  { %1928 = vxpose.xlu2.b32.cont [3/4] (short) (narrow) %v1507_v32, 32  ;;  %v6961_v32 = vpop.xlane.xlu1 %3440  ;;  %9688 = vst [vmem:[#allocation79_spill] sm:$0xff] %v6998_v42 }
 0x3ec   :  { %9677 = vst [vmem:[#allocation68_spill] sm:$0xff] %v6961_v32 }
 0x3f2   :  { %v7008_v62 = vpop.xlane.xlu0 %3912 }
 0x3f3   :  { %1929 = vxpose.xlu2.b32.end [4/4] (short) (narrow) %v1509_v48, 32  ;;  %v5761_v48 = vpop.eup %5760  ;;  %v6980_v17 = vpop.xlane.xlu1 %3909  ;;  %9691 = vst [vmem:[#allocation82_spill] sm:$0xff] %v7008_v62 }
 0x3f4   :  { %v3248_v0 = vmul.f32 %v5761_v48, %v5757_v39  ;;  %v5763_v51 = vpop.eup %5762  ;;  %v1434_v39 = vpop.f32.mrf.mxu1  ;;  %9682 = vst [vmem:[#allocation73_spill] sm:$0xff] %v6980_v17 }
 0x3f5   :  { %v3249_v35 = vmul.f32 %v5763_v51, %v5759_v27 }
 0x3f6   :  { %v3312_v58 = vsel %vm3184_vm4, %v5761_v48, %v3248_v0  ;;  %v6987_v48 = vpop.xlane.xlu2 %3906 }
 0x3f7   :  { %v4753_v21 = vadd.f32 %v6948_v63, %v3312_v58  ;;  %v6975_v36 = vmul.f32 %v3312_v58, %v6969_v18  ;;  %9684 = vst [vmem:[#allocation75_spill] sm:$0xff] %v6987_v48 }
 0x3f9   :  { %9680 = vst [vmem:[#allocation71_spill] sm:$0xff] %v6975_v36  ;;  %v6978_v52 = vmul.f32 %v4753_v21, %v6969_v18 }
 0x3fa   :  { %v7025_v46 = vpop.xlane.xlu0 %3353 }
 0x3fb   :  { %9681 = vst [vmem:[#allocation72_spill] sm:$0xff] %v6978_v52  ;;  %v6996_v27 = vpop.xlane.xlu1 %3350 }
 0x3fc   :  { %v1437_v21 = vpop.f32.mrf.mxu1  ;;  %9687 = vst [vmem:[#allocation78_spill] sm:$0xff] %v6996_v27 }
 0x3fd   :  { %9692 = vst [vmem:[#allocation83_spill] sm:$0xff] %v7025_v46 }
 0x3fe   :  { %v7002_v52 = vpop.xlane.xlu2 %3816 }
 0x3ff   :  { %9689 = vst [vmem:[#allocation80_spill] sm:$0xff] %v7002_v52 }
 0x403   :  { %v7005_v49 = vpop.xlane.xlu1 %3819 }
 0x404   :  { %9690 = vst [vmem:[#allocation81_spill] sm:$0xff] %v7005_v49  ;;  %v3361_v49 = vsel %vm451_vm0, %v6826_v54, 0.0 }
 0x40b   :  { %v1910_v15 = vpop.trf.xlu1 }
 0x41c   :  { %1702 = vxpose.xlu1.b32.start [1/4] (short) (narrow) %v1432_v8, 32  ;;  %v3313_v8 = vsel %vm3185_vm5, %v5763_v51, %v3249_v35  ;;  %v2386_v51 = vand.u32 2147483647, %v7000_v26 }
 0x41d   :  { %v4754_v0 = vadd.f32 %v6958_v30, %v3313_v8  ;;  %v6991_v25 = vmul.f32 %v3313_v8, %v6982_v29  ;;  %v1439_v8 = vpop.f32.mrf.mxu1 }
 0x41e   :  { %v2450_v35 = vsub.f32 0.0, %v2386_v51  ;;  %v2703_v51 = vmul.f32 %v6769_v40, %v6729_v24 }
 0x41f   :  { %9685 = vst [vmem:[#allocation76_spill] sm:$0xff] %v6991_v25  ;;  %v6994_v58 = vmul.f32 %v4754_v0, %v6982_v29  ;;  %v1654_v0 = vpop.trf.xlu2  ;;  %v7020_v25 = vld [vmem:[#allocation2 + $0x160] sm:$0xff] }
 0x420   :  { %vm3186_vm8 = vcmp.ge.f32.partialorder %v7020_v25, 0.0 }
 0x421   :  { %9686 = vst [vmem:[#allocation77_spill] sm:$0xff] %v6994_v58  ;;  %v2066_v58 = vmul.f32 0.0010405828, %v1654_v0 }
 0x423   :  { %v2130_v57 = vsub.f32 %v2066_v58, %v7010_v9 }
 0x424   :  { %1703 = vxpose.xlu1.b32.cont [2/4] (short) (narrow) %v1434_v39, 32  ;;  %v2526_v39 = vmul.f32 1.442695, %v2450_v35 }
 0x425   :  { %v2194_v50 = vand.u32 2147483647, %v2130_v57  ;;  %v2419_v57 = vand.u32 2147483647, %v7029_v1 }
 0x426   :  { %5764 = vpow2.f32 %v2526_v39  ;;  %v7018_v39 = vld [vmem:[#allocation2 + $0x68] sm:$0xff] }
 0x427   :  { %5766 = vlog2.f32 %v6788_v7  ;;  %v2387_v0 = vand.u32 2147483647, %v7018_v39  ;;  %v2258_v32 = vmul.f32 5.0, %v2194_v50  ;;  %v2483_v50 = vsub.f32 0.0, %v2419_v57 }
 0x428   :  { %v2672_v57 = vmax.f32 %v6936_v12, 0.0  ;;  %vm3155_vm7 = vcmp.ge.f32.partialorder %v7018_v39, 0.0 }
 0x429   :  { %v2451_v58 = vsub.f32 0.0, %v2387_v0  ;;  %v2098_v0 = vmul.f32 0.0010405828, %v1910_v15 }
 0x42b   :  { %v2528_v40 = vmul.f32 1.442695, %v2451_v58  ;;  %v2592_v58 = vmul.f32 1.442695, %v2483_v50 }
 0x42c   :  { %1704 = vxpose.xlu1.b32.cont [3/4] (short) (narrow) %v1437_v21, 32  ;;  %v5765_v55 = vpop.eup %5764  ;;  %v2639_v21 = vmax.f32 %v6729_v24, 0.0  ;;  %v1655_v24 = vpop.trf.xlu2 }
 0x42d   :  { %v7016_v35 = vadd.f32 1.0, %v5765_v55  ;;  %v5767_v7 = vpop.eup %5766  ;;  %v2067_v14 = vmul.f32 0.0010405828, %v1655_v24 }
 0x42e   :  { %v2767_v36 = vsub.f32 %v2639_v21, %v2703_v51  ;;  %v2905_v62 = vmul.f32 0.6931472, %v5767_v7  ;;  %v7032_v51 = vld [vmem:[#allocation4 + $0x68] sm:$0xff] }
 0x42f   :  { %5768 = vrcp.f32 %v7016_v35 }
 0x430   :  { %5770 = vpow2.f32 %v2528_v40  ;;  %v3023_v45 = vadd.f32 %v2905_v62, %v2767_v36  ;;  %v7041_v36 = vld [vmem:[#allocation4 + $0x160] sm:$0xff] }
 0x432   :  { %v3748_v62 = vmul.f32 %v3023_v45, %v6826_v54  ;;  %v7054_v45 = vpop.xlane.xlu0 %3822 }
 0x433   :  { %9695 = vst [vmem:[#allocation86_spill] sm:$0xff] %v7054_v45 }
 0x434   :  { %1705 = vxpose.xlu1.b32.end [4/4] (short) (narrow) %v1439_v8, 32  ;;  %v2418_v8 = vand.u32 2147483647, %v7020_v25 }
 0x435   :  { %v5769_v17 = vpop.eup %5768 }
 0x436   :  { %v2482_v38 = vsub.f32 0.0, %v2418_v8  ;;  %v3218_v21 = vmul.f32 %v5769_v17, %v5765_v55  ;;  %v7037_v8 = vadd.f32 1.0, %v2258_v32  ;;  %v2162_v55 = vsub.f32 %v2098_v0, %v7041_v36 }
 0x437   :  { %v3830_v0 = vsel %vm451_vm0, %v3748_v62, 0.0 }
 0x438   :  { %v2590_v42 = vmul.f32 1.442695, %v2482_v38  ;;  %v2131_v38 = vsub.f32 %v2067_v14, %v7032_v51  ;;  %v3282_v7 = vsel %vm3154_vm6, %v5769_v17, %v3218_v21  ;;  %v2736_v21 = vmul.f32 %v6948_v63, %v6936_v12 }
 0x439   :  { %v4723_v15 = vadd.f32 %v7010_v9, %v3282_v7 }
 0x43a   :  { %5772 = vpow2.f32 %v2590_v42  ;;  %v1911_v42 = vpop.trf.xlu1  ;;  %v2195_v24 = vand.u32 2147483647, %v2131_v38  ;;  %v7061_v38 = vld [vmem:[#allocation2 + $0x170] sm:$0xff]  ;;  %v2800_v45 = vsub.f32 %v2672_v57, %v2736_v21 }
 0x43b   :  { %5774 = vlog2.f32 %v6955_v33  ;;  %v7047_v33 = vmul.f32 %v3282_v7, %v7037_v8  ;;  %v2099_v32 = vmul.f32 0.0010405828, %v1911_v42  ;;  %v7052_v54 = vmul.f32 %v4723_v15, %v7037_v8 }
 0x43c   :  { %5776 = vpow2.f32 %v2592_v58  ;;  %v2226_v7 = vand.u32 2147483647, %v2162_v55  ;;  %v2420_v42 = vand.u32 2147483647, %v7061_v38  ;;  %v2259_v15 = vmul.f32 5.0, %v2195_v24  ;;  %v7064_v58 = vld [vmem:[#allocation4 + $0x168] sm:$0xff] }
 0x43d   :  { %9693 = vst [vmem:[#allocation84_spill] sm:$0xff] %v7047_v33  ;;  %vm3188_vm10 = vcmp.ge.f32.partialorder %v7061_v38, 0.0 }
 0x43e   :  { %9694 = vst [vmem:[#allocation85_spill] sm:$0xff] %v7052_v54  ;;  %v2163_v54 = vsub.f32 %v2099_v32, %v7064_v58  ;;  %v2484_v62 = vsub.f32 0.0, %v2420_v42  ;;  %v2290_v63 = vmul.f32 5.0, %v2226_v7  ;;  %v7068_v48 = vadd.f32 1.0, %v2259_v15 }
 0x43f   :  { %v3460_v32 = vsel %vm451_vm0, %v6969_v18, 0.0 }
 0x440   :  { %3362 = vadd.xlane.f32.xlu0 %v3361_v49  ;;  %v5771_v49 = vpop.eup %5770  ;;  %v2594_v52 = vmul.f32 1.442695, %v2484_v62  ;;  %v2227_v55 = vand.u32 2147483647, %v2163_v54  ;;  %v7075_v21 = vadd.f32 1.0, %v2290_v63 }
 0x441   :  { %v5773_v14 = vpop.eup %5772  ;;  %v7044_v40 = vadd.f32 1.0, %v5771_v49 }
 0x442   :  { %v7049_v17 = vadd.f32 1.0, %v5773_v14  ;;  %v5775_v50 = vpop.eup %5774  ;;  %v2291_v7 = vmul.f32 5.0, %v2227_v55  ;;  %v2642_v55 = vmax.f32 %v7000_v26, 0.0 }
 0x443   :  { %5778 = vrcp.f32 %v7044_v40  ;;  %v2971_v46 = vmul.f32 0.6931472, %v5775_v50  ;;  %v5777_v12 = vpop.eup %5776 }
 0x444   :  { %5780 = vrcp.f32 %v7049_v17  ;;  %v7070_v37 = vadd.f32 1.0, %v5777_v12 }
 0x445   :  { %5782 = vpow2.f32 %v2594_v52  ;;  %v3056_v42 = vadd.f32 %v2971_v46, %v2800_v45  ;;  %v7079_v52 = vpop.xlane.xlu0 %3452  ;;  %v7083_v46 = vld [vmem:[#allocation4 + $0x170] sm:$0xff] }
 0x446   :  { %5784 = vlog2.f32 %v7016_v35  ;;  %9696 = vst [vmem:[#allocation87_spill] sm:$0xff] %v7079_v52 }
 0x447   :  { %5786 = vrcp.f32 %v7070_v37  ;;  %v3781_v15 = vmul.f32 %v3056_v42, %v6969_v18 }
 0x448   :  { %3831 = vadd.xlane.f32.xlu0 %v3830_v0  ;;  %v1912_v0 = vpop.trf.xlu1  ;;  %5788 = vlog2.f32 %v6965_v53 }
 0x449   :  { %v5779_v27 = vpop.eup %5778  ;;  %v2100_v41 = vmul.f32 0.0010405828, %v1912_v0  ;;  %v3929_v53 = vsel %vm451_vm0, %v3781_v15, 0.0 }
 0x44a   :  { %v3219_v24 = vmul.f32 %v5779_v27, %v5771_v49  ;;  %v5781_v57 = vpop.eup %5780 }
 0x44b   :  { %v3250_v49 = vmul.f32 %v5781_v57, %v5773_v14  ;;  %v2164_v45 = vsub.f32 %v2100_v41, %v7083_v46  ;;  %v5783_v35 = vpop.eup %5782  ;;  %v2706_v41 = vmul.f32 %v7010_v9, %v7000_v26 }
 0x44c   :  { %v3283_v50 = vsel %vm3155_vm7, %v5779_v27, %v3219_v24  ;;  %v7100_v0 = vadd.f32 1.0, %v5783_v35  ;;  %v5785_v18 = vpop.eup %5784  ;;  %v7102_v24 = vadd.f32 1.0, %v2291_v7  ;;  %v2673_v7 = vmax.f32 %v6943_v5, 0.0 }
 0x44d   :  { %v4724_v54 = vadd.f32 %v7032_v51, %v3283_v50  ;;  %v7088_v62 = vmul.f32 %v3283_v50, %v7068_v48  ;;  %v3314_v27 = vsel %vm3186_vm8, %v5781_v57, %v3250_v49  ;;  %v2228_v42 = vand.u32 2147483647, %v2164_v45  ;;  %v7106_v57 = vld [vmem:[#allocation2 + $0x80] sm:$0xff] }
 0x44e   :  { %v7092_v63 = vmul.f32 %v3314_v27, %v7075_v21  ;;  %5790 = vrcp.f32 %v7100_v0  ;;  %v2390_v50 = vand.u32 2147483647, %v7106_v57  ;;  %v2770_v26 = vsub.f32 %v2642_v55, %v2706_v41 }
 0x44f   :  { %9697 = vst [vmem:[#allocation88_spill] sm:$0xff] %v7088_v62  ;;  %v7095_v14 = vmul.f32 %v4724_v54, %v7068_v48  ;;  %v2911_v9 = vmul.f32 0.6931472, %v5785_v18  ;;  %v2737_v45 = vmul.f32 %v6958_v30, %v6943_v5  ;;  %v2292_v52 = vmul.f32 5.0, %v2228_v42 }
 0x450   :  { %3461 = vadd.xlane.f32.xlu0 %v3460_v32  ;;  %9698 = vst [vmem:[#allocation89_spill] sm:$0xff] %v7092_v63  ;;  %v5787_v32 = vpop.eup %5786  ;;  %v7113_v63 = vpop.xlane.xlu0 %3921  ;;  %v3370_v55 = vsel %vm451_vm0, %v7037_v8, 0.0  ;;  %vm3158_vm11 = vcmp.ge.f32.partialorder %v7106_v57, 0.0 }
 0x451   :  { %9699 = vst [vmem:[#allocation90_spill] sm:$0xff] %v7095_v14  ;;  %v3251_v49 = vmul.f32 %v5787_v32, %v5777_v12  ;;  %v5789_v54 = vpop.eup %5788  ;;  %v2454_v14 = vsub.f32 0.0, %v2390_v50  ;;  %v3026_v41 = vadd.f32 %v2911_v9, %v2770_v26  ;;  %v2801_v43 = vsub.f32 %v2673_v7, %v2737_v45  ;;  %v6055_v45 = vld [vmem:[#allocation4 + $0x80] sm:$0xff] }
 0x452   :  { %9700 = vst [vmem:[#allocation91_spill] sm:$0xff] %v7113_v63  ;;  %v2973_v18 = vmul.f32 0.6931472, %v5789_v54  ;;  %v3463_v50 = vsel %vm451_vm0, %v6982_v29, 0.0 }
 0x453   :  { %v3315_v15 = vsel %vm3187_vm9, %v5787_v32, %v3251_v49  ;;  %v2356_v32 = vadd.f32 1.0, %v2292_v52 }
 0x454   :  { %v7116_v61 = vmul.f32 %v3315_v15, %v7102_v24  ;;  %v4756_v31 = vadd.f32 %v7064_v58, %v3315_v15  ;;  %v5791_v12 = vpop.eup %5790  ;;  %v3057_v49 = vadd.f32 %v2973_v18, %v2801_v43 }
 0x455   :  { %v3252_v5 = vmul.f32 %v5791_v12, %v5783_v35 }
 0x456   :  { %9701 = vst [vmem:[#allocation92_spill] sm:$0xff] %v7116_v61  ;;  %v7122_v30 = vmul.f32 %v4756_v31, %v7102_v24  ;;  %v3782_v7 = vmul.f32 %v3057_v49, %v6982_v29  ;;  %v3373_v49 = vsel %vm451_vm0, %v7068_v48, 0.0  ;;  %v7281_v61 = vld [vmem:[#allocation2 + $0x180] sm:$0xff] }
 0x457   :  { %v3316_v42 = vsel %vm3188_vm10, %v5791_v12, %v3252_v5  ;;  %vm3190_vm15 = vcmp.ge.f32.partialorder %v7281_v61, 0.0 }
 0x458   :  { %3930 = vadd.xlane.f32.xlu0 %v3929_v53  ;;  %v2534_v53 = vmul.f32 1.442695, %v2454_v14  ;;  %9702 = vst [vmem:[#allocation93_spill] sm:$0xff] %v7122_v30  ;;  %v3751_v14 = vmul.f32 %v3026_v41, %v7037_v8  ;;  %v7128_v9 = vmul.f32 %v3316_v42, %v2356_v32  ;;  %v4755_v8 = vadd.f32 %v7041_v36, %v3314_v27 }
 0x459   :  { %v3932_v12 = vsel %vm451_vm0, %v3782_v7, 0.0  ;;  %v7154_v7 = vld [vmem:[#allocation2 + $0x70] sm:$0xff] }
 0x45a   :  { %5792 = vpow2.f32 %v2534_v53  ;;  %9703 = vst [vmem:[#allocation94_spill] sm:$0xff] %v7128_v9  ;;  %v3839_v31 = vsel %vm451_vm0, %v3751_v14, 0.0  ;;  %v7135_v53 = vmul.f32 %v4755_v8, %v7075_v21 }
 0x45b   :  { %v1686_v26 = vpop.trf.xlu0  ;;  %5794 = vlog2.f32 %v7044_v40  ;;  %v2707_v40 = vmul.f32 %v7032_v51, %v7018_v39 }
 0x45c   :  { %v2070_v35 = vmul.f32 0.0010405828, %v1686_v26  ;;  %9704 = vst [vmem:[#allocation95_spill] sm:$0xff] %v7135_v53 }
 0x45e   :  { %v2134_v15 = vsub.f32 %v2070_v35, %v6055_v45 }
 0x460   :  { %3371 = vadd.xlane.f32.xlu0 %v3370_v55  ;;  %v5793_v54 = vpop.eup %5792  ;;  %v2198_v43 = vand.u32 2147483647, %v2134_v15  ;;  %v2643_v55 = vmax.f32 %v7018_v39, 0.0  ;;  %v4757_v15 = vadd.f32 %v7083_v46, %v3316_v42 }
 0x461   :  { %v2838_v52 = vadd.f32 1.0, %v5793_v54  ;;  %v5795_v41 = vpop.eup %5794 }
 0x462   :  { %v2262_v29 = vmul.f32 5.0, %v2198_v43  ;;  %v2771_v5 = vsub.f32 %v2643_v55, %v2707_v40  ;;  %v2913_v14 = vmul.f32 0.6931472, %v5795_v41  ;;  %v7157_v8 = vmul.f32 %v4757_v15, %v2356_v32 }
 0x463   :  { %5796 = vrcp.f32 %v2838_v52  ;;  %v2740_v55 = vmul.f32 %v7083_v46, %v7061_v38  ;;  %v2388_v40 = vand.u32 2147483647, %v7154_v7  ;;  %v2738_v46 = vmul.f32 %v7041_v36, %v7020_v25 }
 0x464   :  { %3464 = vadd.xlane.f32.xlu2 %v3463_v50  ;;  %v7141_v27 = vadd.f32 1.0, %v2262_v29  ;;  %5798 = vlog2.f32 %v7100_v0  ;;  %9707 = vst [vmem:[#allocation98_spill] sm:$0xff] %v7157_v8  ;;  %v7266_v8 = vld [vmem:[#allocation2 + $0x98] sm:$0xff] }
 0x465   :  { %5800 = vlog2.f32 %v7049_v17  ;;  %v2393_v30 = vand.u32 2147483647, %v7266_v8  ;;  %vm3161_vm14 = vcmp.ge.f32.partialorder %v7266_v8, 0.0 }
 0x466   :  { %5802 = vlog2.f32 %v2838_v52 }
 0x468   :  { %3840 = vadd.xlane.f32.xlu0 %v3839_v31  ;;  %v3027_v31 = vadd.f32 %v2913_v14, %v2771_v5 }
 0x469   :  { %v5797_v18 = vpop.eup %5796 }
 0x46a   :  { %v3222_v50 = vmul.f32 %v5797_v18, %v5793_v54  ;;  %v3752_v54 = vmul.f32 %v3027_v31, %v7068_v48  ;;  %v5799_v41 = vpop.eup %5798  ;;  %v2452_v48 = vsub.f32 0.0, %v2388_v40  ;;  %v2646_v31 = vmax.f32 %v7106_v57, 0.0 }
 0x46b   :  { %v2979_v29 = vmul.f32 0.6931472, %v5799_v41 }
 0x46c   :  { %3933 = vadd.xlane.f32.xlu2 %v3932_v12  ;;  %v3286_v26 = vsel %vm3158_vm11, %v5797_v18, %v3222_v50  ;;  %v3842_v43 = vsel %vm451_vm0, %v3752_v54, 0.0  ;;  %v2676_v12 = vmax.f32 %v7061_v38, 0.0  ;;  %v3472_v18 = vsel %vm451_vm0, %v2356_v32, 0.0  ;;  %v7166_v50 = vld [vmem:[#allocation2 + $0x178] sm:$0xff] }
 0x46d   :  { %v4727_v35 = vadd.f32 %v6055_v45, %v3286_v26  ;;  %v7147_v39 = vmul.f32 %v3286_v26, %v7141_v27  ;;  %v2530_v42 = vmul.f32 1.442695, %v2452_v48  ;;  %v2674_v38 = vmax.f32 %v7020_v25, 0.0  ;;  %v1512_v26 = vpop.f32.mrf.mxu3 }
 0x46e   :  { %v2804_v0 = vsub.f32 %v2676_v12, %v2740_v55  ;;  %v2710_v54 = vmul.f32 %v6055_v45, %v7106_v57  ;;  %v2421_v17 = vand.u32 2147483647, %v7166_v50  ;;  %v3382_v57 = vsel %vm451_vm0, %v7141_v27, 0.0 }
 0x46f   :  { %9705 = vst [vmem:[#allocation96_spill] sm:$0xff] %v7147_v39  ;;  %v7150_v51 = vmul.f32 %v4727_v35, %v7141_v27  ;;  %5804 = vpow2.f32 %v2530_v42  ;;  %v2802_v12 = vsub.f32 %v2674_v38, %v2738_v46  ;;  %v3466_v45 = vsel %vm451_vm0, %v7075_v21, 0.0 }
 0x470   :  { %v3060_v5 = vadd.f32 %v2979_v29, %v2804_v0  ;;  %v2774_v40 = vsub.f32 %v2646_v31, %v2710_v54  ;;  %v2485_v36 = vsub.f32 0.0, %v2421_v17  ;;  %v6056_v0 = vld [vmem:[#allocation4 + $0x70] sm:$0xff] }
 0x471   :  { %9706 = vst [vmem:[#allocation97_spill] sm:$0xff] %v7150_v51  ;;  %v2708_v31 = vmul.f32 %v6056_v0, %v7154_v7  ;;  %v2457_v51 = vsub.f32 0.0, %v2393_v30 }
 0x472   :  { %v3785_v14 = vmul.f32 %v3060_v5, %v2356_v32  ;;  %v1656_v32 = vpop.trf.xlu2  ;;  %v2596_v5 = vmul.f32 1.442695, %v2485_v36 }
 0x474   :  { %3374 = vadd.xlane.f32.xlu2 %v3373_v49  ;;  %v5801_v49 = vpop.eup %5800  ;;  %v3941_v35 = vsel %vm451_vm0, %v3785_v14, 0.0 }
 0x475   :  { %v5803_v52 = vpop.eup %5802  ;;  %v2975_v55 = vmul.f32 0.6931472, %v5801_v49  ;;  %v1514_v42 = vpop.f32.mrf.mxu3  ;;  %v7187_v49 = vld [vmem:[#allocation2 + $0x88] sm:$0xff] }
 0x476   :  { %v7175_v15 = vpop.eup %5804  ;;  %v2919_v25 = vmul.f32 0.6931472, %v5803_v52 }
 0x477   :  { %9708 = vst [vmem:[#allocation99_spill] sm:$0xff] %v7175_v15  ;;  %v7178_v41 = vadd.f32 1.0, %v7175_v15  ;;  %v3058_v48 = vadd.f32 %v2975_v55, %v2802_v12 }
 0x479   :  { %9709 = vst [vmem:[#allocation100_spill] sm:$0xff] %v7178_v41  ;;  %5806 = vlog2.f32 %v7178_v41  ;;  %v3783_v38 = vmul.f32 %v3058_v48, %v7075_v21 }
 0x47a   :  { %5808 = vpow2.f32 %v2596_v5 }
 0x47b   :  { %v3935_v17 = vsel %vm451_vm0, %v3783_v38, 0.0 }
 0x47c   :  { %3843 = vadd.xlane.f32.xlu2 %v3842_v43  ;;  %v2068_v43 = vmul.f32 0.0010405828, %v1656_v32  ;;  %v2391_v32 = vand.u32 2147483647, %v7187_v49 }
 0x47e   :  { %v2132_v29 = vsub.f32 %v2068_v43, %v6056_v0  ;;  %v1913_v43 = vpop.trf.xlu1  ;;  %v6057_v0 = vld [vmem:[#allocation4 + $0x178] sm:$0xff] }
 0x47f   :  { %v5807_v54 = vpop.eup %5806  ;;  %v2101_v12 = vmul.f32 0.0010405828, %v1913_v43 }
 0x480   :  { %v2196_v14 = vand.u32 2147483647, %v2132_v29  ;;  %v7194_v21 = vpop.eup %5808 }
 0x481   :  { %9710 = vst [vmem:[#allocation101_spill] sm:$0xff] %v7194_v21  ;;  %v7199_v36 = vadd.f32 1.0, %v7194_v21  ;;  %v2165_v29 = vsub.f32 %v2101_v12, %v6057_v0 }
 0x483   :  { %9712 = vst [vmem:[#allocation103_spill] sm:$0xff] %v7199_v36  ;;  %5810 = vlog2.f32 %v7199_v36 }
 0x484   :  { %3473 = vadd.xlane.f32.xlu2 %v3472_v18  ;;  %v3030_v18 = vadd.f32 %v2919_v25, %v2774_v40  ;;  %v2915_v40 = vmul.f32 0.6931472, %v5807_v54  ;;  %v1517_v25 = vpop.f32.mrf.mxu3 }
 0x486   :  { %v3755_v46 = vmul.f32 %v3030_v18, %v7141_v27  ;;  %v2229_v18 = vand.u32 2147483647, %v2165_v29 }
 0x488   :  { %v3851_v52 = vsel %vm451_vm0, %v3755_v46, 0.0  ;;  %v2677_v46 = vmax.f32 %v7166_v50, 0.0 }
 0x48c   :  { %3942 = vadd.xlane.f32.xlu2 %v3941_v35  ;;  %v2644_v35 = vmax.f32 %v7154_v7, 0.0  ;;  %v2455_v7 = vsub.f32 0.0, %v2391_v32 }
 0x48e   :  { %v2772_v55 = vsub.f32 %v2644_v35, %v2708_v31  ;;  %v2536_v48 = vmul.f32 1.442695, %v2455_v7  ;;  %v5811_v35 = vpop.eup %5810  ;;  %v1687_v31 = vpop.trf.xlu0 }
 0x48f   :  { %v2981_v43 = vmul.f32 0.6931472, %v5811_v35  ;;  %v1657_v7 = vpop.trf.xlu2  ;;  %v1442_v35 = vpop.f32.mrf.mxu1 }
 0x490   :  { %5812 = vpow2.f32 %v2536_v48  ;;  %v2647_v48 = vmax.f32 %v7187_v49, 0.0 }
 0x491   :  { %1958 = vxpose.xlu0.b32.start [1/4] (short) (narrow) %v1512_v26, 32  ;;  %v2260_v26 = vmul.f32 5.0, %v2196_v14  ;;  %v2293_v14 = vmul.f32 5.0, %v2229_v18 }
 0x493   :  { %v7196_v27 = vadd.f32 1.0, %v2260_v26  ;;  %v2741_v26 = vmul.f32 %v6057_v0, %v7166_v50 }
 0x494   :  { %3467 = vadd.xlane.f32.xlu1 %v3466_v45  ;;  %3383 = vadd.xlane.f32.xlu2 %v3382_v57  ;;  %v3028_v45 = vadd.f32 %v2915_v40, %v2772_v55  ;;  %v6058_v55 = vld [vmem:[#allocation4 + $0x88] sm:$0xff] }
 0x495   :  { %9711 = vst [vmem:[#allocation102_spill] sm:$0xff] %v7196_v27  ;;  %v3376_v57 = vsel %vm451_vm0, %v7196_v27, 0.0  ;;  %v2805_v32 = vsub.f32 %v2677_v46, %v2741_v26  ;;  %v2711_v18 = vmul.f32 %v6058_v55, %v7187_v49  ;;  %v2069_v49 = vmul.f32 0.0010405828, %v1657_v7 }
 0x496   :  { %v3753_v5 = vmul.f32 %v3028_v45, %v7196_v27  ;;  %v7208_v54 = vpop.eup %5812 }
 0x497   :  { %9713 = vst [vmem:[#allocation104_spill] sm:$0xff] %v7208_v54  ;;  %v7213_v12 = vadd.f32 1.0, %v7208_v54  ;;  %v3061_v50 = vadd.f32 %v2981_v43, %v2805_v32 }
 0x498   :  { %v3845_v38 = vsel %vm451_vm0, %v3753_v5, 0.0 }
 0x499   :  { %1959 = vxpose.xlu0.b32.cont [2/4] (short) (narrow) %v1514_v42, 32  ;;  %v1519_v42 = vpop.f32.mrf.mxu3  ;;  %9715 = vst [vmem:[#allocation106_spill] sm:$0xff] %v7213_v12  ;;  %5814 = vlog2.f32 %v7213_v12 }
 0x49c   :  { %3936 = vadd.xlane.f32.xlu1 %v3935_v17  ;;  %3852 = vadd.xlane.f32.xlu2 %v3851_v52  ;;  %v7210_v17 = vadd.f32 1.0, %v2293_v14  ;;  %v2071_v52 = vmul.f32 0.0010405828, %v1687_v31  ;;  %v7227_v31 = vpop.xlane.xlu2 %3446 }
 0x49d   :  { %9717 = vst [vmem:[#allocation108_spill] sm:$0xff] %v7227_v31 }
 0x49e   :  { %9714 = vst [vmem:[#allocation105_spill] sm:$0xff] %v7210_v17  ;;  %v2135_v40 = vsub.f32 %v2071_v52, %v6058_v55  ;;  %v3786_v29 = vmul.f32 %v3061_v50, %v7210_v17 }
 0x49f   :  { %v5815_v5 = vpop.eup %5814 }
 0x4a0   :  { %v2199_v0 = vand.u32 2147483647, %v2135_v40  ;;  %v3944_v45 = vsel %vm451_vm0, %v3786_v29, 0.0  ;;  %v2921_v46 = vmul.f32 0.6931472, %v5815_v5 }
 0x4a1   :  { %1960 = vxpose.xlu0.b32.cont [3/4] (short) (narrow) %v1517_v25, 32  ;;  %v3475_v25 = vsel %vm451_vm0, %v7210_v17, 0.0  ;;  %v1522_v21 = vpop.f32.mrf.mxu3 }
 0x4a4   :  { %3377 = vadd.xlane.f32.xlu1 %v3376_v57  ;;  %v2263_v57 = vmul.f32 5.0, %v2199_v0  ;;  %v7232_v0 = vld [vmem:[#allocation4 + $0x78] sm:$0xff] }
 0x4a5   :  { %v2133_v29 = vsub.f32 %v2069_v49, %v7232_v0 }
 0x4a6   :  { %v7224_v14 = vadd.f32 1.0, %v2263_v57  ;;  %v7235_v57 = vpop.xlane.xlu2 %3915 }
 0x4a7   :  { %9718 = vst [vmem:[#allocation109_spill] sm:$0xff] %v7235_v57 }
 0x4a8   :  { %9716 = vst [vmem:[#allocation107_spill] sm:$0xff] %v7224_v14  ;;  %v3385_v32 = vsel %vm451_vm0, %v7224_v14, 0.0 }
 0x4a9   :  { %1961 = vxpose.xlu0.b32.end [4/4] (short) (narrow) %v1519_v42, 32  ;;  %v7222_v42 = vld [vmem:[#allocation2 + $0x78] sm:$0xff] }
 0x4aa   :  { %v2389_v26 = vand.u32 2147483647, %v7222_v42  ;;  %vm3157_vm12 = vcmp.ge.f32.partialorder %v7222_v42, 0.0 }
 0x4ac   :  { %3846 = vadd.xlane.f32.xlu1 %v3845_v38  ;;  %v2775_v38 = vsub.f32 %v2647_v48, %v2711_v18  ;;  %v2453_v52 = vsub.f32 0.0, %v2389_v26  ;;  %v2197_v18 = vand.u32 2147483647, %v2133_v29  ;;  %v1688_v29 = vpop.trf.xlu0 }
 0x4ae   :  { %v3031_v43 = vadd.f32 %v2921_v46, %v2775_v38  ;;  %v2532_v40 = vmul.f32 1.442695, %v2453_v52  ;;  %v2261_v7 = vmul.f32 5.0, %v2197_v18  ;;  %v7241_v46 = vpop.xlane.xlu2 %3356 }
 0x4af   :  { %9719 = vst [vmem:[#allocation110_spill] sm:$0xff] %v7241_v46 }
 0x4b0   :  { %5816 = vpow2.f32 %v2532_v40  ;;  %v3756_v55 = vmul.f32 %v3031_v43, %v7224_v14 }
 0x4b4   :  { %3476 = vadd.xlane.f32.xlu1 %v3475_v25  ;;  %v1444_v25 = vpop.f32.mrf.mxu1 }
 0x4b6   :  { %v5817_v50 = vpop.eup %5816 }
 0x4b7   :  { %v7238_v48 = vadd.f32 1.0, %v5817_v50 }
 0x4b9   :  { %5818 = vrcp.f32 %v7238_v48 }
 0x4bc   :  { %3945 = vadd.xlane.f32.xlu1 %v3944_v45  ;;  %v3854_v45 = vsel %vm451_vm0, %v3756_v55, 0.0  ;;  %v1447_v38 = vpop.f32.mrf.mxu1  ;;  %v7253_v55 = vpop.xlane.xlu2 %3825 }
 0x4bd   :  { %9722 = vst [vmem:[#allocation113_spill] sm:$0xff] %v7253_v55 }
 0x4bf   :  { %v5819_v5 = vpop.eup %5818 }
 0x4c0   :  { %v3221_v26 = vmul.f32 %v5819_v5, %v5817_v50  ;;  %v7257_v50 = vpop.xlane.xlu1 %3449 }
 0x4c1   :  { %9724 = vst [vmem:[#allocation115_spill] sm:$0xff] %v7257_v50 }
 0x4c2   :  { %v3285_v52 = vsel %vm3157_vm12, %v5819_v5, %v3221_v26 }
 0x4c4   :  { %3386 = vadd.xlane.f32.xlu1 %v3385_v32  ;;  %v4726_v32 = vadd.f32 %v7232_v0, %v3285_v52  ;;  %v1449_v49 = vpop.f32.mrf.mxu1 }
 0x4c5   :  { %1734 = vxpose.xlu2.b32.start [1/4] (short) (narrow) %v1442_v35, 32  ;;  %v7243_v35 = vadd.f32 1.0, %v2261_v7  ;;  %v7263_v7 = vld [vmem:[#allocation2 + $0x90] sm:$0xff] }
 0x4c6   :  { %v2392_v5 = vand.u32 2147483647, %v7263_v7  ;;  %vm3160_vm13 = vcmp.ge.f32.partialorder %v7263_v7, 0.0 }
 0x4c7   :  { %v7248_v43 = vmul.f32 %v3285_v52, %v7243_v35  ;;  %v7251_v40 = vmul.f32 %v4726_v32, %v7243_v35  ;;  %v2072_v52 = vmul.f32 0.0010405828, %v1688_v29  ;;  %v1689_v32 = vpop.trf.xlu0 }
 0x4c8   :  { %v7261_v18 = vpop.xlane.xlu1 %3918 }
 0x4c9   :  { %9720 = vst [vmem:[#allocation111_spill] sm:$0xff] %v7248_v43 }
 0x4ca   :  { %9721 = vst [vmem:[#allocation112_spill] sm:$0xff] %v7251_v40  ;;  %v7273_v40 = vld [vmem:[#allocation4 + $0x90] sm:$0xff] }
 0x4cb   :  { %9726 = vst [vmem:[#allocation117_spill] sm:$0xff] %v7261_v18  ;;  %v2136_v9 = vsub.f32 %v2072_v52, %v7273_v40  ;;  %v2422_v52 = vand.u32 2147483647, %v7281_v61 }
 0x4cc   :  { %3855 = vadd.xlane.f32.xlu1 %v3854_v45 }
 0x4cd   :  { %1735 = vxpose.xlu2.b32.cont [2/4] (short) (narrow) %v1444_v25, 32  ;;  %v7255_v25 = vpop.xlane.xlu2 %3455  ;;  %v2200_v29 = vand.u32 2147483647, %v2136_v9 }
 0x4ce   :  { %9723 = vst [vmem:[#allocation114_spill] sm:$0xff] %v7255_v25 }
 0x4cf   :  { %v7279_v36 = vpop.xlane.xlu0 %3362  ;;  %v2264_v18 = vmul.f32 5.0, %v2200_v29 }
 0x4d0   :  { %v7270_v53 = vpop.xlane.xlu1 %3359  ;;  %9729 = vst [vmem:[#allocation120_spill] sm:$0xff] %v7279_v36 }
 0x4d1   :  { %9728 = vst [vmem:[#allocation119_spill] sm:$0xff] %v7270_v53  ;;  %v7293_v36 = vadd.f32 1.0, %v2264_v18 }
 0x4d5   :  { %1736 = vxpose.xlu2.b32.cont [3/4] (short) (narrow) %v1447_v38, 32  ;;  %v7259_v45 = vpop.xlane.xlu2 %3924  ;;  %v2456_v38 = vsub.f32 0.0, %v2392_v5  ;;  %v2540_v5 = vmul.f32 1.442695, %v2457_v51 }
 0x4d6   :  { %9725 = vst [vmem:[#allocation116_spill] sm:$0xff] %v7259_v45 }
 0x4d7   :  { %v2538_v26 = vmul.f32 1.442695, %v2456_v38 }
 0x4d8   :  { %v7285_v30 = vpop.xlane.xlu1 %3828 }
 0x4d9   :  { %5820 = vpow2.f32 %v2538_v26  ;;  %v2073_v26 = vmul.f32 0.0010405828, %v1689_v32  ;;  %9731 = vst [vmem:[#allocation122_spill] sm:$0xff] %v7285_v30  ;;  %v1524_v32 = vpop.f32.mrf.mxu3 }
 0x4da   :  { %5822 = vpow2.f32 %v2540_v5  ;;  %v2486_v5 = vsub.f32 0.0, %v2422_v52  ;;  %v7299_v52 = vpop.xlane.xlu0 %3831 }
 0x4db   :  { %9732 = vst [vmem:[#allocation123_spill] sm:$0xff] %v7299_v52 }
 0x4dc   :  { %v2598_v63 = vmul.f32 1.442695, %v2486_v5 }
 0x4dd   :  { %1737 = vxpose.xlu2.b32.end [4/4] (short) (narrow) %v1449_v49, 32  ;;  %v7268_v49 = vpop.xlane.xlu2 %3365 }
 0x4de   :  { %9727 = vst [vmem:[#allocation118_spill] sm:$0xff] %v7268_v49  ;;  %v7288_v49 = vld [vmem:[#allocation4 + $0x98] sm:$0xff] }
 0x4df   :  { %v5821_v17 = vpop.eup %5820  ;;  %v2137_v9 = vsub.f32 %v2073_v26, %v7288_v49 }
 0x4e0   :  { %v7276_v38 = vadd.f32 1.0, %v5821_v17  ;;  %v5823_v51 = vpop.eup %5822 }
 0x4e1   :  { %v7291_v53 = vadd.f32 1.0, %v5823_v51 }
 0x4e2   :  { %5824 = vrcp.f32 %v7276_v38  ;;  %v7328_v13 = vpop.xlane.xlu0 %3461 }
 0x4e3   :  { %5826 = vpow2.f32 %v2598_v63  ;;  %9737 = vst [vmem:[#allocation128_spill] sm:$0xff] %v7328_v13 }
 0x4e4   :  { %5828 = vlog2.f32 %v7070_v37 }
 0x4e5   :  { %v7283_v45 = vpop.xlane.xlu2 %3834  ;;  %5830 = vrcp.f32 %v7291_v53 }
 0x4e6   :  { %9730 = vst [vmem:[#allocation121_spill] sm:$0xff] %v7283_v45  ;;  %v2201_v45 = vand.u32 2147483647, %v2137_v9  ;;  %v7307_v9 = vpop.xlane.xlu1 %3458 }
 0x4e7   :  { %9735 = vst [vmem:[#allocation126_spill] sm:$0xff] %v7307_v9 }
 0x4e8   :  { %v5825_v25 = vpop.eup %5824  ;;  %v2265_v63 = vmul.f32 5.0, %v2201_v45 }
 0x4e9   :  { %v3224_v50 = vmul.f32 %v5825_v25, %v5821_v17 }
 0x4ea   :  { %v7319_v57 = vadd.f32 1.0, %v2265_v63 }
 0x4eb   :  { %v3288_v29 = vsel %vm3160_vm13, %v5825_v25, %v3224_v50  ;;  %v5827_v25 = vpop.eup %5826  ;;  %v7309_v50 = vld [vmem:[#allocation4 + $0x180] sm:$0xff] }
 0x4ec   :  { %v7302_v17 = vmul.f32 %v3288_v29, %v7293_v36  ;;  %v5829_v37 = vpop.eup %5828  ;;  %v7315_v52 = vadd.f32 1.0, %v5827_v25 }
 0x4ed   :  { %v1942_v30 = vpop.trf.xlu2 }
 0x4ee   :  { %v2102_v26 = vmul.f32 0.0010405828, %v1942_v30  ;;  %9733 = vst [vmem:[#allocation124_spill] sm:$0xff] %v7302_v17  ;;  %v2675_v30 = vmax.f32 %v7029_v1, 0.0  ;;  %5832 = vrcp.f32 %v7315_v52  ;;  %v7330_v39 = vpop.xlane.xlu1 %3927 }
 0x4ef   :  { %9738 = vst [vmem:[#allocation129_spill] sm:$0xff] %v7330_v39 }
 0x4f0   :  { %v2166_v5 = vsub.f32 %v2102_v26, %v7309_v50 }
 0x4f2   :  { %v2230_v55 = vand.u32 2147483647, %v2166_v5 }
 0x4f4   :  { %v2294_v5 = vmul.f32 5.0, %v2230_v55 }
 0x4f5   :  { %v1943_v11 = vpop.trf.xlu2 }
 0x4f6   :  { %v2103_v19 = vmul.f32 0.0010405828, %v1943_v11 }
 0x506   :  { %1990 = vxpose.xlu1.b32.start [1/4] (short) (narrow) %v1522_v21, 32  ;;  %v4729_v21 = vadd.f32 %v7273_v40, %v3288_v29  ;;  %v7317_v29 = vld [vmem:[#allocation2 + $0x188] sm:$0xff] }
 0x507   :  { %v2423_v45 = vand.u32 2147483647, %v7317_v29  ;;  %vm3191_vm1 = vcmp.ge.f32.partialorder %v7317_v29, 0.0 }
 0x508   :  { %v7305_v18 = vmul.f32 %v4729_v21, %v7293_v36  ;;  %v5831_v21 = vpop.eup %5830 }
 0x509   :  { %v3225_v26 = vmul.f32 %v5831_v21, %v5823_v51  ;;  %v2487_v9 = vsub.f32 0.0, %v2423_v45  ;;  %v7340_v45 = vld [vmem:[#allocation4 + $0x188] sm:$0xff] }
 0x50a   :  { %9734 = vst [vmem:[#allocation125_spill] sm:$0xff] %v7305_v18  ;;  %v1527_v18 = vpop.f32.mrf.mxu3  ;;  %v2167_v11 = vsub.f32 %v2103_v19, %v7340_v45  ;;  %v7354_v19 = vpop.xlane.xlu1 %3368 }
 0x50b   :  { %v2600_v46 = vmul.f32 1.442695, %v2487_v9  ;;  %v3469_v9 = vsel %vm451_vm0, %v7102_v24, 0.0  ;;  %9741 = vst [vmem:[#allocation132_spill] sm:$0xff] %v7354_v19 }
 0x50d   :  { %5834 = vpow2.f32 %v2600_v46 }
 0x50e   :  { %1991 = vxpose.xlu1.b32.cont [2/4] (short) (narrow) %v1524_v32, 32  ;;  %v2739_v32 = vmul.f32 %v7064_v58, %v7029_v1  ;;  %v2977_v1 = vmul.f32 0.6931472, %v5829_v37  ;;  %v3289_v58 = vsel %vm3161_vm14, %v5831_v21, %v3225_v26  ;;  %5836 = vlog2.f32 %v7238_v48 }
 0x50f   :  { %v7325_v17 = vmul.f32 %v3289_v58, %v7319_v57  ;;  %v4730_v63 = vadd.f32 %v7288_v49, %v3289_v58  ;;  %v7345_v26 = vadd.f32 1.0, %v2294_v5  ;;  %v2231_v48 = vand.u32 2147483647, %v2167_v11  ;;  %v1944_v5 = vpop.trf.xlu2  ;;  %v7366_v11 = vld [vmem:[#allocation2 + $0x198] sm:$0xff] }
 0x510   :  { %v2803_v31 = vsub.f32 %v2675_v30, %v2739_v32  ;;  %v7337_v32 = vld [vmem:[#allocation2 + $0x190] sm:$0xff]  ;;  %vm3193_vm3 = vcmp.ge.f32.partialorder %v7366_v11, 0.0 }
 0x511   :  { %9736 = vst [vmem:[#allocation127_spill] sm:$0xff] %v7325_v17  ;;  %v7333_v51 = vmul.f32 %v4730_v63, %v7319_v57  ;;  %v2424_v46 = vand.u32 2147483647, %v7337_v32  ;;  %vm3192_vm2 = vcmp.ge.f32.partialorder %v7337_v32, 0.0  ;;  %v3478_v16 = vsel %vm451_vm0, %v7345_v26, 0.0 }
 0x512   :  { %v3059_v37 = vadd.f32 %v2977_v1, %v2803_v31  ;;  %v1529_v21 = vpop.f32.mrf.mxu3 }
 0x513   :  { %9739 = vst [vmem:[#allocation130_spill] sm:$0xff] %v7333_v51  ;;  %v2488_v58 = vsub.f32 0.0, %v2424_v46 }
 0x514   :  { %v3784_v31 = vmul.f32 %v3059_v37, %v7102_v24  ;;  %v2645_v37 = vmax.f32 %v7222_v42, 0.0 }
 0x515   :  { %v2602_v51 = vmul.f32 1.442695, %v2488_v58  ;;  %v2425_v58 = vand.u32 2147483647, %v7366_v11 }
 0x516   :  { %1992 = vxpose.xlu1.b32.cont [3/4] (short) (narrow) %v1527_v18, 32  ;;  %v5833_v18 = vpop.eup %5832  ;;  %v3938_v24 = vsel %vm451_vm0, %v3784_v31, 0.0 }
 0x517   :  { %v3254_v30 = vmul.f32 %v5833_v18, %v5827_v25  ;;  %v5835_v1 = vpop.eup %5834  ;;  %v2489_v39 = vsub.f32 0.0, %v2425_v58 }
 0x518   :  { %v7349_v63 = vadd.f32 1.0, %v5835_v1  ;;  %v5837_v46 = vpop.eup %5836 }
 0x519   :  { %v3318_v55 = vsel %vm3190_vm15, %v5833_v18, %v3254_v30  ;;  %v7359_v30 = vpop.xlane.xlu0 %3930 }
 0x51a   :  { %3470 = vadd.xlane.f32.xlu0 %v3469_v9  ;;  %v4759_v25 = vadd.f32 %v7309_v50, %v3318_v55  ;;  %v7352_v9 = vmul.f32 %v3318_v55, %v7345_v26  ;;  %9743 = vst [vmem:[#allocation134_spill] sm:$0xff] %v7359_v30  ;;  %5838 = vrcp.f32 %v7349_v63  ;;  %v2104_v55 = vmul.f32 0.0010405828, %v1944_v5  ;;  %v7369_v30 = vld [vmem:[#allocation4 + $0x190] sm:$0xff] }
 0x51b   :  { %5840 = vpow2.f32 %v2602_v51 }
 0x51c   :  { %9740 = vst [vmem:[#allocation131_spill] sm:$0xff] %v7352_v9  ;;  %v7357_v18 = vmul.f32 %v4759_v25, %v7345_v26  ;;  %v2295_v25 = vmul.f32 5.0, %v2231_v48  ;;  %v2917_v9 = vmul.f32 0.6931472, %v5837_v46  ;;  %v2168_v31 = vsub.f32 %v2104_v55, %v7369_v30  ;;  %v7378_v48 = vpop.xlane.xlu1 %3837  ;;  %v1945_v55 = vpop.trf.xlu2 }
 0x51d   :  { %5842 = vlog2.f32 %v7315_v52  ;;  %9744 = vst [vmem:[#allocation135_spill] sm:$0xff] %v7378_v48 }
 0x51e   :  { %1993 = vxpose.xlu1.b32.end [4/4] (short) (narrow) %v1529_v21, 32  ;;  %9742 = vst [vmem:[#allocation133_spill] sm:$0xff] %v7357_v18  ;;  %v2709_v21 = vmul.f32 %v7232_v0, %v7222_v42  ;;  %v7372_v42 = vadd.f32 1.0, %v2295_v25  ;;  %v2604_v0 = vmul.f32 1.442695, %v2489_v39 }
 0x51f   :  { %v2105_v25 = vmul.f32 0.0010405828, %v1945_v55 }
 0x520   :  { %v2773_v18 = vsub.f32 %v2645_v37, %v2709_v21  ;;  %v5839_v19 = vpop.eup %5838  ;;  %v2232_v37 = vand.u32 2147483647, %v2168_v31  ;;  %5844 = vpow2.f32 %v2604_v0 }
 0x521   :  { %v3255_v13 = vmul.f32 %v5839_v19, %v5835_v1  ;;  %v5841_v5 = vpop.eup %5840  ;;  %v7382_v39 = vpop.xlane.xlu0 %3371 }
 0x522   :  { %3939 = vadd.xlane.f32.xlu0 %v3938_v24  ;;  %v3379_v24 = vsel %vm451_vm0, %v7243_v35, 0.0  ;;  %v3029_v51 = vadd.f32 %v2917_v9, %v2773_v18  ;;  %v7380_v21 = vadd.f32 1.0, %v5841_v5  ;;  %9745 = vst [vmem:[#allocation136_spill] sm:$0xff] %v7382_v39  ;;  %v2296_v58 = vmul.f32 5.0, %v2232_v37 }
 0x523   :  { %v3319_v46 = vsel %vm3191_vm1, %v5839_v19, %v3255_v13  ;;  %v5843_v31 = vpop.eup %5842  ;;  %v2678_v13 = vmax.f32 %v7281_v61, 0.0  ;;  %v2742_v19 = vmul.f32 %v7309_v50, %v7281_v61 }
 0x524   :  { %v4760_v1 = vadd.f32 %v7340_v45, %v3319_v46  ;;  %v3754_v9 = vmul.f32 %v3029_v51, %v7243_v35  ;;  %5846 = vrcp.f32 %v7380_v21  ;;  %v7388_v52 = vmul.f32 %v3319_v46, %v7372_v42  ;;  %v7402_v46 = vld [vmem:[#allocation2 + $0x1a0] sm:$0xff] }
 0x525   :  { %v7406_v37 = vadd.f32 1.0, %v2296_v58  ;;  %v2806_v39 = vsub.f32 %v2678_v13, %v2742_v19  ;;  %v2983_v48 = vmul.f32 0.6931472, %v5843_v31  ;;  %vm3194_vm5 = vcmp.ge.f32.partialorder %v7402_v46, 0.0 }
 0x526   :  { %9746 = vst [vmem:[#allocation137_spill] sm:$0xff] %v7388_v52  ;;  %v7391_v18 = vmul.f32 %v4760_v1, %v7372_v42  ;;  %v5845_v0 = vpop.eup %5844  ;;  %v3848_v51 = vsel %vm451_vm0, %v3754_v9, 0.0  ;;  %v7404_v1 = vld [vmem:[#allocation2 + $0xa0] sm:$0xff]  ;;  %v1718_v52 = vpop.trf.xlu1 }
 0x527   :  { %v7400_v55 = vadd.f32 1.0, %v5845_v0  ;;  %v2394_v61 = vand.u32 2147483647, %v7404_v1  ;;  %v2074_v58 = vmul.f32 0.0010405828, %v1718_v52  ;;  %v3062_v60 = vadd.f32 %v2983_v48, %v2806_v39  ;;  %v7423_v52 = vld [vmem:[#allocation2 + $0xa8] sm:$0xff] }
 0x528   :  { %9747 = vst [vmem:[#allocation138_spill] sm:$0xff] %v7391_v18  ;;  %v2426_v18 = vand.u32 2147483647, %v7402_v46  ;;  %vm3162_vm4 = vcmp.ge.f32.partialorder %v7404_v1, 0.0  ;;  %vm3163_vm6 = vcmp.ge.f32.partialorder %v7423_v52, 0.0 }
 0x529   :  { %5848 = vrcp.f32 %v7400_v55  ;;  %v2458_v9 = vsub.f32 0.0, %v2394_v61  ;;  %v7412_v43 = vpop.xlane.xlu0 %3840  ;;  %v3787_v48 = vmul.f32 %v3062_v60, %v7345_v26 }
 0x52a   :  { %3380 = vadd.xlane.f32.xlu0 %v3379_v24  ;;  %v7396_v24 = vld [vmem:[#allocation4 + $0x198] sm:$0xff]  ;;  %v5847_v50 = vpop.eup %5846  ;;  %9748 = vst [vmem:[#allocation139_spill] sm:$0xff] %v7412_v43 }
 0x52b   :  { %v2169_v35 = vsub.f32 %v2105_v25, %v7396_v24  ;;  %v2490_v25 = vsub.f32 0.0, %v2426_v18  ;;  %v3256_v17 = vmul.f32 %v5847_v50, %v5841_v5  ;;  %v2542_v62 = vmul.f32 1.442695, %v2458_v9  ;;  %v7420_v5 = vld [vmem:[#allocation4 + $0xa0] sm:$0xff] }
 0x52c   :  { %v3947_v26 = vsel %vm451_vm0, %v3787_v48, 0.0  ;;  %v2712_v48 = vmul.f32 %v7273_v40, %v7263_v7  ;;  %v2743_v40 = vmul.f32 %v7340_v45, %v7317_v29 }
 0x52d   :  { %v2233_v44 = vand.u32 2147483647, %v2169_v35  ;;  %v3320_v33 = vsel %vm3192_vm2, %v5847_v50, %v3256_v17  ;;  %v2138_v35 = vsub.f32 %v2074_v58, %v7420_v5  ;;  %v2395_v17 = vand.u32 2147483647, %v7423_v52 }
 0x52e   :  { %v7417_v31 = vmul.f32 %v3320_v33, %v7406_v37  ;;  %v4761_v13 = vadd.f32 %v7369_v30, %v3320_v33  ;;  %v1719_v9 = vpop.trf.xlu1 }
 0x52f   :  { %v5849_v18 = vpop.eup %5848  ;;  %v2297_v19 = vmul.f32 5.0, %v2233_v44  ;;  %v2459_v44 = vsub.f32 0.0, %v2395_v17 }
 0x530   :  { %9749 = vst [vmem:[#allocation140_spill] sm:$0xff] %v7417_v31  ;;  %v3257_v61 = vmul.f32 %v5849_v18, %v5845_v0  ;;  %v7429_v39 = vmul.f32 %v4761_v13, %v7406_v37  ;;  %v2075_v0 = vmul.f32 0.0010405828, %v1719_v9 }
 0x531   :  { %v7432_v50 = vadd.f32 1.0, %v2297_v19  ;;  %v2544_v60 = vmul.f32 1.442695, %v2459_v44  ;;  %v7442_v19 = vld [vmem:[#allocation4 + $0x1a0] sm:$0xff] }
 0x532   :  { %3849 = vadd.xlane.f32.xlu0 %v3848_v51  ;;  %v2606_v51 = vmul.f32 1.442695, %v2490_v25  ;;  %9750 = vst [vmem:[#allocation141_spill] sm:$0xff] %v7429_v39  ;;  %v3321_v33 = vsel %vm3193_vm3, %v5849_v18, %v3257_v61  ;;  %v2202_v25 = vand.u32 2147483647, %v2138_v35  ;;  %v2648_v61 = vmax.f32 %v7263_v7, 0.0 }
 0x534   :  { %5850 = vpow2.f32 %v2606_v51  ;;  %v2776_v31 = vsub.f32 %v2648_v61, %v2712_v48 }
 0x535   :  { %5852 = vpow2.f32 %v2542_v62  ;;  %v4762_v62 = vadd.f32 %v7396_v24, %v3321_v33 }
 0x536   :  { %5854 = vlog2.f32 %v7276_v38  ;;  %v7440_v38 = vmul.f32 %v3321_v33, %v7432_v50 }
 0x537   :  { %5856 = vlog2.f32 %v7349_v63  ;;  %v7446_v17 = vmul.f32 %v4762_v62, %v7432_v50  ;;  %v7452_v63 = vld [vmem:[#allocation2 + $0xb0] sm:$0xff] }
 0x538   :  { %9751 = vst [vmem:[#allocation142_spill] sm:$0xff] %v7440_v38  ;;  %5858 = vpow2.f32 %v2544_v60  ;;  %v7457_v60 = vld [vmem:[#allocation4 + $0xa8] sm:$0xff]  ;;  %vm3164_vm7 = vcmp.ge.f32.partialorder %v7452_v63, 0.0 }
 0x539   :  { %9752 = vst [vmem:[#allocation143_spill] sm:$0xff] %v7446_v17  ;;  %v2139_v62 = vsub.f32 %v2075_v0, %v7457_v60  ;;  %v2679_v17 = vmax.f32 %v7317_v29, 0.0  ;;  %v1720_v0 = vpop.trf.xlu1 }
 0x53a   :  { %3479 = vadd.xlane.f32.xlu0 %v3478_v16  ;;  %v1974_v16 = vpop.trf.xlu0  ;;  %v5851_v58 = vpop.eup %5850  ;;  %v2076_v45 = vmul.f32 0.0010405828, %v1720_v0 }
 0x53b   :  { %v2106_v51 = vmul.f32 0.0010405828, %v1974_v16  ;;  %v7437_v13 = vadd.f32 1.0, %v5851_v58  ;;  %v5853_v18 = vpop.eup %5852  ;;  %v2396_v16 = vand.u32 2147483647, %v7452_v63  ;;  %v2807_v56 = vsub.f32 %v2679_v17, %v2743_v40 }
 0x53c   :  { %v7454_v44 = vadd.f32 1.0, %v5853_v18  ;;  %v5855_v33 = vpop.eup %5854  ;;  %v2203_v59 = vand.u32 2147483647, %v2139_v62 }
 0x53d   :  { %v2170_v35 = vsub.f32 %v2106_v51, %v7442_v19  ;;  %5860 = vrcp.f32 %v7437_v13  ;;  %v2266_v51 = vmul.f32 5.0, %v2202_v25  ;;  %v2460_v7 = vsub.f32 0.0, %v2396_v16  ;;  %v5857_v39 = vpop.eup %5856 }
 0x53e   :  { %5862 = vrcp.f32 %v7454_v44  ;;  %v2923_v38 = vmul.f32 0.6931472, %v5855_v33  ;;  %v2985_v14 = vmul.f32 0.6931472, %v5857_v39  ;;  %v3388_v16 = vsel %vm451_vm0, %v7293_v36, 0.0 }
 0x53f   :  { %v2234_v9 = vand.u32 2147483647, %v2170_v35  ;;  %v5859_v35 = vpop.eup %5858  ;;  %v2546_v43 = vmul.f32 1.442695, %v2460_v7  ;;  %v7464_v25 = vadd.f32 1.0, %v2266_v51 }
 0x540   :  { %v7466_v47 = vadd.f32 1.0, %v5859_v35  ;;  %v3032_v61 = vadd.f32 %v2923_v38, %v2776_v31  ;;  %v3063_v17 = vadd.f32 %v2985_v14, %v2807_v56  ;;  %v7479_v38 = vld [vmem:[#allocation4 + $0xb0] sm:$0xff]  ;;  %v2681_v56 = vmax.f32 %v7366_v11, 0.0 }
 0x541   :  { %5864 = vpow2.f32 %v2546_v43  ;;  %v2140_v51 = vsub.f32 %v2076_v45, %v7479_v38 }
 0x542   :  { %3948 = vadd.xlane.f32.xlu0 %v3947_v26  ;;  %v2298_v26 = vmul.f32 5.0, %v2234_v9  ;;  %v3481_v9 = vsel %vm451_vm0, %v7372_v42, 0.0  ;;  %5866 = vlog2.f32 %v7400_v55  ;;  %v3757_v62 = vmul.f32 %v3032_v61, %v7293_v36 }
 0x543   :  { %v5861_v28 = vpop.eup %5860  ;;  %5868 = vrcp.f32 %v7466_v47  ;;  %v3788_v0 = vmul.f32 %v3063_v17, %v7372_v42  ;;  %v2204_v45 = vand.u32 2147483647, %v2140_v51 }
 0x544   :  { %v3258_v29 = vmul.f32 %v5861_v28, %v5851_v58  ;;  %v7470_v48 = vadd.f32 1.0, %v2298_v26  ;;  %v5863_v33 = vpop.eup %5862  ;;  %v2267_v58 = vmul.f32 5.0, %v2203_v59  ;;  %v2745_v59 = vmul.f32 %v7396_v24, %v7366_v11 }
 0x545   :  { %v3226_v43 = vmul.f32 %v5863_v33, %v5853_v18  ;;  %5870 = vlog2.f32 %v7291_v53  ;;  %v3950_v11 = vsel %vm451_vm0, %v3788_v0, 0.0  ;;  %v2649_v53 = vmax.f32 %v7266_v8, 0.0 }
 0x546   :  { %v3322_v39 = vsel %vm3194_vm5, %v5861_v28, %v3258_v29  ;;  %v7496_v18 = vadd.f32 1.0, %v2267_v58  ;;  %v2713_v24 = vmul.f32 %v7288_v49, %v7266_v8 }
 0x547   :  { %v4763_v31 = vadd.f32 %v7442_v19, %v3322_v39  ;;  %v3290_v55 = vsel %vm3162_vm4, %v5863_v33, %v3226_v43  ;;  %v7484_v40 = vmul.f32 %v3322_v39, %v7470_v48  ;;  %v5865_v7 = vpop.eup %5864  ;;  %v2809_v33 = vsub.f32 %v2681_v56, %v2745_v59 }
 0x548   :  { %v7487_v26 = vmul.f32 %v3290_v55, %v7464_v25  ;;  %v2844_v14 = vadd.f32 1.0, %v5865_v7  ;;  %v5867_v36 = vpop.eup %5866  ;;  %v2268_v39 = vmul.f32 5.0, %v2204_v45  ;;  %v4731_v45 = vadd.f32 %v7420_v5, %v3290_v55 }
 0x549   :  { %9753 = vst [vmem:[#allocation144_spill] sm:$0xff] %v7484_v40  ;;  %v7490_v28 = vmul.f32 %v4763_v31, %v7470_v48  ;;  %v5869_v29 = vpop.eup %5868 }
 0x54a   :  { %3389 = vadd.xlane.f32.xlu0 %v3388_v16  ;;  %9754 = vst [vmem:[#allocation145_spill] sm:$0xff] %v7487_v26  ;;  %v3857_v16 = vsel %vm451_vm0, %v3757_v62, 0.0  ;;  %5872 = vrcp.f32 %v2844_v14  ;;  %v3227_v61 = vmul.f32 %v5869_v29, %v5859_v35  ;;  %v3487_v35 = vsel %vm451_vm0, %v7432_v50, 0.0 }
 0x54b   :  { %9755 = vst [vmem:[#allocation146_spill] sm:$0xff] %v7490_v28  ;;  %v5871_v42 = vpop.eup %5870  ;;  %v2777_v62 = vsub.f32 %v2649_v53, %v2713_v24  ;;  %v2332_v8 = vadd.f32 1.0, %v2268_v39  ;;  %5874 = vlog2.f32 %v7437_v13  ;;  %v2682_v53 = vmax.f32 %v7402_v46, 0.0  ;;  %v7538_v13 = vpop.xlane.xlu2 %3464 }
 0x54c   :  { %v3291_v43 = vsel %vm3163_vm6, %v5869_v29, %v3227_v61  ;;  %v2925_v56 = vmul.f32 0.6931472, %v5871_v42  ;;  %v2746_v24 = vmul.f32 %v7442_v19, %v7402_v46  ;;  %5876 = vlog2.f32 %v7380_v21  ;;  %9761 = vst [vmem:[#allocation152_spill] sm:$0xff] %v7538_v13 }
 0x54d   :  { %v7506_v58 = vmul.f32 %v3291_v43, %v7496_v18  ;;  %v4732_v17 = vadd.f32 %v7457_v60, %v3291_v43  ;;  %5878 = vlog2.f32 %v2844_v14  ;;  %v2680_v46 = vmax.f32 %v7337_v32, 0.0 }
 0x54e   :  { %3482 = vadd.xlane.f32.xlu2 %v3481_v9  ;;  %v2989_v9 = vmul.f32 0.6931472, %v5867_v36  ;;  %v3033_v61 = vadd.f32 %v2925_v56, %v2777_v62  ;;  %v2810_v42 = vsub.f32 %v2682_v53, %v2746_v24  ;;  %v2744_v19 = vmul.f32 %v7369_v30, %v7337_v32  ;;  %v7545_v62 = vpop.trf.xlu1  ;;  %v1452_v24 = vpop.f32.mrf.mxu1 }
 0x54f   :  { %9756 = vst [vmem:[#allocation147_spill] sm:$0xff] %v7506_v58  ;;  %v7512_v36 = vmul.f32 %v4732_v17, %v7496_v18  ;;  %v3490_v17 = vsel %vm451_vm0, %v7470_v48, 0.0  ;;  %v2716_v21 = vmul.f32 %v7479_v38, %v7452_v63  ;;  %v3400_v32 = vsel %vm451_vm0, %v2332_v8, 0.0 }
 0x550   :  { %v5873_v31 = vpop.eup %5872  ;;  %v3065_v51 = vadd.f32 %v2989_v9, %v2809_v33  ;;  %v7525_v9 = vmul.f32 %v4731_v45, %v7464_v25  ;;  %5880 = vlog2.f32 %v7454_v44 }
 0x551   :  { %v3228_v59 = vmul.f32 %v5873_v31, %v5865_v7  ;;  %9757 = vst [vmem:[#allocation148_spill] sm:$0xff] %v7512_v36  ;;  %v5875_v43 = vpop.eup %5874 }
 0x552   :  { %3858 = vadd.xlane.f32.xlu0 %v3857_v16  ;;  %v3790_v0 = vmul.f32 %v3065_v51, %v7432_v50  ;;  %v3391_v16 = vsel %vm451_vm0, %v7319_v57, 0.0  ;;  %9760 = vst [vmem:[#allocation151_spill] sm:$0xff] %v7525_v9  ;;  %v3758_v50 = vmul.f32 %v3033_v61, %v7319_v57  ;;  %v2991_v39 = vmul.f32 0.6931472, %v5875_v43  ;;  %v5877_v51 = vpop.eup %5876 }
 0x553   :  { %v3292_v49 = vsel %vm3164_vm7, %v5873_v31, %v3228_v59  ;;  %v2652_v59 = vmax.f32 %v7452_v63, 0.0  ;;  %v5879_v14 = vpop.eup %5878  ;;  %v7553_v30 = vpop.xlane.xlu2 %3933  ;;  %v3484_v61 = vsel %vm451_vm0, %v7406_v37, 0.0 }
 0x554   :  { %v4733_v29 = vadd.f32 %v7479_v38, %v3292_v49  ;;  %v7520_v7 = vmul.f32 %v3292_v49, %v2332_v8  ;;  %v3860_v55 = vsel %vm451_vm0, %v3758_v50, 0.0  ;;  %v3066_v31 = vadd.f32 %v2991_v39, %v2810_v42  ;;  %9762 = vst [vmem:[#allocation153_spill] sm:$0xff] %v7553_v30 }
 0x555   :  { %v2808_v49 = vsub.f32 %v2680_v46, %v2744_v19  ;;  %v2931_v45 = vmul.f32 0.6931472, %v5879_v14  ;;  %v2650_v39 = vmax.f32 %v7404_v1, 0.0  ;;  %v1975_v46 = vpop.trf.xlu0 }
 0x556   :  { %3951 = vadd.xlane.f32.xlu2 %v3950_v11  ;;  %9758 = vst [vmem:[#allocation149_spill] sm:$0xff] %v7520_v7  ;;  %v7522_v33 = vmul.f32 %v4733_v29, %v2332_v8  ;;  %v3956_v11 = vsel %vm451_vm0, %v3790_v0, 0.0  ;;  %v3791_v57 = vmul.f32 %v3066_v31, %v7470_v48  ;;  %v2987_v0 = vmul.f32 0.6931472, %v5877_v51  ;;  %v7557_v63 = vpop.xlane.xlu1 %3467  ;;  %v5881_v31 = vpop.eup %5880 }
 0x557   :  { %v2780_v29 = vsub.f32 %v2652_v59, %v2716_v21  ;;  %9763 = vst [vmem:[#allocation154_spill] sm:$0xff] %v7557_v63  ;;  %v2927_v51 = vmul.f32 0.6931472, %v5881_v31  ;;  %v6070_v59 = vld [vmem:[#allocation4 + $0x1a8] sm:$0xff] }
 0x558   :  { %9759 = vst [vmem:[#allocation150_spill] sm:$0xff] %v7522_v33  ;;  %v3959_v56 = vsel %vm451_vm0, %v3791_v57, 0.0 }
 0x559   :  { %v3036_v50 = vadd.f32 %v2931_v45, %v2780_v29 }
 0x55a   :  { %3488 = vadd.xlane.f32.xlu0 %v3487_v35  ;;  %v7540_v35 = vld [vmem:[#allocation2 + $0x1a8] sm:$0xff] }
 0x55b   :  { %v2427_v48 = vand.u32 2147483647, %v7540_v35  ;;  %v3761_v53 = vmul.f32 %v3036_v50, %v2332_v8  ;;  %v7566_v57 = vpop.xlane.xlu2 %3374 }
 0x55c   :  { %9764 = vst [vmem:[#allocation155_spill] sm:$0xff] %v7566_v57 }
 0x55d   :  { %v3869_v42 = vsel %vm451_vm0, %v3761_v53, 0.0 }
 0x55e   :  { %3392 = vadd.xlane.f32.xlu2 %v3391_v16  ;;  %v2491_v16 = vsub.f32 0.0, %v2427_v48  ;;  %v7570_v8 = vpop.xlane.xlu1 %3936  ;;  %v1454_v48 = vpop.f32.mrf.mxu1 }
 0x55f   :  { %9766 = vst [vmem:[#allocation157_spill] sm:$0xff] %v7570_v8 }
 0x562   :  { %3957 = vadd.xlane.f32.xlu0 %v3956_v11  ;;  %v3064_v11 = vadd.f32 %v2987_v0, %v2808_v49 }
 0x563   :  { %v7578_v49 = vpop.xlane.xlu2 %3843 }
 0x564   :  { %v3789_v38 = vmul.f32 %v3064_v11, %v7406_v37  ;;  %v2107_v37 = vmul.f32 0.0010405828, %v1975_v46  ;;  %9768 = vst [vmem:[#allocation159_spill] sm:$0xff] %v7578_v49 }
 0x566   :  { %3861 = vadd.xlane.f32.xlu2 %v3860_v55  ;;  %v2608_v55 = vmul.f32 1.442695, %v2491_v16  ;;  %v3953_v43 = vsel %vm451_vm0, %v3789_v38, 0.0  ;;  %v2171_v21 = vsub.f32 %v2107_v37, %v6070_v59  ;;  %v7581_v29 = vpop.xlane.xlu1 %3377  ;;  %v2683_v16 = vmax.f32 %v7540_v35, 0.0  ;;  %v1457_v53 = vpop.f32.mrf.mxu1 }
 0x567   :  { %9769 = vst [vmem:[#allocation160_spill] sm:$0xff] %v7581_v29  ;;  %v1532_v37 = vpop.f32.mrf.mxu3  ;;  %v7656_v29 = vld [vmem:[#allocation2 + $0xd0] sm:$0xff] }
 0x568   :  { %5882 = vpow2.f32 %v2608_v55  ;;  %v2235_v14 = vand.u32 2147483647, %v2171_v21  ;;  %vm3168_vm13 = vcmp.ge.f32.partialorder %v7656_v29, 0.0 }
 0x56a   :  { %v2299_v45 = vmul.f32 5.0, %v2235_v14  ;;  %v7608_v14 = vld [vmem:[#allocation2 + $0xb8] sm:$0xff] }
 0x56b   :  { %vm3165_vm8 = vcmp.ge.f32.partialorder %v7608_v14, 0.0 }
 0x56c   :  { %v7586_v50 = vadd.f32 1.0, %v2299_v45  ;;  %v2397_v45 = vand.u32 2147483647, %v7608_v14 }
 0x56e   :  { %3491 = vadd.xlane.f32.xlu2 %v3490_v17  ;;  %v2714_v17 = vmul.f32 %v7420_v5, %v7404_v1  ;;  %v7568_v44 = vpop.eup %5882  ;;  %v3394_v1 = vsel %vm451_vm0, %v7464_v25, 0.0  ;;  %9770 = vst [vmem:[#allocation161_spill] sm:$0xff] %v7586_v50 }
 0x56f   :  { %9765 = vst [vmem:[#allocation156_spill] sm:$0xff] %v7568_v44 }
 0x570   :  { %v2778_v19 = vsub.f32 %v2650_v39, %v2714_v17  ;;  %v1459_v39 = vpop.f32.mrf.mxu1 }
 0x572   :  { %v3034_v5 = vadd.f32 %v2927_v51, %v2778_v19 }
 0x574   :  { %v3759_v0 = vmul.f32 %v3034_v5, %v7464_v25  ;;  %v3493_v25 = vsel %vm451_vm0, %v7586_v50, 0.0 }
 0x576   :  { %3960 = vadd.xlane.f32.xlu2 %v3959_v56  ;;  %v7573_v56 = vadd.f32 1.0, %v7568_v44  ;;  %v3863_v11 = vsel %vm451_vm0, %v3759_v0, 0.0  ;;  %v7610_v0 = vld [vmem:[#allocation2 + $0x1b0] sm:$0xff] }
 0x577   :  { %vm3196_vm10 = vcmp.ge.f32.partialorder %v7610_v0, 0.0 }
 0x578   :  { %9767 = vst [vmem:[#allocation158_spill] sm:$0xff] %v7573_v56  ;;  %5884 = vlog2.f32 %v7573_v56 }
 0x57e   :  { %3485 = vadd.xlane.f32.xlu1 %v3484_v61  ;;  %3401 = vadd.xlane.f32.xlu2 %v3400_v32  ;;  %v2747_v32 = vmul.f32 %v6070_v59, %v7540_v35  ;;  %v5885_v61 = vpop.eup %5884  ;;  %v1534_v59 = vpop.f32.mrf.mxu3 }
 0x57f   :  { %v2993_v38 = vmul.f32 0.6931472, %v5885_v61 }
 0x580   :  { %v2811_v55 = vsub.f32 %v2683_v16, %v2747_v32  ;;  %v2428_v16 = vand.u32 2147483647, %v7610_v0  ;;  %v2077_v32 = vmul.f32 0.0010405828, %v7545_v62 }
 0x586   :  { %3954 = vadd.xlane.f32.xlu1 %v3953_v43  ;;  %3870 = vadd.xlane.f32.xlu2 %v3869_v42  ;;  %v3067_v43 = vadd.f32 %v2993_v38, %v2811_v55  ;;  %v7592_v42 = vpop.xlane.xlu1 %3846  ;;  %v2492_v55 = vsub.f32 0.0, %v2428_v16 }
 0x587   :  { %9772 = vst [vmem:[#allocation163_spill] sm:$0xff] %v7592_v42 }
 0x588   :  { %v3792_v35 = vmul.f32 %v3067_v43, %v7586_v50 }
 0x58a   :  { %v3962_v17 = vsel %vm451_vm0, %v3792_v35, 0.0 }
 0x58b   :  { %1766 = vxpose.xlu0.b32.start [1/4] (short) (narrow) %v1452_v24, 32  ;;  %v7588_v24 = vpop.xlane.xlu2 %3473 }
 0x58c   :  { %9771 = vst [vmem:[#allocation162_spill] sm:$0xff] %v7588_v24 }
 0x58e   :  { %3395 = vadd.xlane.f32.xlu1 %v3394_v1  ;;  %v7598_v46 = vpop.xlane.xlu1 %3476  ;;  %v1976_v1 = vpop.trf.xlu0 }
 0x58f   :  { %9774 = vst [vmem:[#allocation165_spill] sm:$0xff] %v7598_v46 }
 0x593   :  { %1767 = vxpose.xlu0.b32.cont [2/4] (short) (narrow) %v1454_v48, 32  ;;  %v7596_v31 = vpop.xlane.xlu2 %3942  ;;  %v1537_v48 = vpop.f32.mrf.mxu3 }
 0x594   :  { %9773 = vst [vmem:[#allocation164_spill] sm:$0xff] %v7596_v31  ;;  %v2400_v31 = vand.u32 2147483647, %v7656_v29 }
 0x596   :  { %3864 = vadd.xlane.f32.xlu1 %v3863_v11  ;;  %v7602_v51 = vpop.xlane.xlu1 %3945  ;;  %v2461_v11 = vsub.f32 0.0, %v2397_v45  ;;  %v7618_v43 = vpop.trf.xlu0 }
 0x597   :  { %9776 = vst [vmem:[#allocation167_spill] sm:$0xff] %v7602_v51 }
 0x598   :  { %v2548_v38 = vmul.f32 1.442695, %v2461_v11 }
 0x59a   :  { %5886 = vpow2.f32 %v2548_v38 }
 0x59b   :  { %1768 = vxpose.xlu0.b32.cont [3/4] (short) (narrow) %v1457_v53, 32  ;;  %v7600_v19 = vpop.xlane.xlu2 %3383  ;;  %v7615_v53 = vld [vmem:[#allocation4 + $0xb8] sm:$0xff] }
 0x59c   :  { %9775 = vst [vmem:[#allocation166_spill] sm:$0xff] %v7600_v19 }
 0x59e   :  { %3494 = vadd.xlane.f32.xlu1 %v3493_v25  ;;  %v7606_v5 = vpop.xlane.xlu1 %3386  ;;  %v2141_v25 = vsub.f32 %v2077_v32, %v7615_v53  ;;  %v7628_v40 = vpop.xlane.xlu0 %3470 }
 0x59f   :  { %9778 = vst [vmem:[#allocation169_spill] sm:$0xff] %v7606_v5 }
 0x5a0   :  { %v2205_v45 = vand.u32 2147483647, %v2141_v25  ;;  %v5887_v32 = vpop.eup %5886  ;;  %9780 = vst [vmem:[#allocation171_spill] sm:$0xff] %v7628_v40 }
 0x5a1   :  { %v2845_v38 = vadd.f32 1.0, %v5887_v32 }
 0x5a2   :  { %v2269_v33 = vmul.f32 5.0, %v2205_v45  ;;  %v7637_v45 = vld [vmem:[#allocation4 + $0xc0] sm:$0xff] }
 0x5a3   :  { %1769 = vxpose.xlu0.b32.end [4/4] (short) (narrow) %v1459_v39, 32  ;;  %v7604_v21 = vpop.xlane.xlu2 %3852  ;;  %v1539_v39 = vpop.f32.mrf.mxu3 }
 0x5a4   :  { %9777 = vst [vmem:[#allocation168_spill] sm:$0xff] %v7604_v21  ;;  %v7651_v21 = vld [vmem:[#allocation4 + $0x1b0] sm:$0xff] }
 0x5a6   :  { %3963 = vadd.xlane.f32.xlu1 %v3962_v17  ;;  %v7620_v35 = vpop.xlane.xlu1 %3855  ;;  %v2610_v17 = vmul.f32 1.442695, %v2492_v55  ;;  %v7661_v24 = vpop.xlane.xlu0 %3939 }
 0x5a7   :  { %9779 = vst [vmem:[#allocation170_spill] sm:$0xff] %v7620_v35 }
 0x5a8   :  { %5888 = vpow2.f32 %v2610_v17  ;;  %v7635_v17 = vadd.f32 1.0, %v2269_v33  ;;  %9781 = vst [vmem:[#allocation172_spill] sm:$0xff] %v7661_v24 }
 0x5aa   :  { %v3403_v33 = vsel %vm451_vm0, %v7635_v17, 0.0 }
 0x5ab   :  { %v1750_v61 = vpop.trf.xlu2 }
 0x5ac   :  { %v2078_v36 = vmul.f32 0.0010405828, %v1750_v61 }
 0x5ae   :  { %v2006_v55 = vpop.trf.xlu1  ;;  %v2142_v61 = vsub.f32 %v2078_v36, %v7637_v45  ;;  %v2717_v36 = vmul.f32 %v7615_v53, %v7608_v14  ;;  %3404 = vadd.xlane.f32.xlu1 %v3403_v33 }
 0x5af   :  { %2022 = vxpose.xlu2.b32.start [1/4] (short) (narrow) %v1532_v37, 32  ;;  %v7622_v37 = vld [vmem:[#allocation2 + $0xc0] sm:$0xff]  ;;  %v2110_v50 = vmul.f32 0.0010405828, %v2006_v55 }
 0x5b0   :  { %v2398_v62 = vand.u32 2147483647, %v7622_v37  ;;  %v2206_v8 = vand.u32 2147483647, %v2142_v61  ;;  %vm3166_vm9 = vcmp.ge.f32.partialorder %v7622_v37, 0.0 }
 0x5b2   :  { %v2462_v16 = vsub.f32 0.0, %v2398_v62  ;;  %v7633_v62 = vpop.eup %5888  ;;  %v2270_v24 = vmul.f32 5.0, %v2206_v8 }
 0x5b3   :  { %v1751_v11 = vpop.trf.xlu2 }
 0x5b4   :  { %v2550_v9 = vmul.f32 1.442695, %v2462_v16  ;;  %v7640_v16 = vld [vmem:[#allocation4 + $0x1c0] sm:$0xff]  ;;  %v2079_v19 = vmul.f32 0.0010405828, %v1751_v11 }
 0x5b5   :  { %v2174_v55 = vsub.f32 %v2110_v50, %v7640_v16 }
 0x5b6   :  { %5890 = vpow2.f32 %v2550_v9 }
 0x5b7   :  { %2023 = vxpose.xlu2.b32.cont [2/4] (short) (narrow) %v1534_v59, 32  ;;  %v7624_v59 = vld [vmem:[#allocation2 + $0x1b8] sm:$0xff]  ;;  %5892 = vrcp.f32 %v2845_v38 }
 0x5b8   :  { %5894 = vlog2.f32 %v2845_v38  ;;  %v7644_v38 = vadd.f32 1.0, %v7633_v62  ;;  %vm3197_vm12 = vcmp.ge.f32.partialorder %v7624_v59, 0.0 }
 0x5bb   :  { %v1752_v35 = vpop.trf.xlu2 }
 0x5bc   :  { %v5891_v56 = vpop.eup %5890  ;;  %v2080_v42 = vmul.f32 0.0010405828, %v1752_v35 }
 0x5bd   :  { %v5893_v51 = vpop.eup %5892 }
 0x5be   :  { %v3229_v35 = vmul.f32 %v5893_v51, %v5887_v32 }
 0x5bf   :  { %2024 = vxpose.xlu2.b32.cont [3/4] (short) (narrow) %v1537_v48, 32  ;;  %v2429_v48 = vand.u32 2147483647, %v7624_v59 }
 0x5c1   :  { %v2493_v28 = vsub.f32 0.0, %v2429_v48  ;;  %v2108_v48 = vmul.f32 0.0010405828, %v1976_v1  ;;  %v2653_v1 = vmax.f32 %v7608_v14, 0.0  ;;  %v7671_v14 = vsel %vm3165_vm8, %v5893_v51, %v3229_v35 }
 0x5c3   :  { %v2612_v44 = vmul.f32 1.442695, %v2493_v28  ;;  %v2172_v50 = vsub.f32 %v2108_v48, %v7651_v21  ;;  %v2781_v5 = vsub.f32 %v2653_v1, %v2717_v36  ;;  %v2464_v1 = vsub.f32 0.0, %v2400_v31  ;;  %v1753_v58 = vpop.trf.xlu2 }
 0x5c4   :  { %v7678_v31 = vmul.f32 %v7671_v14, %v7635_v17 }
 0x5c5   :  { %5896 = vpow2.f32 %v2612_v44  ;;  %v7654_v44 = vadd.f32 1.0, %v5891_v56  ;;  %v2236_v33 = vand.u32 2147483647, %v2172_v50  ;;  %v2554_v32 = vmul.f32 1.442695, %v2464_v1  ;;  %v7691_v1 = vld [vmem:[#allocation2 + $0xd8] sm:$0xff] }
 0x5c6   :  { %9782 = vst [vmem:[#allocation173_spill] sm:$0xff] %v7678_v31  ;;  %v2401_v40 = vand.u32 2147483647, %v7691_v1  ;;  %v2081_v31 = vmul.f32 0.0010405828, %v1753_v58  ;;  %vm3169_vm14 = vcmp.ge.f32.partialorder %v7691_v1, 0.0 }
 0x5c7   :  { %2025 = vxpose.xlu2.b32.end [4/4] (short) (narrow) %v1539_v39, 32  ;;  %v7630_v39 = vld [vmem:[#allocation2 + $0xc8] sm:$0xff]  ;;  %v2300_v63 = vmul.f32 5.0, %v2236_v33 }
 0x5c8   :  { %v2399_v25 = vand.u32 2147483647, %v7630_v39  ;;  %vm3167_vm11 = vcmp.ge.f32.partialorder %v7630_v39, 0.0 }
 0x5ca   :  { %v2463_v9 = vsub.f32 0.0, %v2399_v25  ;;  %v5895_v25 = vpop.eup %5894 }
 0x5cb   :  { %v2933_v46 = vmul.f32 0.6931472, %v5895_v25  ;;  %v7663_v61 = vpop.eup %5896 }
 0x5cc   :  { %v2552_v28 = vmul.f32 1.442695, %v2463_v9  ;;  %v2238_v9 = vand.u32 2147483647, %v2174_v55  ;;  %v2109_v55 = vmul.f32 0.0010405828, %v7618_v43 }
 0x5cd   :  { %v3037_v48 = vadd.f32 %v2933_v46, %v2781_v5  ;;  %v7673_v46 = vld [vmem:[#allocation4 + $0xc8] sm:$0xff] }
 0x5ce   :  { %5898 = vpow2.f32 %v2552_v28  ;;  %v7667_v28 = vld [vmem:[#allocation4 + $0xd0] sm:$0xff]  ;;  %v2302_v36 = vmul.f32 5.0, %v2238_v9  ;;  %v2143_v5 = vsub.f32 %v2079_v19, %v7673_v46 }
 0x5cf   :  { %5900 = vrcp.f32 %v7644_v38  ;;  %v2144_v11 = vsub.f32 %v2080_v42, %v7667_v28  ;;  %v3762_v25 = vmul.f32 %v3037_v48, %v7635_v17  ;;  %v7682_v42 = vadd.f32 1.0, %v7663_v61  ;;  %v7684_v48 = vld [vmem:[#allocation4 + $0x1b8] sm:$0xff] }
 0x5d0   :  { %5902 = vrcp.f32 %v7654_v44  ;;  %v2173_v8 = vsub.f32 %v2109_v55, %v7684_v48  ;;  %v7687_v19 = vadd.f32 1.0, %v2302_v36  ;;  %v2207_v49 = vand.u32 2147483647, %v2143_v5 }
 0x5d1   :  { %v3872_v50 = vsel %vm451_vm0, %v3762_v25, 0.0  ;;  %5904 = vpow2.f32 %v2554_v32  ;;  %v2208_v51 = vand.u32 2147483647, %v2144_v11  ;;  %v7693_v25 = vadd.f32 1.0, %v2270_v24 }
 0x5d2   :  { %3873 = vadd.xlane.f32.xlu1 %v3872_v50  ;;  %9783 = vst [vmem:[#allocation174_spill] sm:$0xff] %v7687_v19  ;;  %5906 = vrcp.f32 %v7682_v42  ;;  %v2237_v36 = vand.u32 2147483647, %v2173_v8  ;;  %v2465_v32 = vsub.f32 0.0, %v2401_v40  ;;  %v7700_v50 = vpop.xlane.xlu0 %3380  ;;  %v3502_v24 = vsel %vm451_vm0, %v7687_v19, 0.0 }
 0x5d3   :  { %9784 = vst [vmem:[#allocation175_spill] sm:$0xff] %v7700_v50  ;;  %v2272_v57 = vmul.f32 5.0, %v2208_v51  ;;  %v7705_v5 = vadd.f32 1.0, %v2300_v63  ;;  %v2271_v13 = vmul.f32 5.0, %v2207_v49 }
 0x5d4   :  { %v5899_v43 = vpop.eup %5898  ;;  %v2556_v7 = vmul.f32 1.442695, %v2465_v32  ;;  %v2301_v40 = vmul.f32 5.0, %v2237_v36 }
 0x5d5   :  { %v5901_v9 = vpop.eup %5900  ;;  %v7689_v35 = vadd.f32 1.0, %v5899_v43  ;;  %v2336_v26 = vadd.f32 1.0, %v2272_v57  ;;  %v7710_v54 = vadd.f32 1.0, %v2271_v13 }
 0x5d6   :  { %v5903_v30 = vpop.eup %5902  ;;  %v3260_v11 = vmul.f32 %v5901_v9, %v7633_v62  ;;  %v7716_v49 = vadd.f32 1.0, %v2301_v40 }
 0x5d7   :  { %v3230_v55 = vmul.f32 %v5903_v30, %v5891_v56  ;;  %5908 = vrcp.f32 %v7689_v35  ;;  %v5905_v33 = vpop.eup %5904  ;;  %v3412_v13 = vsel %vm451_vm0, %v2336_v26, 0.0 }
 0x5d8   :  { %v2848_v62 = vadd.f32 1.0, %v5905_v33  ;;  %5910 = vpow2.f32 %v2556_v7  ;;  %v3324_v51 = vsel %vm3196_vm10, %v5901_v9, %v3260_v11  ;;  %v5907_v50 = vpop.eup %5906 }
 0x5d9   :  { %v3294_v56 = vsel %vm3166_vm9, %v5903_v30, %v3230_v55  ;;  %v7714_v30 = vmul.f32 %v3324_v51, %v7705_v5  ;;  %v7718_v55 = vld [vmem:[#allocation4 + $0xd8] sm:$0xff]  ;;  %v3261_v7 = vmul.f32 %v5907_v50, %v7663_v61 }
 0x5da   :  { %v7708_v8 = vmul.f32 %v3294_v56, %v7693_v25  ;;  %3503 = vadd.xlane.f32.xlu1 %v3502_v24  ;;  %5912 = vrcp.f32 %v2848_v62  ;;  %v2145_v58 = vsub.f32 %v2081_v31, %v7718_v55  ;;  %v7727_v32 = vpop.xlane.xlu0 %3849  ;;  %v2720_v24 = vmul.f32 %v7667_v28, %v7656_v29 }
 0x5db   :  { %5914 = vlog2.f32 %v2848_v62  ;;  %9786 = vst [vmem:[#allocation177_spill] sm:$0xff] %v7714_v30  ;;  %v3325_v62 = vsel %vm3197_vm12, %v5907_v50, %v3261_v7  ;;  %v4735_v27 = vadd.f32 %v7637_v45, %v3294_v56 }
 0x5dc   :  { %9785 = vst [vmem:[#allocation176_spill] sm:$0xff] %v7708_v8  ;;  %v2209_v61 = vand.u32 2147483647, %v2145_v58  ;;  %v4766_v50 = vadd.f32 %v7684_v48, %v3325_v62  ;;  %v4765_v58 = vadd.f32 %v7651_v21, %v3324_v51 }
 0x5dd   :  { %v5909_v23 = vpop.eup %5908  ;;  %9788 = vst [vmem:[#allocation179_spill] sm:$0xff] %v7727_v32 }
 0x5de   :  { %v3231_v63 = vmul.f32 %v5909_v23, %v5899_v43  ;;  %v5911_v9 = vpop.eup %5910  ;;  %v2656_v43 = vmax.f32 %v7656_v29, 0.0  ;;  %v7755_v56 = vmul.f32 %v4765_v58, %v7705_v5  ;;  %v7782_v58 = vld [vmem:[#allocation2 + $0x1c0] sm:$0xff] }
 0x5df   :  { %v7732_v31 = vadd.f32 1.0, %v5911_v9  ;;  %vm3198_vm15 = vcmp.ge.f32.partialorder %v7782_v58, 0.0  ;;  %v2686_v3 = vmax.f32 %v7782_v58, 0.0 }
 0x5e0   :  { %v3295_v57 = vsel %vm3167_vm11, %v5909_v23, %v3231_v63  ;;  %v5913_v36 = vpop.eup %5912  ;;  %v7735_v23 = vmul.f32 %v3325_v62, %v7716_v49  ;;  %v2784_v63 = vsub.f32 %v2656_v43, %v2720_v24  ;;  %v2007_v43 = vpop.trf.xlu1  ;;  %v7746_v24 = vmul.f32 %v4735_v27, %v7693_v25  ;;  %9794 = vst [vmem:[#allocation185_spill] sm:$0xff] %v7755_v56 }
 0x5e1   :  { %v7725_v11 = vmul.f32 %v3295_v57, %v7710_v54  ;;  %v5915_v40 = vpop.eup %5914  ;;  %v3232_v30 = vmul.f32 %v5913_v36, %v5905_v33  ;;  %5916 = vrcp.f32 %v7732_v31  ;;  %v4736_v15 = vadd.f32 %v7673_v46, %v3295_v57 }
 0x5e2   :  { %3413 = vadd.xlane.f32.xlu1 %v3412_v13  ;;  %9789 = vst [vmem:[#allocation180_spill] sm:$0xff] %v7735_v23  ;;  %v2273_v33 = vmul.f32 5.0, %v2209_v61  ;;  %5918 = vlog2.f32 %v7466_v47  ;;  %v2715_v47 = vmul.f32 %v7457_v60, %v7423_v52 }
 0x5e3   :  { %9787 = vst [vmem:[#allocation178_spill] sm:$0xff] %v7725_v11  ;;  %v2939_v11 = vmul.f32 0.6931472, %v5915_v40  ;;  %v3296_v32 = vsel %vm3168_vm13, %v5913_v36, %v3232_v30  ;;  %v7749_v29 = vmul.f32 %v4736_v15, %v7710_v54  ;;  %v7752_v30 = vmul.f32 %v4766_v50, %v7716_v49  ;;  %v7760_v36 = vpop.xlane.xlu0 %3479  ;;  %v7768_v40 = vpop.xlane.xlu2 %3482 }
 0x5e4   :  { %v7743_v13 = vmul.f32 %v3296_v32, %v2336_v26  ;;  %9791 = vst [vmem:[#allocation182_spill] sm:$0xff] %v7746_v24  ;;  %v7763_v15 = vadd.f32 1.0, %v2273_v33 }
 0x5e5   :  { %v3040_v8 = vadd.f32 %v2939_v11, %v2784_v63  ;;  %9792 = vst [vmem:[#allocation183_spill] sm:$0xff] %v7749_v29 }
 0x5e6   :  { %9790 = vst [vmem:[#allocation181_spill] sm:$0xff] %v7743_v13 }
 0x5e7   :  { %v3765_v7 = vmul.f32 %v3040_v8, %v2336_v26  ;;  %9793 = vst [vmem:[#allocation184_spill] sm:$0xff] %v7752_v30  ;;  %v5917_v57 = vpop.eup %5916  ;;  %v4734_v8 = vadd.f32 %v7615_v53, %v7671_v14  ;;  %v4737_v14 = vadd.f32 %v7667_v28, %v3296_v32  ;;  %v7792_v28 = vld [vmem:[#allocation4 + $0x1d8] sm:$0xff]  ;;  %v7803_v30 = vld [vmem:[#allocation2 + $0xe8] sm:$0xff] }
 0x5e8   :  { %v3233_v11 = vmul.f32 %v5917_v57, %v5911_v9  ;;  %9795 = vst [vmem:[#allocation186_spill] sm:$0xff] %v7760_v36  ;;  %v7773_v63 = vpop.trf.xlu1  ;;  %vm3171_vm3 = vcmp.ge.f32.partialorder %v7803_v30, 0.0 }
 0x5e9   :  { %v3881_v51 = vsel %vm451_vm0, %v3765_v7, 0.0  ;;  %v7766_v62 = vmul.f32 %v4734_v8, %v7635_v17  ;;  %9797 = vst [vmem:[#allocation188_spill] sm:$0xff] %v7768_v40  ;;  %v7778_v9 = vmul.f32 %v4737_v14, %v2336_v26  ;;  %v2430_v17 = vand.u32 2147483647, %v7782_v58  ;;  %v7923_v40 = vld [vmem:[#allocation4 + $0xe8] sm:$0xff] }
 0x5ea   :  { %3882 = vadd.xlane.f32.xlu1 %v3881_v51  ;;  %v3297_v27 = vsel %vm3169_vm14, %v5917_v57, %v3233_v11  ;;  %v2651_v14 = vmax.f32 %v7423_v52, 0.0  ;;  %v3397_v52 = vsel %vm451_vm0, %v7496_v18, 0.0 }
 0x5eb   :  { %9796 = vst [vmem:[#allocation187_spill] sm:$0xff] %v7766_v62  ;;  %v7771_v61 = vmul.f32 %v3297_v27, %v7763_v15  ;;  %v7775_v53 = vpop.xlane.xlu0 %3948  ;;  %v7780_v50 = vpop.xlane.xlu2 %3951  ;;  %v4738_v57 = vadd.f32 %v7718_v55, %v3297_v27  ;;  %v2494_v51 = vsub.f32 0.0, %v2430_v17  ;;  %v7800_v27 = vld [vmem:[#allocation2 + $0x1c8] sm:$0xff] }
 0x5ec   :  { %9799 = vst [vmem:[#allocation190_spill] sm:$0xff] %v7775_v53  ;;  %v2431_v17 = vand.u32 2147483647, %v7800_v27  ;;  %v2779_v62 = vsub.f32 %v2651_v14, %v2715_v47  ;;  %vm3199_vm1 = vcmp.ge.f32.partialorder %v7800_v27, 0.0 }
 0x5ed   :  { %9798 = vst [vmem:[#allocation189_spill] sm:$0xff] %v7771_v61  ;;  %v7790_v11 = vmul.f32 %v4738_v57, %v7763_v15  ;;  %v2614_v26 = vmul.f32 1.442695, %v2494_v51 }
 0x5ee   :  { %9800 = vst [vmem:[#allocation191_spill] sm:$0xff] %v7778_v9  ;;  %v5919_v9 = vpop.eup %5918 }
 0x5ef   :  { %9801 = vst [vmem:[#allocation192_spill] sm:$0xff] %v7780_v50  ;;  %5920 = vpow2.f32 %v2614_v26  ;;  %v2929_v51 = vmul.f32 0.6931472, %v5919_v9  ;;  %v2403_v9 = vand.u32 2147483647, %v7803_v30  ;;  %v7835_v50 = vld [vmem:[#allocation2 + $0xe0] sm:$0xff] }
 0x5f0   :  { %v2009_v33 = vpop.trf.xlu1  ;;  %9803 = vst [vmem:[#allocation194_spill] sm:$0xff] %v7790_v11  ;;  %v2495_v11 = vsub.f32 0.0, %v2431_v17  ;;  %v2684_v17 = vmax.f32 %v7610_v0, 0.0  ;;  %vm3170_vm2 = vcmp.ge.f32.partialorder %v7835_v50, 0.0 }
 0x5f1   :  { %v2113_v7 = vmul.f32 0.0010405828, %v2009_v33  ;;  %v3035_v60 = vadd.f32 %v2929_v51, %v2779_v62  ;;  %v2748_v62 = vmul.f32 %v7651_v21, %v7610_v0 }
 0x5f3   :  { %v7787_v8 = vpop.xlane.xlu0 %3389  ;;  %v2177_v32 = vsub.f32 %v2113_v7, %v7792_v28  ;;  %v7798_v33 = vpop.xlane.xlu2 %3392  ;;  %v2616_v7 = vmul.f32 1.442695, %v2495_v11  ;;  %v3760_v11 = vmul.f32 %v3035_v60, %v7496_v18  ;;  %v7828_v18 = vld [vmem:[#allocation2 + $0x1d0] sm:$0xff] }
 0x5f4   :  { %9802 = vst [vmem:[#allocation193_spill] sm:$0xff] %v7787_v8  ;;  %v2432_v60 = vand.u32 2147483647, %v7828_v18  ;;  %vm3200_vm4 = vcmp.ge.f32.partialorder %v7828_v18, 0.0 }
 0x5f5   :  { %9804 = vst [vmem:[#allocation195_spill] sm:$0xff] %v7798_v33  ;;  %v2241_v57 = vand.u32 2147483647, %v2177_v32  ;;  %v5921_v56 = vpop.eup %5920  ;;  %5922 = vpow2.f32 %v2616_v7  ;;  %v2111_v32 = vmul.f32 0.0010405828, %v2007_v43 }
 0x5f6   :  { %v7809_v26 = vadd.f32 1.0, %v5921_v56  ;;  %5924 = vlog2.f32 %v7644_v38  ;;  %v7822_v38 = vld [vmem:[#allocation4 + $0x1c8] sm:$0xff] }
 0x5f7   :  { %v2305_v24 = vmul.f32 5.0, %v2241_v57  ;;  %v2467_v57 = vsub.f32 0.0, %v2403_v9  ;;  %v2175_v43 = vsub.f32 %v2111_v32, %v7822_v38  ;;  %v2812_v9 = vsub.f32 %v2684_v17, %v2748_v62 }
 0x5f8   :  { %5926 = vrcp.f32 %v7809_v26 }
 0x5f9   :  { %v7815_v47 = vadd.f32 1.0, %v2305_v24  ;;  %v2560_v53 = vmul.f32 1.442695, %v2467_v57  ;;  %5928 = vlog2.f32 %v7654_v44 }
 0x5fb   :  { %v7805_v29 = vpop.xlane.xlu0 %3858  ;;  %v7813_v14 = vpop.xlane.xlu2 %3861  ;;  %9807 = vst [vmem:[#allocation198_spill] sm:$0xff] %v7815_v47  ;;  %v3511_v24 = vsel %vm451_vm0, %v7815_v47, 0.0 }
 0x5fc   :  { %9805 = vst [vmem:[#allocation196_spill] sm:$0xff] %v7805_v29  ;;  %v5923_v51 = vpop.eup %5922  ;;  %3512 = vadd.xlane.f32.xlu1 %v3511_v24 }
 0x5fd   :  { %9806 = vst [vmem:[#allocation197_spill] sm:$0xff] %v7813_v14  ;;  %v5925_v7 = vpop.eup %5924  ;;  %v7831_v23 = vadd.f32 1.0, %v5923_v51  ;;  %v2496_v14 = vsub.f32 0.0, %v2432_v60 }
 0x5fe   :  { %v5927_v21 = vpop.eup %5926  ;;  %v2995_v32 = vmul.f32 0.6931472, %v5925_v7  ;;  %v3496_v7 = vsel %vm451_vm0, %v7705_v5, 0.0 }
 0x5ff   :  { %v3262_v29 = vmul.f32 %v5927_v21, %v5921_v56  ;;  %v2618_v33 = vmul.f32 1.442695, %v2496_v14  ;;  %5930 = vrcp.f32 %v7831_v23  ;;  %v5929_v44 = vpop.eup %5928  ;;  %v7848_v14 = vld [vmem:[#allocation2 + $0x1d8] sm:$0xff] }
 0x600   :  { %5932 = vpow2.f32 %v2560_v53  ;;  %v3068_v62 = vadd.f32 %v2995_v32, %v2812_v9  ;;  %vm3201_vm7 = vcmp.ge.f32.partialorder %v7848_v14, 0.0 }
 0x601   :  { %v7841_v8 = vsel %vm3198_vm15, %v5927_v21, %v3262_v29  ;;  %5934 = vpow2.f32 %v2618_v33  ;;  %v2654_v33 = vmax.f32 %v7622_v37, 0.0  ;;  %v7859_v21 = vld [vmem:[#allocation2 + $0x1e0] sm:$0xff] }
 0x602   :  { %9809 = vst [vmem:[#allocation200_spill] sm:$0xff] %v7841_v8  ;;  %5936 = vlog2.f32 %v7682_v42  ;;  %v3793_v29 = vmul.f32 %v3068_v62, %v7705_v5  ;;  %v2718_v42 = vmul.f32 %v7637_v45, %v7622_v37  ;;  %v2749_v62 = vmul.f32 %v7684_v48, %v7624_v59 }
 0x603   :  { %v7833_v0 = vpop.xlane.xlu0 %3488  ;;  %v7843_v17 = vpop.xlane.xlu2 %3491  ;;  %v2434_v45 = vand.u32 2147483647, %v7859_v21  ;;  %vm3202_vm5 = vcmp.ge.f32.partialorder %v7859_v21, 0.0 }
 0x604   :  { %9808 = vst [vmem:[#allocation199_spill] sm:$0xff] %v7833_v0  ;;  %v3965_v37 = vsel %vm451_vm0, %v3793_v29, 0.0  ;;  %v2935_v0 = vmul.f32 0.6931472, %v5929_v44  ;;  %v7891_v44 = vld [vmem:[#allocation2 + $0xf0] sm:$0xff] }
 0x605   :  { %9810 = vst [vmem:[#allocation201_spill] sm:$0xff] %v7843_v17  ;;  %v2782_v17 = vsub.f32 %v2654_v33, %v2718_v42  ;;  %v2404_v33 = vand.u32 2147483647, %v7891_v44  ;;  %v2498_v42 = vsub.f32 0.0, %v2434_v45  ;;  %vm3172_vm6 = vcmp.ge.f32.partialorder %v7891_v44, 0.0 }
 0x60b   :  { %v7854_v60 = vpop.xlane.xlu0 %3957 }
 0x60c   :  { %9811 = vst [vmem:[#allocation202_spill] sm:$0xff] %v7854_v60  ;;  %v7877_v60 = vpop.xlane.xlu2 %3960 }
 0x60d   :  { %9813 = vst [vmem:[#allocation204_spill] sm:$0xff] %v7877_v60 }
 0x614   :  { %3398 = vadd.xlane.f32.xlu0 %v3397_v52  ;;  %v3866_v52 = vsel %vm451_vm0, %v3760_v11, 0.0  ;;  %v2402_v11 = vand.u32 2147483647, %v7835_v50 }
 0x616   :  { %v2466_v24 = vsub.f32 0.0, %v2402_v11 }
 0x618   :  { %v2558_v57 = vmul.f32 1.442695, %v2466_v24  ;;  %v2685_v24 = vmax.f32 %v7624_v59, 0.0 }
 0x61a   :  { %5938 = vpow2.f32 %v2558_v57 }
 0x61c   :  { %3867 = vadd.xlane.f32.xlu0 %v3866_v52  ;;  %v2239_v52 = vand.u32 2147483647, %v2175_v43  ;;  %v5931_v43 = vpop.eup %5930 }
 0x61d   :  { %v7852_v53 = vpop.eup %5932  ;;  %v3263_v9 = vmul.f32 %v5931_v43, %v5923_v51 }
 0x61e   :  { %v2303_v56 = vmul.f32 5.0, %v2239_v52  ;;  %v5935_v32 = vpop.eup %5934  ;;  %v2433_v52 = vand.u32 2147483647, %v7848_v14  ;;  %v2851_v59 = vadd.f32 1.0, %v7852_v53 }
 0x61f   :  { %v5937_v5 = vpop.eup %5936  ;;  %v7867_v57 = vadd.f32 1.0, %v5935_v32 }
 0x620   :  { %v7861_v11 = vadd.f32 1.0, %v2303_v56  ;;  %v7869_v8 = vpop.eup %5938  ;;  %v2497_v48 = vsub.f32 0.0, %v2433_v52  ;;  %v3038_v52 = vadd.f32 %v2935_v0, %v2782_v17  ;;  %v2719_v0 = vmul.f32 %v7673_v46, %v7630_v39  ;;  %v7906_v17 = vld [vmem:[#allocation4 + $0xe0] sm:$0xff] }
 0x621   :  { %5940 = vrcp.f32 %v7867_v57  ;;  %v3499_v46 = vsel %vm451_vm0, %v7716_v49, 0.0 }
 0x622   :  { %5942 = vlog2.f32 %v7689_v35  ;;  %v2620_v36 = vmul.f32 1.442695, %v2497_v48  ;;  %v2622_v48 = vmul.f32 1.442695, %v2498_v42  ;;  %v2659_v42 = vmax.f32 %v7803_v30, 0.0 }
 0x623   :  { %5944 = vlog2.f32 %v2851_v59 }
 0x624   :  { %3497 = vadd.xlane.f32.xlu0 %v3496_v7  ;;  %v3327_v7 = vsel %vm3199_vm1, %v5931_v43, %v3263_v9  ;;  %v7882_v43 = vadd.f32 1.0, %v7869_v8  ;;  %v7888_v9 = vmul.f32 0.0010405828, %v7773_v63  ;;  %v2468_v63 = vsub.f32 0.0, %v2404_v33 }
 0x625   :  { %v7874_v51 = vmul.f32 %v3327_v7, %v7861_v11  ;;  %v4768_v56 = vadd.f32 %v7822_v38, %v3327_v7  ;;  %v2813_v7 = vsub.f32 %v2685_v24, %v2749_v62  ;;  %v2655_v62 = vmax.f32 %v7630_v39, 0.0 }
 0x626   :  { %5946 = vrcp.f32 %v7882_v43 }
 0x627   :  { %9812 = vst [vmem:[#allocation203_spill] sm:$0xff] %v7874_v51  ;;  %v7885_v29 = vmul.f32 %v4768_v56, %v7861_v11  ;;  %v2997_v51 = vmul.f32 0.6931472, %v5937_v5  ;;  %v7895_v56 = vld [vmem:[#allocation2 + $0x1f0] sm:$0xff]  ;;  %5948 = vlog2.f32 %v7732_v31  ;;  %v3763_v31 = vmul.f32 %v3038_v52, %v7693_v25 }
 0x628   :  { %v7899_v5 = vld [vmem:[#allocation4 + $0x1d0] sm:$0xff]  ;;  %5950 = vlog2.f32 %v7809_v26  ;;  %v2723_v26 = vmul.f32 %v7923_v40, %v7803_v30  ;;  %v2721_v52 = vmul.f32 %v7718_v55, %v7691_v1  ;;  %vm3204_vm10 = vcmp.ge.f32.partialorder %v7895_v56, 0.0 }
 0x629   :  { %9814 = vst [vmem:[#allocation205_spill] sm:$0xff] %v7885_v29  ;;  %v7897_v29 = vpop.eup %5940  ;;  %v2176_v35 = vsub.f32 %v7888_v9, %v7899_v5  ;;  %v3069_v24 = vadd.f32 %v2997_v51, %v2813_v7  ;;  %v3406_v9 = vsel %vm451_vm0, %v7693_v25, 0.0  ;;  %v2436_v51 = vand.u32 2147483647, %v7895_v56 }
 0x62a   :  { %v7911_v33 = vmul.f32 %v7897_v29, %v5935_v32  ;;  %v2562_v7 = vmul.f32 1.442695, %v2468_v63  ;;  %5952 = vpow2.f32 %v2620_v36  ;;  %v7920_v32 = vpop.xlane.xlu2 %3401  ;;  %v2783_v63 = vsub.f32 %v2655_v62, %v2719_v0 }
 0x62b   :  { %9815 = vst [vmem:[#allocation206_spill] sm:$0xff] %v7920_v32  ;;  %5954 = vrcp.f32 %v2851_v59  ;;  %v3794_v61 = vmul.f32 %v3069_v24, %v7716_v49  ;;  %v2657_v25 = vmax.f32 %v7691_v1, 0.0  ;;  %v2500_v32 = vsub.f32 0.0, %v2436_v51 }
 0x62c   :  { %3966 = vadd.xlane.f32.xlu0 %v3965_v37  ;;  %5956 = vpow2.f32 %v2622_v48  ;;  %v2787_v49 = vsub.f32 %v2659_v42, %v2723_v26  ;;  %v2750_v48 = vmul.f32 %v7640_v16, %v7782_v58  ;;  %v2240_v1 = vand.u32 2147483647, %v2176_v35 }
 0x62d   :  { %5958 = vpow2.f32 %v2562_v7  ;;  %v3875_v51 = vsel %vm451_vm0, %v3763_v31, 0.0  ;;  %v2785_v41 = vsub.f32 %v2657_v25, %v2721_v52  ;;  %v2626_v42 = vmul.f32 1.442695, %v2500_v32 }
 0x62e   :  { %v2814_v31 = vsub.f32 %v2686_v3, %v2750_v48 }
 0x62f   :  { %v1782_v37 = vpop.trf.xlu0  ;;  %5960 = vpow2.f32 %v2626_v42 }
 0x630   :  { %v2082_v60 = vmul.f32 0.0010405828, %v1782_v37  ;;  %v5943_v37 = vpop.eup %5942 }
 0x631   :  { %v2937_v13 = vmul.f32 0.6931472, %v5943_v37 }
 0x632   :  { %v2146_v45 = vsub.f32 %v2082_v60, %v7906_v17  ;;  %v5945_v60 = vpop.eup %5944  ;;  %v7953_v32 = vpop.xlane.xlu2 %3870 }
 0x633   :  { %v2945_v24 = vmul.f32 0.6931472, %v5945_v60  ;;  %v3039_v22 = vadd.f32 %v2937_v13, %v2783_v63  ;;  %9816 = vst [vmem:[#allocation207_spill] sm:$0xff] %v7953_v32 }
 0x634   :  { %v2210_v39 = vand.u32 2147483647, %v2146_v45  ;;  %3407 = vadd.xlane.f32.xlu0 %v3406_v9  ;;  %v7927_v45 = vld [vmem:[#allocation2 + $0x1e8] sm:$0xff]  ;;  %v5947_v9 = vpop.eup %5946 }
 0x635   :  { %v2435_v12 = vand.u32 2147483647, %v7927_v45  ;;  %v5949_v59 = vpop.eup %5948  ;;  %v3234_v37 = vmul.f32 %v5947_v9, %v7869_v8  ;;  %v3043_v35 = vadd.f32 %v2945_v24, %v2787_v49  ;;  %v3505_v49 = vsel %vm451_vm0, %v7861_v11, 0.0 }
 0x636   :  { %v2274_v62 = vmul.f32 5.0, %v2210_v39  ;;  %v5951_v6 = vpop.eup %5950  ;;  %v2941_v58 = vmul.f32 0.6931472, %v5949_v59  ;;  %vm3203_vm9 = vcmp.ge.f32.partialorder %v7927_v45, 0.0 }
 0x637   :  { %v1783_v36 = vpop.trf.xlu0  ;;  %v2499_v7 = vsub.f32 0.0, %v2435_v12  ;;  %v2999_v12 = vmul.f32 0.6931472, %v5951_v6  ;;  %v7961_v6 = vsel %vm3170_vm2, %v5947_v9, %v3234_v37  ;;  %v7980_v9 = vpop.xlane.xlu1 %3485  ;;  %v7984_v37 = vld [vmem:[#allocation4 + $0xf0] sm:$0xff]  ;;  %vm3595_vm2 = vcmask 130112  }
 0x638   :  { %3500 = vadd.xlane.f32.xlu2 %v3499_v46  ;;  %v2083_v0 = vmul.f32 0.0010405828, %v1783_v36  ;;  %v7938_v46 = vpop.eup %5952  ;;  %v3968_v36 = vsel %vm451_vm0, %v3794_v61, 0.0  ;;  %v7945_v26 = vadd.f32 1.0, %v2274_v62  ;;  %9818 = vst [vmem:[#allocation209_spill] sm:$0xff] %v7980_v9 }
 0x639   :  { %v5955_v39 = vpop.eup %5954  ;;  %v2624_v13 = vmul.f32 1.442695, %v2499_v7  ;;  %v3409_v7 = vsel %vm451_vm0, %v7710_v54, 0.0 }
 0x63a   :  { %v2147_v55 = vsub.f32 %v2083_v0, %v7923_v40  ;;  %v7943_v60 = vpop.eup %5956  ;;  %v2881_v0 = vadd.f32 1.0, %v7938_v46  ;;  %v3235_v52 = vmul.f32 %v5955_v39, %v7852_v53  ;;  %v7970_v62 = vmul.f32 %v7961_v6, %v7945_v26 }
 0x63b   :  { %v7948_v8 = vpop.eup %5958  ;;  %v7956_v25 = vadd.f32 1.0, %v7943_v60  ;;  %5962 = vpow2.f32 %v2624_v13  ;;  %v7978_v53 = vsel %vm3200_vm4, %v7897_v29, %v7911_v33  ;;  %v7991_v29 = vld [vmem:[#allocation2 + $0xf8] sm:$0xff]  ;;  %vm3603_vm4 = vcmask 261312  }
 0x63c   :  { %v2211_v16 = vand.u32 2147483647, %v2147_v55  ;;  %3876 = vadd.xlane.f32.xlu0 %v3875_v51  ;;  %v7966_v30 = vadd.f32 1.0, %v7948_v8  ;;  %9817 = vst [vmem:[#allocation208_spill] sm:$0xff] %v7970_v62  ;;  %v7974_v24 = vsel %vm3171_vm3, %v5955_v39, %v3235_v52  ;;  %5964 = vlog2.f32 %v2881_v0  ;;  %v7998_v13 = vld [vmem:[#allocation2 + $0x1f8] sm:$0xff]  ;;  %v8019_v62 = vld [vmem:[#allocation4 + $0x1e0] sm:$0xff] }
 0x63d   :  { %v2304_v51 = vmul.f32 5.0, %v2240_v1  ;;  %v3764_v39 = vmul.f32 %v3039_v22, %v7710_v54  ;;  %5966 = vrcp.f32 %v7956_v25  ;;  %v2405_v42 = vand.u32 2147483647, %v7991_v29 }
 0x63e   :  { %v2275_v61 = vmul.f32 5.0, %v2211_v16  ;;  %5968 = vrcp.f32 %v7966_v30  ;;  %v7996_v16 = vpop.eup %5960  ;;  %v3070_v1 = vadd.f32 %v2999_v12, %v2814_v31  ;;  %v2689_v54 = vmax.f32 %v7848_v14, 0.0 }
 0x63f   :  { %v1784_v63 = vpop.trf.xlu0  ;;  %5970 = vrcp.f32 %v2881_v0  ;;  %v8011_v31 = vadd.f32 1.0, %v2304_v51  ;;  %v3878_v0 = vsel %vm451_vm0, %v3764_v39, 0.0  ;;  %vm3173_vm8 = vcmp.ge.f32.partialorder %v7991_v29, 0.0 }
 0x640   :  { %3969 = vadd.xlane.f32.xlu2 %v3968_v36  ;;  %v7963_v3 = vadd.f32 1.0, %v2275_v61  ;;  %v2084_v59 = vmul.f32 0.0010405828, %v1784_v63  ;;  %v3041_v36 = vadd.f32 %v2941_v58, %v2785_v41  ;;  %v2753_v41 = vmul.f32 %v7792_v28, %v7848_v14 }
 0x641   :  { %v2469_v58 = vsub.f32 0.0, %v2405_v42  ;;  %v8008_v63 = vpop.eup %5962  ;;  %5972 = vrcp.f32 %v6578_v4  ;;  %v3415_v28 = vsel %vm451_vm0, %v7763_v15, 0.0  ;;  %v3795_v42 = vmul.f32 %v3070_v1, %v7687_v19  ;;  %v8027_v1 = vpop.xlane.xlu1 %3954 }
 0x642   :  { %v3421_v48 = vsel %vm451_vm0, %v7963_v3, 0.0  ;;  %v2148_v55 = vsub.f32 %v2084_v59, %v7984_v37  ;;  %v3768_v33 = vmul.f32 %v3043_v35, %v7963_v3  ;;  %v8002_v22 = vmul.f32 %v7974_v24, %v7963_v3  ;;  %v5965_v52 = vpop.eup %5964  ;;  %9821 = vst [vmem:[#allocation212_spill] sm:$0xff] %v8027_v1 }
 0x643   :  { %3422 = vadd.xlane.f32.xlu1 %v3421_v48  ;;  %v2437_v35 = vand.u32 2147483647, %v7998_v13  ;;  %v3766_v48 = vmul.f32 %v3041_v36, %v7763_v15  ;;  %v2564_v4 = vmul.f32 1.442695, %v2469_v58  ;;  %v2817_v39 = vsub.f32 %v2689_v54, %v2753_v41 }
 0x644   :  { %3506 = vadd.xlane.f32.xlu0 %v3505_v49  ;;  %v2212_v61 = vand.u32 2147483647, %v2148_v55  ;;  %9819 = vst [vmem:[#allocation210_spill] sm:$0xff] %v8002_v22  ;;  %v3890_v49 = vsel %vm451_vm0, %v3768_v33, 0.0  ;;  %v5967_v55 = vpop.eup %5966  ;;  %v8024_v33 = vadd.f32 1.0, %v8008_v63  ;;  %v2658_v14 = vmax.f32 %v7835_v50, 0.0 }
 0x645   :  { %v2501_v51 = vsub.f32 0.0, %v2437_v35  ;;  %v5969_v9 = vpop.eup %5968  ;;  %v3005_v15 = vmul.f32 0.6931472, %v5965_v52  ;;  %5974 = vpow2.f32 %v2564_v4  ;;  %v3266_v35 = vmul.f32 %v5967_v55, %v7943_v60 }
 0x646   :  { %v2276_v32 = vmul.f32 5.0, %v2212_v61  ;;  %9820 = vst [vmem:[#allocation211_spill] sm:$0xff] %v8024_v33  ;;  %v5971_v22 = vpop.eup %5970  ;;  %v3236_v58 = vmul.f32 %v5969_v9, %v7948_v8  ;;  %v3884_v4 = vsel %vm451_vm0, %v3766_v48, 0.0  ;;  %v4739_v60 = vadd.f32 %v7906_v17, %v7961_v6 }
 0x647   :  { %v2628_v36 = vmul.f32 1.442695, %v2501_v51  ;;  %v8031_v54 = vpop.eup %5972  ;;  %v8048_v8 = vsel %vm3202_vm5, %v5967_v55, %v3266_v35  ;;  %v2660_v1 = vmax.f32 %v7891_v44, 0.0  ;;  %vm3205_vm11 = vcmp.ge.f32.partialorder %v7998_v13, 0.0 }
 0x648   :  { %v2038_v12 = vpop.trf.xlu2  ;;  %3410 = vadd.xlane.f32.xlu2 %v3409_v7  ;;  %v8033_v41 = vadd.f32 1.0, %v2276_v32  ;;  %v8044_v32 = vsel %vm3172_vm6, %v5969_v9, %v3236_v58  ;;  %v8067_v6 = vmul.f32 %v4739_v60, %v7945_v26  ;;  %v2752_v60 = vmul.f32 %v7899_v5, %v7828_v18 }
 0x649   :  { %v2114_v59 = vmul.f32 0.0010405828, %v2038_v12  ;;  %v2884_v12 = vadd.f32 1.0, %v7996_v16  ;;  %vm3599_vm3 = vcmask 195712   ;;  %vm3710_vm5 = vcmask 1041409  }
 0x64a   :  { %9825 = vst [vmem:[#allocation216_spill] sm:$0xff] %v8067_v6  ;;  %vm3712_vm6 = vcmask 1042434  }
 0x64b   :  { %v2178_v7 = vsub.f32 %v2114_v59, %v8019_v62  ;;  %3891 = vadd.xlane.f32.xlu1 %v3890_v49  ;;  %5976 = vrcp.f32 %v2884_v12  ;;  %v8040_v59 = vmul.f32 %v7978_v53, %v8011_v31  ;;  %v3265_v49 = vmul.f32 %v5971_v22, %v7938_v46 }
 0x64c   :  { %3416 = vadd.xlane.f32.xlu0 %v3415_v28  ;;  %5978 = vpow2.f32 %v2628_v36  ;;  %v8055_v46 = vmul.f32 %v8044_v32, %v8033_v41 }
 0x64d   :  { %v2242_v61 = vand.u32 2147483647, %v2178_v7  ;;  %5980 = vrcp.f32 %v8024_v33  ;;  %9822 = vst [vmem:[#allocation213_spill] sm:$0xff] %v8040_v59  ;;  %v3073_v7 = vadd.f32 %v3005_v15, %v2817_v39  ;;  %v8064_v9 = vsel %vm3201_vm7, %v5971_v22, %v3265_v49  ;;  %v8101_v49 = vpop.xlane.xlu1 %3395 }
 0x64e   :  { %5982 = vlog2.f32 %v7831_v23  ;;  %9823 = vst [vmem:[#allocation214_spill] sm:$0xff] %v8055_v46  ;;  %v8071_v23 = vld [vmem:[#allocation4 + $0x1e8] sm:$0xff]  ;;  %v3971_v15 = vsel %vm451_vm0, %v3795_v42, 0.0  ;;  %v2722_v22 = vmul.f32 %v7906_v17, %v7835_v50  ;;  %v8110_v50 = vld [vmem:[#allocation4 + $0x1f0] sm:$0xff]  ;;  %vm3714_vm7 = vcmask 1043459  }
 0x64f   :  { %v2306_v52 = vmul.f32 5.0, %v2242_v61  ;;  %5984 = vlog2.f32 %v7882_v43  ;;  %9824 = vst [vmem:[#allocation215_spill] sm:$0xff] %v8064_v9  ;;  %v1785_v61 = vpop.trf.xlu0  ;;  %v3798_v35 = vmul.f32 %v3073_v7, %v7815_v47  ;;  %v2756_v6 = vmul.f32 %v8110_v50, %v7895_v56 }
 0x650   :  { %v2039_v28 = vpop.trf.xlu2  ;;  %3879 = vadd.xlane.f32.xlu2 %v3878_v0  ;;  %v8057_v0 = vpop.eup %5974  ;;  %5986 = vlog2.f32 %v2884_v12  ;;  %v3508_v12 = vsel %vm451_vm0, %v8011_v31, 0.0  ;;  %9827 = vst [vmem:[#allocation218_spill] sm:$0xff] %v8101_v49  ;;  %v2786_v47 = vsub.f32 %v2658_v14, %v2722_v22  ;;  %v2724_v49 = vmul.f32 %v7984_v37, %v7891_v44 }
 0x651   :  { %v2115_v51 = vmul.f32 0.0010405828, %v2039_v28  ;;  %v8059_v48 = vadd.f32 1.0, %v2306_v52  ;;  %v8069_v55 = vpop.eup %5976  ;;  %v8076_v36 = vadd.f32 1.0, %v8057_v0  ;;  %5988 = vlog2.f32 %v7867_v57 }
 0x652   :  { %v8078_v43 = vpop.eup %5978  ;;  %5990 = vlog2.f32 %v7966_v30  ;;  %v2085_v52 = vmul.f32 0.0010405828, %v1785_v61  ;;  %v2692_v61 = vmax.f32 %v7895_v56, 0.0  ;;  %v2788_v44 = vsub.f32 %v2660_v1, %v2724_v49 }
 0x653   :  { %v2179_v39 = vsub.f32 %v2115_v51, %v8071_v23  ;;  %3972 = vadd.xlane.f32.xlu1 %v3971_v15  ;;  %v8086_v58 = vmul.f32 %v8048_v8, %v8059_v48  ;;  %v8088_v42 = vpop.eup %5980  ;;  %5992 = vrcp.f32 %v8076_v36  ;;  %v8097_v57 = vadd.f32 1.0, %v8078_v43  ;;  %v8106_v51 = vld [vmem:[#allocation4 + $0xf8] sm:$0xff] }
 0x654   :  { %3885 = vadd.xlane.f32.xlu0 %v3884_v4  ;;  %v8099_v17 = vpop.eup %5982  ;;  %v2688_v4 = vmax.f32 %v7828_v18, 0.0  ;;  %9828 = vst [vmem:[#allocation219_spill] sm:$0xff] %v8106_v51  ;;  %v2149_v30 = vsub.f32 %v2085_v52, %v8106_v51  ;;  %v3268_v18 = vmul.f32 %v8069_v55, %v7996_v16  ;;  %v3980_v52 = vsel %vm451_vm0, %v3798_v35, 0.0 }
 0x655   :  { %9826 = vst [vmem:[#allocation217_spill] sm:$0xff] %v8086_v58  ;;  %v2243_v28 = vand.u32 2147483647, %v2179_v39  ;;  %v5985_v7 = vpop.eup %5984  ;;  %v3267_v39 = vmul.f32 %v8088_v42, %v8008_v63  ;;  %v3514_v58 = vsel %vm451_vm0, %v8059_v48, 0.0  ;;  %5994 = vrcp.f32 %v8097_v57  ;;  %v8142_v1 = vpop.xlane.xlu1 %3864 }
 0x656   :  { %v5987_v59 = vpop.eup %5986  ;;  %v2213_v19 = vand.u32 2147483647, %v2149_v30  ;;  %v2820_v14 = vsub.f32 %v2692_v61, %v2756_v6  ;;  %v2816_v30 = vsub.f32 %v2688_v4, %v2752_v60  ;;  %v2751_v51 = vmul.f32 %v7822_v38, %v7800_v27 }
 0x657   :  { %v2307_v46 = vmul.f32 5.0, %v2243_v28  ;;  %v3011_v22 = vmul.f32 0.6931472, %v5987_v59  ;;  %v3418_v38 = vsel %vm451_vm0, %v7945_v26, 0.0  ;;  %v3331_v56 = vsel %vm3203_vm9, %v8088_v42, %v3267_v39  ;;  %v8154_v39 = vld [vmem:[#allocation4 + $0x1f8] sm:$0xff] }
 0x658   :  { %v2040_v15 = vpop.trf.xlu2  ;;  %3509 = vadd.xlane.f32.xlu2 %v3508_v12  ;;  %v5989_v12 = vpop.eup %5988  ;;  %v2277_v33 = vmul.f32 5.0, %v2213_v19  ;;  %5996 = vlog2.f32 %v7956_v25  ;;  %v2690_v25 = vmax.f32 %v7859_v21, 0.0  ;;  %vm9620_vm9 = vcmask 1045509  }
 0x659   :  { %v2116_v9 = vmul.f32 0.0010405828, %v2040_v15  ;;  %v5991_v63 = vpop.eup %5990  ;;  %v2943_v15 = vmul.f32 0.6931472, %v5985_v7  ;;  %v8134_v6 = vadd.f32 1.0, %v2307_v46  ;;  %v3076_v46 = vadd.f32 %v3011_v22, %v2820_v14 }
 0x65a   :  { %v5993_v35 = vpop.eup %5992  ;;  %v8131_v28 = vadd.f32 1.0, %v2277_v33  ;;  %v3003_v60 = vmul.f32 0.6931472, %v5989_v12  ;;  %v3332_v33 = vsel %vm3204_vm10, %v8069_v55, %v3268_v18  ;;  %5998 = vlog2.f32 %v8076_v36 }
 0x65b   :  { %v2180_v16 = vsub.f32 %v2116_v9, %v8110_v50  ;;  %3981 = vadd.xlane.f32.xlu1 %v3980_v52  ;;  %v2947_v9 = vmul.f32 0.6931472, %v5991_v63  ;;  %v3237_v19 = vmul.f32 %v5993_v35, %v8057_v0  ;;  %v3042_v4 = vadd.f32 %v2943_v15, %v2786_v47 }
 0x65c   :  { %3515 = vadd.xlane.f32.xlu0 %v3514_v58  ;;  %v5995_v58 = vpop.eup %5994  ;;  %v8158_v63 = vmul.f32 %v3331_v56, %v8134_v6  ;;  %vm9618_vm10 = vcmask 1047559  }
 0x65d   :  { %v2244_v10 = vand.u32 2147483647, %v2180_v16  ;;  %v8138_v61 = vsel %vm3173_vm8, %v5993_v35, %v3237_v19  ;;  %v3044_v47 = vadd.f32 %v2947_v9, %v2788_v44  ;;  %v3269_v12 = vmul.f32 %v5995_v58, %v8078_v43 }
 0x65e   :  { %v8149_v52 = vmul.f32 %v8138_v61, %v8131_v28  ;;  %v3767_v55 = vmul.f32 %v3042_v4, %v7945_v26  ;;  %9829 = vst [vmem:[#allocation220_spill] sm:$0xff] %v8158_v63  ;;  %v4772_v35 = vadd.f32 %v8071_v23, %v3331_v56  ;;  %v4769_v43 = vadd.f32 %v7899_v5, %v7978_v53 }
 0x65f   :  { %v2308_v59 = vmul.f32 5.0, %v2244_v10  ;;  %v3424_v10 = vsel %vm451_vm0, %v8033_v41, 0.0  ;;  %v3333_v16 = vsel %vm3205_vm11, %v5995_v58, %v3269_v12  ;;  %v3769_v26 = vmul.f32 %v3044_v47, %v8033_v41  ;;  %v6090_v47 = vld [vmem:[#allocation2 + $0x28] sm:$0xff]  ;;  %v6091_v12 = vld [vmem:[#allocation4 + $0x10] sm:$0xff] }
 0x660   :  { %3419 = vadd.xlane.f32.xlu2 %v3418_v38  ;;  %v2041_v7 = vpop.trf.xlu2  ;;  %v8167_v44 = vmul.f32 %v4772_v35, %v8134_v6  ;;  %v3887_v9 = vsel %vm451_vm0, %v3767_v55, 0.0  ;;  %v3072_v19 = vadd.f32 %v3003_v60, %v2816_v30  ;;  %v4774_v38 = vadd.f32 %v8154_v39, %v3333_v16  ;;  %v5997_v35 = vpop.eup %5996 }
 0x661   :  { %v2372_v0 = vadd.f32 1.0, %v2308_v59  ;;  %v2117_v49 = vmul.f32 0.0010405828, %v2041_v7  ;;  %v9832_v4 = vmax.f32 %v7800_v27, 0.0  ;;  %v3001_v5 = vmul.f32 0.6931472, %v8099_v17  ;;  %v8188_v17 = vpop.xlane.xlu1 %3494 }
 0x662   :  { %9831 = vst [vmem:[#allocation222_spill] sm:$0xff] %v8167_v44  ;;  %v8175_v53 = vmul.f32 %v4769_v43, %v8011_v31  ;;  %v4773_v7 = vadd.f32 %v8110_v50, %v3332_v33  ;;  %v3893_v30 = vsel %vm451_vm0, %v3769_v26, 0.0  ;;  %v4771_v27 = vadd.f32 %v8019_v62, %v8048_v8  ;;  %v9841_v43 = vld [vmem:[#allocation57_spill] sm:$0xff]  ;;  %v9843_v26 = vld [vmem:[#allocation219_spill] sm:$0xff] }
 0x663   :  { %v3520_v42 = vsel %vm451_vm0, %v2372_v0, 0.0  ;;  %v2181_v18 = vsub.f32 %v2117_v49, %v8154_v39  ;;  %v8160_v15 = vmul.f32 %v3332_v33, %v2372_v0  ;;  %v3801_v14 = vmul.f32 %v3076_v46, %v2372_v0  ;;  %v9903_v44 = vld [vmem:[#allocation127_spill] sm:$0xff] }
 0x664   :  { %3521 = vadd.xlane.f32.xlu1 %v3520_v42  ;;  %3425 = vadd.xlane.f32.xlu0 %v3424_v10  ;;  %v2815_v58 = vsub.f32 %v9832_v4, %v2751_v51  ;;  %9833 = vst [vmem:[#allocation223_spill] sm:$0xff] %v8175_v53  ;;  %v8182_v60 = vmul.f32 %v4773_v7, %v2372_v0  ;;  %vm3147_vm12 = vcmp.ge.f32.partialorder %v6090_v47, 0.0  ;;  %6000 = vrcp.f32 %v9841_v43  ;;  %v9847_v47 = vld [vmem:[#allocation55_spill] sm:$0xff]  ;;  %v9849_v43 = vld [vmem:[#allocation58_spill] sm:$0xff] }
 0x665   :  { %9830 = vst [vmem:[#allocation221_spill] sm:$0xff] %v8160_v15  ;;  %v2245_v22 = vand.u32 2147483647, %v2181_v18  ;;  %v3989_v56 = vsel %vm451_vm0, %v3801_v14, 0.0  ;;  %v4740_v49 = vadd.f32 %v7923_v40, %v7974_v24  ;;  %v3797_v51 = vmul.f32 %v3072_v19, %v8011_v31  ;;  %v6120_v53 = vld [vmem:[#allocation4 + $0x118] sm:$0xff] }
 0x666   :  { %9834 = vst [vmem:[#allocation224_spill] sm:$0xff] %v8182_v60  ;;  %v3071_v10 = vadd.f32 %v3001_v5, %v2815_v58  ;;  %v8201_v24 = vmul.f32 %v4771_v27, %v8059_v48  ;;  %v3211_v8 = vmul.f32 %v8031_v54, %v6571_v20  ;;  %v4259_v42 = vmul.f32 %v6091_v12, %v6478_v2 }
 0x667   :  { %v2309_v59 = vmul.f32 5.0, %v2245_v22  ;;  %v8198_v0 = vmul.f32 %v4740_v49, %v7963_v3  ;;  %v3977_v31 = vsel %vm451_vm0, %v3797_v51, 0.0  ;;  %v4741_v20 = vadd.f32 %v7984_v37, %v8044_v32  ;;  %v6092_v37 = vld [vmem:[#allocation4 + $0x28] sm:$0xff]  ;;  %v6093_v51 = vld [vmem:[#allocation4 + $0x40] sm:$0xff] }
 0x668   :  { %3888 = vadd.xlane.f32.xlu2 %v3887_v9  ;;  %9838 = vst [vmem:[#allocation228_spill] sm:$0xff] %v8201_v24  ;;  %v3796_v3 = vmul.f32 %v3071_v10, %v7861_v11  ;;  %v8210_v55 = vsel %vm3147_vm12, %v8031_v54, %v3211_v8  ;;  %v2754_v11 = vmul.f32 %v8019_v62, %v7859_v21  ;;  %v3517_v14 = vsel %vm451_vm0, %v8134_v6, 0.0  ;;  %v5999_v21 = vpop.eup %5998  ;;  %v9846_v10 = vld [vmem:[#allocation45_spill] sm:$0xff]  ;;  %v6118_v24 = vld [vmem:[#allocation4 + $0x80] sm:$0xff] }
 0x669   :  { %v8179_v46 = vadd.f32 1.0, %v2309_v59  ;;  %9837 = vst [vmem:[#allocation227_spill] sm:$0xff] %v8198_v0  ;;  %v4198_v18 = vmul.f32 %v8210_v55, %v6585_v34  ;;  %v8223_v54 = vmul.f32 %v4741_v20, %v8033_v41  ;;  %v8226_v36 = vpop.xlane.xlu1 %3963  ;;  %v2661_v22 = vmax.f32 %v7991_v29, 0.0  ;;  %v9844_v59 = vld [vmem:[#allocation211_spill] sm:$0xff]  ;;  %v9884_v0 = vld [vmem:[#allocation96_spill] sm:$0xff]  ;;  %v9904_v34 = vld [vmem:[#allocation81_spill] sm:$0xff] }
 0x66a   :  { %9839 = vst [vmem:[#allocation229_spill] sm:$0xff] %v8210_v55  ;;  %v3974_v2 = vsel %vm451_vm0, %v3796_v3, 0.0  ;;  %v2725_v9 = vmul.f32 %v9843_v26, %v7991_v29  ;;  %6002 = vlog2.f32 %v8097_v57  ;;  %v2818_v62 = vsub.f32 %v2690_v25, %v2754_v11 }
 0x66b   :  { %v8192_v50 = vmul.f32 %v3333_v16, %v8179_v46  ;;  %v8195_v33 = vmul.f32 %v4774_v38, %v8179_v46  ;;  %v4327_v16 = vsel %vm451_vm0, %v4259_v42, 0.0  ;;  %9840 = vst [vmem:[#allocation230_spill] sm:$0xff] %v8223_v54  ;;  %v4262_v32 = vmul.f32 %v6092_v37, %v4198_v18  ;;  %v6001_v38 = vpop.eup %6000  ;;  %v6094_v42 = vld [vmem:[#allocation2 + $0x58] sm:$0xff] }
 0x66c   :  { %3990 = vadd.xlane.f32.xlu1 %v3989_v56  ;;  %3894 = vadd.xlane.f32.xlu0 %v3893_v30  ;;  %9842 = vst [vmem:[#allocation57_spill] sm:$0xff] %v8226_v36  ;;  %v3007_v41 = vmul.f32 0.6931472, %v5997_v35  ;;  %v3523_v19 = vsel %vm451_vm0, %v8179_v46, 0.0  ;;  %6004 = vlog2.f32 %v9844_v59  ;;  %v2789_v58 = vsub.f32 %v2661_v22, %v2725_v9  ;;  %v9845_v30 = vld [vmem:[#allocation100_spill] sm:$0xff]  ;;  %v9850_v22 = vld [vmem:[#allocation106_spill] sm:$0xff] }
 0x66d   :  { %9835 = vst [vmem:[#allocation225_spill] sm:$0xff] %v8192_v50  ;;  %v4336_v4 = vsel %vm451_vm0, %v4262_v32, 0.0  ;;  %v2949_v5 = vmul.f32 0.6931472, %v5999_v21  ;;  %v2693_v29 = vmax.f32 %v7998_v13, 0.0  ;;  %v2757_v57 = vmul.f32 %v8154_v39, %v7998_v13 }
 0x66e   :  { %9836 = vst [vmem:[#allocation226_spill] sm:$0xff] %v8195_v33  ;;  %v3074_v7 = vadd.f32 %v3007_v41, %v2818_v62  ;;  %6006 = vrcp.f32 %v9845_v30  ;;  %v3427_v27 = vsel %vm451_vm0, %v8131_v28, 0.0  ;;  %v4265_v8 = vmul.f32 %v6093_v51, %v9846_v10  ;;  %v6095_v41 = vld [vmem:[#allocation4 + $0x58] sm:$0xff]  ;;  %v9898_v33 = vld [vmem:[#allocation78_spill] sm:$0xff] }
 0x66f   :  { %v3045_v12 = vadd.f32 %v2949_v5, %v2789_v58  ;;  %vm3153_vm13 = vcmp.ge.f32.partialorder %v6094_v42, 0.0  ;;  %v2691_v3 = vmax.f32 %v7927_v45, 0.0  ;;  %v2755_v13 = vmul.f32 %v8071_v23, %v7927_v45  ;;  %v6099_v42 = vld [vmem:[#allocation4] sm:$0xff] }
 0x670   :  { %3978 = vadd.xlane.f32.xlu2 %v3977_v31  ;;  %v6003_v56 = vpop.eup %6002  ;;  %v3217_v31 = vmul.f32 %v6001_v38, %v9847_v47  ;;  %v3799_v18 = vmul.f32 %v3074_v7, %v8059_v48  ;;  %v2821_v20 = vsub.f32 %v2693_v29, %v2757_v57  ;;  %6008 = vrcp.f32 %v9850_v22  ;;  %v9851_v48 = vld [vmem:[#allocation99_spill] sm:$0xff]  ;;  %v6097_v47 = vld [vmem:[#allocation4 + $0x70] sm:$0xff]  ;;  %v6101_v22 = vld [vmem:[#allocation4 + $0x88] sm:$0xff] }
 0x671   :  { %v8242_v49 = vpop.xlane.xlu1 %3404  ;;  %v3770_v35 = vmul.f32 %v3045_v12, %v8131_v28  ;;  %v2819_v32 = vsub.f32 %v2691_v3, %v2755_v13  ;;  %v4742_v5 = vadd.f32 %v9843_v26, %v8138_v61  ;;  %v4273_v60 = vmul.f32 %v6118_v24, %v9884_v0  ;;  %v9888_v0 = vld [vmem:[#allocation28_spill] sm:$0xff] }
 0x672   :  { %v6005_v39 = vpop.eup %6004  ;;  %v8253_v25 = vsel %vm3153_vm13, %v6001_v38, %v3217_v31  ;;  %v3983_v45 = vsel %vm451_vm0, %v3799_v18, 0.0  ;;  %v6096_v38 = vld [vmem:[#allocation2 + $0x70] sm:$0xff]  ;;  %vm3716_vm8 = vcmask 1044484   ;;  %vm9619_vm11 = vcmask 1046534  }
 0x673   :  { %9848 = vst [vmem:[#allocation219_spill] sm:$0xff] %v8253_v25  ;;  %v4204_v37 = vmul.f32 %v8253_v25, %v9849_v43  ;;  %v3896_v62 = vsel %vm451_vm0, %v3770_v35, 0.0  ;;  %vm3156_vm14 = vcmp.ge.f32.partialorder %v6096_v38, 0.0  ;;  %v8272_v29 = vmul.f32 %v4742_v5, %v8131_v28  ;;  %v6098_v28 = vld [vmem:[#allocation2 + $0x88] sm:$0xff]  ;;  %v6103_v38 = vld [vmem:[#allocation4 + $0x20] sm:$0xff] }
 0x674   :  { %4328 = vadd.xlane.f32.xlu1 %v4327_v16  ;;  %3975 = vadd.xlane.f32.xlu0 %v3974_v2  ;;  %v3013_v16 = vmul.f32 0.6931472, %v6003_v56  ;;  %v4345_v2 = vsel %vm451_vm0, %v4265_v8, 0.0  ;;  %v6007_v11 = vpop.eup %6006  ;;  %vm3159_vm15 = vcmp.ge.f32.partialorder %v6098_v28, 0.0  ;;  %v6106_v28 = vld [vmem:[#allocation4 + $0x38] sm:$0xff]  ;;  %v9901_v43 = vld [vmem:[#allocation65_spill] sm:$0xff] }
 0x675   :  { %v3220_v9 = vmul.f32 %v6007_v11, %v9851_v48  ;;  %9853 = vst [vmem:[#allocation100_spill] sm:$0xff] %v8272_v29  ;;  %v9882_v29 = vld [vmem:[#allocation32_spill] sm:$0xff] }
 0x676   :  { %v3077_v23 = vadd.f32 %v3013_v16, %v2821_v20  ;;  %v6009_v57 = vpop.eup %6008  ;;  %v6100_v20 = vld [vmem:[#allocation4 + $0x8] sm:$0xff]  ;;  %v9858_v16 = vld [vmem:[#allocation14_spill] sm:$0xff] }
 0x677   :  { %v8269_v7 = vsel %vm3156_vm14, %v6007_v11, %v3220_v9  ;;  %v9859_v11 = vld [vmem:[#allocation107_spill] sm:$0xff] }
 0x678   :  { %3518 = vadd.xlane.f32.xlu2 %v3517_v14  ;;  %v3009_v14 = vmul.f32 0.6931472, %v6005_v39  ;;  %v3802_v58 = vmul.f32 %v3077_v23, %v8179_v46  ;;  %9852 = vst [vmem:[#allocation211_spill] sm:$0xff] %v8269_v7  ;;  %v9855_v46 = vld [vmem:[#allocation104_spill] sm:$0xff] }
 0x679   :  { %v8261_v21 = vpop.xlane.xlu1 %3873  ;;  %v3223_v8 = vmul.f32 %v6009_v57, %v9855_v46 }
 0x67a   :  { %v3075_v59 = vadd.f32 %v3009_v14, %v2819_v32  ;;  %v3992_v10 = vsel %vm451_vm0, %v3802_v58, 0.0  ;;  %v9860_v32 = vld [vmem:[#allocation26_spill] sm:$0xff]  ;;  %v9862_v58 = vld [vmem:[#allocation23_spill] sm:$0xff] }
 0x67b   :  { %v8286_v39 = vsel %vm3159_vm15, %v6009_v57, %v3223_v8  ;;  %v9861_v14 = vld [vmem:[#allocation30_spill] sm:$0xff]  ;;  %v4261_v5 = vmul.f32 %v6103_v38, %v9862_v58 }
 0x67c   :  { %4337 = vadd.xlane.f32.xlu1 %v4336_v4  ;;  %3524 = vadd.xlane.f32.xlu0 %v3523_v19  ;;  %v4268_v19 = vmul.f32 %v6095_v41, %v4204_v37  ;;  %v3800_v30 = vmul.f32 %v3075_v59, %v8134_v6  ;;  %v9856_v6 = vld [vmem:[#allocation12_spill] sm:$0xff]  ;;  %9857 = vst [vmem:[#allocation45_spill] sm:$0xff] %v8286_v39  ;;  %v6105_v8 = vld [vmem:[#allocation4 + $0x30] sm:$0xff] }
 0x67d   :  { %v4257_v3 = vmul.f32 %v6099_v42, %v9856_v6  ;;  %v4210_v35 = vmul.f32 %v8286_v39, %v9859_v11  ;;  %v9866_v42 = vld [vmem:[#allocation36_spill] sm:$0xff]  ;;  %v9896_v11 = vld [vmem:[#allocation61_spill] sm:$0xff] }
 0x67e   :  { %v4354_v56 = vsel %vm451_vm0, %v4268_v19, 0.0  ;;  %v3986_v61 = vsel %vm451_vm0, %v3800_v30, 0.0  ;;  %v6104_v30 = vld [vmem:[#allocation4 + $0xa0] sm:$0xff]  ;;  %v4264_v6 = vmul.f32 %v6106_v28, %v9866_v42  ;;  %v3590_v28 = vlaneseq }
 0x67f   :  { %v4321_v37 = vsel %vm451_vm0, %v4257_v3, 0.0  ;;  %v4274_v48 = vmul.f32 %v6101_v22, %v4210_v35 }
 0x680   :  { %3428 = vadd.xlane.f32.xlu2 %v3427_v27  ;;  %v9854_v27 = vld [vmem:[#allocation102_spill] sm:$0xff] }
 0x681   :  { %v4207_v51 = vmul.f32 %v8269_v7, %v9854_v27  ;;  %v8284_v13 = vpop.xlane.xlu1 %3503  ;;  %v4372_v59 = vsel %vm451_vm0, %v4274_v48, 0.0  ;;  %v9899_v27 = vld [vmem:[#allocation31_spill] sm:$0xff]  ;;  %v9900_v7 = vld [vmem:[#allocation80_spill] sm:$0xff] }
 0x683   :  { %v4271_v31 = vmul.f32 %v6097_v47, %v4207_v51  ;;  %v9863_v51 = vld [vmem:[#allocation145_spill] sm:$0xff] }
 0x684   :  { %4346 = vadd.xlane.f32.xlu1 %v4345_v2  ;;  %3984 = vadd.xlane.f32.xlu0 %v3983_v45  ;;  %v4258_v2 = vmul.f32 %v6100_v20, %v9858_v16  ;;  %v4196_v45 = vmul.f32 %v9861_v14, %v9860_v32  ;;  %v4342_v20 = vsel %vm451_vm0, %v4264_v6, 0.0  ;;  %v6107_v16 = vld [vmem:[#allocation4 + $0xb8] sm:$0xff] }
 0x685   :  { %v4363_v18 = vsel %vm451_vm0, %v4271_v31, 0.0  ;;  %v6124_v14 = vld [vmem:[#allocation4 + $0x138] sm:$0xff] }
 0x686   :  { %v4324_v23 = vsel %vm451_vm0, %v4258_v2, 0.0  ;;  %v9867_v2 = vld [vmem:[#allocation173_spill] sm:$0xff] }
 0x687   :  { %v8264_v4 = vpop.xlane.xlu0 %3398  ;;  %v4280_v35 = vmul.f32 %v6107_v16, %v9867_v2 }
 0x688   :  { %3897 = vadd.xlane.f32.xlu2 %v3896_v62  ;;  %v6102_v62 = vld [vmem:[#allocation4 + $0x18] sm:$0xff] }
 0x689   :  { %v4260_v41 = vmul.f32 %v6102_v62, %v4196_v45  ;;  %v8298_v19 = vpop.xlane.xlu1 %3413  ;;  %v6108_v45 = vld [vmem:[#allocation4 + $0x48] sm:$0xff]  ;;  %v4390_v62 = vsel %vm451_vm0, %v4280_v35, 0.0 }
 0x68b   :  { %v4330_v57 = vsel %vm451_vm0, %v4260_v41, 0.0  ;;  %v6109_v41 = vld [vmem:[#allocation4 + $0x50] sm:$0xff] }
 0x68c   :  { %4355 = vadd.xlane.f32.xlu1 %v4354_v56  ;;  %3993 = vadd.xlane.f32.xlu0 %v3992_v10  ;;  %v4333_v56 = vsel %vm451_vm0, %v4261_v5, 0.0  ;;  %v4277_v10 = vmul.f32 %v6104_v30, %v9863_v51  ;;  %v6110_v30 = vld [vmem:[#allocation4 + $0xd0] sm:$0xff]  ;;  %v9871_v51 = vld [vmem:[#allocation181_spill] sm:$0xff] }
 0x68e   :  { %v4381_v31 = vsel %vm451_vm0, %v4277_v10, 0.0  ;;  %v4283_v10 = vmul.f32 %v6110_v30, %v9871_v51  ;;  %v9877_v51 = vld [vmem:[#allocation25_spill] sm:$0xff] }
 0x68f   :  { %v8281_v12 = vpop.xlane.xlu0 %3867 }
 0x690   :  { %3987 = vadd.xlane.f32.xlu2 %v3986_v61  ;;  %v9865_v61 = vld [vmem:[#allocation33_spill] sm:$0xff]  ;;  %v4399_v6 = vsel %vm451_vm0, %v4283_v10, 0.0 }
 0x691   :  { %v4263_v47 = vmul.f32 %v6105_v8, %v9865_v61  ;;  %v6111_v61 = vld [vmem:[#allocation4 + $0x60] sm:$0xff] }
 0x693   :  { %v4339_v3 = vsel %vm451_vm0, %v4263_v47, 0.0  ;;  %v9872_v47 = vld [vmem:[#allocation84_spill] sm:$0xff] }
 0x694   :  { %4364 = vadd.xlane.f32.xlu1 %v4363_v18  ;;  %4322 = vadd.xlane.f32.xlu0 %v4321_v37  ;;  %v8311_v18 = vpop.xlane.xlu1 %3882 }
 0x697   :  { %v8296_v9 = vpop.xlane.xlu0 %3497 }
 0x698   :  { %4325 = vadd.xlane.f32.xlu2 %v4324_v23  ;;  %v9868_v23 = vld [vmem:[#allocation47_spill] sm:$0xff] }
 0x699   :  { %v4266_v22 = vmul.f32 %v6108_v45, %v9868_v23  ;;  %v8336_v45 = vand.u32 127, %v3590_v28  ;;  %v6115_v28 = vld [vmem:[#allocation4 + $0x100] sm:$0xff] }
 0x69b   :  { %v4348_v58 = vsel %vm451_vm0, %v4266_v22, 0.0  ;;  %v8339_v23 = vadd.s32 4294967288, %v8336_v45 }
 0x69c   :  { %4373 = vadd.xlane.f32.xlu1 %v4372_v59  ;;  %4331 = vadd.xlane.f32.xlu0 %v4330_v57  ;;  %v9869_v59 = vld [vmem:[#allocation51_spill] sm:$0xff]  ;;  %v8323_v5 = vpop.xlane.xlu1 %3512 }
 0x69d   :  { %v4267_v38 = vmul.f32 %v6109_v41, %v9869_v59  ;;  %v9870_v57 = vld [vmem:[#allocation27_spill] sm:$0xff]  ;;  %v9875_v41 = vld [vmem:[#allocation210_spill] sm:$0xff] }
 0x69e   :  { %6010 = vrcp.f32 %v9870_v57  ;;  %v4286_v59 = vmul.f32 %v7923_v40, %v9875_v41  ;;  %v6113_v57 = vld [vmem:[#allocation4 + $0x78] sm:$0xff] }
 0x69f   :  { %v8305_v46 = vpop.xlane.xlu0 %3966 }
 0x6a0   :  { %4334 = vadd.xlane.f32.xlu2 %v4333_v56  ;;  %9864 = vst [vmem:[#allocation55_spill] sm:$0xff] %v8305_v46  ;;  %v4351_v56 = vsel %vm451_vm0, %v4267_v38, 0.0  ;;  %v8347_v38 = vadd.s32 4294967280, %v8336_v45 }
 0x6a4   :  { %4382 = vadd.xlane.f32.xlu1 %v4381_v31  ;;  %4340 = vadd.xlane.f32.xlu0 %v4339_v3  ;;  %v4269_v31 = vmul.f32 %v6111_v61, %v9872_v47  ;;  %v6112_v3 = vld [vmem:[#allocation4 + $0x68] sm:$0xff]  ;;  %v6011_v35 = vpop.eup %6010  ;;  %v9878_v61 = vld [vmem:[#allocation59_spill] sm:$0xff] }
 0x6a5   :  { %v3241_v10 = vmul.f32 %v6011_v35, %v9877_v51  ;;  %v3594_v47 = vperm.slane %v9878_v61, %v8339_v23  ;;  %v4408_v61 = vsel %vm451_vm0, %v4286_v59, 0.0  ;;  %v8376_v59 = vadd.s32 4294967272, %v8336_v45 }
 0x6a6   :  { %v4357_v2 = vsel %vm451_vm0, %v4269_v31, 0.0  ;;  %v6114_v31 = vld [vmem:[#allocation2 + $0x118] sm:$0xff] }
 0x6a7   :  { %v8315_v37 = vpop.xlane.xlu0 %3407  ;;  %vm3177_vm1 = vcmp.ge.f32.partialorder %v6114_v31, 0.0 }
 0x6a8   :  { %4343 = vadd.xlane.f32.xlu2 %v4342_v20  ;;  %v9874_v20 = vld [vmem:[#allocation88_spill] sm:$0xff] }
 0x6a9   :  { %v4270_v16 = vmul.f32 %v6112_v3, %v9874_v20  ;;  %v6116_v3 = vld [vmem:[#allocation4 + $0x108] sm:$0xff]  ;;  %v9880_v20 = vld [vmem:[#allocation19_spill] sm:$0xff] }
 0x6ab   :  { %v8318_v48 = vpop.xlane.xlu2 %3500 }
 0x6ac   :  { %4391 = vadd.xlane.f32.xlu1 %v4390_v62  ;;  %4349 = vadd.xlane.f32.xlu0 %v4348_v58  ;;  %v4360_v62 = vsel %vm451_vm0, %v4270_v16, 0.0  ;;  %v4290_v16 = vmul.f32 %v6116_v3, %v9880_v20  ;;  %v8370_v20 = vsel %vm3177_vm1, %v6011_v35, %v3241_v10  ;;  %v4369_v10 = vsel %vm451_vm0, %v4273_v60, 0.0 }
 0x6ad   :  { %9886 = vst [vmem:[#allocation99_spill] sm:$0xff] %v8370_v20  ;;  %v4228_v24 = vmul.f32 %v8370_v20, %v9888_v0  ;;  %v9893_v0 = vld [vmem:[#allocation70_spill] sm:$0xff] }
 0x6ae   :  { %v3657_v60 = vperm.slane %v9893_v0, %v8347_v38 }
 0x6af   :  { %v8328_v8 = vpop.xlane.xlu0 %3876 }
 0x6b0   :  { %4352 = vadd.xlane.f32.xlu2 %v4351_v56  ;;  %v9876_v56 = vld [vmem:[#allocation111_spill] sm:$0xff] }
 0x6b1   :  { %v4272_v30 = vmul.f32 %v6113_v57, %v9876_v56  ;;  %v3592_v57 = vperm.slane %v9882_v29, %v8336_v45  ;;  %v9883_v56 = vld [vmem:[#allocation64_spill] sm:$0xff]  ;;  %v9887_v29 = vld [vmem:[#allocation35_spill] sm:$0xff] }
 0x6b2   :  { %v4060_v51 = vperm.slane %v9883_v56, %v8339_v23 }
 0x6b3   :  { %v8331_v42 = vpop.xlane.xlu2 %3969  ;;  %v4366_v3 = vsel %vm451_vm0, %v4272_v30, 0.0 }
 0x6b4   :  { %9873 = vst [vmem:[#allocation106_spill] sm:$0xff] %v8331_v42  ;;  %4400 = vadd.xlane.f32.xlu1 %v4399_v6  ;;  %4358 = vadd.xlane.f32.xlu0 %v4357_v2  ;;  %v9879_v6 = vld [vmem:[#allocation17_spill] sm:$0xff]  ;;  %v6117_v2 = vld [vmem:[#allocation4 + $0x110] sm:$0xff] }
 0x6b5   :  { %v4289_v40 = vmul.f32 %v6115_v28, %v9879_v6  ;;  %v9885_v28 = vld [vmem:[#allocation67_spill] sm:$0xff] }
 0x6b6   :  { %v8341_v22 = vpop.xlane.xlu1 %3422  ;;  %v3598_v6 = vperm.slane %v9885_v28, %v8347_v38 }
 0x6b7   :  { %v8349_v58 = vpop.xlane.xlu0 %3506  ;;  %v4417_v56 = vsel %vm451_vm0, %v4289_v40, 0.0  ;;  %v9891_v40 = vld [vmem:[#allocation66_spill] sm:$0xff] }
 0x6b8   :  { %4361 = vadd.xlane.f32.xlu2 %v4360_v62  ;;  %v9881_v62 = vld [vmem:[#allocation21_spill] sm:$0xff] }
 0x6b9   :  { %v4291_v41 = vmul.f32 %v6117_v2, %v9881_v62  ;;  %v4059_v2 = vperm.slane %v9887_v29, %v8336_v45  ;;  %v3596_v62 = vsel %vm3595_vm2, %v3594_v47, %v3592_v57  ;;  %v9890_v57 = vld [vmem:[#allocation60_spill] sm:$0xff] }
 0x6ba   :  { %v3600_v31 = vsel %vm3599_vm3, %v3598_v6, %v3596_v62  ;;  %v3654_v28 = vperm.slane %v9890_v57, %v8336_v45  ;;  %v9892_v29 = vld [vmem:[#allocation124_spill] sm:$0xff]  ;;  %v9895_v6 = vld [vmem:[#allocation63_spill] sm:$0xff]  ;;  %v4292_v57 = vmul.f32 %v6120_v53, %v4228_v24  ;;  %v9902_v53 = vld [vmem:[#allocation69_spill] sm:$0xff] }
 0x6bb   :  { %v8362_v54 = vpop.xlane.xlu2 %3410  ;;  %v4061_v35 = vsel %vm3595_vm2, %v4060_v51, %v4059_v2  ;;  %v8389_v47 = vsel %vm451_vm0, %v4291_v41, 0.0  ;;  %v6119_v51 = vld [vmem:[#allocation4 + $0x90] sm:$0xff]  ;;  %v3602_v62 = vperm.slane %v9895_v6, %v8376_v59  ;;  %v3605_v6 = vperm.slane %v9901_v43, %v8336_v45 }
 0x6bc   :  { %4409 = vadd.xlane.f32.xlu1 %v4408_v61  ;;  %4367 = vadd.xlane.f32.xlu0 %v4366_v3  ;;  %v8382_v61 = vsel %vm451_vm0, %v4290_v16, 0.0  ;;  %v3655_v3 = vperm.slane %v9891_v40, %v8339_v23  ;;  %v4275_v2 = vmul.f32 %v6119_v51, %v9892_v29  ;;  %v9894_v41 = vld [vmem:[#allocation62_spill] sm:$0xff]  ;;  %v4115_v40 = vperm.slane %v9896_v11, %v8336_v45  ;;  %v6121_v29 = vld [vmem:[#allocation4 + $0x120] sm:$0xff]  ;;  %v6122_v11 = vld [vmem:[#allocation4 + $0x98] sm:$0xff] }
 0x6bd   :  { %v4062_v20 = vperm.slane %v9894_v41, %v8347_v38  ;;  %v3606_v51 = vperm.slane %v9898_v33, %v8339_v23  ;;  %v4293_v0 = vmul.f32 %v6121_v29, %v9899_v27  ;;  %v4066_v41 = vperm.slane %v9900_v7, %v8336_v45  ;;  %v6123_v7 = vld [vmem:[#allocation4 + $0x130] sm:$0xff]  ;;  %v9905_v29 = vld [vmem:[#allocation37_spill] sm:$0xff] }
 0x6be   :  { %v8385_v30 = vpop.xlane.xlu1 %3891  ;;  %v4116_v24 = vperm.slane %v9902_v53, %v8339_v23  ;;  %v4067_v33 = vperm.slane %v9904_v34, %v8339_v23  ;;  %v3656_v55 = vsel %vm3595_vm2, %v3655_v3, %v3654_v28  ;;  %v4375_v27 = vsel %vm451_vm0, %v4275_v2, 0.0  ;;  %v9907_v34 = vld [vmem:[#allocation68_spill] sm:$0xff] }
 0x6bf   :  { %9889 = vst [vmem:[#allocation104_spill] sm:$0xff] %v8385_v30  ;;  %v8396_v16 = vpop.xlane.xlu0 %3416  ;;  %v4295_v32 = vmul.f32 %v6123_v7, %v9905_v29  ;;  %v4063_v43 = vsel %vm3599_vm3, %v4062_v20, %v4061_v35  ;;  %v3604_v53 = vsel %vm3603_vm4, %v3602_v62, %v3600_v31  ;;  %v4426_v15 = vsel %vm451_vm0, %v4292_v57, 0.0  ;;  %v9909_v31 = vld [vmem:[#allocation74_spill] sm:$0xff]  ;;  %v9911_v7 = vld [vmem:[#allocation83_spill] sm:$0xff] }
 0x6c0   :  { %4370 = vadd.xlane.f32.xlu2 %v4369_v10  ;;  %v9897_v10 = vld [vmem:[#allocation75_spill] sm:$0xff]  ;;  %v3659_v63 = vperm.slane %v9907_v34, %v8376_v59  ;;  %v3607_v3 = vsel %vm3595_vm2, %v3606_v51, %v3605_v6  ;;  %v8436_v2 = vsel %vm451_vm0, %v4293_v0, 0.0  ;;  %v3658_v20 = vsel %vm3599_vm3, %v3657_v60, %v3656_v55  ;;  %v6125_v0 = vld [vmem:[#allocation4 + $0xa8] sm:$0xff] }
 0x6c1   :  { %v4118_v39 = vperm.slane %v9897_v10, %v8347_v38  ;;  %v4276_v10 = vmul.f32 %v6122_v11, %v9903_v44  ;;  %v9906_v44 = vld [vmem:[#allocation39_spill] sm:$0xff]  ;;  %v4117_v35 = vsel %vm3595_vm2, %v4116_v24, %v4115_v40  ;;  %v4064_v62 = vperm.slane %v9909_v31, %v8376_v59  ;;  %v9913_v40 = vld [vmem:[#allocation54_spill] sm:$0xff] }
 0x6c2   :  { %v4296_v11 = vmul.f32 %v6124_v14, %v9906_v44  ;;  %v3608_v29 = vperm.slane %v9911_v7, %v8347_v38  ;;  %v9912_v6 = vld [vmem:[#allocation147_spill] sm:$0xff]  ;;  %v4435_v60 = vsel %vm451_vm0, %v4295_v32, 0.0  ;;  %6012 = vrcp.f32 %v9913_v40  ;;  %v9914_v24 = vld [vmem:[#allocation86_spill] sm:$0xff]  ;;  %v9919_v7 = vld [vmem:[#allocation113_spill] sm:$0xff] }
 0x6c3   :  { %v8418_v25 = vpop.xlane.xlu2 %3879  ;;  %v4378_v14 = vsel %vm451_vm0, %v4276_v10, 0.0  ;;  %v4278_v55 = vmul.f32 %v6125_v0, %v9912_v6  ;;  %v4069_v44 = vperm.slane %v9914_v24, %v8347_v38  ;;  %v9915_v10 = vld [vmem:[#allocation110_spill] sm:$0xff]  ;;  %v8464_v31 = vsel %vm3599_vm3, %v4118_v39, %v4117_v35  ;;  %v9920_v40 = vld [vmem:[#allocation79_spill] sm:$0xff] }
 0x6c4   :  { %4418 = vadd.xlane.f32.xlu1 %v4417_v56  ;;  %4376 = vadd.xlane.f32.xlu0 %v4375_v27  ;;  %v4068_v27 = vsel %vm3595_vm2, %v4067_v33, %v4066_v41  ;;  %v3610_v34 = vperm.slane %v9915_v10, %v8376_v59  ;;  %v8458_v41 = vsel %vm451_vm0, %v4296_v11, 0.0  ;;  %v8461_v33 = vsel %vm3603_vm4, %v3659_v63, %v3658_v20  ;;  %v9921_v11 = vld [vmem:[#allocation109_spill] sm:$0xff]  ;;  %v6126_v63 = vld [vmem:[#allocation4 + $0xb0] sm:$0xff]  ;;  %v9925_v56 = vld [vmem:[#allocation123_spill] sm:$0xff] }
 0x6c5   :  { %9916 = vst [vmem:[#allocation14_spill] sm:$0xff] %v8458_v41  ;;  %v4071_v0 = vperm.slane %v9919_v7, %v8376_v59  ;;  %v4065_v6 = vsel %vm3603_vm4, %v4064_v62, %v4063_v43  ;;  %v3661_v24 = vperm.slane %v9920_v40, %v8336_v45  ;;  %v4123_v10 = vperm.slane %v9921_v11, %v8339_v23  ;;  %v9922_v20 = vld [vmem:[#allocation149_spill] sm:$0xff]  ;;  %v9924_v62 = vld [vmem:[#allocation82_spill] sm:$0xff]  ;;  %v9945_v41 = vld [vmem:[#allocation135_spill] sm:$0xff] }
 0x6c6   :  { %v8442_v57 = vpop.xlane.xlu1 %3972  ;;  %9917 = vst [vmem:[#allocation23_spill] sm:$0xff] %v8464_v31  ;;  %v4279_v39 = vmul.f32 %v6126_v63, %v9922_v20  ;;  %v3609_v35 = vsel %vm3599_vm3, %v3608_v29, %v3607_v3  ;;  %v4384_v43 = vsel %vm451_vm0, %v4278_v55, 0.0  ;;  %v4122_v7 = vperm.slane %v9924_v62, %v8336_v45  ;;  %v9926_v63 = vld [vmem:[#allocation115_spill] sm:$0xff] }
 0x6c7   :  { %9910 = vst [vmem:[#allocation12_spill] sm:$0xff] %v8442_v57  ;;  %v8448_v51 = vpop.xlane.xlu0 %3885  ;;  %v4070_v40 = vsel %vm3599_vm3, %v4069_v44, %v4068_v27  ;;  %v3611_v11 = vsel %vm3603_vm4, %v3610_v34, %v3609_v35  ;;  %v4074_v31 = vperm.slane %v9925_v56, %v8339_v23  ;;  %v9927_v55 = vld [vmem:[#allocation119_spill] sm:$0xff]  ;;  %v9930_v56 = vld [vmem:[#allocation122_spill] sm:$0xff]  ;;  %v4078_v57 = vperm.slane %v9945_v41, %v8376_v59 }
 0x6c8   :  { %4379 = vadd.xlane.f32.xlu2 %v4378_v14  ;;  %v9918_v14 = vld [vmem:[#allocation108_spill] sm:$0xff]  ;;  %v4072_v29 = vsel %vm3603_vm4, %v4071_v0, %v4070_v40  ;;  %v3612_v20 = vperm.slane %v9927_v55, %v8336_v45  ;;  %v4124_v27 = vsel %vm3595_vm2, %v4123_v10, %v4122_v7  ;;  %v9929_v44 = vld [vmem:[#allocation87_spill] sm:$0xff]  ;;  %v4073_v35 = vperm.slane %v9930_v56, %v8336_v45  ;;  %v9934_v56 = vld [vmem:[#allocation114_spill] sm:$0xff] }
 0x6c9   :  { %v3662_v32 = vperm.slane %v9918_v14, %v8339_v23  ;;  %v9923_v14 = vld [vmem:[#allocation120_spill] sm:$0xff]  ;;  %v3666_v34 = vperm.slane %v9929_v44, %v8376_v59  ;;  %v3711_v0 = vsel %vm3710_vm5, %v3611_v11, %v3604_v53  ;;  %v4171_v44 = vsel %vm3710_vm5, %v4072_v29, %v4065_v6 }
 0x6ca   :  { %v3613_v50 = vperm.slane %v9923_v14, %v8339_v23  ;;  %v8494_v14 = vpop.eup %6012  ;;  %v6127_v10 = vld [vmem:[#allocation4 + $0xc0] sm:$0xff]  ;;  %v4075_v53 = vsel %vm3595_vm2, %v4074_v31, %v4073_v35 }
 0x6cb   :  { %v8475_v28 = vpop.xlane.xlu2 %3509  ;;  %v3663_v3 = vsel %vm3595_vm2, %v3662_v32, %v3661_v24  ;;  %9928 = vst [vmem:[#allocation145_spill] sm:$0xff] %v8494_v14  ;;  %v4387_v32 = vsel %vm451_vm0, %v4279_v39, 0.0  ;;  %v9932_v24 = vld [vmem:[#allocation91_spill] sm:$0xff]  ;;  %v9933_v7 = vld [vmem:[#allocation176_spill] sm:$0xff]  ;;  %v3668_v14 = vperm.slane %v9934_v56, %v8336_v45  ;;  %v9935_v39 = vld [vmem:[#allocation118_spill] sm:$0xff] }
 0x6cc   :  { %4427 = vadd.xlane.f32.xlu1 %v4426_v15  ;;  %4385 = vadd.xlane.f32.xlu0 %v4384_v43  ;;  %v3664_v15 = vperm.slane %v9926_v63, %v8347_v38  ;;  %v4127_v62 = vperm.slane %v9932_v24, %v8376_v59  ;;  %v3614_v40 = vsel %vm3595_vm2, %v3613_v50, %v3612_v20  ;;  %v9936_v50 = vld [vmem:[#allocation117_spill] sm:$0xff]  ;;  %v9939_v6 = vld [vmem:[#allocation116_spill] sm:$0xff] }
 0x6cd   :  { %v4281_v55 = vmul.f32 %v6127_v10, %v9933_v7  ;;  %v4125_v20 = vperm.slane %v9936_v50, %v8347_v38  ;;  %v9938_v10 = vld [vmem:[#allocation126_spill] sm:$0xff]  ;;  %v4129_v29 = vperm.slane %v9939_v6, %v8336_v45  ;;  %v9942_v50 = vld [vmem:[#allocation132_spill] sm:$0xff] }
 0x6ce   :  { %v8501_v43 = vpop.xlane.xlu1 %3981  ;;  %v3665_v11 = vsel %vm3599_vm3, %v3664_v15, %v3663_v3  ;;  %v3669_v7 = vperm.slane %v9938_v10, %v8339_v23  ;;  %v6128_v3 = vld [vmem:[#allocation4 + $0xc8] sm:$0xff]  ;;  %v9941_v15 = vld [vmem:[#allocation178_spill] sm:$0xff]  ;;  %v3617_v46 = vperm.slane %v9942_v50, %v8376_v59  ;;  %v9943_v10 = vld [vmem:[#allocation152_spill] sm:$0xff] }
 0x6cf   :  { %9931 = vst [vmem:[#allocation33_spill] sm:$0xff] %v8501_v43  ;;  %v8508_v63 = vpop.xlane.xlu0 %3515  ;;  %v3615_v43 = vperm.slane %v9935_v39, %v8347_v38  ;;  %v9940_v39 = vld [vmem:[#allocation128_spill] sm:$0xff]  ;;  %v4282_v35 = vmul.f32 %v6128_v3, %v9941_v15  ;;  %v3673_v36 = vperm.slane %v9943_v10, %v8376_v59  ;;  %v4393_v6 = vsel %vm451_vm0, %v4281_v55, 0.0  ;;  %v6129_v3 = vld [vmem:[#allocation4 + $0x150] sm:$0xff]  ;;  %v9946_v15 = vld [vmem:[#allocation71_spill] sm:$0xff] }
 0x6d0   :  { %4388 = vadd.xlane.f32.xlu2 %v4387_v32  ;;  %v9937_v32 = vld [vmem:[#allocation121_spill] sm:$0xff]  ;;  %v3671_v42 = vperm.slane %v9940_v39, %v8347_v38  ;;  %v8544_v50 = vmul.f32 %v6129_v3, %v9946_v15 }
 0x6d1   :  { %v4076_v24 = vperm.slane %v9937_v32, %v8347_v38  ;;  %v3616_v56 = vsel %vm3599_vm3, %v3615_v43, %v3614_v40  ;;  %v3667_v43 = vsel %vm3603_vm4, %v3666_v34, %v3665_v11  ;;  %v9944_v40 = vld [vmem:[#allocation129_spill] sm:$0xff]  ;;  %v9948_v11 = vld [vmem:[#allocation134_spill] sm:$0xff] }
 0x6d2   :  { %v4130_v39 = vperm.slane %v9944_v40, %v8339_v23  ;;  %9947 = vst [vmem:[#allocation36_spill] sm:$0xff] %v8544_v50  ;;  %v4132_v10 = vperm.slane %v9948_v11, %v8347_v38  ;;  %v9955_v11 = vld [vmem:[#allocation154_spill] sm:$0xff] }
 0x6d3   :  { %v8529_v31 = vpop.xlane.xlu2 %3419  ;;  %v4077_v32 = vsel %vm3599_vm3, %v4076_v24, %v4075_v53  ;;  %v4126_v53 = vsel %vm3599_vm3, %v4125_v20, %v4124_v27  ;;  %v3670_v24 = vsel %vm3595_vm2, %v3669_v7, %v3668_v14  ;;  %v9949_v27 = vld [vmem:[#allocation155_spill] sm:$0xff] }
 0x6d4   :  { %4436 = vadd.xlane.f32.xlu1 %v4435_v60  ;;  %4394 = vadd.xlane.f32.xlu0 %v4393_v6  ;;  %v3618_v60 = vsel %vm3603_vm4, %v3617_v46, %v3616_v56  ;;  %v4079_v34 = vsel %vm3603_vm4, %v4078_v57, %v4077_v32  ;;  %v3672_v55 = vsel %vm3599_vm3, %v3671_v42, %v3670_v24  ;;  %v4396_v6 = vsel %vm451_vm0, %v4282_v35, 0.0  ;;  %v9950_v14 = vld [vmem:[#allocation171_spill] sm:$0xff]  ;;  %v9951_v42 = vld [vmem:[#allocation189_spill] sm:$0xff]  ;;  %v9954_v24 = vld [vmem:[#allocation136_spill] sm:$0xff] }
 0x6d5   :  { %v3674_v40 = vsel %vm3603_vm4, %v3673_v36, %v3672_v55  ;;  %v3620_v20 = vperm.slane %v9949_v27, %v8339_v23  ;;  %v3676_v46 = vperm.slane %v9950_v14, %v8339_v23  ;;  %v6130_v57 = vld [vmem:[#allocation4 + $0xd8] sm:$0xff]  ;;  %v8565_v32 = vsel %vm3603_vm4, %v4127_v62, %v4126_v53  ;;  %v6131_v53 = vld [vmem:[#allocation4 + $0xe0] sm:$0xff] }
 0x6d6   :  { %v4284_v56 = vmul.f32 %v6130_v57, %v9951_v42  ;;  %9952 = vst [vmem:[#allocation173_spill] sm:$0xff] %v8565_v32  ;;  %v4131_v3 = vsel %vm3595_vm2, %v4130_v39, %v4129_v29  ;;  %v3724_v36 = vsel %vm3710_vm5, %v3667_v43, %v8461_v33  ;;  %v9953_v35 = vld [vmem:[#allocation159_spill] sm:$0xff]  ;;  %v3619_v55 = vperm.slane %v9954_v24, %v8336_v45  ;;  %v9959_v57 = vld [vmem:[#allocation208_spill] sm:$0xff] }
 0x6d7   :  { %v8553_v41 = vpop.xlane.xlu1 %3521  ;;  %v8561_v7 = vpop.xlane.xlu0 %3425  ;;  %v4081_v15 = vperm.slane %v9953_v35, %v8339_v23  ;;  %v3713_v27 = vsel %vm3712_vm6, %v3618_v60, %v3711_v0  ;;  %v8578_v14 = vsel %vm3712_vm6, %v4079_v34, %v4171_v44  ;;  %v8581_v62 = vsel %vm3599_vm3, %v4132_v10, %v4131_v3  ;;  %v9958_v33 = vld [vmem:[#allocation139_spill] sm:$0xff]  ;;  %v9961_v10 = vld [vmem:[#allocation162_spill] sm:$0xff] }
 0x6d8   :  { %4397 = vadd.xlane.f32.xlu2 %v4396_v6  ;;  %v3675_v6 = vperm.slane %v9955_v11, %v8336_v45  ;;  %9956 = vst [vmem:[#allocation47_spill] sm:$0xff] %v8578_v14  ;;  %v3725_v29 = vsel %vm3712_vm6, %v3674_v40, %v3724_v36  ;;  %v4080_v43 = vperm.slane %v9958_v33, %v8336_v45  ;;  %v4402_v60 = vsel %vm451_vm0, %v4284_v56, 0.0  ;;  %v9963_v11 = vld [vmem:[#allocation166_spill] sm:$0xff]  ;;  %v9966_v56 = vld [vmem:[#allocation169_spill] sm:$0xff] }
 0x6d9   :  { %9957 = vst [vmem:[#allocation51_spill] sm:$0xff] %v8581_v62  ;;  %v4285_v42 = vmul.f32 %v6131_v53, %v9959_v57  ;;  %v3621_v0 = vsel %vm3595_vm2, %v3620_v20, %v3619_v55  ;;  %v3678_v40 = vperm.slane %v9961_v10, %v8347_v38  ;;  %v3626_v33 = vperm.slane %v9963_v11, %v8336_v45  ;;  %v9964_v53 = vld [vmem:[#allocation160_spill] sm:$0xff]  ;;  %v9965_v20 = vld [vmem:[#allocation165_spill] sm:$0xff]  ;;  %v9968_v10 = vld [vmem:[#allocation175_spill] sm:$0xff] }
 0x6da   :  { %v3677_v44 = vsel %vm3595_vm2, %v3676_v46, %v3675_v6  ;;  %v4082_v34 = vsel %vm3595_vm2, %v4081_v15, %v4080_v43  ;;  %v3622_v57 = vperm.slane %v9964_v53, %v8347_v38  ;;  %v3680_v46 = vperm.slane %v9965_v20, %v8376_v59  ;;  %v9967_v15 = vld [vmem:[#allocation188_spill] sm:$0xff]  ;;  %v9969_v11 = vld [vmem:[#allocation209_spill] sm:$0xff]  ;;  %v9971_v20 = vld [vmem:[#allocation163_spill] sm:$0xff] }
 0x6db   :  { %v8586_v39 = vpop.xlane.xlu2 %3888  ;;  %v3627_v55 = vperm.slane %v9966_v56, %v8339_v23  ;;  %v3683_v6 = vperm.slane %v9967_v15, %v8339_v23  ;;  %v3679_v43 = vsel %vm3599_vm3, %v3678_v40, %v3677_v44  ;;  %v3624_v24 = vperm.slane %v9968_v10, %v8376_v59  ;;  %v9972_v56 = vld [vmem:[#allocation186_spill] sm:$0xff]  ;;  %v9973_v15 = vld [vmem:[#allocation193_spill] sm:$0xff] }
 0x6dc   :  { %4403 = vadd.xlane.f32.xlu0 %v4402_v60  ;;  %v3685_v60 = vperm.slane %v9969_v11, %v8347_v38  ;;  %v4405_v53 = vsel %vm451_vm0, %v4285_v42, 0.0  ;;  %v4083_v32 = vperm.slane %v9971_v20, %v8347_v38  ;;  %v3682_v50 = vperm.slane %v9972_v56, %v8336_v45  ;;  %v6132_v40 = vld [vmem:[#allocation4 + $0xf0] sm:$0xff]  ;;  %v9976_v11 = vld [vmem:[#allocation157_spill] sm:$0xff]  ;;  %v9977_v42 = vld [vmem:[#allocation168_spill] sm:$0xff] }
 0x6dd   :  { %v3629_v35 = vperm.slane %v9973_v15, %v8347_v38  ;;  %v9975_v10 = vld [vmem:[#allocation214_spill] sm:$0xff]  ;;  %v4087_v3 = vperm.slane %v9977_v42, %v8336_v45  ;;  %v9979_v56 = vld [vmem:[#allocation195_spill] sm:$0xff]  ;;  %v3623_v15 = vsel %vm3599_vm3, %v3622_v57, %v3621_v0 }
 0x6de   :  { %v4287_v62 = vmul.f32 %v6132_v40, %v9975_v10  ;;  %v9978_v20 = vld [vmem:[#allocation170_spill] sm:$0xff]  ;;  %v3631_v30 = vperm.slane %v9979_v56, %v8376_v59  ;;  %v3628_v40 = vsel %vm3595_vm2, %v3627_v55, %v3626_v33  ;;  %v3625_v10 = vsel %vm3603_vm4, %v3624_v24, %v3623_v15  ;;  %v9980_v57 = vld [vmem:[#allocation199_spill] sm:$0xff] }
 0x6df   :  { %v8614_v36 = vpop.xlane.xlu1 %3990  ;;  %v8623_v44 = vpop.xlane.xlu0 %3894  ;;  %v4088_v14 = vperm.slane %v9978_v20, %v8339_v23  ;;  %v4288_v20 = vmul.f32 %v9843_v26, %v8149_v52  ;;  %v8645_v56 = vsel %vm3599_vm3, %v4083_v32, %v4082_v34  ;;  %v3630_v0 = vsel %vm3599_vm3, %v3629_v35, %v3628_v40  ;;  %v9981_v52 = vld [vmem:[#allocation172_spill] sm:$0xff]  ;;  %v9982_v35 = vld [vmem:[#allocation179_spill] sm:$0xff]  ;;  %v9987_v40 = vld [vmem:[#allocation218_spill] sm:$0xff] }
 0x6e0   :  { %9970 = vst [vmem:[#allocation27_spill] sm:$0xff] %v8614_v36  ;;  %4406 = vadd.xlane.f32.xlu2 %v4405_v53  ;;  %v3681_v53 = vsel %vm3603_vm4, %v3680_v46, %v3679_v43  ;;  %v3687_v46 = vperm.slane %v9980_v57, %v8376_v59  ;;  %v3632_v24 = vsel %vm3603_vm4, %v3631_v30, %v3630_v0 }
 0x6e1   :  { %9974 = vst [vmem:[#allocation181_spill] sm:$0xff] %v8623_v44  ;;  %v3684_v44 = vsel %vm3595_vm2, %v3683_v6, %v3682_v50  ;;  %v4411_v50 = vsel %vm451_vm0, %v4287_v62, 0.0  ;;  %v8652_v33 = vsel %vm3595_vm2, %v4088_v14, %v4087_v3  ;;  %v3726_v55 = vsel %vm3714_vm7, %v3681_v53, %v3725_v29  ;;  %v9983_v62 = vld [vmem:[#allocation196_spill] sm:$0xff] }
 0x6e2   :  { %v3686_v36 = vsel %vm3599_vm3, %v3685_v60, %v3684_v44  ;;  %v4137_v26 = vperm.slane %v9981_v52, %v8339_v23  ;;  %v3715_v32 = vsel %vm3714_vm7, %v3625_v10, %v3713_v27  ;;  %v4085_v34 = vperm.slane %v9982_v35, %v8376_v59  ;;  %v9984_v27 = vld [vmem:[#allocation197_spill] sm:$0xff] }
 0x6e3   :  { %v8640_v42 = vpop.xlane.xlu2 %3978  ;;  %v3688_v6 = vsel %vm3603_vm4, %v3687_v46, %v3686_v36  ;;  %v4090_v14 = vperm.slane %v9983_v62, %v8347_v38  ;;  %v3690_v3 = vperm.slane %v8188_v17, %v8339_v23  ;;  %v3634_v30 = vperm.slane %v8264_v4, %v8339_v23  ;;  %v9985_v44 = vld [vmem:[#allocation201_spill] sm:$0xff]  ;;  %v9986_v17 = vld [vmem:[#allocation206_spill] sm:$0xff]  ;;  %v9988_v46 = vld [vmem:[#allocation207_spill] sm:$0xff] }
 0x6e4   :  { %4412 = vadd.xlane.f32.xlu0 %v4411_v50  ;;  %v4414_v29 = vsel %vm451_vm0, %v4288_v20, 0.0  ;;  %v8670_v43 = vsel %vm3716_vm8, %v3632_v24, %v3715_v32  ;;  %v4092_v60 = vperm.slane %v9984_v27, %v8376_v59  ;;  %v3689_v36 = vperm.slane %v9985_v44, %v8336_v45  ;;  %v9995_v27 = vld [vmem:[#allocation190_spill] sm:$0xff] }
 0x6e5   :  { %v3697_v15 = vperm.slane %v8349_v58, %v8339_v23  ;;  %v3636_v4 = vperm.slane %v9986_v17, %v8347_v38  ;;  %v3633_v10 = vperm.slane %v9987_v40, %v8336_v45  ;;  %v3699_v20 = vperm.slane %v8475_v28, %v8347_v38 }
 0x6e6   :  { %v3727_v57 = vsel %vm3716_vm8, %v3688_v6, %v3726_v55  ;;  %v4097_v50 = vperm.slane %v9988_v46, %v8347_v38  ;;  %v4094_v58 = vperm.slane %v8142_v1, %v8336_v45  ;;  %v3696_v24 = vperm.slane %v8284_v13, %v8336_v45 }
 0x6e7   :  { %v8678_v53 = vpop.xlane.xlu0 %3975  ;;  %v8686_v0 = vpop.xlane.xlu1 %4328  ;;  %v3692_v32 = vperm.slane %v8296_v9, %v8347_v38  ;;  %v3635_v28 = vsel %vm3595_vm2, %v3634_v30, %v3633_v10  ;;  %v3694_v44 = vperm.slane %v8318_v48, %v8376_v59  ;;  %v3641_v55 = vperm.slane %v8362_v54, %v8339_v23 }
 0x6e8   :  { %4415 = vadd.xlane.f32.xlu2 %v4414_v29  ;;  %v3691_v29 = vsel %vm3595_vm2, %v3690_v3, %v3689_v36  ;;  %v3638_v1 = vperm.slane %v8242_v49, %v8376_v59  ;;  %v3701_v13 = vperm.slane %v8323_v5, %v8376_v59  ;;  %v3698_v17 = vsel %vm3595_vm2, %v3697_v15, %v3696_v24 }
 0x6e9   :  { %v3643_v3 = vperm.slane %v8298_v19, %v8347_v38  ;;  %v3640_v48 = vperm.slane %v8315_v37, %v8336_v45  ;;  %v3700_v30 = vsel %vm3599_vm3, %v3699_v20, %v3698_v17  ;;  %v3703_v54 = vperm.slane %v8508_v63, %v8336_v45 }
 0x6ea   :  { %v3637_v49 = vsel %vm3599_vm3, %v3636_v4, %v3635_v28  ;;  %v3693_v5 = vsel %vm3599_vm3, %v3692_v32, %v3691_v29  ;;  %v3706_v36 = vperm.slane %v8553_v41, %v8347_v38  ;;  %v3645_v37 = vperm.slane %v8396_v16, %v8376_v59 }
 0x6eb   :  { %v3519_v6 = vpop.xlane.xlu2 %3518  ;;  %v3695_v19 = vsel %vm3603_vm4, %v3694_v44, %v3693_v5  ;;  %v3642_v15 = vsel %vm3595_vm2, %v3641_v55, %v3640_v48  ;;  %v3648_v63 = vperm.slane %v8341_v22, %v8339_v23  ;;  %v3647_v4 = vperm.slane %v8529_v31, %v8336_v45  ;;  %v9989_v48 = vld [vmem:[#allocation167_spill] sm:$0xff] }
 0x6ec   :  { %v3704_v9 = vperm.slane %v3519_v6, %v8339_v23  ;;  %4421 = vadd.xlane.f32.xlu0 %v8382_v61  ;;  %v4095_v61 = vperm.slane %v8281_v12, %v8339_v23  ;;  %v3702_v10 = vsel %vm3603_vm4, %v3701_v13, %v3700_v30  ;;  %v3650_v20 = vperm.slane %v8561_v7, %v8347_v38 }
 0x6ed   :  { %v3639_v46 = vsel %vm3603_vm4, %v3638_v1, %v3637_v49  ;;  %v3644_v12 = vsel %vm3599_vm3, %v3643_v3, %v3642_v15  ;;  %v3728_v31 = vsel %vm9620_vm9, %v3695_v19, %v3727_v57  ;;  %v4102_v24 = vperm.slane %v8418_v25, %v8339_v23  ;;  %v9992_v49 = vld [vmem:[#allocation192_spill] sm:$0xff] }
 0x6ee   :  { %v3705_v40 = vsel %vm3595_vm2, %v3704_v9, %v3703_v54  ;;  %v3729_v28 = vsel %vm9619_vm11, %v3702_v10, %v3728_v31  ;;  %v4096_v44 = vsel %vm3595_vm2, %v4095_v61, %v4094_v58  ;;  %v3649_v55 = vsel %vm3595_vm2, %v3648_v63, %v3647_v4  ;;  %v9996_v4 = vld [vmem:[#allocation212_spill] sm:$0xff] }
 0x6ef   :  { %v3525_v41 = vpop.xlane.xlu0 %3524  ;;  %v3707_v22 = vsel %vm3599_vm3, %v3706_v36, %v3705_v40  ;;  %v8744_v32 = vpop.xlane.xlu1 %4337  ;;  %v4101_v1 = vperm.slane %v8328_v8, %v8336_v45  ;;  %v3651_v25 = vsel %vm3599_vm3, %v3650_v20, %v3649_v55  ;;  %v3719_v17 = vsel %vm9620_vm9, %v3639_v46, %v8670_v43  ;;  %v9993_v36 = vld [vmem:[#allocation104_spill] sm:$0xff] }
 0x6f0   :  { %4424 = vadd.xlane.f32.xlu2 %v8389_v47  ;;  %v3708_v16 = vperm.slane %v3525_v41, %v8376_v59  ;;  %v3646_v47 = vsel %vm3603_vm4, %v3645_v37, %v3644_v12  ;;  %v4086_v58 = vsel %vm3603_vm4, %v4085_v34, %v8645_v56  ;;  %v4091_v8 = vsel %vm3599_vm3, %v4090_v14, %v8652_v33 }
 0x6f1   :  { %v3721_v9 = vsel %vm9619_vm11, %v3646_v47, %v3719_v17  ;;  %v4098_v3 = vsel %vm3599_vm3, %v4097_v50, %v4096_v44  ;;  %v4103_v43 = vsel %vm3595_vm2, %v4102_v24, %v4101_v1  ;;  %v4106_v35 = vperm.slane %v8448_v51, %v8376_v59  ;;  %v10000_v24 = vld [vmem:[#allocation14_spill] sm:$0xff] }
 0x6f2   :  { %v3709_v29 = vsel %vm3603_vm4, %v3708_v16, %v3707_v22  ;;  %v4099_v34 = vperm.slane %v8261_v21, %v8376_v59  ;;  %v4104_v33 = vperm.slane %v8311_v18, %v8347_v38  ;;  %v4108_v62 = vperm.slane %v8586_v39, %v8336_v45  ;;  %v9991_v39 = vld [vmem:[#allocation181_spill] sm:$0xff]  ;;  %v9997_v16 = vld [vmem:[#allocation164_spill] sm:$0xff] }
 0x6f3   :  { %v3429_v7 = vpop.xlane.xlu2 %3428  ;;  %v3730_v57 = vsel %vm9618_vm10, %v3709_v29, %v3729_v28  ;;  %v4141_v30 = vperm.slane %v9989_v48, %v8376_v59  ;;  %v9990_v51 = vperm.slane %v9976_v11, %v8336_v45  ;;  %v4093_v18 = vsel %vm3603_vm4, %v4092_v60, %v4091_v8  ;;  %v9999_v22 = vld [vmem:[#allocation12_spill] sm:$0xff]  ;;  %v10001_v28 = vld [vmem:[#allocation57_spill] sm:$0xff] }
 0x6f4   :  { %v3652_v6 = vperm.slane %v3429_v7, %v8376_v59  ;;  %4430 = vadd.xlane.f32.xlu0 %v8436_v2  ;;  %v3736_v13 = vsel %vm451_vm0, %v3730_v57, 0.0  ;;  %v4111_v54 = vperm.slane %v9991_v39, %v8347_v38  ;;  %v4144_v5 = vperm.slane %v9992_v49, %v8339_v23  ;;  %v10002_v57 = vld [vmem:[#allocation204_spill] sm:$0xff]  ;;  %v10009_v48 = vld [vmem:[#allocation153_spill] sm:$0xff] }
 0x6f5   :  { %3737 = vadd.xlane.f32.xlu1 %v3736_v13  ;;  %v4138_v21 = vsel %vm3595_vm2, %v4137_v26, %v9990_v51  ;;  %v4109_v11 = vperm.slane %v9993_v36, %v8339_v23  ;;  %v4105_v19 = vsel %vm3599_vm3, %v4104_v33, %v4103_v43  ;;  %v4100_v52 = vsel %vm3603_vm4, %v4099_v34, %v4098_v3  ;;  %v9994_v26 = vld [vmem:[#allocation47_spill] sm:$0xff]  ;;  %v10006_v34 = vld [vmem:[#allocation73_spill] sm:$0xff] }
 0x6f6   :  { %v3653_v2 = vsel %vm3603_vm4, %v3652_v6, %v3651_v25  ;;  %v4173_v15 = vsel %vm3714_vm7, %v4086_v58, %v9994_v26  ;;  %v4143_v60 = vperm.slane %v9995_v27, %v8336_v45  ;;  %v4107_v37 = vsel %vm3603_vm4, %v4106_v35, %v4105_v19  ;;  %v10003_v25 = vld [vmem:[#allocation55_spill] sm:$0xff]  ;;  %v10013_v19 = vld [vmem:[#allocation36_spill] sm:$0xff]  ;;  %v10014_v26 = vld [vmem:[#allocation173_spill] sm:$0xff] }
 0x6f7   :  { %v3723_v56 = vsel %vm9618_vm10, %v3653_v2, %v3721_v9  ;;  %v8782_v14 = vpop.xlane.xlu0 %3984  ;;  %v4158_v40 = vperm.slane %v8678_v53, %v8339_v23  ;;  %v4174_v63 = vsel %vm3716_vm8, %v4093_v18, %v4173_v15  ;;  %v4146_v41 = vperm.slane %v9996_v4, %v8347_v38  ;;  %v8825_v47 = vpop.xlane.xlu1 %4346  ;;  %v10004_v2 = vld [vmem:[#allocation106_spill] sm:$0xff] }
 0x6f8   :  { %v3733_v50 = vsel %vm451_vm0, %v3723_v56, 0.0  ;;  %v4110_v10 = vsel %vm3595_vm2, %v4109_v11, %v4108_v62  ;;  %v9998_v46 = vperm.slane %v9997_v16, %v8347_v38  ;;  %v4157_v31 = vperm.slane %v9999_v22, %v8336_v45  ;;  %v10005_v56 = vld [vmem:[#allocation23_spill] sm:$0xff]  ;;  %v10011_v18 = vld [vmem:[#allocation202_spill] sm:$0xff]  ;;  %v10018_v22 = vld [vmem:[#allocation145_spill] sm:$0xff] }
 0x6f9   :  { %3734 = vadd.xlane.f32.xlu2 %v3733_v50  ;;  %v4112_v53 = vsel %vm3599_vm3, %v4111_v54, %v4110_v10  ;;  %v4175_v7 = vsel %vm9620_vm9, %v4100_v52, %v4174_v63  ;;  %v4145_v29 = vsel %vm3595_vm2, %v4144_v5, %v4143_v60  ;;  %v4151_v44 = vperm.slane %v10001_v28, %v8339_v23  ;;  %v10008_v50 = vld [vmem:[#allocation51_spill] sm:$0xff]  ;;  %v10012_v54 = vld [vmem:[#allocation34_spill] sm:$0xff] }
 0x6fa   :  { %v4140_v12 = vsel %vm3599_vm3, %v9998_v46, %v4138_v21  ;;  %v4176_v6 = vsel %vm9619_vm11, %v4107_v37, %v4175_v7  ;;  %v4150_v1 = vperm.slane %v10002_v57, %v8336_v45  ;;  %v4153_v13 = vperm.slane %v10003_v25, %v8347_v38  ;;  %v10015_v37 = vld [vmem:[#allocation33_spill] sm:$0xff]  ;;  %v10016_v10 = vld [vmem:[#allocation27_spill] sm:$0xff] }
 0x6fb   :  { %v3898_v61 = vpop.xlane.xlu2 %3897  ;;  %v4159_v17 = vsel %vm3595_vm2, %v4158_v40, %v4157_v31  ;;  %v4147_v8 = vsel %vm3599_vm3, %v4146_v41, %v4145_v29  ;;  %v4155_v9 = vperm.slane %v10004_v2, %v8376_v59  ;;  %v4160_v3 = vperm.slane %v8640_v42, %v8347_v38  ;;  %v6133_v42 = vld [vmem:[#allocation4 + $0x128] sm:$0xff] }
 0x6fc   :  { %v4113_v20 = vperm.slane %v3898_v61, %v8376_v59  ;;  %4439 = vadd.xlane.f32.xlu0 %v10000_v24  ;;  %v10007_v33 = vperm.slane %v10006_v34, %v8376_v59  ;;  %v10010_v51 = vperm.slane %v10009_v48, %v8376_v59  ;;  %v4148_v39 = vperm.slane %v10011_v18, %v8376_v59  ;;  %v6135_v25 = vld [vmem:[#allocation4 + $0x168] sm:$0xff] }
 0x6fd   :  { %v4294_v49 = vmul.f32 %v6133_v42, %v10012_v54  ;;  %v4142_v5 = vsel %vm3603_vm4, %v4141_v30, %v4140_v12  ;;  %v4152_v36 = vsel %vm3595_vm2, %v4151_v44, %v4150_v1  ;;  %v4161_v11 = vsel %vm3599_vm3, %v4160_v3, %v4159_v17  ;;  %v10017_v12 = vld [vmem:[#allocation53_spill] sm:$0xff] }
 0x6fe   :  { %v4114_v55 = vsel %vm3603_vm4, %v4113_v20, %v4112_v53  ;;  %v4121_v62 = vsel %vm3603_vm4, %v10007_v33, %v10005_v56  ;;  %v4135_v21 = vsel %vm3603_vm4, %v10010_v51, %v10008_v50  ;;  %v4447_v52 = vsel %vm451_vm0, %v10013_v19, 0.0  ;;  %v10021_v56 = vld [vmem:[#allocation44_spill] sm:$0xff]  ;;  %v10022_v33 = vld [vmem:[#allocation103_spill] sm:$0xff]  ;;  %v8907_v18 = vld [vmem:[#allocation4 + $0x148] sm:$0xff] }
 0x6ff   :  { %v4177_v58 = vsel %vm9618_vm10, %v4114_v55, %v4176_v6  ;;  %v3994_v43 = vpop.xlane.xlu0 %3993  ;;  %v4178_v15 = vsel %vm3710_vm5, %v10014_v26, %v4121_v62  ;;  %v4149_v27 = vsel %vm3603_vm4, %v4148_v39, %v4147_v8  ;;  %v4154_v60 = vsel %vm3599_vm3, %v4153_v13, %v4152_v36  ;;  %v8884_v29 = vpop.xlane.xlu1 %4355  ;;  %v10019_v13 = vld [vmem:[#allocation92_spill] sm:$0xff]  ;;  %v10023_v36 = vld [vmem:[#allocation131_spill] sm:$0xff] }
 0x700   :  { %v4187_v35 = vsel %vm451_vm0, %v4177_v58, 0.0  ;;  %v4162_v40 = vperm.slane %v10015_v37, %v8376_v59  ;;  %v4179_v30 = vsel %vm3712_vm6, %v4135_v21, %v4178_v15  ;;  %v4156_v63 = vsel %vm3603_vm4, %v4155_v9, %v4154_v60  ;;  %v10020_v9 = vld [vmem:[#allocation56_spill] sm:$0xff] }
 0x701   :  { %4188 = vadd.xlane.f32.xlu2 %v4187_v35  ;;  %v4164_v4 = vperm.slane %v8782_v14, %v8336_v45  ;;  %v4167_v20 = vperm.slane %v10016_v10, %v8347_v38  ;;  %v4180_v46 = vsel %vm3714_vm7, %v4142_v5, %v4179_v30  ;;  %v3247_v31 = vmul.f32 %v10018_v22, %v10017_v12  ;;  %v6134_v14 = vld [vmem:[#allocation2 + $0x148] sm:$0xff]  ;;  %v6136_v35 = vld [vmem:[#allocation4 + $0x140] sm:$0xff]  ;;  %v6141_v12 = vld [vmem:[#allocation2 + $0x178] sm:$0xff] }
 0x702   :  { %v4163_v16 = vsel %vm3603_vm4, %v4162_v40, %v4161_v11  ;;  %v4169_v53 = vperm.slane %v3994_v43, %v8376_v59  ;;  %v4181_v7 = vsel %vm3716_vm8, %v4149_v27, %v4180_v46  ;;  %vm3183_vm12 = vcmp.ge.f32.partialorder %v6134_v14, 0.0  ;;  %v6138_v5 = vld [vmem:[#allocation4 + $0x180] sm:$0xff] }
 0x703   :  { %v3988_v61 = vpop.xlane.xlu2 %3987  ;;  %v4182_v44 = vsel %vm9620_vm9, %v4156_v63, %v4181_v7  ;;  %v4432_v6 = vsel %vm451_vm0, %v4294_v49, 0.0  ;;  %v4302_v17 = vmul.f32 %v6135_v25, %v10019_v13  ;;  %v8894_v8 = vsel %vm3183_vm12, %v10018_v22, %v3247_v31  ;;  %v10024_v30 = vld [vmem:[#allocation76_spill] sm:$0xff]  ;;  %v6142_v31 = vld [vmem:[#allocation4 + $0x198] sm:$0xff] }
 0x704   :  { %v4165_v41 = vperm.slane %v3988_v61, %v8339_v23  ;;  %4448 = vadd.xlane.f32.xlu0 %v4447_v52  ;;  %v4183_v1 = vsel %vm9619_vm11, %v4163_v16, %v4182_v44  ;;  %v4234_v3 = vmul.f32 %v8894_v8, %v10020_v9  ;;  %v4297_v34 = vmul.f32 %v6136_v35, %v10021_v56  ;;  %v6139_v61 = vld [vmem:[#allocation4 + $0x158] sm:$0xff]  ;;  %v10026_v16 = vld [vmem:[#allocation89_spill] sm:$0xff] }
 0x705   :  { %6014 = vrcp.f32 %v10022_v33  ;;  %v4456_v48 = vsel %vm451_vm0, %v4302_v17, 0.0  ;;  %v4580_v51 = vperm.slane %v8686_v0, %v8347_v38  ;;  %v4305_v11 = vmul.f32 %v6138_v5, %v10023_v36  ;;  %v10028_v44 = vld [vmem:[#allocation105_spill] sm:$0xff]  ;;  %v6143_v17 = vld [vmem:[#allocation4 + $0x170] sm:$0xff]  ;;  %v8942_v35 = vld [vmem:[#allocation4 + $0x178] sm:$0xff] }
 0x706   :  { %v4166_v24 = vsel %vm3595_vm2, %v4165_v41, %v4164_v4  ;;  %v4298_v39 = vmul.f32 %v8907_v18, %v4234_v3  ;;  %v4441_v49 = vsel %vm451_vm0, %v4297_v34, 0.0  ;;  %v4585_v60 = vperm.slane %v8744_v32, %v8339_v23  ;;  %v10025_v4 = vld [vmem:[#allocation101_spill] sm:$0xff] }
 0x707   :  { %v4168_v28 = vsel %vm3599_vm3, %v4167_v20, %v4166_v24  ;;  %v4323_v55 = vpop.xlane.xlu0 %4322  ;;  %v8913_v19 = vpop.xlane.xlu1 %4364  ;;  %v4465_v40 = vsel %vm451_vm0, %v4305_v11, 0.0  ;;  %v4300_v63 = vmul.f32 %v6139_v61, %v10024_v30  ;;  %v6140_v20 = vld [vmem:[#allocation4 + $0x160] sm:$0xff]  ;;  %vm3189_vm13 = vcmp.ge.f32.partialorder %v6141_v12, 0.0  ;;  %v10032_v5 = vld [vmem:[#allocation137_spill] sm:$0xff]  ;;  %v10035_v30 = vld [vmem:[#allocation203_spill] sm:$0xff] }
 0x708   :  { %v4170_v57 = vsel %vm3603_vm4, %v4169_v53, %v4168_v28  ;;  %v4577_v62 = vperm.slane %v4323_v55, %v8336_v45  ;;  %v4444_v26 = vsel %vm451_vm0, %v4298_v39, 0.0  ;;  %v4301_v46 = vmul.f32 %v6140_v20, %v10026_v16  ;;  %v10027_v53 = vld [vmem:[#allocation142_spill] sm:$0xff]  ;;  %v6149_v61 = vld [vmem:[#allocation4 + $0x1c8] sm:$0xff]  ;;  %v6150_v12 = vld [vmem:[#allocation4 + $0x1a0] sm:$0xff] }
 0x709   :  { %4433 = vadd.xlane.f32.xlu2 %v4432_v6  ;;  %v4184_v58 = vsel %vm9618_vm10, %v4170_v57, %v4183_v1  ;;  %v4450_v32 = vsel %vm451_vm0, %v4300_v63, 0.0  ;;  %v4308_v24 = vmul.f32 %v6142_v31, %v10027_v53  ;;  %v10029_v1 = vld [vmem:[#allocation158_spill] sm:$0xff]  ;;  %v4314_v63 = vmul.f32 %v6149_v61, %v10035_v30  ;;  %v8974_v31 = vld [vmem:[#allocation4 + $0x1a8] sm:$0xff]  ;;  %v9006_v30 = vld [vmem:[#allocation4 + $0x1d8] sm:$0xff] }
 0x70a   :  { %v4190_v2 = vsel %vm451_vm0, %v4184_v58, 0.0  ;;  %v4453_v28 = vsel %vm451_vm0, %v4301_v46, 0.0  ;;  %6016 = vrcp.f32 %v10029_v1  ;;  %v10030_v58 = vld [vmem:[#allocation94_spill] sm:$0xff] }
 0x70b   :  { %v4326_v43 = vpop.xlane.xlu2 %4325  ;;  %4191 = vadd.xlane.f32.xlu1 %v4190_v2  ;;  %v6015_v0 = vpop.eup %6014  ;;  %v4474_v13 = vsel %vm451_vm0, %v4308_v24, 0.0  ;;  %v4303_v2 = vmul.f32 %v6143_v17, %v10030_v58  ;;  %v4492_v46 = vsel %vm451_vm0, %v4314_v63, 0.0  ;;  %v10040_v17 = vld [vmem:[#allocation200_spill] sm:$0xff] }
 0x70c   :  { %v4578_v50 = vperm.slane %v4326_v43, %v8339_v23  ;;  %4457 = vadd.xlane.f32.xlu0 %v4456_v48  ;;  %v3253_v41 = vmul.f32 %v6015_v0, %v10025_v4  ;;  %v10031_v48 = vld [vmem:[#allocation177_spill] sm:$0xff] }
 0x70e   :  { %v4579_v21 = vsel %vm3595_vm2, %v4578_v50, %v4577_v62  ;;  %v8929_v14 = vsel %vm3189_vm13, %v6015_v0, %v3253_v41  ;;  %v4459_v62 = vsel %vm451_vm0, %v4303_v2, 0.0  ;;  %v6145_v50 = vld [vmem:[#allocation4 + $0x1b0] sm:$0xff] }
 0x70f   :  { %v4581_v42 = vsel %vm3599_vm3, %v4580_v51, %v4579_v21  ;;  %v4332_v54 = vpop.xlane.xlu0 %4331  ;;  %v4240_v55 = vmul.f32 %v8929_v14, %v10028_v44  ;;  %v8934_v6 = vpop.xlane.xlu1 %4373  ;;  %v4311_v51 = vmul.f32 %v6145_v50, %v10031_v48  ;;  %v8990_v50 = vld [vmem:[#allocation4 + $0x1c0] sm:$0xff] }
 0x710   :  { %v4582_v52 = vperm.slane %v4332_v54, %v8376_v59  ;;  %v6017_v21 = vpop.eup %6016 }
 0x711   :  { %4442 = vadd.xlane.f32.xlu2 %v4441_v49  ;;  %v4304_v56 = vmul.f32 %v8942_v35, %v4240_v55  ;;  %v4483_v54 = vsel %vm451_vm0, %v4311_v51, 0.0  ;;  %v6146_v49 = vld [vmem:[#allocation4 + $0x188] sm:$0xff]  ;;  %v6152_v55 = vld [vmem:[#allocation4 + $0x1e0] sm:$0xff] }
 0x712   :  { %v4583_v15 = vsel %vm3603_vm4, %v4582_v52, %v4581_v42  ;;  %v4306_v36 = vmul.f32 %v6146_v49, %v10032_v5  ;;  %v10033_v52 = vld [vmem:[#allocation156_spill] sm:$0xff] }
 0x713   :  { %v4335_v27 = vpop.xlane.xlu2 %4334  ;;  %4445 = vadd.xlane.f32.xlu1 %v4444_v26  ;;  %v4462_v39 = vsel %vm451_vm0, %v4304_v56, 0.0  ;;  %v3259_v0 = vmul.f32 %v6017_v21, %v10033_v52  ;;  %v6147_v26 = vld [vmem:[#allocation4 + $0x190] sm:$0xff]  ;;  %v10041_v56 = vld [vmem:[#allocation180_spill] sm:$0xff] }
 0x714   :  { %v4584_v37 = vperm.slane %v4335_v27, %v8336_v45  ;;  %4466 = vadd.xlane.f32.xlu0 %v4465_v40  ;;  %v4468_v40 = vsel %vm451_vm0, %v4306_v36, 0.0  ;;  %v10043_v52 = vld [vmem:[#allocation198_spill] sm:$0xff] }
 0x716   :  { %v4586_v10 = vsel %vm3595_vm2, %v4585_v60, %v4584_v37  ;;  %v6148_v60 = vld [vmem:[#allocation2 + $0x1a8] sm:$0xff] }
 0x717   :  { %v4341_v22 = vpop.xlane.xlu0 %4340  ;;  %v8957_v11 = vpop.xlane.xlu1 %4382  ;;  %vm3195_vm14 = vcmp.ge.f32.partialorder %v6148_v60, 0.0  ;;  %v6156_v60 = vld [vmem:[#allocation4 + $0x1d0] sm:$0xff] }
 0x718   :  { %v4587_v7 = vperm.slane %v4341_v22, %v8347_v38  ;;  %v8965_v4 = vsel %vm3195_vm14, %v6017_v21, %v3259_v0  ;;  %v10037_v22 = vld [vmem:[#allocation144_spill] sm:$0xff]  ;;  %v10044_v0 = vld [vmem:[#allocation215_spill] sm:$0xff] }
 0x719   :  { %4451 = vadd.xlane.f32.xlu2 %v4450_v32  ;;  %v4309_v32 = vmul.f32 %v6150_v12, %v10037_v22 }
 0x71a   :  { %v4588_v3 = vsel %vm3599_vm3, %v4587_v7, %v4586_v10  ;;  %v10036_v10 = vld [vmem:[#allocation161_spill] sm:$0xff] }
 0x71b   :  { %v4344_v57 = vpop.xlane.xlu2 %4343  ;;  %4454 = vadd.xlane.f32.xlu1 %v4453_v28  ;;  %v4246_v20 = vmul.f32 %v8965_v4, %v10036_v10  ;;  %v4477_v28 = vsel %vm451_vm0, %v4309_v32, 0.0  ;;  %v10046_v32 = vld [vmem:[#allocation13_spill] sm:$0xff] }
 0x71c   :  { %v4589_v25 = vperm.slane %v4344_v57, %v8376_v59  ;;  %4475 = vadd.xlane.f32.xlu0 %v4474_v13  ;;  %v10038_v57 = vld [vmem:[#allocation217_spill] sm:$0xff]  ;;  %v10039_v13 = vld [vmem:[#allocation174_spill] sm:$0xff] }
 0x71d   :  { %v4310_v53 = vmul.f32 %v8974_v31, %v4246_v20  ;;  %v4317_v1 = vmul.f32 %v6152_v55, %v10038_v57  ;;  %v4249_v58 = vmul.f32 %v10040_v17, %v10039_v13  ;;  %v10047_v55 = vld [vmem:[#allocation220_spill] sm:$0xff] }
 0x71e   :  { %v4590_v43 = vsel %vm3603_vm4, %v4589_v25, %v4588_v3 }
 0x71f   :  { %v8946_v34 = vsel %vm3710_vm5, %v4590_v43, %v4583_v15  ;;  %v8948_v33 = vpop.xlane.xlu0 %4349  ;;  %v10034_v15 = vld [vmem:[#allocation140_spill] sm:$0xff]  ;;  %v8977_v24 = vpop.xlane.xlu1 %4391  ;;  %v4480_v25 = vsel %vm451_vm0, %v4310_v53, 0.0  ;;  %v4501_v3 = vsel %vm451_vm0, %v4317_v1, 0.0  ;;  %v6153_v43 = vld [vmem:[#allocation4 + $0x1b8] sm:$0xff]  ;;  %v4313_v48 = vmul.f32 %v8990_v50, %v4249_v58 }
 0x720   :  { %v4307_v27 = vmul.f32 %v6147_v26, %v10034_v15  ;;  %v4252_v26 = vmul.f32 %v10044_v0, %v10043_v52  ;;  %v4839_v53 = vsel %vm451_vm0, %v10046_v32, 0.0  ;;  %v6159_v1 = vld [vmem:[#allocation4 + $0x18] sm:$0xff] }
 0x721   :  { %4460 = vadd.xlane.f32.xlu2 %v4459_v62  ;;  %v4312_v62 = vmul.f32 %v6153_v43, %v10041_v56  ;;  %v4489_v36 = vsel %vm451_vm0, %v4313_v48, 0.0  ;;  %v10049_v43 = vld [vmem:[#allocation221_spill] sm:$0xff] }
 0x722   :  { %v4471_v41 = vsel %vm451_vm0, %v4307_v27, 0.0  ;;  %v4316_v63 = vmul.f32 %v9006_v30, %v4252_v26  ;;  %v4592_v26 = vperm.slane %v8948_v33, %v8339_v23  ;;  %v4596_v33 = vperm.slane %v8884_v29, %v8376_v59 }
 0x723   :  { %v8953_v42 = vpop.xlane.xlu2 %4352  ;;  %4463 = vadd.xlane.f32.xlu1 %v4462_v39  ;;  %v4486_v21 = vsel %vm451_vm0, %v4312_v62, 0.0  ;;  %v6155_v39 = vld [vmem:[#allocation4 + $0x1f8] sm:$0xff]  ;;  %v4601_v29 = vperm.slane %v8913_v19, %v8347_v38  ;;  %v4617_v19 = vperm.slane %v8977_v24, %v8376_v59 }
 0x724   :  { %4484 = vadd.xlane.f32.xlu0 %v4483_v54  ;;  %v10042_v54 = vld [vmem:[#allocation225_spill] sm:$0xff] }
 0x725   :  { %v4320_v49 = vmul.f32 %v6155_v39, %v10042_v54 }
 0x727   :  { %v8961_v37 = vpop.xlane.xlu0 %4358  ;;  %v8997_v5 = vpop.xlane.xlu1 %4400  ;;  %v4510_v27 = vsel %vm451_vm0, %v4320_v49, 0.0 }
 0x729   :  { %4469 = vadd.xlane.f32.xlu2 %v4468_v40  ;;  %v10045_v40 = vld [vmem:[#allocation213_spill] sm:$0xff] }
 0x72a   :  { %v4315_v61 = vmul.f32 %v6156_v60, %v10045_v40  ;;  %v4594_v60 = vperm.slane %v8953_v42, %v8347_v38  ;;  %v4591_v40 = vperm.slane %v8825_v47, %v8336_v45  ;;  %v10051_v42 = vld [vmem:[#allocation38_spill] sm:$0xff] }
 0x72b   :  { %v8970_v16 = vpop.xlane.xlu2 %4361  ;;  %4472 = vadd.xlane.f32.xlu1 %v4471_v41 }
 0x72c   :  { %4493 = vadd.xlane.f32.xlu0 %v4492_v46  ;;  %v4495_v20 = vsel %vm451_vm0, %v4315_v61, 0.0  ;;  %v4498_v46 = vsel %vm451_vm0, %v4316_v63, 0.0  ;;  %v4599_v61 = vperm.slane %v8970_v16, %v8339_v23 }
 0x72f   :  { %v8979_v7 = vpop.xlane.xlu0 %4367  ;;  %v9011_v12 = vpop.xlane.xlu1 %4409 }
 0x731   :  { %4478 = vadd.xlane.f32.xlu2 %v4477_v28  ;;  %v6158_v28 = vld [vmem:[#allocation4 + $0x1e8] sm:$0xff] }
 0x732   :  { %v4318_v57 = vmul.f32 %v6158_v28, %v10047_v55  ;;  %v4857_v28 = vsel %vm451_vm0, %v10051_v42, 0.0 }
 0x733   :  { %v8986_v2 = vpop.xlane.xlu2 %4370  ;;  %4481 = vadd.xlane.f32.xlu1 %v4480_v25  ;;  %v10048_v25 = vld [vmem:[#allocation30_spill] sm:$0xff] }
 0x734   :  { %4502 = vadd.xlane.f32.xlu0 %v4501_v3  ;;  %v4714_v58 = vadd.f32 %v6159_v1, %v10048_v25  ;;  %v6160_v3 = vld [vmem:[#allocation4 + $0x1f0] sm:$0xff]  ;;  %v4504_v48 = vsel %vm451_vm0, %v4318_v57, 0.0  ;;  %v4605_v16 = vperm.slane %v8986_v2, %v8336_v45  ;;  %v4612_v1 = vperm.slane %v8957_v11, %v8336_v45 }
 0x735   :  { %v4319_v56 = vmul.f32 %v6160_v3, %v10049_v43  ;;  %v4606_v2 = vperm.slane %v8934_v6, %v8339_v23 }
 0x737   :  { %v8993_v51 = vpop.xlane.xlu0 %4376  ;;  %v4507_v54 = vsel %vm451_vm0, %v4319_v56, 0.0 }
 0x738   :  { %v4608_v25 = vperm.slane %v8993_v51, %v8347_v38  ;;  %v4607_v51 = vsel %vm3595_vm2, %v4606_v2, %v4605_v16  ;;  %v10053_v2 = vld [vmem:[#allocation85_spill] sm:$0xff] }
 0x739   :  { %4487 = vadd.xlane.f32.xlu2 %v4486_v21  ;;  %v10050_v21 = vld [vmem:[#allocation26_spill] sm:$0xff] }
 0x73a   :  { %v4778_v39 = vmul.f32 %v4714_v58, %v10050_v21 }
 0x73b   :  { %v9002_v15 = vpop.xlane.xlu2 %4379  ;;  %4490 = vadd.xlane.f32.xlu1 %v4489_v36 }
 0x73c   :  { %4511 = vadd.xlane.f32.xlu0 %v4510_v27  ;;  %v4848_v36 = vsel %vm451_vm0, %v4778_v39, 0.0  ;;  %v9024_v27 = vpop.xlane.xlu1 %4418 }
 0x73f   :  { %v4386_v41 = vpop.xlane.xlu0 %4385 }
 0x741   :  { %4496 = vadd.xlane.f32.xlu2 %v4495_v20  ;;  %v4593_v20 = vsel %vm3595_vm2, %v4592_v26, %v4591_v40 }
 0x742   :  { %v4595_v32 = vsel %vm3599_vm3, %v4594_v60, %v4593_v20 }
 0x743   :  { %v4389_v22 = vpop.xlane.xlu2 %4388  ;;  %4499 = vadd.xlane.f32.xlu1 %v4498_v46  ;;  %v4598_v46 = vperm.slane %v8961_v37, %v8336_v45  ;;  %v4597_v11 = vsel %vm3603_vm4, %v4596_v33, %v4595_v32  ;;  %v10052_v32 = vld [vmem:[#allocation50_spill] sm:$0xff] }
 0x744   :  { %4840 = vadd.xlane.f32.xlu0 %v4839_v53  ;;  %v4613_v53 = vperm.slane %v4386_v41, %v8339_v23  ;;  %v4615_v55 = vperm.slane %v4389_v22, %v8347_v38  ;;  %v4603_v41 = vperm.slane %v8979_v7, %v8376_v59  ;;  %v4610_v22 = vperm.slane %v9002_v15, %v8376_v59  ;;  %v4428_v43 = vpop.xlane.xlu1 %4427 }
 0x745   :  { %v4600_v47 = vsel %vm3595_vm2, %v4599_v61, %v4598_v46  ;;  %v4690_v26 = vsel %vm3712_vm6, %v4597_v11, %v8946_v34 }
 0x746   :  { %v4602_v3 = vsel %vm3599_vm3, %v4601_v29, %v4600_v47  ;;  %v4614_v7 = vsel %vm3595_vm2, %v4613_v53, %v4612_v1 }
 0x747   :  { %v4395_v62 = vpop.xlane.xlu0 %4394  ;;  %v4616_v6 = vsel %vm3599_vm3, %v4615_v55, %v4614_v7  ;;  %v4604_v24 = vsel %vm3603_vm4, %v4603_v41, %v4602_v3  ;;  %v10054_v3 = vld [vmem:[#allocation15_spill] sm:$0xff] }
 0x748   :  { %v4619_v58 = vperm.slane %v4395_v62, %v8336_v45  ;;  %v4622_v62 = vperm.slane %v8997_v5, %v8347_v38  ;;  %v4618_v60 = vsel %vm3603_vm4, %v4617_v19, %v4616_v6  ;;  %v4691_v40 = vsel %vm3714_vm7, %v4604_v24, %v4690_v26  ;;  %v10056_v24 = vld [vmem:[#allocation24_spill] sm:$0xff]  ;;  %v10057_v26 = vld [vmem:[#allocation125_spill] sm:$0xff] }
 0x749   :  { %4505 = vadd.xlane.f32.xlu2 %v4504_v48  ;;  %v4609_v48 = vsel %vm3599_vm3, %v4608_v25, %v4607_v51  ;;  %v4842_v7 = vsel %vm451_vm0, %v10054_v3, 0.0 }
 0x74b   :  { %v4398_v49 = vpop.xlane.xlu2 %4397  ;;  %4508 = vadd.xlane.f32.xlu1 %v4507_v54  ;;  %v4611_v54 = vsel %vm3603_vm4, %v4610_v22, %v4609_v48  ;;  %v4875_v22 = vsel %vm451_vm0, %v10053_v2, 0.0  ;;  %v4851_v48 = vsel %vm451_vm0, %v10056_v24, 0.0 }
 0x74c   :  { %4849 = vadd.xlane.f32.xlu0 %v4848_v36  ;;  %v4620_v57 = vperm.slane %v4398_v49, %v8339_v23  ;;  %v4627_v36 = vperm.slane %v9011_v12, %v8339_v23  ;;  %v4692_v20 = vsel %vm3716_vm8, %v4611_v54, %v4691_v40  ;;  %v4866_v12 = vsel %vm451_vm0, %v10052_v32, 0.0 }
 0x74d   :  { %v4693_v53 = vsel %vm9620_vm9, %v4618_v60, %v4692_v20  ;;  %v4893_v60 = vsel %vm451_vm0, %v10057_v26, 0.0  ;;  %vm5259_vm9 = vcmask 7168  }
 0x74e   :  { %v4621_v56 = vsel %vm3595_vm2, %v4620_v57, %v4619_v58  ;;  %v4633_v57 = vperm.slane %v9024_v27, %v8336_v45  ;;  %v4638_v58 = vperm.slane %v4428_v43, %v8376_v59 }
 0x74f   :  { %v4404_v63 = vpop.xlane.xlu0 %4403  ;;  %v4623_v5 = vsel %vm3599_vm3, %v4622_v62, %v4621_v56  ;;  %v10055_v56 = vld [vmem:[#allocation112_spill] sm:$0xff] }
 0x750   :  { %v4624_v15 = vperm.slane %v4404_v63, %v8376_v59 }
 0x752   :  { %v4625_v61 = vsel %vm3603_vm4, %v4624_v15, %v4623_v5  ;;  %v4884_v15 = vsel %vm451_vm0, %v10055_v56, 0.0 }
 0x753   :  { %v4407_v37 = vpop.xlane.xlu2 %4406 }
 0x754   :  { %4858 = vadd.xlane.f32.xlu0 %v4857_v28  ;;  %v4626_v21 = vperm.slane %v4407_v37, %v8336_v45  ;;  %v4694_v28 = vsel %vm9619_vm11, %v4625_v61, %v4693_v53  ;;  %v9096_v37 = vpop.xlane.xlu1 %4436 }
 0x756   :  { %v4628_v46 = vsel %vm3595_vm2, %v4627_v36, %v4626_v21 }
 0x757   :  { %v4413_v39 = vpop.xlane.xlu0 %4412 }
 0x758   :  { %v4629_v49 = vperm.slane %v4413_v39, %v8347_v38 }
 0x75a   :  { %v4630_v34 = vsel %vm3599_vm3, %v4629_v49, %v4628_v46 }
 0x75b   :  { %v4416_v63 = vpop.xlane.xlu2 %4415 }
 0x75c   :  { %v4631_v33 = vperm.slane %v4416_v63, %v8376_v59  ;;  %4867 = vadd.xlane.f32.xlu0 %v4866_v12  ;;  %v10058_v63 = vld [vmem:[#allocation40_spill] sm:$0xff] }
 0x75d   :  { %v4860_v20 = vsel %vm451_vm0, %v10058_v63, 0.0 }
 0x75e   :  { %v4632_v42 = vsel %vm3603_vm4, %v4631_v33, %v4630_v34 }
 0x75f   :  { %v4695_v47 = vsel %vm9618_vm10, %v4632_v42, %v4694_v28  ;;  %v4422_v16 = vpop.xlane.xlu0 %4421 }
 0x760   :  { %v4705_v55 = vsel %vm451_vm0, %v4695_v47, 0.0  ;;  %v4634_v29 = vperm.slane %v4422_v16, %v8339_v23  ;;  %v10061_v16 = vld [vmem:[#allocation148_spill] sm:$0xff] }
 0x761   :  { %4706 = vadd.xlane.f32.xlu2 %v4705_v55  ;;  %v4902_v55 = vsel %vm451_vm0, %v10061_v16, 0.0  ;;  %v10069_v16 = vld [vmem:[#allocation46_spill] sm:$0xff] }
 0x762   :  { %v4635_v1 = vsel %vm3595_vm2, %v4634_v29, %v4633_v57 }
 0x763   :  { %v4425_v41 = vpop.xlane.xlu2 %4424 }
 0x764   :  { %v4636_v25 = vperm.slane %v4425_v41, %v8347_v38  ;;  %4876 = vadd.xlane.f32.xlu0 %v4875_v22 }
 0x766   :  { %v4637_v19 = vsel %vm3599_vm3, %v4636_v25, %v4635_v1 }
 0x767   :  { %v9106_v27 = vsel %vm3603_vm4, %v4638_v58, %v4637_v19  ;;  %v4431_v11 = vpop.xlane.xlu0 %4430  ;;  %v4643_v58 = vperm.slane %v9096_v37, %v8347_v38 }
 0x768   :  { %v3738_v51 = vpop.xlane.xlu1 %3737  ;;  %v4640_v25 = vperm.slane %v4431_v11, %v8336_v45 }
 0x769   :  { %4843 = vadd.xlane.f32.xlu2 %v4842_v7  ;;  %6018 = vrcp.f32 %v3738_v51  ;;  %v5255_v34 = vand.u32 2147483648, %v3738_v51  ;;  %vm5249_vm12 = vweird.f32 %v3738_v51  ;;  %v5253_v53 = vand.u32 2147483647, %v3738_v51 }
 0x76b   :  { %v5256_v41 = vor.u32 1.1754944e-38, %v5255_v34 }
 0x76c   :  { %v3735_v6 = vpop.xlane.xlu2 %3734  ;;  %4885 = vadd.xlane.f32.xlu0 %v4884_v15 }
 0x76d   :  { %6020 = vrcp.f32 %v3735_v6  ;;  %v5240_v61 = vand.u32 2147483648, %v3735_v6  ;;  %v5238_v32 = vand.u32 2147483647, %v3735_v6  ;;  %vm5234_vm13 = vweird.f32 %v3735_v6 }
 0x76f   :  { %v6019_v43 = vpop.eup %6018  ;;  %v4440_v62 = vpop.xlane.xlu0 %4439  ;;  %v5241_v47 = vor.u32 1.1754944e-38, %v5240_v61  ;;  %vm5239_vm11 = vcmp.eq.f32.partialorder %v5238_v32, 8.507059e+37 }
 0x770   :  { %v5245_v21 = vmul.f32 %v6019_v43, %v3738_v51  ;;  %vm5250_vm15 = vweird.f32 %v6019_v43  ;;  %v4645_v51 = vperm.slane %v4440_v62, %v8376_v59 }
 0x771   :  { %4852 = vadd.xlane.f32.xlu2 %v4851_v48  ;;  %vm9120_vm14 = vmor %vm5249_vm12, %vm5250_vm15  ;;  %vm5254_vm15 = vcmp.eq.f32.partialorder %v5253_v53, 8.507059e+37  ;;  %v10068_v53 = vld [vmem:[#allocation130_spill] sm:$0xff] }
 0x772   :  { %v5246_v54 = vsub.f32 1.0, %v5245_v21  ;;  %v10063_v21 = vld [vmem:[#allocation182_spill] sm:$0xff] }
 0x773   :  { %v6021_v39 = vpop.eup %6020 }
 0x774   :  { %v5230_v49 = vmul.f32 %v6021_v39, %v3735_v6  ;;  %v4189_v36 = vpop.xlane.xlu2 %4188  ;;  %4894 = vadd.xlane.f32.xlu0 %v4893_v60  ;;  %v5247_v5 = vmul.f32 %v6019_v43, %v5246_v54  ;;  %vm5235_vm1 = vweird.f32 %v6021_v39 }
 0x775   :  { %vm5236_vm10 = vmor %vm5234_vm13, %vm5235_vm1  ;;  %vm10080_vm1 = vcmask 1047559  }
 0x776   :  { %v5231_v40 = vsub.f32 1.0, %v5230_v49  ;;  %v5248_v46 = vadd.f32 %v6019_v43, %v5247_v5  ;;  %v10065_v5 = vld [vmem:[#allocation18_spill] sm:$0xff] }
 0x777   :  { %v9118_v12 = vpop.xlane.xlu0 %4448 }
 0x778   :  { %v5232_v33 = vmul.f32 %v6021_v39, %v5231_v40  ;;  %v5252_v57 = vsel %vm9120_vm14, %v6019_v43, %v5248_v46  ;;  %v10062_v43 = vld [vmem:[#allocation52_spill] sm:$0xff]  ;;  %v4935_v40 = vsel %vm451_vm0, %v10065_v5, 0.0  ;;  %v10075_v5 = vld [vmem:[#allocation133_spill] sm:$0xff] }
 0x779   :  { %4861 = vadd.xlane.f32.xlu2 %v4860_v20  ;;  %v5257_v3 = vsel %vm5254_vm15, %v5256_v41, %v5252_v57  ;;  %v4869_v37 = vsel %vm451_vm0, %v10062_v43, 0.0  ;;  %v10074_v43 = vld [vmem:[#allocation20_spill] sm:$0xff] }
 0x77a   :  { %v5233_v42 = vadd.f32 %v6021_v39, %v5232_v33  ;;  %v10067_v33 = vld [vmem:[#allocation41_spill] sm:$0xff] }
 0x77b   :  { %v4950_v32 = vsel %vm451_vm0, %v10067_v33, 0.0 }
 0x77c   :  { %v5237_v29 = vsel %vm5236_vm10, %v6021_v39, %v5233_v42  ;;  %v4434_v1 = vpop.xlane.xlu2 %4433  ;;  %4903 = vadd.xlane.f32.xlu0 %v4902_v55  ;;  %v4911_v39 = vsel %vm451_vm0, %v10063_v21, 0.0  ;;  %v4896_v42 = vsel %vm451_vm0, %v10068_v53, 0.0  ;;  %v4959_v55 = vsel %vm451_vm0, %v10069_v16, 0.0 }
 0x77d   :  { %v5242_v2 = vsel %vm5239_vm11, %v5241_v47, %v5237_v29  ;;  %v4641_v22 = vperm.slane %v4434_v1, %v8339_v23  ;;  %v10070_v29 = vld [vmem:[#allocation150_spill] sm:$0xff]  ;;  %v4752_v16 = vadd.f32 %v8907_v18, %v8894_v8  ;;  %vm10078_vm10 = vcmask 1045509  }
 0x77e   :  { %v5243_v19 = vmul.f32 %v5242_v2, %v4189_v36  ;;  %v4192_v7 = vpop.xlane.xlu1 %4191  ;;  %v10064_v36 = vld [vmem:[#allocation90_spill] sm:$0xff]  ;;  %v4905_v1 = vsel %vm451_vm0, %v10070_v29, 0.0  ;;  %vm10079_vm11 = vcmask 1046534   ;;  %vm10118_vm12 = vmmov %vm10078_vm10 }
 0x77f   :  { %v4642_v6 = vsel %vm3595_vm2, %v4641_v22, %v4640_v25  ;;  %v5258_v56 = vmul.f32 %v5257_v3, %v4192_v7  ;;  %v9139_v15 = vpop.xlane.xlu0 %4457  ;;  %v4878_v26 = vsel %vm451_vm0, %v10064_v36, 0.0  ;;  %v10071_v25 = vld [vmem:[#allocation42_spill] sm:$0xff]  ;;  %vm10119_vm13 = vmmov %vm10079_vm11 }
 0x780   :  { %5260 = vst.msk [vmem:[%s9561_s4] sm:$0xff] %vm5259_vm9, %v5243_v19  ;;  %v4644_v11 = vsel %vm3599_vm3, %v4643_v58, %v4642_v6  ;;  %v4956_v2 = vsel %vm451_vm0, %v10071_v25, 0.0  ;;  %v10072_v19 = vld [vmem:[#allocation183_spill] sm:$0xff] }
 0x781   :  { %v4646_v24 = vsel %vm3603_vm4, %v4645_v51, %v4644_v11  ;;  %5261 = vst.msk [vmem:[%s9561_s4 + $0x8] sm:$0xff] %vm5259_vm9, %v5258_v56  ;;  %4870 = vadd.xlane.f32.xlu2 %v4869_v37  ;;  %v4914_v3 = vsel %vm451_vm0, %v10072_v19, 0.0  ;;  %v10073_v51 = vld [vmem:[#allocation93_spill] sm:$0xff]  ;;  %v4938_v37 = vsel %vm451_vm0, %v10074_v43, 0.0 }
 0x782   :  { %v9150_v62 = vsel %vm3710_vm5, %v4646_v24, %v9106_v27  ;;  %v10066_v27 = vld [vmem:[#allocation97_spill] sm:$0xff]  ;;  %v4974_v6 = vsel %vm451_vm0, %v10073_v51, 0.0 }
 0x783   :  { %v4887_v63 = vsel %vm451_vm0, %v10066_v27, 0.0  ;;  %v4655_v27 = vperm.slane %v9139_v15, %v8339_v23  ;;  %v4650_v15 = vperm.slane %v9118_v12, %v8347_v38  ;;  %v10077_v43 = vld [vmem:[#allocation141_spill] sm:$0xff] }
 0x784   :  { %v4443_v48 = vpop.xlane.xlu2 %4442  ;;  %4912 = vadd.xlane.f32.xlu0 %v4911_v39 }
 0x785   :  { %v4647_v39 = vperm.slane %v4443_v48, %v8336_v45 }
 0x786   :  { %v4446_v54 = vpop.xlane.xlu1 %4445 }
 0x787   :  { %v4467_v49 = vpop.xlane.xlu0 %4466  ;;  %v4648_v24 = vperm.slane %v4446_v54, %v8339_v23 }
 0x789   :  { %4879 = vadd.xlane.f32.xlu2 %v4878_v26  ;;  %v4649_v53 = vsel %vm3595_vm2, %v4648_v24, %v4647_v39 }
 0x78c   :  { %v9156_v60 = vpop.xlane.xlu2 %4451  ;;  %4936 = vadd.xlane.f32.xlu0 %v4935_v40  ;;  %v4983_v40 = vsel %vm451_vm0, %v10075_v5, 0.0 }
 0x78d   :  { %v4652_v48 = vperm.slane %v9156_v60, %v8376_v59 }
 0x78e   :  { %v4455_v61 = vpop.xlane.xlu1 %4454 }
 0x78f   :  { %v9162_v20 = vpop.xlane.xlu0 %4475  ;;  %v4654_v36 = vperm.slane %v4455_v61, %v8336_v45 }
 0x791   :  { %4888 = vadd.xlane.f32.xlu2 %v4887_v63  ;;  %v4661_v63 = vperm.slane %v4467_v49, %v8336_v45 }
 0x794   :  { %v4461_v46 = vpop.xlane.xlu2 %4460  ;;  %4951 = vadd.xlane.f32.xlu0 %v4950_v32  ;;  %v10076_v32 = vld [vmem:[#allocation22_spill] sm:$0xff] }
 0x795   :  { %v4657_v33 = vperm.slane %v4461_v46, %v8347_v38  ;;  %v4941_v54 = vsel %vm451_vm0, %v10076_v32, 0.0 }
 0x796   :  { %v9166_v34 = vpop.xlane.xlu1 %4463 }
 0x797   :  { %v9170_v28 = vpop.xlane.xlu0 %4484  ;;  %v4659_v60 = vperm.slane %v9166_v34, %v8376_v59 }
 0x798   :  { %v4671_v19 = vperm.slane %v9170_v28, %v8347_v38 }
 0x799   :  { %4897 = vadd.xlane.f32.xlu2 %v4896_v42 }
 0x79c   :  { %v4470_v47 = vpop.xlane.xlu2 %4469  ;;  %4960 = vadd.xlane.f32.xlu0 %v4959_v55  ;;  %v4656_v55 = vsel %vm3595_vm2, %v4655_v27, %v4654_v36 }
 0x79d   :  { %v4662_v21 = vperm.slane %v4470_v47, %v8339_v23  ;;  %v4658_v12 = vsel %vm3599_vm3, %v4657_v33, %v4656_v55 }
 0x79e   :  { %v4473_v57 = vpop.xlane.xlu1 %4472  ;;  %v4660_v51 = vsel %vm3603_vm4, %v4659_v60, %v4658_v12  ;;  %v10084_v60 = vld [vmem:[#allocation16_spill] sm:$0xff] }
 0x79f   :  { %v4494_v22 = vpop.xlane.xlu0 %4493  ;;  %v4664_v61 = vperm.slane %v4473_v57, %v8347_v38  ;;  %v4663_v49 = vsel %vm3595_vm2, %v4662_v21, %v4661_v63 }
 0x7a0   :  { %v4676_v25 = vperm.slane %v4494_v22, %v8339_v23 }
 0x7a1   :  { %4906 = vadd.xlane.f32.xlu2 %v4905_v1  ;;  %v4651_v1 = vsel %vm3599_vm3, %v4650_v15, %v4649_v53  ;;  %v4665_v8 = vsel %vm3599_vm3, %v4664_v61, %v4663_v49  ;;  %v10082_v49 = vld [vmem:[#allocation72_spill] sm:$0xff] }
 0x7a4   :  { %v4479_v41 = vpop.xlane.xlu2 %4478  ;;  %4957 = vadd.xlane.f32.xlu0 %v4956_v2  ;;  %v4653_v2 = vsel %vm3603_vm4, %v4652_v48, %v4651_v1  ;;  %v10085_v1 = vld [vmem:[#allocation229_spill] sm:$0xff] }
 0x7a5   :  { %v4668_v57 = vperm.slane %v4479_v41, %v8336_v45  ;;  %v4666_v41 = vperm.slane %v9162_v20, %v8376_v59  ;;  %v4697_v39 = vsel %vm3712_vm6, %v4653_v2, %v9150_v62  ;;  %v10086_v2 = vld [vmem:[#allocation77_spill] sm:$0xff] }
 0x7a6   :  { %v4482_v58 = vpop.xlane.xlu1 %4481  ;;  %v4698_v5 = vsel %vm3714_vm7, %v4660_v51, %v4697_v39  ;;  %v10089_v51 = vld [vmem:[#allocation138_spill] sm:$0xff] }
 0x7a7   :  { %v4503_v11 = vpop.xlane.xlu0 %4502  ;;  %v4669_v42 = vperm.slane %v4482_v58, %v8339_v23  ;;  %v4667_v24 = vsel %vm3603_vm4, %v4666_v41, %v4665_v8  ;;  %v4968_v8 = vsel %vm451_vm0, %v10086_v2, 0.0  ;;  %v10088_v41 = vld [vmem:[#allocation184_spill] sm:$0xff] }
 0x7a8   :  { %v4682_v20 = vperm.slane %v4503_v11, %v8336_v45  ;;  %v4699_v33 = vsel %vm3716_vm8, %v4667_v24, %v4698_v5 }
 0x7a9   :  { %4915 = vadd.xlane.f32.xlu2 %v4914_v3  ;;  %v4670_v18 = vsel %vm3595_vm2, %v4669_v42, %v4668_v57  ;;  %v10081_v42 = vld [vmem:[#allocation143_spill] sm:$0xff]  ;;  %v4845_v57 = vsel %vm451_vm0, %v10084_v60, 0.0  ;;  %v10099_v60 = vld [vmem:[#allocation45_spill] sm:$0xff] }
 0x7aa   :  { %v4672_v28 = vsel %vm3599_vm3, %v4671_v19, %v4670_v18  ;;  %v10087_v18 = vld [vmem:[#allocation29_spill] sm:$0xff]  ;;  %v5004_v19 = vsel %vm451_vm0, %v10088_v41, 0.0  ;;  %v10102_v41 = vld [vmem:[#allocation223_spill] sm:$0xff] }
 0x7ac   :  { %v4488_v7 = vpop.xlane.xlu2 %4487  ;;  %4975 = vadd.xlane.f32.xlu0 %v4974_v6 }
 0x7ad   :  { %v4673_v58 = vperm.slane %v4488_v7, %v8376_v59  ;;  %v4816_v7 = vmul.f32 %v4752_v16, %v10020_v9  ;;  %v10083_v16 = vld [vmem:[#allocation205_spill] sm:$0xff] }
 0x7ae   :  { %v4491_v56 = vpop.xlane.xlu1 %4490  ;;  %v5010_v55 = vsel %vm451_vm0, %v10083_v16, 0.0 }
 0x7af   :  { %v4675_v46 = vperm.slane %v4491_v56, %v8336_v45  ;;  %v4512_v34 = vpop.xlane.xlu0 %4511  ;;  %v4674_v36 = vsel %vm3603_vm4, %v4673_v58, %v4672_v28  ;;  %v4962_v63 = vsel %vm451_vm0, %v4816_v7, 0.0  ;;  %v10091_v7 = vld [vmem:[#allocation48_spill] sm:$0xff]  ;;  %v6162_v28 = vld [vmem:[#allocation4 + $0x58] sm:$0xff] }
 0x7b0   :  { %v4687_v11 = vperm.slane %v4512_v34, %v8376_v59  ;;  %v4700_v62 = vsel %vm10078_vm10, %v4674_v36, %v4699_v33  ;;  %v4863_v24 = vsel %vm451_vm0, %v10091_v7, 0.0 }
 0x7b1   :  { %4939 = vadd.xlane.f32.xlu2 %v4938_v37  ;;  %v4677_v3 = vsel %vm3595_vm2, %v4676_v25, %v4675_v46  ;;  %v4989_v37 = vsel %vm451_vm0, %v10077_v43, 0.0  ;;  %v4965_v46 = vsel %vm451_vm0, %v10082_v49, 0.0  ;;  %v10090_v43 = vld [vmem:[#allocation222_spill] sm:$0xff] }
 0x7b2   :  { %v10098_v49 = vld [vmem:[#allocation226_spill] sm:$0xff] }
 0x7b4   :  { %v4497_v26 = vpop.xlane.xlu2 %4496  ;;  %4984 = vadd.xlane.f32.xlu0 %v4983_v40 }
 0x7b5   :  { %v4678_v29 = vperm.slane %v4497_v26, %v8347_v38 }
 0x7b6   :  { %v4500_v47 = vpop.xlane.xlu1 %4499 }
 0x7b7   :  { %v4680_v22 = vperm.slane %v4500_v47, %v8376_v59  ;;  %v4679_v6 = vsel %vm3599_vm3, %v4678_v29, %v4677_v3  ;;  %v4841_v61 = vpop.xlane.xlu0 %4840  ;;  %v4992_v47 = vsel %vm451_vm0, %v10081_v42, 0.0  ;;  %v6161_v29 = vld [vmem:[#allocation4 + $0x28] sm:$0xff] }
 0x7b8   :  { %v4716_v12 = vadd.f32 %v6161_v29, %v10085_v1  ;;  %v5095_v36 = vperm.slane %v4841_v61, %v8336_v45  ;;  %v10100_v29 = vld [vmem:[#allocation216_spill] sm:$0xff] }
 0x7b9   :  { %4942 = vadd.xlane.f32.xlu2 %v4941_v54  ;;  %v4681_v40 = vsel %vm3603_vm4, %v4680_v22, %v4679_v6  ;;  %v4986_v6 = vsel %vm451_vm0, %v10089_v51, 0.0  ;;  %v4923_v1 = vsel %vm451_vm0, %v10100_v29, 0.0  ;;  %v10103_v51 = vld [vmem:[#allocation151_spill] sm:$0xff] }
 0x7ba   :  { %v4701_v53 = vsel %vm10079_vm11, %v4681_v40, %v4700_v62  ;;  %v4780_v58 = vmul.f32 %v4716_v12, %v10087_v18  ;;  %v10093_v40 = vld [vmem:[#allocation146_spill] sm:$0xff]  ;;  %v10101_v12 = vld [vmem:[#allocation107_spill] sm:$0xff] }
 0x7bb   :  { %v6163_v62 = vld [vmem:[#allocation4 + $0x70] sm:$0xff] }
 0x7bc   :  { %v4506_v56 = vpop.xlane.xlu2 %4505  ;;  %4990 = vadd.xlane.f32.xlu0 %v4989_v37  ;;  %v4854_v3 = vsel %vm451_vm0, %v4780_v58, 0.0  ;;  %v5022_v37 = vsel %vm451_vm0, %v10090_v43, 0.0 }
 0x7bd   :  { %v4683_v21 = vperm.slane %v4506_v56, %v8339_v23 }
 0x7be   :  { %v4509_v26 = vpop.xlane.xlu1 %4508 }
 0x7bf   :  { %v4684_v9 = vsel %vm3595_vm2, %v4683_v21, %v4682_v20  ;;  %v4685_v27 = vperm.slane %v4509_v26, %v8347_v38  ;;  %v9259_v25 = vpop.xlane.xlu0 %4849  ;;  %v4770_v20 = vadd.f32 %v9006_v30, %v10044_v0  ;;  %v10092_v21 = vld [vmem:[#allocation219_spill] sm:$0xff] }
 0x7c0   :  { %v4722_v39 = vadd.f32 %v6162_v28, %v10092_v21  ;;  %v10105_v21 = vld [vmem:[#allocation187_spill] sm:$0xff] }
 0x7c1   :  { %v4686_v32 = vsel %vm3599_vm3, %v4685_v27, %v4684_v9  ;;  %4963 = vadd.xlane.f32.xlu2 %v4962_v63  ;;  %v4995_v9 = vsel %vm451_vm0, %v10093_v40, 0.0  ;;  %v4834_v27 = vmul.f32 %v4770_v20, %v10043_v52  ;;  %v10097_v52 = vld [vmem:[#allocation102_spill] sm:$0xff] }
 0x7c2   :  { %v4688_v54 = vsel %vm3603_vm4, %v4687_v11, %v4686_v32  ;;  %v10094_v11 = vld [vmem:[#allocation58_spill] sm:$0xff] }
 0x7c3   :  { %v4702_v48 = vsel %vm10080_vm1, %v4688_v54, %v4701_v53  ;;  %v4786_v63 = vmul.f32 %v4722_v39, %v10094_v11  ;;  %v5016_v33 = vsel %vm451_vm0, %v4834_v27, 0.0  ;;  %v10095_v54 = vld [vmem:[#allocation211_spill] sm:$0xff]  ;;  %v4908_v39 = vsel %vm451_vm0, %v10105_v21, 0.0 }
 0x7c4   :  { %v4708_v15 = vsel %vm451_vm0, %v4702_v48, 0.0  ;;  %4993 = vadd.xlane.f32.xlu0 %v4992_v47  ;;  %v4725_v53 = vadd.f32 %v6163_v62, %v10095_v54  ;;  %v10096_v48 = vld [vmem:[#allocation185_spill] sm:$0xff]  ;;  %v10107_v27 = vld [vmem:[#allocation191_spill] sm:$0xff]  ;;  %v4758_v21 = vadd.f32 %v8942_v35, %v8929_v14 }
 0x7c5   :  { %4709 = vadd.xlane.f32.xlu1 %v4708_v15  ;;  %v4872_v32 = vsel %vm451_vm0, %v4786_v63, 0.0  ;;  %v5001_v61 = vsel %vm451_vm0, %v10096_v48, 0.0  ;;  %v4917_v11 = vsel %vm451_vm0, %v10107_v27, 0.0 }
 0x7c6   :  { %v4789_v42 = vmul.f32 %v4725_v53, %v10097_v52  ;;  %v10109_v53 = vld [vmem:[#allocation49_spill] sm:$0xff]  ;;  %v10110_v52 = vld [vmem:[#allocation99_spill] sm:$0xff] }
 0x7c7   :  { %v9269_v22 = vpop.xlane.xlu0 %4858  ;;  %v4953_v48 = vsel %vm451_vm0, %v10109_v53, 0.0 }
 0x7c8   :  { %v4881_v16 = vsel %vm451_vm0, %v4789_v42, 0.0 }
 0x7c9   :  { %4966 = vadd.xlane.f32.xlu2 %v4965_v46  ;;  %v5028_v46 = vsel %vm451_vm0, %v10098_v49, 0.0 }
 0x7cc   :  { %5011 = vadd.xlane.f32.xlu0 %v5010_v55  ;;  %v6164_v55 = vld [vmem:[#allocation4 + $0x88] sm:$0xff] }
 0x7cd   :  { %4846 = vadd.xlane.f32.xlu1 %v4845_v57  ;;  %v4728_v57 = vadd.f32 %v6164_v55, %v10099_v60  ;;  %v10111_v55 = vld [vmem:[#allocation28_spill] sm:$0xff] }
 0x7cf   :  { %v9289_v0 = vpop.xlane.xlu0 %4867  ;;  %v4792_v2 = vmul.f32 %v4728_v57, %v10101_v12 }
 0x7d1   :  { %4969 = vadd.xlane.f32.xlu2 %v4968_v8  ;;  %v4890_v18 = vsel %vm451_vm0, %v4792_v2, 0.0 }
 0x7d4   :  { %v9264_v34 = vpop.xlane.xlu2 %4706  ;;  %5005 = vadd.xlane.f32.xlu0 %v5004_v19  ;;  %v5013_v19 = vsel %vm451_vm0, %v10102_v41, 0.0 }
 0x7d5   :  { %4855 = vadd.xlane.f32.xlu1 %v4854_v3 }
 0x7d7   :  { %v4877_v47 = vpop.xlane.xlu0 %4876 }
 0x7d9   :  { %4987 = vadd.xlane.f32.xlu2 %v4986_v6  ;;  %v4899_v6 = vsel %vm451_vm0, %v10103_v51, 0.0 }
 0x7dc   :  { %v4844_v56 = vpop.xlane.xlu2 %4843  ;;  %5023 = vadd.xlane.f32.xlu0 %v5022_v37 }
 0x7dd   :  { %v5096_v26 = vperm.slane %v4844_v56, %v8339_v23  ;;  %4864 = vadd.xlane.f32.xlu1 %v4863_v24  ;;  %v5116_v56 = vperm.slane %v4877_v47, %v8336_v45  ;;  %v10104_v24 = vld [vmem:[#allocation194_spill] sm:$0xff] }
 0x7de   :  { %v4920_v20 = vsel %vm451_vm0, %v10104_v24, 0.0  ;;  %v10113_v24 = vld [vmem:[#allocation98_spill] sm:$0xff] }
 0x7df   :  { %v9283_v5 = vsel %vm3595_vm2, %v5096_v26, %v5095_v36  ;;  %v9311_v58 = vpop.xlane.xlu0 %4885  ;;  %v10106_v36 = vld [vmem:[#allocation224_spill] sm:$0xff] }
 0x7e0   :  { %v5025_v26 = vsel %vm451_vm0, %v10106_v36, 0.0 }
 0x7e1   :  { %4996 = vadd.xlane.f32.xlu2 %v4995_v9 }
 0x7e4   :  { %v9291_v30 = vpop.xlane.xlu2 %4852  ;;  %5017 = vadd.xlane.f32.xlu0 %v5016_v33 }
 0x7e5   :  { %4873 = vadd.xlane.f32.xlu1 %v4872_v32  ;;  %v10108_v32 = vld [vmem:[#allocation43_spill] sm:$0xff] }
 0x7e6   :  { %v4947_v62 = vsel %vm451_vm0, %v10108_v32, 0.0  ;;  %v4764_v32 = vadd.f32 %v8974_v31, %v8965_v4  ;;  %v4767_v4 = vadd.f32 %v8990_v50, %v10040_v17 }
 0x7e7   :  { %v9322_v7 = vpop.xlane.xlu0 %4894 }
 0x7e8   :  { %v4828_v14 = vmul.f32 %v4764_v32, %v10036_v10  ;;  %v4831_v10 = vmul.f32 %v4767_v4, %v10039_v13 }
 0x7e9   :  { %5002 = vadd.xlane.f32.xlu2 %v5001_v61  ;;  %v6165_v61 = vld [vmem:[#allocation4 + $0x118] sm:$0xff] }
 0x7ea   :  { %v4746_v42 = vadd.f32 %v6165_v61, %v10110_v52  ;;  %v4998_v61 = vsel %vm451_vm0, %v4828_v14, 0.0  ;;  %v5102_v52 = vperm.slane %v9291_v30, %v8336_v45  ;;  %v5007_v17 = vsel %vm451_vm0, %v4831_v10, 0.0 }
 0x7ec   :  { %v9299_v15 = vpop.xlane.xlu2 %4861  ;;  %5029 = vadd.xlane.f32.xlu0 %v5028_v46  ;;  %v4810_v60 = vmul.f32 %v4746_v42, %v10111_v55 }
 0x7ed   :  { %4882 = vadd.xlane.f32.xlu1 %v4881_v16  ;;  %v5107_v42 = vperm.slane %v9299_v15, %v8376_v59 }
 0x7ee   :  { %v4944_v29 = vsel %vm451_vm0, %v4810_v60, 0.0 }
 0x7ef   :  { %v9332_v40 = vpop.xlane.xlu0 %4903 }
 0x7f0   :  { %v5131_v4 = vperm.slane %v9332_v40, %v8339_v23 }
 0x7f1   :  { %4924 = vadd.xlane.f32.xlu2 %v4923_v1 }
 0x7f4   :  { %v9308_v8 = vpop.xlane.xlu2 %4870 }
 0x7f5   :  { %4891 = vadd.xlane.f32.xlu1 %v4890_v18  ;;  %v5112_v15 = vperm.slane %v9308_v8, %v8347_v38 }
 0x7f7   :  { %v4913_v63 = vpop.xlane.xlu0 %4912 }
 0x7f8   :  { %v5137_v47 = vperm.slane %v4913_v63, %v8336_v45 }
 0x7f9   :  { %5014 = vadd.xlane.f32.xlu2 %v5013_v19  ;;  %v10112_v19 = vld [vmem:[#allocation95_spill] sm:$0xff] }
 0x7fc   :  { %v4880_v3 = vpop.xlane.xlu2 %4879 }
 0x7fd   :  { %v5117_v43 = vperm.slane %v4880_v3, %v8339_v23  ;;  %4900 = vadd.xlane.f32.xlu1 %v4899_v6  ;;  %v4971_v3 = vsel %vm451_vm0, %v10112_v19, 0.0 }
 0x7ff   :  { %v9320_v37 = vsel %vm3595_vm2, %v5117_v43, %v5116_v56  ;;  %v4937_v46 = vpop.xlane.xlu0 %4936 }
 0x800   :  { %v5151_v1 = vperm.slane %v4937_v46, %v8336_v45 }
 0x801   :  { %4921 = vadd.xlane.f32.xlu2 %v4920_v20  ;;  %v4977_v20 = vsel %vm451_vm0, %v10113_v24, 0.0 }
 0x804   :  { %v9326_v28 = vpop.xlane.xlu2 %4888 }
 0x805   :  { %4909 = vadd.xlane.f32.xlu1 %v4908_v39  ;;  %v5123_v32 = vperm.slane %v9326_v28, %v8336_v45 }
 0x807   :  { %v9355_v18 = vpop.xlane.xlu0 %4951 }
 0x809   :  { %5026 = vadd.xlane.f32.xlu2 %v5025_v26 }
 0x80c   :  { %v9334_v9 = vpop.xlane.xlu2 %4897 }
 0x80d   :  { %4918 = vadd.xlane.f32.xlu1 %v4917_v11  ;;  %v4822_v11 = vmul.f32 %v4758_v21, %v10028_v44 }
 0x80f   :  { %v4961_v56 = vpop.xlane.xlu0 %4960  ;;  %v4980_v63 = vsel %vm451_vm0, %v4822_v11, 0.0 }
 0x810   :  { %v5165_v39 = vperm.slane %v4961_v56, %v8336_v45 }
 0x814   :  { %v9338_v33 = vpop.xlane.xlu2 %4906 }
 0x815   :  { %4948 = vadd.xlane.f32.xlu1 %v4947_v62 }
 0x81c   :  { %v4916_v54 = vpop.xlane.xlu2 %4915 }
 0x81d   :  { %v5138_v49 = vperm.slane %v4916_v54, %v8339_v23  ;;  %4954 = vadd.xlane.f32.xlu1 %v4953_v48  ;;  %v5100_v54 = vperm.slane %v9259_v25, %v8376_v59 }
 0x81f   :  { %v9348_v16 = vsel %vm3595_vm2, %v5138_v49, %v5137_v47 }
 0x824   :  { %v4940_v57 = vpop.xlane.xlu2 %4939 }
 0x825   :  { %v5152_v12 = vperm.slane %v4940_v57, %v8339_v23  ;;  %4945 = vadd.xlane.f32.xlu1 %v4944_v29  ;;  %v10114_v57 = vld [vmem:[#allocation227_spill] sm:$0xff] }
 0x826   :  { %v4926_v29 = vsel %vm451_vm0, %v10114_v57, 0.0 }
 0x827   :  { %v5153_v2 = vsel %vm3595_vm2, %v5152_v12, %v5151_v1 }
 0x82c   :  { %v4943_v41 = vpop.xlane.xlu2 %4942 }
 0x82d   :  { %v5154_v51 = vperm.slane %v4943_v41, %v8347_v38  ;;  %4972 = vadd.xlane.f32.xlu1 %v4971_v3  ;;  %v10115_v3 = vld [vmem:[#allocation228_spill] sm:$0xff] }
 0x82e   :  { %v5019_v8 = vsel %vm451_vm0, %v10115_v3, 0.0 }
 0x82f   :  { %v9361_v6 = vsel %vm3599_vm3, %v5154_v51, %v5153_v2 }
 0x834   :  { %v4964_v43 = vpop.xlane.xlu2 %4963 }
 0x835   :  { %v5166_v36 = vperm.slane %v4964_v43, %v8339_v23  ;;  %4978 = vadd.xlane.f32.xlu1 %v4977_v20  ;;  %v5121_v43 = vperm.slane %v9311_v58, %v8376_v59  ;;  %v5126_v58 = vperm.slane %v9322_v7, %v8347_v38 }
 0x837   :  { %v9370_v26 = vsel %vm3595_vm2, %v5166_v36, %v5165_v39  ;;  %v10116_v39 = vld [vmem:[#allocation230_spill] sm:$0xff] }
 0x838   :  { %v9372_v27 = vpop.xlane.xlu1 %4709  ;;  %v4929_v36 = vsel %vm451_vm0, %v10116_v39, 0.0 }
 0x83c   :  { %v9384_v48 = vpop.xlane.xlu2 %4966 }
 0x83d   :  { %4981 = vadd.xlane.f32.xlu1 %v4980_v63 }
 0x840   :  { %v4847_v62 = vpop.xlane.xlu1 %4846 }
 0x841   :  { %v5098_v35 = vperm.slane %v4847_v62, %v8347_v38 }
 0x843   :  { %v5099_v53 = vsel %vm3599_vm3, %v5098_v35, %v9283_v5  ;;  %v5105_v5 = vperm.slane %v9269_v22, %v8347_v38  ;;  %v5110_v22 = vperm.slane %v9289_v0, %v8339_v23 }
 0x844   :  { %v5101_v44 = vsel %vm3603_vm4, %v5100_v54, %v5099_v53  ;;  %v9402_v13 = vpop.xlane.xlu2 %4969  ;;  %v10117_v53 = vld [vmem:[#allocation100_spill] sm:$0xff] }
 0x845   :  { %4999 = vadd.xlane.f32.xlu1 %v4998_v61 }
 0x848   :  { %v4856_v31 = vpop.xlane.xlu1 %4855 }
 0x849   :  { %v5103_v25 = vperm.slane %v4856_v31, %v8339_v23 }
 0x84b   :  { %v5104_v47 = vsel %vm3595_vm2, %v5103_v25, %v5102_v52  ;;  %v4958_v52 = vpop.xlane.xlu0 %4957 }
 0x84c   :  { %v5106_v49 = vsel %vm3599_vm3, %v5105_v5, %v5104_v47  ;;  %v9414_v12 = vpop.xlane.xlu2 %4987 }
 0x84d   :  { %v5108_v50 = vsel %vm3603_vm4, %v5107_v42, %v5106_v49  ;;  %5008 = vadd.xlane.f32.xlu1 %v5007_v17 }
 0x84e   :  { %v5207_v30 = vsel %vm3710_vm5, %v5108_v50, %v5101_v44  ;;  %v4932_v44 = vsel %vm451_vm0, %v10117_v53, 0.0 }
 0x850   :  { %v4865_v46 = vpop.xlane.xlu1 %4864 }
 0x851   :  { %v5109_v55 = vperm.slane %v4865_v46, %v8336_v45 }
 0x853   :  { %v5111_v60 = vsel %vm3595_vm2, %v5110_v22, %v5109_v55  ;;  %v4976_v40 = vpop.xlane.xlu0 %4975  ;;  %v5159_v55 = vperm.slane %v9355_v18, %v8339_v23 }
 0x854   :  { %v5113_v1 = vsel %vm3599_vm3, %v5112_v15, %v5111_v60  ;;  %v9424_v24 = vpop.xlane.xlu2 %4996 }
 0x855   :  { %4927 = vadd.xlane.f32.xlu1 %v4926_v29 }
 0x858   :  { %v4874_v2 = vpop.xlane.xlu1 %4873 }
 0x859   :  { %v5114_v41 = vperm.slane %v4874_v2, %v8376_v59 }
 0x85b   :  { %v5115_v0 = vsel %vm3603_vm4, %v5114_v41, %v5113_v1  ;;  %v4985_v60 = vpop.xlane.xlu0 %4984 }
 0x85c   :  { %v5208_v19 = vsel %vm3712_vm6, %v5115_v0, %v5207_v30  ;;  %v9440_v35 = vpop.xlane.xlu2 %5002 }
 0x85d   :  { %5020 = vadd.xlane.f32.xlu1 %v5019_v8 }
 0x860   :  { %v4883_v51 = vpop.xlane.xlu1 %4882 }
 0x861   :  { %v5119_v56 = vperm.slane %v4883_v51, %v8347_v38  ;;  %v5168_v51 = vperm.slane %v9384_v48, %v8347_v38 }
 0x863   :  { %v5120_v20 = vsel %vm3599_vm3, %v5119_v56, %v9320_v37  ;;  %v5128_v37 = vperm.slane %v9334_v9, %v8376_v59  ;;  %v5133_v9 = vperm.slane %v9338_v33, %v8347_v38  ;;  %v4991_v3 = vpop.xlane.xlu0 %4990  ;;  %v5170_v56 = vperm.slane %v9402_v13, %v8376_v59 }
 0x864   :  { %v5122_v21 = vsel %vm3603_vm4, %v5121_v43, %v5120_v20  ;;  %v9453_v25 = vpop.xlane.xlu2 %4924 }
 0x865   :  { %v5209_v11 = vsel %vm3714_vm7, %v5122_v21, %v5208_v19  ;;  %4930 = vadd.xlane.f32.xlu1 %v4929_v36  ;;  %v5163_v19 = vperm.slane %v4958_v52, %v8376_v59  ;;  %v5169_v21 = vsel %vm3599_vm3, %v5168_v51, %v9370_v26  ;;  %v5179_v52 = vperm.slane %v4985_v60, %v8336_v45 }
 0x866   :  { %v5171_v36 = vsel %vm3603_vm4, %v5170_v56, %v5169_v21 }
 0x868   :  { %v4892_v63 = vpop.xlane.xlu1 %4891 }
 0x869   :  { %v5124_v62 = vperm.slane %v4892_v63, %v8339_v23 }
 0x86b   :  { %v5125_v14 = vsel %vm3595_vm2, %v5124_v62, %v5123_v32  ;;  %v4994_v32 = vpop.xlane.xlu0 %4993 }
 0x86c   :  { %v5127_v54 = vsel %vm3599_vm3, %v5126_v58, %v5125_v14  ;;  %v9458_v17 = vpop.xlane.xlu2 %5014  ;;  %v5184_v60 = vperm.slane %v4994_v32, %v8376_v59 }
 0x86d   :  { %v5129_v61 = vsel %vm3603_vm4, %v5128_v37, %v5127_v54  ;;  %4933 = vadd.xlane.f32.xlu1 %v4932_v44 }
 0x86e   :  { %v5210_v47 = vsel %vm3716_vm8, %v5129_v61, %v5209_v11  ;;  %v5180_v61 = vperm.slane %v9414_v12, %v8339_v23 }
 0x870   :  { %v4901_v28 = vpop.xlane.xlu1 %4900 }
 0x871   :  { %v5130_v7 = vperm.slane %v4901_v28, %v8336_v45 }
 0x873   :  { %v5132_v31 = vsel %vm3595_vm2, %v5131_v4, %v5130_v7  ;;  %v5012_v62 = vpop.xlane.xlu0 %5011 }
 0x874   :  { %v5134_v10 = vsel %vm3599_vm3, %v5133_v9, %v5132_v31  ;;  %v4922_v57 = vpop.xlane.xlu2 %4921  ;;  %v5173_v9 = vperm.slane %v4976_v40, %v8339_v23  ;;  %v5186_v31 = vperm.slane %v9424_v24, %v8336_v45  ;;  %v5182_v24 = vperm.slane %v4991_v3, %v8347_v38 }
 0x875   :  { %v5142_v1 = vperm.slane %v4922_v57, %v8376_v59 }
 0x878   :  { %v4910_v5 = vpop.xlane.xlu1 %4909 }
 0x879   :  { %v5135_v42 = vperm.slane %v4910_v5, %v8376_v59  ;;  %v5194_v5 = vperm.slane %v5012_v62, %v8339_v23  ;;  %v5144_v62 = vperm.slane %v9453_v25, %v8336_v45 }
 0x87b   :  { %v5136_v49 = vsel %vm3603_vm4, %v5135_v42, %v5134_v10  ;;  %v5006_v37 = vpop.xlane.xlu0 %5005 }
 0x87c   :  { %v5211_v46 = vsel %vm10118_vm12, %v5136_v49, %v5210_v47  ;;  %v5181_v47 = vsel %vm3595_vm2, %v5180_v61, %v5179_v52  ;;  %v5189_v49 = vperm.slane %v9440_v35, %v8347_v38 }
 0x880   :  { %v4919_v50 = vpop.xlane.xlu1 %4918 }
 0x881   :  { %v5140_v33 = vperm.slane %v4919_v50, %v8347_v38 }
 0x883   :  { %v5141_v30 = vsel %vm3599_vm3, %v5140_v33, %v9348_v16  ;;  %v5024_v54 = vpop.xlane.xlu0 %5023  ;;  %v5196_v33 = vperm.slane %v9458_v17, %v8347_v38 }
 0x884   :  { %v5143_v2 = vsel %vm3603_vm4, %v5142_v1, %v5141_v30  ;;  %v5201_v17 = vperm.slane %v5024_v54, %v8339_v23 }
 0x885   :  { %v9471_v0 = vsel %vm10119_vm13, %v5143_v2, %v5211_v46 }
 0x888   :  { %v4949_v22 = vpop.xlane.xlu1 %4948 }
 0x889   :  { %v5158_v15 = vperm.slane %v4949_v22, %v8336_v45  ;;  %v5191_v22 = vperm.slane %v5006_v37, %v8376_v59 }
 0x88b   :  { %v5160_v29 = vsel %vm3595_vm2, %v5159_v55, %v5158_v15  ;;  %v5018_v44 = vpop.xlane.xlu0 %5017  ;;  %v5183_v55 = vsel %vm3599_vm3, %v5182_v24, %v5181_v47  ;;  %v5027_v15 = vpop.xlane.xlu2 %5026 }
 0x88c   :  { %v5198_v57 = vperm.slane %v5018_v44, %v8376_v59 }
 0x890   :  { %v4955_v41 = vpop.xlane.xlu1 %4954 }
 0x891   :  { %v5161_v16 = vperm.slane %v4955_v41, %v8347_v38 }
 0x893   :  { %v5162_v18 = vsel %vm3599_vm3, %v5161_v16, %v5160_v29  ;;  %v5030_v29 = vpop.xlane.xlu0 %5029 }
 0x894   :  { %v5164_v8 = vsel %vm3603_vm4, %v5163_v19, %v5162_v18  ;;  %v5185_v19 = vsel %vm3603_vm4, %v5184_v60, %v5183_v55  ;;  %v5203_v18 = vperm.slane %v5027_v15, %v8347_v38 }
 0x898   :  { %v4946_v43 = vpop.xlane.xlu1 %4945 }
 0x899   :  { %v5156_v20 = vperm.slane %v4946_v43, %v8376_v59 }
 0x89b   :  { %v5157_v39 = vsel %vm3603_vm4, %v5156_v20, %v9361_v6 }
 0x89c   :  { %v5214_v11 = vsel %vm3710_vm5, %v5164_v8, %v5157_v39  ;;  %v5205_v8 = vperm.slane %v5030_v29, %v8376_v59  ;;  %vm10120_vm5 = vmmov %vm10078_vm10 }
 0x89d   :  { %v5215_v63 = vsel %vm3712_vm6, %v5171_v36, %v5214_v11  ;;  %vm10121_vm6 = vmmov %vm10079_vm11 }
 0x8a0   :  { %v4973_v48 = vpop.xlane.xlu1 %4972 }
 0x8a1   :  { %v5172_v26 = vperm.slane %v4973_v48, %v8336_v45 }
 0x8a3   :  { %v5174_v42 = vsel %vm3595_vm2, %v5173_v9, %v5172_v26 }
 0x8a8   :  { %v4979_v58 = vpop.xlane.xlu1 %4978 }
 0x8a9   :  { %v5175_v28 = vperm.slane %v4979_v58, %v8347_v38 }
 0x8ab   :  { %v5176_v40 = vsel %vm3599_vm3, %v5175_v28, %v5174_v42 }
 0x8b0   :  { %v4982_v13 = vpop.xlane.xlu1 %4981 }
 0x8b1   :  { %v5177_v10 = vperm.slane %v4982_v13, %v8376_v59 }
 0x8b3   :  { %v5178_v30 = vsel %vm3603_vm4, %v5177_v10, %v5176_v40  ;;  %v5263_v10 = vadd.f32 1.0, %v9372_v27 }
 0x8b4   :  { %v5216_v1 = vsel %vm3714_vm7, %v5178_v30, %v5215_v63  ;;  %vm10122_vm7 = vmmov %vm10080_vm1 }
 0x8b5   :  { %v5217_v56 = vsel %vm3716_vm8, %v5185_v19, %v5216_v1  ;;  %vm10123_vm8 = vmmov %vm10080_vm1 }
 0x8b8   :  { %v5000_v14 = vpop.xlane.xlu1 %4999 }
 0x8b9   :  { %v5187_v6 = vperm.slane %v5000_v14, %v8339_v23 }
 0x8bb   :  { %v5188_v12 = vsel %vm3595_vm2, %v5187_v6, %v5186_v31 }
 0x8bc   :  { %v5190_v46 = vsel %vm3599_vm3, %v5189_v49, %v5188_v12 }
 0x8bd   :  { %v5192_v16 = vsel %vm3603_vm4, %v5191_v22, %v5190_v46  ;;  %v5262_v46 = vadd.f32 1.0, %v9264_v34 }
 0x8be   :  { %v5218_v20 = vsel %vm10120_vm5, %v5192_v16, %v5217_v56 }
 0x8c0   :  { %v5009_v53 = vpop.xlane.xlu1 %5008 }
 0x8c1   :  { %v5193_v4 = vperm.slane %v5009_v53, %v8336_v45 }
 0x8c3   :  { %v5195_v50 = vsel %vm3595_vm2, %v5194_v5, %v5193_v4 }
 0x8c4   :  { %v5197_v35 = vsel %vm3599_vm3, %v5196_v33, %v5195_v50 }
 0x8c5   :  { %v5199_v3 = vsel %vm3603_vm4, %v5198_v57, %v5197_v35 }
 0x8c6   :  { %v5219_v39 = vsel %vm10121_vm6, %v5199_v3, %v5218_v20 }
 0x8c8   :  { %v4928_v7 = vpop.xlane.xlu1 %4927 }
 0x8c9   :  { %v5145_v32 = vperm.slane %v4928_v7, %v8339_v23 }
 0x8cb   :  { %v5146_v13 = vsel %vm3595_vm2, %v5145_v32, %v5144_v62 }
 0x8d0   :  { %v5021_v2 = vpop.xlane.xlu1 %5020 }
 0x8d1   :  { %v5200_v41 = vperm.slane %v5021_v2, %v8336_v45 }
 0x8d3   :  { %v5202_v51 = vsel %vm3595_vm2, %v5201_v17, %v5200_v41 }
 0x8d4   :  { %v5204_v43 = vsel %vm3599_vm3, %v5203_v18, %v5202_v51 }
 0x8d5   :  { %v5206_v21 = vsel %vm3603_vm4, %v5205_v8, %v5204_v43 }
 0x8d6   :  { %v5220_v36 = vsel %vm10122_vm7, %v5206_v21, %v5219_v39 }
 0x8d7   :  { %v5226_v11 = vsel %vm451_vm0, %v5220_v36, 0.0 }
 0x8d8   :  { %v4931_v63 = vpop.xlane.xlu1 %4930  ;;  %5227 = vadd.xlane.f32.xlu1 %v5226_v11 }
 0x8d9   :  { %v5147_v48 = vperm.slane %v4931_v63, %v8347_v38 }
 0x8db   :  { %v5148_v14 = vsel %vm3599_vm3, %v5147_v48, %v5146_v13 }
 0x8e0   :  { %v4934_v58 = vpop.xlane.xlu1 %4933 }
 0x8e1   :  { %v5149_v37 = vperm.slane %v4934_v58, %v8376_v59 }
 0x8e3   :  { %v5150_v54 = vsel %vm3603_vm4, %v5149_v37, %v5148_v14 }
 0x8e4   :  { %v5213_v53 = vsel %vm10123_vm8, %v5150_v54, %v9471_v0 }
 0x8e5   :  { %v5223_v44 = vsel %vm451_vm0, %v5213_v53, 0.0 }
 0x8e6   :  { %5224 = vadd.xlane.f32.xlu2 %v5223_v44 }
 0x94b   :  { %v5228_v23 = vpop.xlane.xlu1 %5227 }
 0x94c   :  { %v5265_v38 = vsub.f32 %v5228_v23, %v9372_v27 }
 0x94e   :  { %v5267_v26 = vadd.f32 1.0, %v5265_v38 }
 0x950   :  { %6022 = vrcp.f32 %v5267_v26  ;;  %v5294_v59 = vand.u32 2147483648, %v5267_v26  ;;  %v5292_v7 = vand.u32 2147483647, %v5267_v26  ;;  %vm5288_vm3 = vweird.f32 %v5267_v26 }
 0x952   :  { %v5295_v31 = vor.u32 1.1754944e-38, %v5294_v59  ;;  %vm5293_vm4 = vcmp.eq.f32.partialorder %v5292_v7, 8.507059e+37 }
 0x956   :  { %v6023_v45 = vpop.eup %6022 }
 0x957   :  { %v5284_v25 = vmul.f32 %v6023_v45, %v5267_v26  ;;  %vm5289_vm2 = vweird.f32 %v6023_v45 }
 0x958   :  { %vm5290_vm0 = vmor %vm5288_vm3, %vm5289_vm2 }
 0x959   :  { %v5285_v6 = vsub.f32 1.0, %v5284_v25  ;;  %v5225_v61 = vpop.xlane.xlu2 %5224 }
 0x95a   :  { %v5264_v28 = vsub.f32 %v5225_v61, %v9264_v34 }
 0x95b   :  { %v5286_v4 = vmul.f32 %v6023_v45, %v5285_v6 }
 0x95c   :  { %v5266_v9 = vadd.f32 1.0, %v5264_v28 }
 0x95d   :  { %v5287_v0 = vadd.f32 %v6023_v45, %v5286_v4 }
 0x95e   :  { %6024 = vrcp.f32 %v5266_v9  ;;  %v5279_v50 = vand.u32 2147483648, %v5266_v9  ;;  %v5277_v33 = vand.u32 2147483647, %v5266_v9  ;;  %vm5273_vm15 = vweird.f32 %v5266_v9 }
 0x95f   :  { %v5291_v52 = vsel %vm5290_vm0, %v6023_v45, %v5287_v0 }
 0x960   :  { %v5296_v5 = vsel %vm5293_vm4, %v5295_v31, %v5291_v52  ;;  %v5280_v27 = vor.u32 1.1754944e-38, %v5279_v50  ;;  %vm5278_vm11 = vcmp.eq.f32.partialorder %v5277_v33, 8.507059e+37 }
 0x961   :  { %v5297_v42 = vmul.f32 %v5296_v5, %v5263_v10 }
 0x963   :  { %v5299_v12 = vsub.f32 1.0, %v5297_v42 }
 0x964   :  { %v6025_v47 = vpop.eup %6024 }
 0x965   :  { %5301 = vst.msk [vmem:[%s9562_s5 + $0x8] sm:$0xff] %vm5259_vm9, %v5299_v12  ;;  %v5269_v49 = vmul.f32 %v6025_v47, %v5266_v9  ;;  %vm5274_vm14 = vweird.f32 %v6025_v47 }
 0x966   :  { %vm5275_vm10 = vmor %vm5273_vm15, %vm5274_vm14 }
 0x967   :  { %v5270_v40 = vsub.f32 1.0, %v5269_v49 }
 0x969   :  { %v5271_v24 = vmul.f32 %v6025_v47, %v5270_v40 }
 0x96b   :  { %v5272_v30 = vadd.f32 %v6025_v47, %v5271_v24 }
 0x96d   :  { %v5276_v22 = vsel %vm5275_vm10, %v6025_v47, %v5272_v30 }
 0x96e   :  { %v5281_v55 = vsel %vm5278_vm11, %v5280_v27, %v5276_v22 }
 0x96f   :  { %v5282_v15 = vmul.f32 %v5281_v55, %v5262_v46 }
 0x971   :  { %v5298_v35 = vsub.f32 1.0, %v5282_v15 }
 0x973   :  { %5300 = vst.msk [vmem:[%s9562_s5] sm:$0xff] %vm5259_vm9, %v5298_v35 }
 0x974   :  { %5310 = vsyncpa [#allocation3], 1 }
 0x975   :  { %5311 = vsyncpa [#allocation5], 1 }
 0x976   :  { %5312 = vsyncpa [#allocation8], 1 }

</bundles_post_ra>
